<compile_context>
chip_gen: v5e
topology: v5e:2x2
jax: 0.10.0
libtpu: 0.0.40
codegen_flags: <defaults>
</compile_context>

<pallas_src>
import functools

import numpy as np
import jax
import jax.numpy as jnp
from jax import lax
from jax.experimental import pallas as pl
from jax.experimental.pallas import tpu as pltpu


def _dw5x5(y, dw_ref, db_ref, pad_ref, mask_ref, W):
    """5x5 depthwise conv (padding=2) + folded-BN bias on a (ch, H*W) slab."""
    ch, HW = y.shape
    P = (pad_ref.shape[1] - HW) // 2           # 128-aligned halo on each side
    pad_ref[...] = jnp.zeros(pad_ref.shape, jnp.float32)
    pad_ref[:, P:P + HW] = y                   # center store at aligned offset
    padv = pad_ref[...]                        # (ch, HW + 2*P)
    acc = db_ref[...]                          # (ch, 1) -> broadcasts over lanes
    t = 0
    for dy in range(-2, 3):
        for dx in range(-2, 3):
            start = P + dy * W + dx
            win = padv[:, start:start + HW]    # shifted window; h-halo is zero
            # mask zeroes positions whose w-index wrapped across a row boundary
            acc = acc + (win * mask_ref[t]) * dw_ref[t]
            t += 1
    return acc


def _ghost_bottleneck_kernel(x_ref, w1_ref, b1_ref, dw1_ref, db1_ref,
                             w2_ref, b2_ref, dw2_ref, db2_ref, mask_ref,
                             o_ref, pad1_ref, pad2_ref, *, W):
    x = x_ref[0]                                             # (c1, HW) f32
    x_bf = x.astype(jnp.bfloat16)

    # --- GhostConv(c1, c2//2, 1, 1, act=SiLU) ---------------------------
    # cv1: 1x1 conv (+folded BN) + SiLU -> (c2//4, HW), lane-dense N = HW
    y1a = jnp.dot(w1_ref[...], x_bf,
                  preferred_element_type=jnp.float32) + b1_ref[...]
    y1a = y1a * jax.nn.sigmoid(y1a)                          # SiLU
    # cv2: 5x5 depthwise (+folded BN) + SiLU
    y1b = _dw5x5(y1a, dw1_ref, db1_ref, pad1_ref, mask_ref, W)
    y1b = y1b * jax.nn.sigmoid(y1b)
    g1 = jnp.concatenate([y1a, y1b], axis=0)                 # (c2//2, HW)

    # --- GhostConv(c2//2, c2, 1, 1, act=False) --------------------------
    y2a = jnp.dot(w2_ref[...], g1.astype(jnp.bfloat16),
                  preferred_element_type=jnp.float32) + b2_ref[...]
    y2b = _dw5x5(y2a, dw2_ref, db2_ref, pad2_ref, mask_ref, W)

    # concat + identity shortcut (s == 1); single lane-dense (c2, HW) store
    o_ref[0] = (jnp.concatenate([y2a, y2b], axis=0) + x).astype(o_ref.dtype)


def _tap_masks(H, W):
    """(25, 1, H*W) {0,1} masks: 1 where the 5x5 tap stays inside the image."""
    HW = H * W
    hh, ww = np.arange(HW) // W, np.arange(HW) % W
    rows = []
    for dy in range(-2, 3):
        for dx in range(-2, 3):
            rows.append(((hh + dy >= 0) & (hh + dy < H) &
                         (ww + dx >= 0) & (ww + dx < W)).astype(np.float32))
    return jnp.asarray(np.stack(rows)[:, None, :])


def ghost_bottleneck_forward(x, params):
    """x: NCHW float32.  GhostBottleneck with k=3, s=1 (identity shortcut)."""
    B, c1, H, W = x.shape
    HW = H * W
    ch1 = params["w1"].shape[0]          # c2 // 4
    ch2 = params["w2"].shape[0]          # c2 // 2
    c2 = 2 * ch2
    assert c1 == c2, "s == 1 GhostBottleneck needs c1 == c2 (identity shortcut)"

    xf = x.reshape(B, c1, HW)            # channels-first flat; no transpose needed
    mask = _tap_masks(H, W)

    weights = (params["w1"], params["b1"],
               jnp.transpose(params["dw1"])[:, :, None], params["db1"],
               params["w2"], params["b2"],
               jnp.transpose(params["dw2"])[:, :, None], params["db2"],
               mask)

    halo = -(-(2 * W + 2) // 128) * 128  # 128-aligned halo >= max tap shift
    HWP = HW + 2 * halo

    flops = 2 * B * HW * (ch1 * c1 + ch2 * 2 * ch1 + 25 * (ch1 + ch2))
    bytes_accessed = int(xf.size * 4 + B * c2 * HW * 4 +
                         sum(int(np.prod(w.shape)) * w.dtype.itemsize
                             for w in weights))

    kernel = functools.partial(_ghost_bottleneck_kernel, W=W)

    out = pl.pallas_call(
        kernel,
        out_shape=jax.ShapeDtypeStruct((B, c2, HW), x.dtype),
        grid_spec=pltpu.PrefetchScalarGridSpec(
            num_scalar_prefetch=0,
            grid=(B,),
            in_specs=[pl.BlockSpec((1, c1, HW), lambda b: (b, 0, 0))]
                     + [pl.BlockSpec(w.shape, lambda b, n=w.ndim: (0,) * n)
                        for w in weights],
            out_specs=pl.BlockSpec((1, c2, HW), lambda b: (b, 0, 0)),
            scratch_shapes=[pltpu.VMEM((ch1, HWP), jnp.float32),
                            pltpu.VMEM((ch2, HWP), jnp.float32)],
        ),
        compiler_params=pltpu.CompilerParams(
            dimension_semantics=("parallel",),      # v7x: one batch per TensorCore
            vmem_limit_bytes=32 * 1024 * 1024),
        cost_estimate=pl.CostEstimate(
            flops=flops,
            transcendentals=2 * B * ch1 * HW,
            bytes_accessed=bytes_accessed),
    )(xf, *weights)

    return out.reshape(B, c2, H, W)


def _fold_bn(w, gamma, beta, mean, var, eps=1e-5):
    """Fold inference BatchNorm into a bias-free conv weight w of shape (Cout, K)."""
    scale = gamma / jnp.sqrt(var + eps)
    return w * scale[:, None], (beta - mean * scale)[:, None]


def make_params(key, c1, c2):
    assert c2 % 4 == 0
    ch1, c_, ch2 = c2 // 4, c2 // 2, c2 // 2
    ks = jax.random.split(key, 8)

    def nrm(k, shape, s=0.1):
        return s * jax.random.normal(k, shape, dtype=jnp.float32)

    def bn(k, n):
        k1, k2, k3, k4 = jax.random.split(k, 4)
        return (1.0 + 0.1 * jax.random.normal(k1, (n,), jnp.float32),
                0.1 * jax.random.normal(k2, (n,), jnp.float32),
                0.1 * jax.random.normal(k3, (n,), jnp.float32),
                0.5 + jax.random.uniform(k4, (n,), jnp.float32))

    # GhostConv(c1, c2//2, act=SiLU): cv1=Conv(c1,ch1,1), cv2=Conv(ch1,ch1,5,g=ch1)
    w1, b1 = _fold_bn(nrm(ks[0], (ch1, c1)), *bn(ks[1], ch1))
    dw1, db1 = _fold_bn(nrm(ks[2], (ch1, 25), s=0.2), *bn(ks[3], ch1))
    # GhostConv(c2//2, c2, act=False): cv1=Conv(c_,ch2,1), cv2=Conv(ch2,ch2,5,g=ch2)
    w2, b2 = _fold_bn(nrm(ks[4], (ch2, c_)), *bn(ks[5], ch2))
    dw2, db2 = _fold_bn(nrm(ks[6], (ch2, 25), s=0.2), *bn(ks[7], ch2))

    return {"w1": w1.astype(jnp.bfloat16), "b1": b1, "dw1": dw1, "db1": db1,
            "w2": w2.astype(jnp.bfloat16), "b2": b2, "dw2": dw2, "db2": db2}


# ----------------------------- pure-JAX reference -----------------------------
def _dw5x5_ref(x_nchw, dw, db):
    ch = x_nchw.shape[1]
    y = lax.conv_general_dilated(
        x_nchw, dw.reshape(ch, 1, 5, 5),
        window_strides=(1, 1), padding=((2, 2), (2, 2)),
        dimension_numbers=("NCHW", "OIHW", "NCHW"),
        feature_group_count=ch, precision=lax.Precision.HIGHEST)
    return y + db.reshape(1, ch, 1, 1)


def ghost_bottleneck_reference(x, params):
    B, c1, H, W = x.shape
    HW = H * W
    w1 = params["w1"].astype(jnp.float32)
    w2 = params["w2"].astype(jnp.float32)
    ch1, ch2 = w1.shape[0], w2.shape[0]

    xf = x.reshape(B, c1, HW)
    y1a = jnp.einsum("oi,bih->boh", w1, xf,
                     precision=lax.Precision.HIGHEST) + params["b1"][None]
    y1a = jax.nn.silu(y1a)
    y1b = _dw5x5_ref(y1a.reshape(B, ch1, H, W), params["dw1"], params["db1"])
    y1b = jax.nn.silu(y1b).reshape(B, ch1, HW)
    g1 = jnp.concatenate([y1a, y1b], axis=1)

    y2a = jnp.einsum("oi,bih->boh", w2, g1,
                     precision=lax.Precision.HIGHEST) + params["b2"][None]
    y2b = _dw5x5_ref(y2a.reshape(B, ch2, H, W),
                     params["dw2"], params["db2"]).reshape(B, ch2, HW)
    g2 = jnp.concatenate([y2a, y2b], axis=1)

    return (g2 + xf).reshape(B, c1, H, W)


if __name__ == "__main__":
    key = jax.random.PRNGKey(0)
    kx, kp = jax.random.split(key)

    B, C, H, W = 2, 64, 16, 16          # GhostBottleneck(c1=64, c2=64, k=3, s=1)
    x = jax.random.normal(kx, (B, C, H, W), dtype=jnp.float32)
    params = make_params(kp, C, C)

    out = jax.block_until_ready(ghost_bottleneck_forward(x, params))
    ref = ghost_bottleneck_reference(x, params)

    assert out.shape == (B, C, H, W)
    max_err = float(jnp.max(jnp.abs(out - ref)))
    assert jnp.allclose(out, ref, atol=5e-2, rtol=5e-2), \
        f"Pallas output mismatch vs JAX reference (max abs err {max_err:.4g})"
    print("KERNEL_OK")
</pallas_src>

<mosaic_0001>
module attributes {stable_mosaic.version = 11 : i64} {
  func.func @_ghost_bottleneck_kernel(%arg0: i32, %arg1: memref<1x64x256xf32, #tpu.memory_space<vmem>>, %arg2: memref<16x64xbf16, #tpu.memory_space<vmem>>, %arg3: memref<16x1xf32, #tpu.memory_space<vmem>>, %arg4: memref<25x16x1xf32, #tpu.memory_space<vmem>>, %arg5: memref<16x1xf32, #tpu.memory_space<vmem>>, %arg6: memref<32x32xbf16, #tpu.memory_space<vmem>>, %arg7: memref<32x1xf32, #tpu.memory_space<vmem>>, %arg8: memref<25x32x1xf32, #tpu.memory_space<vmem>>, %arg9: memref<32x1xf32, #tpu.memory_space<vmem>>, %arg10: memref<25x1x256xf32, #tpu.memory_space<vmem>>, %arg11: memref<1x64x256xf32, #tpu.memory_space<vmem>>, %arg12: memref<16x512xf32, #tpu.memory_space<vmem>>, %arg13: memref<32x512xf32, #tpu.memory_space<vmem>>) attributes {dimension_semantics = [#tpu.dimension_semantics<parallel>], iteration_bounds = array<i64: 2>, scalar_prefetch = 0 : i64, scratch_operands = 2 : i64, tpu.core_type = #tpu.core_type<tc>, window_params = [{transform_indices = @transform_0, window_bounds = array<i64: 1, 64, 256>}, {pipeline_mode = #tpu.pipeline_mode<synchronous>, transform_indices = @transform_1, window_bounds = array<i64: 16, 64>}, {pipeline_mode = #tpu.pipeline_mode<synchronous>, transform_indices = @transform_2, window_bounds = array<i64: 16, 1>}, {pipeline_mode = #tpu.pipeline_mode<synchronous>, transform_indices = @transform_3, window_bounds = array<i64: 25, 16, 1>}, {pipeline_mode = #tpu.pipeline_mode<synchronous>, transform_indices = @transform_4, window_bounds = array<i64: 16, 1>}, {pipeline_mode = #tpu.pipeline_mode<synchronous>, transform_indices = @transform_5, window_bounds = array<i64: 32, 32>}, {pipeline_mode = #tpu.pipeline_mode<synchronous>, transform_indices = @transform_6, window_bounds = array<i64: 32, 1>}, {pipeline_mode = #tpu.pipeline_mode<synchronous>, transform_indices = @transform_7, window_bounds = array<i64: 25, 32, 1>}, {pipeline_mode = #tpu.pipeline_mode<synchronous>, transform_indices = @transform_8, window_bounds = array<i64: 32, 1>}, {pipeline_mode = #tpu.pipeline_mode<synchronous>, transform_indices = @transform_9, window_bounds = array<i64: 25, 1, 256>}, {transform_indices = @transform_10, window_bounds = array<i64: 1, 64, 256>}]} {
    %c0 = arith.constant 0 : index
    %c0_0 = arith.constant 0 : index
    %c0_1 = arith.constant 0 : index
    %0 = vector.load %arg1[%c0, %c0_0, %c0_1] : memref<1x64x256xf32, #tpu.memory_space<vmem>>, vector<1x64x256xf32>
    %1 = vector.shape_cast %0 : vector<1x64x256xf32> to vector<64x256xf32>
    %2 = arith.truncf %1 : vector<64x256xf32> to vector<64x256xbf16>
    %c0_2 = arith.constant 0 : index
    %c0_3 = arith.constant 0 : index
    %3 = vector.load %arg2[%c0_2, %c0_3] : memref<16x64xbf16, #tpu.memory_space<vmem>>, vector<16x64xbf16>
    %cst = arith.constant dense<0.000000e+00> : vector<16x256xf32>
    %4 = tpu.matmul %3, %2, %cst {dimension_numbers = #tpu.dot_dimension_numbers<[1], [0], [0], [1], [0, 0, 1, 1], [], []>} : vector<16x64xbf16>, vector<64x256xbf16>, vector<16x256xf32> -> vector<16x256xf32>
    %c0_4 = arith.constant 0 : index
    %c0_5 = arith.constant 0 : index
    %5 = vector.load %arg3[%c0_4, %c0_5] : memref<16x1xf32, #tpu.memory_space<vmem>>, vector<16x1xf32>
    %6 = vector.broadcast %5 : vector<16x1xf32> to vector<16x256xf32>
    %7 = arith.addf %4, %6 : vector<16x256xf32>
    %8 = arith.negf %7 : vector<16x256xf32>
    %9 = math.exp %8 : vector<16x256xf32>
    %cst_6 = arith.constant 1.000000e+00 : f32
    %10 = vector.broadcast %cst_6 : f32 to vector<16x256xf32>
    %11 = arith.addf %10, %9 : vector<16x256xf32>
    %12 = arith.divf %10, %11 : vector<16x256xf32>
    %13 = arith.mulf %7, %12 : vector<16x256xf32>
    %cst_7 = arith.constant 0.000000e+00 : f32
    %14 = vector.broadcast %cst_7 : f32 to vector<16x512xf32>
    %c0_8 = arith.constant 0 : index
    %c0_9 = arith.constant 0 : index
    %15 = vector.load %arg12[%c0_8, %c0_9] : memref<16x512xf32, #tpu.memory_space<vmem>>, vector<16x512xf32>
    tpu.vector_store %arg12[%c0_8, %c0_9], %14 {strides = array<i32>} : memref<16x512xf32, #tpu.memory_space<vmem>>, vector<16x512xf32>,
    %c0_10 = arith.constant 0 : index
    %c128 = arith.constant 128 : index
    %16 = vector.load %arg12[%c0_10, %c128] : memref<16x512xf32, #tpu.memory_space<vmem>>, vector<16x256xf32>
    tpu.vector_store %arg12[%c0_10, %c128], %13 {strides = array<i32>} : memref<16x512xf32, #tpu.memory_space<vmem>>, vector<16x256xf32>,
    %c0_11 = arith.constant 0 : index
    %c0_12 = arith.constant 0 : index
    %17 = vector.load %arg12[%c0_11, %c0_12] : memref<16x512xf32, #tpu.memory_space<vmem>>, vector<16x512xf32>
    %c0_13 = arith.constant 0 : index
    %c0_14 = arith.constant 0 : index
    %18 = vector.load %arg5[%c0_13, %c0_14] : memref<16x1xf32, #tpu.memory_space<vmem>>, vector<16x1xf32>
    %19 = vector.extract_strided_slice %17 {offsets = [0, 94], sizes = [16, 256], strides = [1, 1]} : vector<16x512xf32> to vector<16x256xf32>
    %c0_15 = arith.constant 0 : index
    %c0_16 = arith.constant 0 : index
    %c0_17 = arith.constant 0 : index
    %20 = vector.load %arg10[%c0_15, %c0_16, %c0_17] : memref<25x1x256xf32, #tpu.memory_space<vmem>>, vector<1x1x256xf32>
    %21 = vector.shape_cast %20 : vector<1x1x256xf32> to vector<1x256xf32>
    %22 = vector.broadcast %21 : vector<1x256xf32> to vector<16x256xf32>
    %23 = arith.mulf %19, %22 : vector<16x256xf32>
    %c0_18 = arith.constant 0 : index
    %c0_19 = arith.constant 0 : index
    %c0_20 = arith.constant 0 : index
    %24 = vector.load %arg4[%c0_18, %c0_19, %c0_20] : memref<25x16x1xf32, #tpu.memory_space<vmem>>, vector<1x16x1xf32>
    %25 = vector.shape_cast %24 : vector<1x16x1xf32> to vector<16x1xf32>
    %26 = vector.broadcast %25 : vector<16x1xf32> to vector<16x256xf32>
    %27 = arith.mulf %23, %26 : vector<16x256xf32>
    %28 = vector.broadcast %18 : vector<16x1xf32> to vector<16x256xf32>
    %29 = arith.addf %28, %27 : vector<16x256xf32>
    %30 = vector.extract_strided_slice %17 {offsets = [0, 95], sizes = [16, 256], strides = [1, 1]} : vector<16x512xf32> to vector<16x256xf32>
    %c1 = arith.constant 1 : index
    %c0_21 = arith.constant 0 : index
    %c0_22 = arith.constant 0 : index
    %31 = vector.load %arg10[%c1, %c0_21, %c0_22] : memref<25x1x256xf32, #tpu.memory_space<vmem>>, vector<1x1x256xf32>
    %32 = vector.shape_cast %31 : vector<1x1x256xf32> to vector<1x256xf32>
    %33 = vector.broadcast %32 : vector<1x256xf32> to vector<16x256xf32>
    %34 = arith.mulf %30, %33 : vector<16x256xf32>
    %c1_23 = arith.constant 1 : index
    %c0_24 = arith.constant 0 : index
    %c0_25 = arith.constant 0 : index
    %35 = vector.load %arg4[%c1_23, %c0_24, %c0_25] : memref<25x16x1xf32, #tpu.memory_space<vmem>>, vector<1x16x1xf32>
    %36 = vector.shape_cast %35 : vector<1x16x1xf32> to vector<16x1xf32>
    %37 = vector.broadcast %36 : vector<16x1xf32> to vector<16x256xf32>
    %38 = arith.mulf %34, %37 : vector<16x256xf32>
    %39 = arith.addf %29, %38 : vector<16x256xf32>
    %40 = vector.extract_strided_slice %17 {offsets = [0, 96], sizes = [16, 256], strides = [1, 1]} : vector<16x512xf32> to vector<16x256xf32>
    %c2 = arith.constant 2 : index
    %c0_26 = arith.constant 0 : index
    %c0_27 = arith.constant 0 : index
    %41 = vector.load %arg10[%c2, %c0_26, %c0_27] : memref<25x1x256xf32, #tpu.memory_space<vmem>>, vector<1x1x256xf32>
    %42 = vector.shape_cast %41 : vector<1x1x256xf32> to vector<1x256xf32>
    %43 = vector.broadcast %42 : vector<1x256xf32> to vector<16x256xf32>
    %44 = arith.mulf %40, %43 : vector<16x256xf32>
    %c2_28 = arith.constant 2 : index
    %c0_29 = arith.constant 0 : index
    %c0_30 = arith.constant 0 : index
    %45 = vector.load %arg4[%c2_28, %c0_29, %c0_30] : memref<25x16x1xf32, #tpu.memory_space<vmem>>, vector<1x16x1xf32>
    %46 = vector.shape_cast %45 : vector<1x16x1xf32> to vector<16x1xf32>
    %47 = vector.broadcast %46 : vector<16x1xf32> to vector<16x256xf32>
    %48 = arith.mulf %44, %47 : vector<16x256xf32>
    %49 = arith.addf %39, %48 : vector<16x256xf32>
    %50 = vector.extract_strided_slice %17 {offsets = [0, 97], sizes = [16, 256], strides = [1, 1]} : vector<16x512xf32> to vector<16x256xf32>
    %c3 = arith.constant 3 : index
    %c0_31 = arith.constant 0 : index
    %c0_32 = arith.constant 0 : index
    %51 = vector.load %arg10[%c3, %c0_31, %c0_32] : memref<25x1x256xf32, #tpu.memory_space<vmem>>, vector<1x1x256xf32>
    %52 = vector.shape_cast %51 : vector<1x1x256xf32> to vector<1x256xf32>
    %53 = vector.broadcast %52 : vector<1x256xf32> to vector<16x256xf32>
    %54 = arith.mulf %50, %53 : vector<16x256xf32>
    %c3_33 = arith.constant 3 : index
    %c0_34 = arith.constant 0 : index
    %c0_35 = arith.constant 0 : index
    %55 = vector.load %arg4[%c3_33, %c0_34, %c0_35] : memref<25x16x1xf32, #tpu.memory_space<vmem>>, vector<1x16x1xf32>
    %56 = vector.shape_cast %55 : vector<1x16x1xf32> to vector<16x1xf32>
    %57 = vector.broadcast %56 : vector<16x1xf32> to vector<16x256xf32>
    %58 = arith.mulf %54, %57 : vector<16x256xf32>
    %59 = arith.addf %49, %58 : vector<16x256xf32>
    %60 = vector.extract_strided_slice %17 {offsets = [0, 98], sizes = [16, 256], strides = [1, 1]} : vector<16x512xf32> to vector<16x256xf32>
    %c4 = arith.constant 4 : index
    %c0_36 = arith.constant 0 : index
    %c0_37 = arith.constant 0 : index
    %61 = vector.load %arg10[%c4, %c0_36, %c0_37] : memref<25x1x256xf32, #tpu.memory_space<vmem>>, vector<1x1x256xf32>
    %62 = vector.shape_cast %61 : vector<1x1x256xf32> to vector<1x256xf32>
    %63 = vector.broadcast %62 : vector<1x256xf32> to vector<16x256xf32>
    %64 = arith.mulf %60, %63 : vector<16x256xf32>
    %c4_38 = arith.constant 4 : index
    %c0_39 = arith.constant 0 : index
    %c0_40 = arith.constant 0 : index
    %65 = vector.load %arg4[%c4_38, %c0_39, %c0_40] : memref<25x16x1xf32, #tpu.memory_space<vmem>>, vector<1x16x1xf32>
    %66 = vector.shape_cast %65 : vector<1x16x1xf32> to vector<16x1xf32>
    %67 = vector.broadcast %66 : vector<16x1xf32> to vector<16x256xf32>
    %68 = arith.mulf %64, %67 : vector<16x256xf32>
    %69 = arith.addf %59, %68 : vector<16x256xf32>
    %70 = vector.extract_strided_slice %17 {offsets = [0, 110], sizes = [16, 256], strides = [1, 1]} : vector<16x512xf32> to vector<16x256xf32>
    %c5 = arith.constant 5 : index
    %c0_41 = arith.constant 0 : index
    %c0_42 = arith.constant 0 : index
    %71 = vector.load %arg10[%c5, %c0_41, %c0_42] : memref<25x1x256xf32, #tpu.memory_space<vmem>>, vector<1x1x256xf32>
    %72 = vector.shape_cast %71 : vector<1x1x256xf32> to vector<1x256xf32>
    %73 = vector.broadcast %72 : vector<1x256xf32> to vector<16x256xf32>
    %74 = arith.mulf %70, %73 : vector<16x256xf32>
    %c5_43 = arith.constant 5 : index
    %c0_44 = arith.constant 0 : index
    %c0_45 = arith.constant 0 : index
    %75 = vector.load %arg4[%c5_43, %c0_44, %c0_45] : memref<25x16x1xf32, #tpu.memory_space<vmem>>, vector<1x16x1xf32>
    %76 = vector.shape_cast %75 : vector<1x16x1xf32> to vector<16x1xf32>
    %77 = vector.broadcast %76 : vector<16x1xf32> to vector<16x256xf32>
    %78 = arith.mulf %74, %77 : vector<16x256xf32>
    %79 = arith.addf %69, %78 : vector<16x256xf32>
    %80 = vector.extract_strided_slice %17 {offsets = [0, 111], sizes = [16, 256], strides = [1, 1]} : vector<16x512xf32> to vector<16x256xf32>
    %c6 = arith.constant 6 : index
    %c0_46 = arith.constant 0 : index
    %c0_47 = arith.constant 0 : index
    %81 = vector.load %arg10[%c6, %c0_46, %c0_47] : memref<25x1x256xf32, #tpu.memory_space<vmem>>, vector<1x1x256xf32>
    %82 = vector.shape_cast %81 : vector<1x1x256xf32> to vector<1x256xf32>
    %83 = vector.broadcast %82 : vector<1x256xf32> to vector<16x256xf32>
    %84 = arith.mulf %80, %83 : vector<16x256xf32>
    %c6_48 = arith.constant 6 : index
    %c0_49 = arith.constant 0 : index
    %c0_50 = arith.constant 0 : index
    %85 = vector.load %arg4[%c6_48, %c0_49, %c0_50] : memref<25x16x1xf32, #tpu.memory_space<vmem>>, vector<1x16x1xf32>
    %86 = vector.shape_cast %85 : vector<1x16x1xf32> to vector<16x1xf32>
    %87 = vector.broadcast %86 : vector<16x1xf32> to vector<16x256xf32>
    %88 = arith.mulf %84, %87 : vector<16x256xf32>
    %89 = arith.addf %79, %88 : vector<16x256xf32>
    %90 = vector.extract_strided_slice %17 {offsets = [0, 112], sizes = [16, 256], strides = [1, 1]} : vector<16x512xf32> to vector<16x256xf32>
    %c7 = arith.constant 7 : index
    %c0_51 = arith.constant 0 : index
    %c0_52 = arith.constant 0 : index
    %91 = vector.load %arg10[%c7, %c0_51, %c0_52] : memref<25x1x256xf32, #tpu.memory_space<vmem>>, vector<1x1x256xf32>
    %92 = vector.shape_cast %91 : vector<1x1x256xf32> to vector<1x256xf32>
    %93 = vector.broadcast %92 : vector<1x256xf32> to vector<16x256xf32>
    %94 = arith.mulf %90, %93 : vector<16x256xf32>
    %c7_53 = arith.constant 7 : index
    %c0_54 = arith.constant 0 : index
    %c0_55 = arith.constant 0 : index
    %95 = vector.load %arg4[%c7_53, %c0_54, %c0_55] : memref<25x16x1xf32, #tpu.memory_space<vmem>>, vector<1x16x1xf32>
    %96 = vector.shape_cast %95 : vector<1x16x1xf32> to vector<16x1xf32>
    %97 = vector.broadcast %96 : vector<16x1xf32> to vector<16x256xf32>
    %98 = arith.mulf %94, %97 : vector<16x256xf32>
    %99 = arith.addf %89, %98 : vector<16x256xf32>
    %100 = vector.extract_strided_slice %17 {offsets = [0, 113], sizes = [16, 256], strides = [1, 1]} : vector<16x512xf32> to vector<16x256xf32>
    %c8 = arith.constant 8 : index
    %c0_56 = arith.constant 0 : index
    %c0_57 = arith.constant 0 : index
    %101 = vector.load %arg10[%c8, %c0_56, %c0_57] : memref<25x1x256xf32, #tpu.memory_space<vmem>>, vector<1x1x256xf32>
    %102 = vector.shape_cast %101 : vector<1x1x256xf32> to vector<1x256xf32>
    %103 = vector.broadcast %102 : vector<1x256xf32> to vector<16x256xf32>
    %104 = arith.mulf %100, %103 : vector<16x256xf32>
    %c8_58 = arith.constant 8 : index
    %c0_59 = arith.constant 0 : index
    %c0_60 = arith.constant 0 : index
    %105 = vector.load %arg4[%c8_58, %c0_59, %c0_60] : memref<25x16x1xf32, #tpu.memory_space<vmem>>, vector<1x16x1xf32>
    %106 = vector.shape_cast %105 : vector<1x16x1xf32> to vector<16x1xf32>
    %107 = vector.broadcast %106 : vector<16x1xf32> to vector<16x256xf32>
    %108 = arith.mulf %104, %107 : vector<16x256xf32>
    %109 = arith.addf %99, %108 : vector<16x256xf32>
    %110 = vector.extract_strided_slice %17 {offsets = [0, 114], sizes = [16, 256], strides = [1, 1]} : vector<16x512xf32> to vector<16x256xf32>
    %c9 = arith.constant 9 : index
    %c0_61 = arith.constant 0 : index
    %c0_62 = arith.constant 0 : index
    %111 = vector.load %arg10[%c9, %c0_61, %c0_62] : memref<25x1x256xf32, #tpu.memory_space<vmem>>, vector<1x1x256xf32>
    %112 = vector.shape_cast %111 : vector<1x1x256xf32> to vector<1x256xf32>
    %113 = vector.broadcast %112 : vector<1x256xf32> to vector<16x256xf32>
    %114 = arith.mulf %110, %113 : vector<16x256xf32>
    %c9_63 = arith.constant 9 : index
    %c0_64 = arith.constant 0 : index
    %c0_65 = arith.constant 0 : index
    %115 = vector.load %arg4[%c9_63, %c0_64, %c0_65] : memref<25x16x1xf32, #tpu.memory_space<vmem>>, vector<1x16x1xf32>
    %116 = vector.shape_cast %115 : vector<1x16x1xf32> to vector<16x1xf32>
    %117 = vector.broadcast %116 : vector<16x1xf32> to vector<16x256xf32>
    %118 = arith.mulf %114, %117 : vector<16x256xf32>
    %119 = arith.addf %109, %118 : vector<16x256xf32>
    %120 = vector.extract_strided_slice %17 {offsets = [0, 126], sizes = [16, 256], strides = [1, 1]} : vector<16x512xf32> to vector<16x256xf32>
    %c10 = arith.constant 10 : index
    %c0_66 = arith.constant 0 : index
    %c0_67 = arith.constant 0 : index
    %121 = vector.load %arg10[%c10, %c0_66, %c0_67] : memref<25x1x256xf32, #tpu.memory_space<vmem>>, vector<1x1x256xf32>
    %122 = vector.shape_cast %121 : vector<1x1x256xf32> to vector<1x256xf32>
    %123 = vector.broadcast %122 : vector<1x256xf32> to vector<16x256xf32>
    %124 = arith.mulf %120, %123 : vector<16x256xf32>
    %c10_68 = arith.constant 10 : index
    %c0_69 = arith.constant 0 : index
    %c0_70 = arith.constant 0 : index
    %125 = vector.load %arg4[%c10_68, %c0_69, %c0_70] : memref<25x16x1xf32, #tpu.memory_space<vmem>>, vector<1x16x1xf32>
    %126 = vector.shape_cast %125 : vector<1x16x1xf32> to vector<16x1xf32>
    %127 = vector.broadcast %126 : vector<16x1xf32> to vector<16x256xf32>
    %128 = arith.mulf %124, %127 : vector<16x256xf32>
    %129 = arith.addf %119, %128 : vector<16x256xf32>
    %130 = vector.extract_strided_slice %17 {offsets = [0, 127], sizes = [16, 256], strides = [1, 1]} : vector<16x512xf32> to vector<16x256xf32>
    %c11 = arith.constant 11 : index
    %c0_71 = arith.constant 0 : index
    %c0_72 = arith.constant 0 : index
    %131 = vector.load %arg10[%c11, %c0_71, %c0_72] : memref<25x1x256xf32, #tpu.memory_space<vmem>>, vector<1x1x256xf32>
    %132 = vector.shape_cast %131 : vector<1x1x256xf32> to vector<1x256xf32>
    %133 = vector.broadcast %132 : vector<1x256xf32> to vector<16x256xf32>
    %134 = arith.mulf %130, %133 : vector<16x256xf32>
    %c11_73 = arith.constant 11 : index
    %c0_74 = arith.constant 0 : index
    %c0_75 = arith.constant 0 : index
    %135 = vector.load %arg4[%c11_73, %c0_74, %c0_75] : memref<25x16x1xf32, #tpu.memory_space<vmem>>, vector<1x16x1xf32>
    %136 = vector.shape_cast %135 : vector<1x16x1xf32> to vector<16x1xf32>
    %137 = vector.broadcast %136 : vector<16x1xf32> to vector<16x256xf32>
    %138 = arith.mulf %134, %137 : vector<16x256xf32>
    %139 = arith.addf %129, %138 : vector<16x256xf32>
    %140 = vector.extract_strided_slice %17 {offsets = [0, 128], sizes = [16, 256], strides = [1, 1]} : vector<16x512xf32> to vector<16x256xf32>
    %c12 = arith.constant 12 : index
    %c0_76 = arith.constant 0 : index
    %c0_77 = arith.constant 0 : index
    %141 = vector.load %arg10[%c12, %c0_76, %c0_77] : memref<25x1x256xf32, #tpu.memory_space<vmem>>, vector<1x1x256xf32>
    %142 = vector.shape_cast %141 : vector<1x1x256xf32> to vector<1x256xf32>
    %143 = vector.broadcast %142 : vector<1x256xf32> to vector<16x256xf32>
    %144 = arith.mulf %140, %143 : vector<16x256xf32>
    %c12_78 = arith.constant 12 : index
    %c0_79 = arith.constant 0 : index
    %c0_80 = arith.constant 0 : index
    %145 = vector.load %arg4[%c12_78, %c0_79, %c0_80] : memref<25x16x1xf32, #tpu.memory_space<vmem>>, vector<1x16x1xf32>
    %146 = vector.shape_cast %145 : vector<1x16x1xf32> to vector<16x1xf32>
    %147 = vector.broadcast %146 : vector<16x1xf32> to vector<16x256xf32>
    %148 = arith.mulf %144, %147 : vector<16x256xf32>
    %149 = arith.addf %139, %148 : vector<16x256xf32>
    %150 = vector.extract_strided_slice %17 {offsets = [0, 129], sizes = [16, 256], strides = [1, 1]} : vector<16x512xf32> to vector<16x256xf32>
    %c13 = arith.constant 13 : index
    %c0_81 = arith.constant 0 : index
    %c0_82 = arith.constant 0 : index
    %151 = vector.load %arg10[%c13, %c0_81, %c0_82] : memref<25x1x256xf32, #tpu.memory_space<vmem>>, vector<1x1x256xf32>
    %152 = vector.shape_cast %151 : vector<1x1x256xf32> to vector<1x256xf32>
    %153 = vector.broadcast %152 : vector<1x256xf32> to vector<16x256xf32>
    %154 = arith.mulf %150, %153 : vector<16x256xf32>
    %c13_83 = arith.constant 13 : index
    %c0_84 = arith.constant 0 : index
    %c0_85 = arith.constant 0 : index
    %155 = vector.load %arg4[%c13_83, %c0_84, %c0_85] : memref<25x16x1xf32, #tpu.memory_space<vmem>>, vector<1x16x1xf32>
    %156 = vector.shape_cast %155 : vector<1x16x1xf32> to vector<16x1xf32>
    %157 = vector.broadcast %156 : vector<16x1xf32> to vector<16x256xf32>
    %158 = arith.mulf %154, %157 : vector<16x256xf32>
    %159 = arith.addf %149, %158 : vector<16x256xf32>
    %160 = vector.extract_strided_slice %17 {offsets = [0, 130], sizes = [16, 256], strides = [1, 1]} : vector<16x512xf32> to vector<16x256xf32>
    %c14 = arith.constant 14 : index
    %c0_86 = arith.constant 0 : index
    %c0_87 = arith.constant 0 : index
    %161 = vector.load %arg10[%c14, %c0_86, %c0_87] : memref<25x1x256xf32, #tpu.memory_space<vmem>>, vector<1x1x256xf32>
    %162 = vector.shape_cast %161 : vector<1x1x256xf32> to vector<1x256xf32>
    %163 = vector.broadcast %162 : vector<1x256xf32> to vector<16x256xf32>
    %164 = arith.mulf %160, %163 : vector<16x256xf32>
    %c14_88 = arith.constant 14 : index
    %c0_89 = arith.constant 0 : index
    %c0_90 = arith.constant 0 : index
    %165 = vector.load %arg4[%c14_88, %c0_89, %c0_90] : memref<25x16x1xf32, #tpu.memory_space<vmem>>, vector<1x16x1xf32>
    %166 = vector.shape_cast %165 : vector<1x16x1xf32> to vector<16x1xf32>
    %167 = vector.broadcast %166 : vector<16x1xf32> to vector<16x256xf32>
    %168 = arith.mulf %164, %167 : vector<16x256xf32>
    %169 = arith.addf %159, %168 : vector<16x256xf32>
    %170 = vector.extract_strided_slice %17 {offsets = [0, 142], sizes = [16, 256], strides = [1, 1]} : vector<16x512xf32> to vector<16x256xf32>
    %c15 = arith.constant 15 : index
    %c0_91 = arith.constant 0 : index
    %c0_92 = arith.constant 0 : index
    %171 = vector.load %arg10[%c15, %c0_91, %c0_92] : memref<25x1x256xf32, #tpu.memory_space<vmem>>, vector<1x1x256xf32>
    %172 = vector.shape_cast %171 : vector<1x1x256xf32> to vector<1x256xf32>
    %173 = vector.broadcast %172 : vector<1x256xf32> to vector<16x256xf32>
    %174 = arith.mulf %170, %173 : vector<16x256xf32>
    %c15_93 = arith.constant 15 : index
    %c0_94 = arith.constant 0 : index
    %c0_95 = arith.constant 0 : index
    %175 = vector.load %arg4[%c15_93, %c0_94, %c0_95] : memref<25x16x1xf32, #tpu.memory_space<vmem>>, vector<1x16x1xf32>
    %176 = vector.shape_cast %175 : vector<1x16x1xf32> to vector<16x1xf32>
    %177 = vector.broadcast %176 : vector<16x1xf32> to vector<16x256xf32>
    %178 = arith.mulf %174, %177 : vector<16x256xf32>
    %179 = arith.addf %169, %178 : vector<16x256xf32>
    %180 = vector.extract_strided_slice %17 {offsets = [0, 143], sizes = [16, 256], strides = [1, 1]} : vector<16x512xf32> to vector<16x256xf32>
    %c16 = arith.constant 16 : index
    %c0_96 = arith.constant 0 : index
    %c0_97 = arith.constant 0 : index
    %181 = vector.load %arg10[%c16, %c0_96, %c0_97] : memref<25x1x256xf32, #tpu.memory_space<vmem>>, vector<1x1x256xf32>
    %182 = vector.shape_cast %181 : vector<1x1x256xf32> to vector<1x256xf32>
    %183 = vector.broadcast %182 : vector<1x256xf32> to vector<16x256xf32>
    %184 = arith.mulf %180, %183 : vector<16x256xf32>
    %c16_98 = arith.constant 16 : index
    %c0_99 = arith.constant 0 : index
    %c0_100 = arith.constant 0 : index
    %185 = vector.load %arg4[%c16_98, %c0_99, %c0_100] : memref<25x16x1xf32, #tpu.memory_space<vmem>>, vector<1x16x1xf32>
    %186 = vector.shape_cast %185 : vector<1x16x1xf32> to vector<16x1xf32>
    %187 = vector.broadcast %186 : vector<16x1xf32> to vector<16x256xf32>
    %188 = arith.mulf %184, %187 : vector<16x256xf32>
    %189 = arith.addf %179, %188 : vector<16x256xf32>
    %190 = vector.extract_strided_slice %17 {offsets = [0, 144], sizes = [16, 256], strides = [1, 1]} : vector<16x512xf32> to vector<16x256xf32>
    %c17 = arith.constant 17 : index
    %c0_101 = arith.constant 0 : index
    %c0_102 = arith.constant 0 : index
    %191 = vector.load %arg10[%c17, %c0_101, %c0_102] : memref<25x1x256xf32, #tpu.memory_space<vmem>>, vector<1x1x256xf32>
    %192 = vector.shape_cast %191 : vector<1x1x256xf32> to vector<1x256xf32>
    %193 = vector.broadcast %192 : vector<1x256xf32> to vector<16x256xf32>
    %194 = arith.mulf %190, %193 : vector<16x256xf32>
    %c17_103 = arith.constant 17 : index
    %c0_104 = arith.constant 0 : index
    %c0_105 = arith.constant 0 : index
    %195 = vector.load %arg4[%c17_103, %c0_104, %c0_105] : memref<25x16x1xf32, #tpu.memory_space<vmem>>, vector<1x16x1xf32>
    %196 = vector.shape_cast %195 : vector<1x16x1xf32> to vector<16x1xf32>
    %197 = vector.broadcast %196 : vector<16x1xf32> to vector<16x256xf32>
    %198 = arith.mulf %194, %197 : vector<16x256xf32>
    %199 = arith.addf %189, %198 : vector<16x256xf32>
    %200 = vector.extract_strided_slice %17 {offsets = [0, 145], sizes = [16, 256], strides = [1, 1]} : vector<16x512xf32> to vector<16x256xf32>
    %c18 = arith.constant 18 : index
    %c0_106 = arith.constant 0 : index
    %c0_107 = arith.constant 0 : index
    %201 = vector.load %arg10[%c18, %c0_106, %c0_107] : memref<25x1x256xf32, #tpu.memory_space<vmem>>, vector<1x1x256xf32>
    %202 = vector.shape_cast %201 : vector<1x1x256xf32> to vector<1x256xf32>
    %203 = vector.broadcast %202 : vector<1x256xf32> to vector<16x256xf32>
    %204 = arith.mulf %200, %203 : vector<16x256xf32>
    %c18_108 = arith.constant 18 : index
    %c0_109 = arith.constant 0 : index
    %c0_110 = arith.constant 0 : index
    %205 = vector.load %arg4[%c18_108, %c0_109, %c0_110] : memref<25x16x1xf32, #tpu.memory_space<vmem>>, vector<1x16x1xf32>
    %206 = vector.shape_cast %205 : vector<1x16x1xf32> to vector<16x1xf32>
    %207 = vector.broadcast %206 : vector<16x1xf32> to vector<16x256xf32>
    %208 = arith.mulf %204, %207 : vector<16x256xf32>
    %209 = arith.addf %199, %208 : vector<16x256xf32>
    %210 = vector.extract_strided_slice %17 {offsets = [0, 146], sizes = [16, 256], strides = [1, 1]} : vector<16x512xf32> to vector<16x256xf32>
    %c19 = arith.constant 19 : index
    %c0_111 = arith.constant 0 : index
    %c0_112 = arith.constant 0 : index
    %211 = vector.load %arg10[%c19, %c0_111, %c0_112] : memref<25x1x256xf32, #tpu.memory_space<vmem>>, vector<1x1x256xf32>
    %212 = vector.shape_cast %211 : vector<1x1x256xf32> to vector<1x256xf32>
    %213 = vector.broadcast %212 : vector<1x256xf32> to vector<16x256xf32>
    %214 = arith.mulf %210, %213 : vector<16x256xf32>
    %c19_113 = arith.constant 19 : index
    %c0_114 = arith.constant 0 : index
    %c0_115 = arith.constant 0 : index
    %215 = vector.load %arg4[%c19_113, %c0_114, %c0_115] : memref<25x16x1xf32, #tpu.memory_space<vmem>>, vector<1x16x1xf32>
    %216 = vector.shape_cast %215 : vector<1x16x1xf32> to vector<16x1xf32>
    %217 = vector.broadcast %216 : vector<16x1xf32> to vector<16x256xf32>
    %218 = arith.mulf %214, %217 : vector<16x256xf32>
    %219 = arith.addf %209, %218 : vector<16x256xf32>
    %220 = vector.extract_strided_slice %17 {offsets = [0, 158], sizes = [16, 256], strides = [1, 1]} : vector<16x512xf32> to vector<16x256xf32>
    %c20 = arith.constant 20 : index
    %c0_116 = arith.constant 0 : index
    %c0_117 = arith.constant 0 : index
    %221 = vector.load %arg10[%c20, %c0_116, %c0_117] : memref<25x1x256xf32, #tpu.memory_space<vmem>>, vector<1x1x256xf32>
    %222 = vector.shape_cast %221 : vector<1x1x256xf32> to vector<1x256xf32>
    %223 = vector.broadcast %222 : vector<1x256xf32> to vector<16x256xf32>
    %224 = arith.mulf %220, %223 : vector<16x256xf32>
    %c20_118 = arith.constant 20 : index
    %c0_119 = arith.constant 0 : index
    %c0_120 = arith.constant 0 : index
    %225 = vector.load %arg4[%c20_118, %c0_119, %c0_120] : memref<25x16x1xf32, #tpu.memory_space<vmem>>, vector<1x16x1xf32>
    %226 = vector.shape_cast %225 : vector<1x16x1xf32> to vector<16x1xf32>
    %227 = vector.broadcast %226 : vector<16x1xf32> to vector<16x256xf32>
    %228 = arith.mulf %224, %227 : vector<16x256xf32>
    %229 = arith.addf %219, %228 : vector<16x256xf32>
    %230 = vector.extract_strided_slice %17 {offsets = [0, 159], sizes = [16, 256], strides = [1, 1]} : vector<16x512xf32> to vector<16x256xf32>
    %c21 = arith.constant 21 : index
    %c0_121 = arith.constant 0 : index
    %c0_122 = arith.constant 0 : index
    %231 = vector.load %arg10[%c21, %c0_121, %c0_122] : memref<25x1x256xf32, #tpu.memory_space<vmem>>, vector<1x1x256xf32>
    %232 = vector.shape_cast %231 : vector<1x1x256xf32> to vector<1x256xf32>
    %233 = vector.broadcast %232 : vector<1x256xf32> to vector<16x256xf32>
    %234 = arith.mulf %230, %233 : vector<16x256xf32>
    %c21_123 = arith.constant 21 : index
    %c0_124 = arith.constant 0 : index
    %c0_125 = arith.constant 0 : index
    %235 = vector.load %arg4[%c21_123, %c0_124, %c0_125] : memref<25x16x1xf32, #tpu.memory_space<vmem>>, vector<1x16x1xf32>
    %236 = vector.shape_cast %235 : vector<1x16x1xf32> to vector<16x1xf32>
    %237 = vector.broadcast %236 : vector<16x1xf32> to vector<16x256xf32>
    %238 = arith.mulf %234, %237 : vector<16x256xf32>
    %239 = arith.addf %229, %238 : vector<16x256xf32>
    %240 = vector.extract_strided_slice %17 {offsets = [0, 160], sizes = [16, 256], strides = [1, 1]} : vector<16x512xf32> to vector<16x256xf32>
    %c22 = arith.constant 22 : index
    %c0_126 = arith.constant 0 : index
    %c0_127 = arith.constant 0 : index
    %241 = vector.load %arg10[%c22, %c0_126, %c0_127] : memref<25x1x256xf32, #tpu.memory_space<vmem>>, vector<1x1x256xf32>
    %242 = vector.shape_cast %241 : vector<1x1x256xf32> to vector<1x256xf32>
    %243 = vector.broadcast %242 : vector<1x256xf32> to vector<16x256xf32>
    %244 = arith.mulf %240, %243 : vector<16x256xf32>
    %c22_128 = arith.constant 22 : index
    %c0_129 = arith.constant 0 : index
    %c0_130 = arith.constant 0 : index
    %245 = vector.load %arg4[%c22_128, %c0_129, %c0_130] : memref<25x16x1xf32, #tpu.memory_space<vmem>>, vector<1x16x1xf32>
    %246 = vector.shape_cast %245 : vector<1x16x1xf32> to vector<16x1xf32>
    %247 = vector.broadcast %246 : vector<16x1xf32> to vector<16x256xf32>
    %248 = arith.mulf %244, %247 : vector<16x256xf32>
    %249 = arith.addf %239, %248 : vector<16x256xf32>
    %250 = vector.extract_strided_slice %17 {offsets = [0, 161], sizes = [16, 256], strides = [1, 1]} : vector<16x512xf32> to vector<16x256xf32>
    %c23 = arith.constant 23 : index
    %c0_131 = arith.constant 0 : index
    %c0_132 = arith.constant 0 : index
    %251 = vector.load %arg10[%c23, %c0_131, %c0_132] : memref<25x1x256xf32, #tpu.memory_space<vmem>>, vector<1x1x256xf32>
    %252 = vector.shape_cast %251 : vector<1x1x256xf32> to vector<1x256xf32>
    %253 = vector.broadcast %252 : vector<1x256xf32> to vector<16x256xf32>
    %254 = arith.mulf %250, %253 : vector<16x256xf32>
    %c23_133 = arith.constant 23 : index
    %c0_134 = arith.constant 0 : index
    %c0_135 = arith.constant 0 : index
    %255 = vector.load %arg4[%c23_133, %c0_134, %c0_135] : memref<25x16x1xf32, #tpu.memory_space<vmem>>, vector<1x16x1xf32>
    %256 = vector.shape_cast %255 : vector<1x16x1xf32> to vector<16x1xf32>
    %257 = vector.broadcast %256 : vector<16x1xf32> to vector<16x256xf32>
    %258 = arith.mulf %254, %257 : vector<16x256xf32>
    %259 = arith.addf %249, %258 : vector<16x256xf32>
    %260 = vector.extract_strided_slice %17 {offsets = [0, 162], sizes = [16, 256], strides = [1, 1]} : vector<16x512xf32> to vector<16x256xf32>
    %c24 = arith.constant 24 : index
    %c0_136 = arith.constant 0 : index
    %c0_137 = arith.constant 0 : index
    %261 = vector.load %arg10[%c24, %c0_136, %c0_137] : memref<25x1x256xf32, #tpu.memory_space<vmem>>, vector<1x1x256xf32>
    %262 = vector.shape_cast %261 : vector<1x1x256xf32> to vector<1x256xf32>
    %263 = vector.broadcast %262 : vector<1x256xf32> to vector<16x256xf32>
    %264 = arith.mulf %260, %263 : vector<16x256xf32>
    %c24_138 = arith.constant 24 : index
    %c0_139 = arith.constant 0 : index
    %c0_140 = arith.constant 0 : index
    %265 = vector.load %arg4[%c24_138, %c0_139, %c0_140] : memref<25x16x1xf32, #tpu.memory_space<vmem>>, vector<1x16x1xf32>
    %266 = vector.shape_cast %265 : vector<1x16x1xf32> to vector<16x1xf32>
    %267 = vector.broadcast %266 : vector<16x1xf32> to vector<16x256xf32>
    %268 = arith.mulf %264, %267 : vector<16x256xf32>
    %269 = arith.addf %259, %268 : vector<16x256xf32>
    %270 = arith.negf %269 : vector<16x256xf32>
    %271 = math.exp %270 : vector<16x256xf32>
    %cst_141 = arith.constant 1.000000e+00 : f32
    %272 = vector.broadcast %cst_141 : f32 to vector<16x256xf32>
    %273 = arith.addf %272, %271 : vector<16x256xf32>
    %274 = arith.divf %272, %273 : vector<16x256xf32>
    %275 = arith.mulf %269, %274 : vector<16x256xf32>
    %276 = tpu.concatenate %13, %275 in 0 : vector<16x256xf32>, vector<16x256xf32> -> vector<32x256xf32>
    %c0_142 = arith.constant 0 : index
    %c0_143 = arith.constant 0 : index
    %277 = vector.load %arg6[%c0_142, %c0_143] : memref<32x32xbf16, #tpu.memory_space<vmem>>, vector<32x32xbf16>
    %278 = arith.truncf %276 : vector<32x256xf32> to vector<32x256xbf16>
    %cst_144 = arith.constant dense<0.000000e+00> : vector<32x256xf32>
    %279 = tpu.matmul %277, %278, %cst_144 {dimension_numbers = #tpu.dot_dimension_numbers<[1], [0], [0], [1], [0, 0, 1, 1], [], []>} : vector<32x32xbf16>, vector<32x256xbf16>, vector<32x256xf32> -> vector<32x256xf32>
    %c0_145 = arith.constant 0 : index
    %c0_146 = arith.constant 0 : index
    %280 = vector.load %arg7[%c0_145, %c0_146] : memref<32x1xf32, #tpu.memory_space<vmem>>, vector<32x1xf32>
    %281 = vector.broadcast %280 : vector<32x1xf32> to vector<32x256xf32>
    %282 = arith.addf %279, %281 : vector<32x256xf32>
    %cst_147 = arith.constant 0.000000e+00 : f32
    %283 = vector.broadcast %cst_147 : f32 to vector<32x512xf32>
    %c0_148 = arith.constant 0 : index
    %c0_149 = arith.constant 0 : index
    %284 = vector.load %arg13[%c0_148, %c0_149] : memref<32x512xf32, #tpu.memory_space<vmem>>, vector<32x512xf32>
    tpu.vector_store %arg13[%c0_148, %c0_149], %283 {strides = array<i32>} : memref<32x512xf32, #tpu.memory_space<vmem>>, vector<32x512xf32>,
    %c0_150 = arith.constant 0 : index
    %c128_151 = arith.constant 128 : index
    %285 = vector.load %arg13[%c0_150, %c128_151] : memref<32x512xf32, #tpu.memory_space<vmem>>, vector<32x256xf32>
    tpu.vector_store %arg13[%c0_150, %c128_151], %282 {strides = array<i32>} : memref<32x512xf32, #tpu.memory_space<vmem>>, vector<32x256xf32>,
    %c0_152 = arith.constant 0 : index
    %c0_153 = arith.constant 0 : index
    %286 = vector.load %arg13[%c0_152, %c0_153] : memref<32x512xf32, #tpu.memory_space<vmem>>, vector<32x512xf32>
    %c0_154 = arith.constant 0 : index
    %c0_155 = arith.constant 0 : index
    %287 = vector.load %arg9[%c0_154, %c0_155] : memref<32x1xf32, #tpu.memory_space<vmem>>, vector<32x1xf32>
    %288 = vector.extract_strided_slice %286 {offsets = [0, 94], sizes = [32, 256], strides = [1, 1]} : vector<32x512xf32> to vector<32x256xf32>
    %c0_156 = arith.constant 0 : index
    %c0_157 = arith.constant 0 : index
    %c0_158 = arith.constant 0 : index
    %289 = vector.load %arg10[%c0_156, %c0_157, %c0_158] : memref<25x1x256xf32, #tpu.memory_space<vmem>>, vector<1x1x256xf32>
    %290 = vector.shape_cast %289 : vector<1x1x256xf32> to vector<1x256xf32>
    %291 = vector.broadcast %290 : vector<1x256xf32> to vector<32x256xf32>
    %292 = arith.mulf %288, %291 : vector<32x256xf32>
    %c0_159 = arith.constant 0 : index
    %c0_160 = arith.constant 0 : index
    %c0_161 = arith.constant 0 : index
    %293 = vector.load %arg8[%c0_159, %c0_160, %c0_161] : memref<25x32x1xf32, #tpu.memory_space<vmem>>, vector<1x32x1xf32>
    %294 = vector.shape_cast %293 : vector<1x32x1xf32> to vector<32x1xf32>
    %295 = vector.broadcast %294 : vector<32x1xf32> to vector<32x256xf32>
    %296 = arith.mulf %292, %295 : vector<32x256xf32>
    %297 = vector.broadcast %287 : vector<32x1xf32> to vector<32x256xf32>
    %298 = arith.addf %297, %296 : vector<32x256xf32>
    %299 = vector.extract_strided_slice %286 {offsets = [0, 95], sizes = [32, 256], strides = [1, 1]} : vector<32x512xf32> to vector<32x256xf32>
    %c1_162 = arith.constant 1 : index
    %c0_163 = arith.constant 0 : index
    %c0_164 = arith.constant 0 : index
    %300 = vector.load %arg10[%c1_162, %c0_163, %c0_164] : memref<25x1x256xf32, #tpu.memory_space<vmem>>, vector<1x1x256xf32>
    %301 = vector.shape_cast %300 : vector<1x1x256xf32> to vector<1x256xf32>
    %302 = vector.broadcast %301 : vector<1x256xf32> to vector<32x256xf32>
    %303 = arith.mulf %299, %302 : vector<32x256xf32>
    %c1_165 = arith.constant 1 : index
    %c0_166 = arith.constant 0 : index
    %c0_167 = arith.constant 0 : index
    %304 = vector.load %arg8[%c1_165, %c0_166, %c0_167] : memref<25x32x1xf32, #tpu.memory_space<vmem>>, vector<1x32x1xf32>
    %305 = vector.shape_cast %304 : vector<1x32x1xf32> to vector<32x1xf32>
    %306 = vector.broadcast %305 : vector<32x1xf32> to vector<32x256xf32>
    %307 = arith.mulf %303, %306 : vector<32x256xf32>
    %308 = arith.addf %298, %307 : vector<32x256xf32>
    %309 = vector.extract_strided_slice %286 {offsets = [0, 96], sizes = [32, 256], strides = [1, 1]} : vector<32x512xf32> to vector<32x256xf32>
    %c2_168 = arith.constant 2 : index
    %c0_169 = arith.constant 0 : index
    %c0_170 = arith.constant 0 : index
    %310 = vector.load %arg10[%c2_168, %c0_169, %c0_170] : memref<25x1x256xf32, #tpu.memory_space<vmem>>, vector<1x1x256xf32>
    %311 = vector.shape_cast %310 : vector<1x1x256xf32> to vector<1x256xf32>
    %312 = vector.broadcast %311 : vector<1x256xf32> to vector<32x256xf32>
    %313 = arith.mulf %309, %312 : vector<32x256xf32>
    %c2_171 = arith.constant 2 : index
    %c0_172 = arith.constant 0 : index
    %c0_173 = arith.constant 0 : index
    %314 = vector.load %arg8[%c2_171, %c0_172, %c0_173] : memref<25x32x1xf32, #tpu.memory_space<vmem>>, vector<1x32x1xf32>
    %315 = vector.shape_cast %314 : vector<1x32x1xf32> to vector<32x1xf32>
    %316 = vector.broadcast %315 : vector<32x1xf32> to vector<32x256xf32>
    %317 = arith.mulf %313, %316 : vector<32x256xf32>
    %318 = arith.addf %308, %317 : vector<32x256xf32>
    %319 = vector.extract_strided_slice %286 {offsets = [0, 97], sizes = [32, 256], strides = [1, 1]} : vector<32x512xf32> to vector<32x256xf32>
    %c3_174 = arith.constant 3 : index
    %c0_175 = arith.constant 0 : index
    %c0_176 = arith.constant 0 : index
    %320 = vector.load %arg10[%c3_174, %c0_175, %c0_176] : memref<25x1x256xf32, #tpu.memory_space<vmem>>, vector<1x1x256xf32>
    %321 = vector.shape_cast %320 : vector<1x1x256xf32> to vector<1x256xf32>
    %322 = vector.broadcast %321 : vector<1x256xf32> to vector<32x256xf32>
    %323 = arith.mulf %319, %322 : vector<32x256xf32>
    %c3_177 = arith.constant 3 : index
    %c0_178 = arith.constant 0 : index
    %c0_179 = arith.constant 0 : index
    %324 = vector.load %arg8[%c3_177, %c0_178, %c0_179] : memref<25x32x1xf32, #tpu.memory_space<vmem>>, vector<1x32x1xf32>
    %325 = vector.shape_cast %324 : vector<1x32x1xf32> to vector<32x1xf32>
    %326 = vector.broadcast %325 : vector<32x1xf32> to vector<32x256xf32>
    %327 = arith.mulf %323, %326 : vector<32x256xf32>
    %328 = arith.addf %318, %327 : vector<32x256xf32>
    %329 = vector.extract_strided_slice %286 {offsets = [0, 98], sizes = [32, 256], strides = [1, 1]} : vector<32x512xf32> to vector<32x256xf32>
    %c4_180 = arith.constant 4 : index
    %c0_181 = arith.constant 0 : index
    %c0_182 = arith.constant 0 : index
    %330 = vector.load %arg10[%c4_180, %c0_181, %c0_182] : memref<25x1x256xf32, #tpu.memory_space<vmem>>, vector<1x1x256xf32>
    %331 = vector.shape_cast %330 : vector<1x1x256xf32> to vector<1x256xf32>
    %332 = vector.broadcast %331 : vector<1x256xf32> to vector<32x256xf32>
    %333 = arith.mulf %329, %332 : vector<32x256xf32>
    %c4_183 = arith.constant 4 : index
    %c0_184 = arith.constant 0 : index
    %c0_185 = arith.constant 0 : index
    %334 = vector.load %arg8[%c4_183, %c0_184, %c0_185] : memref<25x32x1xf32, #tpu.memory_space<vmem>>, vector<1x32x1xf32>
    %335 = vector.shape_cast %334 : vector<1x32x1xf32> to vector<32x1xf32>
    %336 = vector.broadcast %335 : vector<32x1xf32> to vector<32x256xf32>
    %337 = arith.mulf %333, %336 : vector<32x256xf32>
    %338 = arith.addf %328, %337 : vector<32x256xf32>
    %339 = vector.extract_strided_slice %286 {offsets = [0, 110], sizes = [32, 256], strides = [1, 1]} : vector<32x512xf32> to vector<32x256xf32>
    %c5_186 = arith.constant 5 : index
    %c0_187 = arith.constant 0 : index
    %c0_188 = arith.constant 0 : index
    %340 = vector.load %arg10[%c5_186, %c0_187, %c0_188] : memref<25x1x256xf32, #tpu.memory_space<vmem>>, vector<1x1x256xf32>
    %341 = vector.shape_cast %340 : vector<1x1x256xf32> to vector<1x256xf32>
    %342 = vector.broadcast %341 : vector<1x256xf32> to vector<32x256xf32>
    %343 = arith.mulf %339, %342 : vector<32x256xf32>
    %c5_189 = arith.constant 5 : index
    %c0_190 = arith.constant 0 : index
    %c0_191 = arith.constant 0 : index
    %344 = vector.load %arg8[%c5_189, %c0_190, %c0_191] : memref<25x32x1xf32, #tpu.memory_space<vmem>>, vector<1x32x1xf32>
    %345 = vector.shape_cast %344 : vector<1x32x1xf32> to vector<32x1xf32>
    %346 = vector.broadcast %345 : vector<32x1xf32> to vector<32x256xf32>
    %347 = arith.mulf %343, %346 : vector<32x256xf32>
    %348 = arith.addf %338, %347 : vector<32x256xf32>
    %349 = vector.extract_strided_slice %286 {offsets = [0, 111], sizes = [32, 256], strides = [1, 1]} : vector<32x512xf32> to vector<32x256xf32>
    %c6_192 = arith.constant 6 : index
    %c0_193 = arith.constant 0 : index
    %c0_194 = arith.constant 0 : index
    %350 = vector.load %arg10[%c6_192, %c0_193, %c0_194] : memref<25x1x256xf32, #tpu.memory_space<vmem>>, vector<1x1x256xf32>
    %351 = vector.shape_cast %350 : vector<1x1x256xf32> to vector<1x256xf32>
    %352 = vector.broadcast %351 : vector<1x256xf32> to vector<32x256xf32>
    %353 = arith.mulf %349, %352 : vector<32x256xf32>
    %c6_195 = arith.constant 6 : index
    %c0_196 = arith.constant 0 : index
    %c0_197 = arith.constant 0 : index
    %354 = vector.load %arg8[%c6_195, %c0_196, %c0_197] : memref<25x32x1xf32, #tpu.memory_space<vmem>>, vector<1x32x1xf32>
    %355 = vector.shape_cast %354 : vector<1x32x1xf32> to vector<32x1xf32>
    %356 = vector.broadcast %355 : vector<32x1xf32> to vector<32x256xf32>
    %357 = arith.mulf %353, %356 : vector<32x256xf32>
    %358 = arith.addf %348, %357 : vector<32x256xf32>
    %359 = vector.extract_strided_slice %286 {offsets = [0, 112], sizes = [32, 256], strides = [1, 1]} : vector<32x512xf32> to vector<32x256xf32>
    %c7_198 = arith.constant 7 : index
    %c0_199 = arith.constant 0 : index
    %c0_200 = arith.constant 0 : index
    %360 = vector.load %arg10[%c7_198, %c0_199, %c0_200] : memref<25x1x256xf32, #tpu.memory_space<vmem>>, vector<1x1x256xf32>
    %361 = vector.shape_cast %360 : vector<1x1x256xf32> to vector<1x256xf32>
    %362 = vector.broadcast %361 : vector<1x256xf32> to vector<32x256xf32>
    %363 = arith.mulf %359, %362 : vector<32x256xf32>
    %c7_201 = arith.constant 7 : index
    %c0_202 = arith.constant 0 : index
    %c0_203 = arith.constant 0 : index
    %364 = vector.load %arg8[%c7_201, %c0_202, %c0_203] : memref<25x32x1xf32, #tpu.memory_space<vmem>>, vector<1x32x1xf32>
    %365 = vector.shape_cast %364 : vector<1x32x1xf32> to vector<32x1xf32>
    %366 = vector.broadcast %365 : vector<32x1xf32> to vector<32x256xf32>
    %367 = arith.mulf %363, %366 : vector<32x256xf32>
    %368 = arith.addf %358, %367 : vector<32x256xf32>
    %369 = vector.extract_strided_slice %286 {offsets = [0, 113], sizes = [32, 256], strides = [1, 1]} : vector<32x512xf32> to vector<32x256xf32>
    %c8_204 = arith.constant 8 : index
    %c0_205 = arith.constant 0 : index
    %c0_206 = arith.constant 0 : index
    %370 = vector.load %arg10[%c8_204, %c0_205, %c0_206] : memref<25x1x256xf32, #tpu.memory_space<vmem>>, vector<1x1x256xf32>
    %371 = vector.shape_cast %370 : vector<1x1x256xf32> to vector<1x256xf32>
    %372 = vector.broadcast %371 : vector<1x256xf32> to vector<32x256xf32>
    %373 = arith.mulf %369, %372 : vector<32x256xf32>
    %c8_207 = arith.constant 8 : index
    %c0_208 = arith.constant 0 : index
    %c0_209 = arith.constant 0 : index
    %374 = vector.load %arg8[%c8_207, %c0_208, %c0_209] : memref<25x32x1xf32, #tpu.memory_space<vmem>>, vector<1x32x1xf32>
    %375 = vector.shape_cast %374 : vector<1x32x1xf32> to vector<32x1xf32>
    %376 = vector.broadcast %375 : vector<32x1xf32> to vector<32x256xf32>
    %377 = arith.mulf %373, %376 : vector<32x256xf32>
    %378 = arith.addf %368, %377 : vector<32x256xf32>
    %379 = vector.extract_strided_slice %286 {offsets = [0, 114], sizes = [32, 256], strides = [1, 1]} : vector<32x512xf32> to vector<32x256xf32>
    %c9_210 = arith.constant 9 : index
    %c0_211 = arith.constant 0 : index
    %c0_212 = arith.constant 0 : index
    %380 = vector.load %arg10[%c9_210, %c0_211, %c0_212] : memref<25x1x256xf32, #tpu.memory_space<vmem>>, vector<1x1x256xf32>
    %381 = vector.shape_cast %380 : vector<1x1x256xf32> to vector<1x256xf32>
    %382 = vector.broadcast %381 : vector<1x256xf32> to vector<32x256xf32>
    %383 = arith.mulf %379, %382 : vector<32x256xf32>
    %c9_213 = arith.constant 9 : index
    %c0_214 = arith.constant 0 : index
    %c0_215 = arith.constant 0 : index
    %384 = vector.load %arg8[%c9_213, %c0_214, %c0_215] : memref<25x32x1xf32, #tpu.memory_space<vmem>>, vector<1x32x1xf32>
    %385 = vector.shape_cast %384 : vector<1x32x1xf32> to vector<32x1xf32>
    %386 = vector.broadcast %385 : vector<32x1xf32> to vector<32x256xf32>
    %387 = arith.mulf %383, %386 : vector<32x256xf32>
    %388 = arith.addf %378, %387 : vector<32x256xf32>
    %389 = vector.extract_strided_slice %286 {offsets = [0, 126], sizes = [32, 256], strides = [1, 1]} : vector<32x512xf32> to vector<32x256xf32>
    %c10_216 = arith.constant 10 : index
    %c0_217 = arith.constant 0 : index
    %c0_218 = arith.constant 0 : index
    %390 = vector.load %arg10[%c10_216, %c0_217, %c0_218] : memref<25x1x256xf32, #tpu.memory_space<vmem>>, vector<1x1x256xf32>
    %391 = vector.shape_cast %390 : vector<1x1x256xf32> to vector<1x256xf32>
    %392 = vector.broadcast %391 : vector<1x256xf32> to vector<32x256xf32>
    %393 = arith.mulf %389, %392 : vector<32x256xf32>
    %c10_219 = arith.constant 10 : index
    %c0_220 = arith.constant 0 : index
    %c0_221 = arith.constant 0 : index
    %394 = vector.load %arg8[%c10_219, %c0_220, %c0_221] : memref<25x32x1xf32, #tpu.memory_space<vmem>>, vector<1x32x1xf32>
    %395 = vector.shape_cast %394 : vector<1x32x1xf32> to vector<32x1xf32>
    %396 = vector.broadcast %395 : vector<32x1xf32> to vector<32x256xf32>
    %397 = arith.mulf %393, %396 : vector<32x256xf32>
    %398 = arith.addf %388, %397 : vector<32x256xf32>
    %399 = vector.extract_strided_slice %286 {offsets = [0, 127], sizes = [32, 256], strides = [1, 1]} : vector<32x512xf32> to vector<32x256xf32>
    %c11_222 = arith.constant 11 : index
    %c0_223 = arith.constant 0 : index
    %c0_224 = arith.constant 0 : index
    %400 = vector.load %arg10[%c11_222, %c0_223, %c0_224] : memref<25x1x256xf32, #tpu.memory_space<vmem>>, vector<1x1x256xf32>
    %401 = vector.shape_cast %400 : vector<1x1x256xf32> to vector<1x256xf32>
    %402 = vector.broadcast %401 : vector<1x256xf32> to vector<32x256xf32>
    %403 = arith.mulf %399, %402 : vector<32x256xf32>
    %c11_225 = arith.constant 11 : index
    %c0_226 = arith.constant 0 : index
    %c0_227 = arith.constant 0 : index
    %404 = vector.load %arg8[%c11_225, %c0_226, %c0_227] : memref<25x32x1xf32, #tpu.memory_space<vmem>>, vector<1x32x1xf32>
    %405 = vector.shape_cast %404 : vector<1x32x1xf32> to vector<32x1xf32>
    %406 = vector.broadcast %405 : vector<32x1xf32> to vector<32x256xf32>
    %407 = arith.mulf %403, %406 : vector<32x256xf32>
    %408 = arith.addf %398, %407 : vector<32x256xf32>
    %409 = vector.extract_strided_slice %286 {offsets = [0, 128], sizes = [32, 256], strides = [1, 1]} : vector<32x512xf32> to vector<32x256xf32>
    %c12_228 = arith.constant 12 : index
    %c0_229 = arith.constant 0 : index
    %c0_230 = arith.constant 0 : index
    %410 = vector.load %arg10[%c12_228, %c0_229, %c0_230] : memref<25x1x256xf32, #tpu.memory_space<vmem>>, vector<1x1x256xf32>
    %411 = vector.shape_cast %410 : vector<1x1x256xf32> to vector<1x256xf32>
    %412 = vector.broadcast %411 : vector<1x256xf32> to vector<32x256xf32>
    %413 = arith.mulf %409, %412 : vector<32x256xf32>
    %c12_231 = arith.constant 12 : index
    %c0_232 = arith.constant 0 : index
    %c0_233 = arith.constant 0 : index
    %414 = vector.load %arg8[%c12_231, %c0_232, %c0_233] : memref<25x32x1xf32, #tpu.memory_space<vmem>>, vector<1x32x1xf32>
    %415 = vector.shape_cast %414 : vector<1x32x1xf32> to vector<32x1xf32>
    %416 = vector.broadcast %415 : vector<32x1xf32> to vector<32x256xf32>
    %417 = arith.mulf %413, %416 : vector<32x256xf32>
    %418 = arith.addf %408, %417 : vector<32x256xf32>
    %419 = vector.extract_strided_slice %286 {offsets = [0, 129], sizes = [32, 256], strides = [1, 1]} : vector<32x512xf32> to vector<32x256xf32>
    %c13_234 = arith.constant 13 : index
    %c0_235 = arith.constant 0 : index
    %c0_236 = arith.constant 0 : index
    %420 = vector.load %arg10[%c13_234, %c0_235, %c0_236] : memref<25x1x256xf32, #tpu.memory_space<vmem>>, vector<1x1x256xf32>
    %421 = vector.shape_cast %420 : vector<1x1x256xf32> to vector<1x256xf32>
    %422 = vector.broadcast %421 : vector<1x256xf32> to vector<32x256xf32>
    %423 = arith.mulf %419, %422 : vector<32x256xf32>
    %c13_237 = arith.constant 13 : index
    %c0_238 = arith.constant 0 : index
    %c0_239 = arith.constant 0 : index
    %424 = vector.load %arg8[%c13_237, %c0_238, %c0_239] : memref<25x32x1xf32, #tpu.memory_space<vmem>>, vector<1x32x1xf32>
    %425 = vector.shape_cast %424 : vector<1x32x1xf32> to vector<32x1xf32>
    %426 = vector.broadcast %425 : vector<32x1xf32> to vector<32x256xf32>
    %427 = arith.mulf %423, %426 : vector<32x256xf32>
    %428 = arith.addf %418, %427 : vector<32x256xf32>
    %429 = vector.extract_strided_slice %286 {offsets = [0, 130], sizes = [32, 256], strides = [1, 1]} : vector<32x512xf32> to vector<32x256xf32>
    %c14_240 = arith.constant 14 : index
    %c0_241 = arith.constant 0 : index
    %c0_242 = arith.constant 0 : index
    %430 = vector.load %arg10[%c14_240, %c0_241, %c0_242] : memref<25x1x256xf32, #tpu.memory_space<vmem>>, vector<1x1x256xf32>
    %431 = vector.shape_cast %430 : vector<1x1x256xf32> to vector<1x256xf32>
    %432 = vector.broadcast %431 : vector<1x256xf32> to vector<32x256xf32>
    %433 = arith.mulf %429, %432 : vector<32x256xf32>
    %c14_243 = arith.constant 14 : index
    %c0_244 = arith.constant 0 : index
    %c0_245 = arith.constant 0 : index
    %434 = vector.load %arg8[%c14_243, %c0_244, %c0_245] : memref<25x32x1xf32, #tpu.memory_space<vmem>>, vector<1x32x1xf32>
    %435 = vector.shape_cast %434 : vector<1x32x1xf32> to vector<32x1xf32>
    %436 = vector.broadcast %435 : vector<32x1xf32> to vector<32x256xf32>
    %437 = arith.mulf %433, %436 : vector<32x256xf32>
    %438 = arith.addf %428, %437 : vector<32x256xf32>
    %439 = vector.extract_strided_slice %286 {offsets = [0, 142], sizes = [32, 256], strides = [1, 1]} : vector<32x512xf32> to vector<32x256xf32>
    %c15_246 = arith.constant 15 : index
    %c0_247 = arith.constant 0 : index
    %c0_248 = arith.constant 0 : index
    %440 = vector.load %arg10[%c15_246, %c0_247, %c0_248] : memref<25x1x256xf32, #tpu.memory_space<vmem>>, vector<1x1x256xf32>
    %441 = vector.shape_cast %440 : vector<1x1x256xf32> to vector<1x256xf32>
    %442 = vector.broadcast %441 : vector<1x256xf32> to vector<32x256xf32>
    %443 = arith.mulf %439, %442 : vector<32x256xf32>
    %c15_249 = arith.constant 15 : index
    %c0_250 = arith.constant 0 : index
    %c0_251 = arith.constant 0 : index
    %444 = vector.load %arg8[%c15_249, %c0_250, %c0_251] : memref<25x32x1xf32, #tpu.memory_space<vmem>>, vector<1x32x1xf32>
    %445 = vector.shape_cast %444 : vector<1x32x1xf32> to vector<32x1xf32>
    %446 = vector.broadcast %445 : vector<32x1xf32> to vector<32x256xf32>
    %447 = arith.mulf %443, %446 : vector<32x256xf32>
    %448 = arith.addf %438, %447 : vector<32x256xf32>
    %449 = vector.extract_strided_slice %286 {offsets = [0, 143], sizes = [32, 256], strides = [1, 1]} : vector<32x512xf32> to vector<32x256xf32>
    %c16_252 = arith.constant 16 : index
    %c0_253 = arith.constant 0 : index
    %c0_254 = arith.constant 0 : index
    %450 = vector.load %arg10[%c16_252, %c0_253, %c0_254] : memref<25x1x256xf32, #tpu.memory_space<vmem>>, vector<1x1x256xf32>
    %451 = vector.shape_cast %450 : vector<1x1x256xf32> to vector<1x256xf32>
    %452 = vector.broadcast %451 : vector<1x256xf32> to vector<32x256xf32>
    %453 = arith.mulf %449, %452 : vector<32x256xf32>
    %c16_255 = arith.constant 16 : index
    %c0_256 = arith.constant 0 : index
    %c0_257 = arith.constant 0 : index
    %454 = vector.load %arg8[%c16_255, %c0_256, %c0_257] : memref<25x32x1xf32, #tpu.memory_space<vmem>>, vector<1x32x1xf32>
    %455 = vector.shape_cast %454 : vector<1x32x1xf32> to vector<32x1xf32>
    %456 = vector.broadcast %455 : vector<32x1xf32> to vector<32x256xf32>
    %457 = arith.mulf %453, %456 : vector<32x256xf32>
    %458 = arith.addf %448, %457 : vector<32x256xf32>
    %459 = vector.extract_strided_slice %286 {offsets = [0, 144], sizes = [32, 256], strides = [1, 1]} : vector<32x512xf32> to vector<32x256xf32>
    %c17_258 = arith.constant 17 : index
    %c0_259 = arith.constant 0 : index
    %c0_260 = arith.constant 0 : index
    %460 = vector.load %arg10[%c17_258, %c0_259, %c0_260] : memref<25x1x256xf32, #tpu.memory_space<vmem>>, vector<1x1x256xf32>
    %461 = vector.shape_cast %460 : vector<1x1x256xf32> to vector<1x256xf32>
    %462 = vector.broadcast %461 : vector<1x256xf32> to vector<32x256xf32>
    %463 = arith.mulf %459, %462 : vector<32x256xf32>
    %c17_261 = arith.constant 17 : index
    %c0_262 = arith.constant 0 : index
    %c0_263 = arith.constant 0 : index
    %464 = vector.load %arg8[%c17_261, %c0_262, %c0_263] : memref<25x32x1xf32, #tpu.memory_space<vmem>>, vector<1x32x1xf32>
    %465 = vector.shape_cast %464 : vector<1x32x1xf32> to vector<32x1xf32>
    %466 = vector.broadcast %465 : vector<32x1xf32> to vector<32x256xf32>
    %467 = arith.mulf %463, %466 : vector<32x256xf32>
    %468 = arith.addf %458, %467 : vector<32x256xf32>
    %469 = vector.extract_strided_slice %286 {offsets = [0, 145], sizes = [32, 256], strides = [1, 1]} : vector<32x512xf32> to vector<32x256xf32>
    %c18_264 = arith.constant 18 : index
    %c0_265 = arith.constant 0 : index
    %c0_266 = arith.constant 0 : index
    %470 = vector.load %arg10[%c18_264, %c0_265, %c0_266] : memref<25x1x256xf32, #tpu.memory_space<vmem>>, vector<1x1x256xf32>
    %471 = vector.shape_cast %470 : vector<1x1x256xf32> to vector<1x256xf32>
    %472 = vector.broadcast %471 : vector<1x256xf32> to vector<32x256xf32>
    %473 = arith.mulf %469, %472 : vector<32x256xf32>
    %c18_267 = arith.constant 18 : index
    %c0_268 = arith.constant 0 : index
    %c0_269 = arith.constant 0 : index
    %474 = vector.load %arg8[%c18_267, %c0_268, %c0_269] : memref<25x32x1xf32, #tpu.memory_space<vmem>>, vector<1x32x1xf32>
    %475 = vector.shape_cast %474 : vector<1x32x1xf32> to vector<32x1xf32>
    %476 = vector.broadcast %475 : vector<32x1xf32> to vector<32x256xf32>
    %477 = arith.mulf %473, %476 : vector<32x256xf32>
    %478 = arith.addf %468, %477 : vector<32x256xf32>
    %479 = vector.extract_strided_slice %286 {offsets = [0, 146], sizes = [32, 256], strides = [1, 1]} : vector<32x512xf32> to vector<32x256xf32>
    %c19_270 = arith.constant 19 : index
    %c0_271 = arith.constant 0 : index
    %c0_272 = arith.constant 0 : index
    %480 = vector.load %arg10[%c19_270, %c0_271, %c0_272] : memref<25x1x256xf32, #tpu.memory_space<vmem>>, vector<1x1x256xf32>
    %481 = vector.shape_cast %480 : vector<1x1x256xf32> to vector<1x256xf32>
    %482 = vector.broadcast %481 : vector<1x256xf32> to vector<32x256xf32>
    %483 = arith.mulf %479, %482 : vector<32x256xf32>
    %c19_273 = arith.constant 19 : index
    %c0_274 = arith.constant 0 : index
    %c0_275 = arith.constant 0 : index
    %484 = vector.load %arg8[%c19_273, %c0_274, %c0_275] : memref<25x32x1xf32, #tpu.memory_space<vmem>>, vector<1x32x1xf32>
    %485 = vector.shape_cast %484 : vector<1x32x1xf32> to vector<32x1xf32>
    %486 = vector.broadcast %485 : vector<32x1xf32> to vector<32x256xf32>
    %487 = arith.mulf %483, %486 : vector<32x256xf32>
    %488 = arith.addf %478, %487 : vector<32x256xf32>
    %489 = vector.extract_strided_slice %286 {offsets = [0, 158], sizes = [32, 256], strides = [1, 1]} : vector<32x512xf32> to vector<32x256xf32>
    %c20_276 = arith.constant 20 : index
    %c0_277 = arith.constant 0 : index
    %c0_278 = arith.constant 0 : index
    %490 = vector.load %arg10[%c20_276, %c0_277, %c0_278] : memref<25x1x256xf32, #tpu.memory_space<vmem>>, vector<1x1x256xf32>
    %491 = vector.shape_cast %490 : vector<1x1x256xf32> to vector<1x256xf32>
    %492 = vector.broadcast %491 : vector<1x256xf32> to vector<32x256xf32>
    %493 = arith.mulf %489, %492 : vector<32x256xf32>
    %c20_279 = arith.constant 20 : index
    %c0_280 = arith.constant 0 : index
    %c0_281 = arith.constant 0 : index
    %494 = vector.load %arg8[%c20_279, %c0_280, %c0_281] : memref<25x32x1xf32, #tpu.memory_space<vmem>>, vector<1x32x1xf32>
    %495 = vector.shape_cast %494 : vector<1x32x1xf32> to vector<32x1xf32>
    %496 = vector.broadcast %495 : vector<32x1xf32> to vector<32x256xf32>
    %497 = arith.mulf %493, %496 : vector<32x256xf32>
    %498 = arith.addf %488, %497 : vector<32x256xf32>
    %499 = vector.extract_strided_slice %286 {offsets = [0, 159], sizes = [32, 256], strides = [1, 1]} : vector<32x512xf32> to vector<32x256xf32>
    %c21_282 = arith.constant 21 : index
    %c0_283 = arith.constant 0 : index
    %c0_284 = arith.constant 0 : index
    %500 = vector.load %arg10[%c21_282, %c0_283, %c0_284] : memref<25x1x256xf32, #tpu.memory_space<vmem>>, vector<1x1x256xf32>
    %501 = vector.shape_cast %500 : vector<1x1x256xf32> to vector<1x256xf32>
    %502 = vector.broadcast %501 : vector<1x256xf32> to vector<32x256xf32>
    %503 = arith.mulf %499, %502 : vector<32x256xf32>
    %c21_285 = arith.constant 21 : index
    %c0_286 = arith.constant 0 : index
    %c0_287 = arith.constant 0 : index
    %504 = vector.load %arg8[%c21_285, %c0_286, %c0_287] : memref<25x32x1xf32, #tpu.memory_space<vmem>>, vector<1x32x1xf32>
    %505 = vector.shape_cast %504 : vector<1x32x1xf32> to vector<32x1xf32>
    %506 = vector.broadcast %505 : vector<32x1xf32> to vector<32x256xf32>
    %507 = arith.mulf %503, %506 : vector<32x256xf32>
    %508 = arith.addf %498, %507 : vector<32x256xf32>
    %509 = vector.extract_strided_slice %286 {offsets = [0, 160], sizes = [32, 256], strides = [1, 1]} : vector<32x512xf32> to vector<32x256xf32>
    %c22_288 = arith.constant 22 : index
    %c0_289 = arith.constant 0 : index
    %c0_290 = arith.constant 0 : index
    %510 = vector.load %arg10[%c22_288, %c0_289, %c0_290] : memref<25x1x256xf32, #tpu.memory_space<vmem>>, vector<1x1x256xf32>
    %511 = vector.shape_cast %510 : vector<1x1x256xf32> to vector<1x256xf32>
    %512 = vector.broadcast %511 : vector<1x256xf32> to vector<32x256xf32>
    %513 = arith.mulf %509, %512 : vector<32x256xf32>
    %c22_291 = arith.constant 22 : index
    %c0_292 = arith.constant 0 : index
    %c0_293 = arith.constant 0 : index
    %514 = vector.load %arg8[%c22_291, %c0_292, %c0_293] : memref<25x32x1xf32, #tpu.memory_space<vmem>>, vector<1x32x1xf32>
    %515 = vector.shape_cast %514 : vector<1x32x1xf32> to vector<32x1xf32>
    %516 = vector.broadcast %515 : vector<32x1xf32> to vector<32x256xf32>
    %517 = arith.mulf %513, %516 : vector<32x256xf32>
    %518 = arith.addf %508, %517 : vector<32x256xf32>
    %519 = vector.extract_strided_slice %286 {offsets = [0, 161], sizes = [32, 256], strides = [1, 1]} : vector<32x512xf32> to vector<32x256xf32>
    %c23_294 = arith.constant 23 : index
    %c0_295 = arith.constant 0 : index
    %c0_296 = arith.constant 0 : index
    %520 = vector.load %arg10[%c23_294, %c0_295, %c0_296] : memref<25x1x256xf32, #tpu.memory_space<vmem>>, vector<1x1x256xf32>
    %521 = vector.shape_cast %520 : vector<1x1x256xf32> to vector<1x256xf32>
    %522 = vector.broadcast %521 : vector<1x256xf32> to vector<32x256xf32>
    %523 = arith.mulf %519, %522 : vector<32x256xf32>
    %c23_297 = arith.constant 23 : index
    %c0_298 = arith.constant 0 : index
    %c0_299 = arith.constant 0 : index
    %524 = vector.load %arg8[%c23_297, %c0_298, %c0_299] : memref<25x32x1xf32, #tpu.memory_space<vmem>>, vector<1x32x1xf32>
    %525 = vector.shape_cast %524 : vector<1x32x1xf32> to vector<32x1xf32>
    %526 = vector.broadcast %525 : vector<32x1xf32> to vector<32x256xf32>
    %527 = arith.mulf %523, %526 : vector<32x256xf32>
    %528 = arith.addf %518, %527 : vector<32x256xf32>
    %529 = vector.extract_strided_slice %286 {offsets = [0, 162], sizes = [32, 256], strides = [1, 1]} : vector<32x512xf32> to vector<32x256xf32>
    %c24_300 = arith.constant 24 : index
    %c0_301 = arith.constant 0 : index
    %c0_302 = arith.constant 0 : index
    %530 = vector.load %arg10[%c24_300, %c0_301, %c0_302] : memref<25x1x256xf32, #tpu.memory_space<vmem>>, vector<1x1x256xf32>
    %531 = vector.shape_cast %530 : vector<1x1x256xf32> to vector<1x256xf32>
    %532 = vector.broadcast %531 : vector<1x256xf32> to vector<32x256xf32>
    %533 = arith.mulf %529, %532 : vector<32x256xf32>
    %c24_303 = arith.constant 24 : index
    %c0_304 = arith.constant 0 : index
    %c0_305 = arith.constant 0 : index
    %534 = vector.load %arg8[%c24_303, %c0_304, %c0_305] : memref<25x32x1xf32, #tpu.memory_space<vmem>>, vector<1x32x1xf32>
    %535 = vector.shape_cast %534 : vector<1x32x1xf32> to vector<32x1xf32>
    %536 = vector.broadcast %535 : vector<32x1xf32> to vector<32x256xf32>
    %537 = arith.mulf %533, %536 : vector<32x256xf32>
    %538 = arith.addf %528, %537 : vector<32x256xf32>
    %539 = tpu.concatenate %282, %538 in 0 : vector<32x256xf32>, vector<32x256xf32> -> vector<64x256xf32>
    %540 = arith.addf %539, %1 : vector<64x256xf32>
    %c0_306 = arith.constant 0 : index
    %c0_307 = arith.constant 0 : index
    %c0_308 = arith.constant 0 : index
    %541 = vector.load %arg11[%c0_306, %c0_307, %c0_308] : memref<1x64x256xf32, #tpu.memory_space<vmem>>, vector<1x64x256xf32>
    %542 = vector.shape_cast %541 : vector<1x64x256xf32> to vector<64x256xf32>
    %543 = vector.shape_cast %540 : vector<64x256xf32> to vector<1x64x256xf32>
    tpu.vector_store %arg11[%c0_306, %c0_307, %c0_308], %543 {strides = array<i32>} : memref<1x64x256xf32, #tpu.memory_space<vmem>>, vector<1x64x256xf32>,
    return
  }
  func.func @transform_0(%arg0: i32) -> (i32, i32, i32) {
    %c0_i32 = arith.constant 0 : i32
    %c0_i32_0 = arith.constant 0 : i32
    %c0_i32_1 = arith.constant 0 : i32
    return %arg0, %c0_i32, %c0_i32_0 : i32, i32, i32
  }
  func.func @transform_1(%arg0: i32) -> (i32, i32) {
    %c0_i32 = arith.constant 0 : i32
    %c0_i32_0 = arith.constant 0 : i32
    %c0_i32_1 = arith.constant 0 : i32
    return %c0_i32, %c0_i32_0 : i32, i32
  }
  func.func @transform_2(%arg0: i32) -> (i32, i32) {
    %c0_i32 = arith.constant 0 : i32
    %c0_i32_0 = arith.constant 0 : i32
    %c0_i32_1 = arith.constant 0 : i32
    return %c0_i32, %c0_i32_0 : i32, i32
  }
  func.func @transform_3(%arg0: i32) -> (i32, i32, i32) {
    %c0_i32 = arith.constant 0 : i32
    %c0_i32_0 = arith.constant 0 : i32
    %c0_i32_1 = arith.constant 0 : i32
    %c0_i32_2 = arith.constant 0 : i32
    return %c0_i32, %c0_i32_0, %c0_i32_1 : i32, i32, i32
  }
  func.func @transform_4(%arg0: i32) -> (i32, i32) {
    %c0_i32 = arith.constant 0 : i32
    %c0_i32_0 = arith.constant 0 : i32
    %c0_i32_1 = arith.constant 0 : i32
    return %c0_i32, %c0_i32_0 : i32, i32
  }
  func.func @transform_5(%arg0: i32) -> (i32, i32) {
    %c0_i32 = arith.constant 0 : i32
    %c0_i32_0 = arith.constant 0 : i32
    %c0_i32_1 = arith.constant 0 : i32
    return %c0_i32, %c0_i32_0 : i32, i32
  }
  func.func @transform_6(%arg0: i32) -> (i32, i32) {
    %c0_i32 = arith.constant 0 : i32
    %c0_i32_0 = arith.constant 0 : i32
    %c0_i32_1 = arith.constant 0 : i32
    return %c0_i32, %c0_i32_0 : i32, i32
  }
  func.func @transform_7(%arg0: i32) -> (i32, i32, i32) {
    %c0_i32 = arith.constant 0 : i32
    %c0_i32_0 = arith.constant 0 : i32
    %c0_i32_1 = arith.constant 0 : i32
    %c0_i32_2 = arith.constant 0 : i32
    return %c0_i32, %c0_i32_0, %c0_i32_1 : i32, i32, i32
  }
  func.func @transform_8(%arg0: i32) -> (i32, i32) {
    %c0_i32 = arith.constant 0 : i32
    %c0_i32_0 = arith.constant 0 : i32
    %c0_i32_1 = arith.constant 0 : i32
    return %c0_i32, %c0_i32_0 : i32, i32
  }
  func.func @transform_9(%arg0: i32) -> (i32, i32, i32) {
    %c0_i32 = arith.constant 0 : i32
    %c0_i32_0 = arith.constant 0 : i32
    %c0_i32_1 = arith.constant 0 : i32
    %c0_i32_2 = arith.constant 0 : i32
    return %c0_i32, %c0_i32_0, %c0_i32_1 : i32, i32, i32
  }
  func.func @transform_10(%arg0: i32) -> (i32, i32, i32) {
    %c0_i32 = arith.constant 0 : i32
    %c0_i32_0 = arith.constant 0 : i32
    %c0_i32_1 = arith.constant 0 : i32
    return %arg0, %c0_i32, %c0_i32_0 : i32, i32, i32
  }
}

</mosaic_0001>

<bundles_post_ra>
// kernel: tpu_custom_call.1
= control target key start
LH: loop header
LB: loop body
LE: loop exit
PB: predicated region body
PF: predicated region fallthrough
CT: control target
= control target key end

     0   :  { %s10303_s0 = inlined_call_operand.vmem [shape: f32[2,64,256], index: 0, kind: input, shape index: {}]   ;;  %s10304_s1 = inlined_call_operand.vmem [shape: bf16[16,64], index: 1, kind: input, shape index: {}]   ;;  %s10305_s2 = inlined_call_operand.vmem [shape: f32[16,1], index: 2, kind: input, shape index: {}]   ;;  %s10306_s3 = inlined_call_operand.vmem [shape: f32[25,16,1], index: 3, kind: input, shape index: {}]   ;;  %s10307_s4 = inlined_call_operand.vmem [shape: f32[16,1], index: 4, kind: input, shape index: {}]   ;;  %s10308_s5 = inlined_call_operand.vmem [shape: bf16[32,32], index: 5, kind: input, shape index: {}]   ;;  %s10309_s6 = inlined_call_operand.vmem [shape: f32[32,1], index: 6, kind: input, shape index: {}]   ;;  %s10310_s7 = inlined_call_operand.vmem [shape: f32[25,32,1], index: 7, kind: input, shape index: {}]   ;;  %s10311_s8 = inlined_call_operand.vmem [shape: f32[32,1], index: 8, kind: input, shape index: {}]   ;;  %s10312_s9 = inlined_call_operand.vmem [shape: f32[25,1,256], index: 9, kind: input, shape index: {}]   ;;  %s10313_s10 = inlined_call_operand.hbm [shape: f32[2,64,256], index: 10, kind: output, shape index: {}]  }
   0x1   :  { %10612 = sst [smem:[#allocation180_spill]] %s10303_s0 }
   0x2   :  { %10613 = sst [smem:[#allocation181_spill]] %s10304_s1 }
   0x3   :  { %10614 = sst [smem:[#allocation182_spill]] %s10305_s2 }
   0x4   :  { %10615 = sst [smem:[#allocation183_spill]] %s10306_s3 }
   0x5   :  { %10616 = sst [smem:[#allocation184_spill]] %s10307_s4 }
   0x6   :  { %10617 = sst [smem:[#allocation185_spill]] %s10308_s5 }
   0x7   :  { %10618 = sst [smem:[#allocation186_spill]] %s10309_s6 }
   0x8   :  { %15 = vsyncpa [#allocation5], 0 }
   0x9   :  { %17 = vsyncpa [#allocation5 + $0x1], 0  ;;  %s6486_s13 = smov 0   ;;  %s6488_s14 = smov 0  }
   0xa   :  { %s6490_s15 = smov 0   ;;  %s6492_s16 = smov 0  }
   0xb LB: > { %s6507_s17 = sadd.s32 4294967295, %s6387_s16   ;;  %s5933_s18 = sadd.s32 4294967294, %s6387_s16   ;;  %s6387_s16 = sphi %s6492_s16, %s11390_s16   ;;  %s6383_s15 = sphi %s6490_s15, %s11389_s15   ;;  %s6379_s14 = sphi %s6488_s14, %s11388_s14   ;;  %s6375_s13 = sphi %s6486_s13, %s11387_s13  }
   0xc   : > { %s6511_s19 = sadd.s32 1, %s6387_s16   ;;  %s245_s20 = sadd.s32 1, %s6383_s15 }
   0xd   : > { %s242_s21 = ssub.s32 %s6387_s16, %s6511_s19  ;;  %p255_p0 = scmp.ne.s32.totalorder %s6383_s15, %s6379_s14 }
   0xe   : > { %p243_p1 = scmp.eq.s32.totalorder %s242_s21, 0  ;;  %p256_p2 = scmp.eq.s32.totalorder %s6507_s17, 1 }
   0xf   : > { %p261_p3 = scmp.ne.s32.totalorder %s6379_s14, %s6375_s13  ;;  %p262_p4 = scmp.eq.s32.totalorder %s5933_s18, 1 }
  0x10   : > { %s6522_s22 = scalar_select %p243_p1, %s6383_s15, %s245_s20  }
  0x11   : > { %p6524_p5 = por %p256_p2, %p255_p0  ;;  %p6528_p6 = por %p262_p4, %p261_p3 }
  0x12   : > { %p5936_p7 = scmp.ge.s32.totalorder %s6387_s16, 1  ;;  %p315_p8 = scmp.lt.s32.totalorder %s6387_s16, 3 }
  0x14   : > { %p316_p9 = pnand %p5936_p7, %p315_p8 }
  0x16   : > { %319 = sbr.rel (%p316_p9) target bundleno = 6729 (0x1a49), region = 60 }
  0x1b   : > { %s10621_s3 = sld [smem:[#allocation183_spill]]  ;;  %v536_v2 = vld [vmem:[%s10312_s9] sm:$0x3]  ;;  %v6389_v3 = vmov 0   ;;  %p353_p10 = scmp.lt.s32.totalorder %s6507_s17, 1  ;;  %vm10479_vm0 = vcmask 523264  }
  0x1c   : > { %s10622_s2 = sld [smem:[#allocation182_spill]]  ;;  %6252 = vset.pattern.permute.xlu2 %v6389_v3  ;;  %6251 = vset.pattern.permute.xlu0 %v6389_v3  ;;  %v538_v4 = vperm.slane %v536_v2, 0  ;;  %s10314_s11 = smov 94   ;;  %v539_v10 = vperm.slane %v536_v2, 1  ;;  %v5950_v22 = vld [vmem:[%s10312_s9 + $0x2] sm:$0x3] }
  0x1d   : > { %s354_s12 = scalar_select %p353_p10, %s6507_s17, 1  ;;  %6253 = vset.pattern.permute.xlu1 %v6389_v3  ;;  %v592_v26 = vperm.slane %v5950_v22, 0  ;;  %v593_v38 = vperm.slane %v5950_v22, 1  ;;  %v5953_v40 = vld [vmem:[%s10312_s9 + $0x4] sm:$0x3]  ;;  %vm598_vm6 = vcmask 777216  }
  0x1e   : > { %540 = vrot.lane.b32.xlu1 %v538_v4, %s10314_s11  ;;  %s10623_s0 = sld [smem:[#allocation180_spill]]  ;;  %s10316_s27 = smov 95   ;;  %v666_v42 = vperm.slane %v5953_v40, 0  ;;  %v667_v43 = vperm.slane %v5953_v40, 1  ;;  %v5956_v44 = vld [vmem:[%s10312_s9 + $0x6] sm:$0x3] }
  0x1f   : > { %s6165_s18 = sshll.u32 %s354_s12, 7  ;;  %s10624_s4 = sld [smem:[#allocation184_spill]]  ;;  %v741_v45 = vperm.slane %v5956_v44, 1  ;;  %v740_v47 = vperm.slane %v5956_v44, 0  ;;  %v5959_v48 = vld [vmem:[%s10312_s9 + $0x8] sm:$0x3] }
  0x20   : > { %s10625_s1 = sld [smem:[#allocation181_spill]]  ;;  %s10318_s30 = smov 96   ;;  %v814_v49 = vperm.slane %v5959_v48, 0  ;;  %v815_v53 = vperm.slane %v5959_v48, 1  ;;  %v5962_v55 = vld [vmem:[%s10312_s9 + $0xa] sm:$0x3] }
  0x21   : > { %v555_v0 = vld [vmem:[%s10621_s3] sm:$0xff]  ;;  %v556_v5 = vld [vmem:[%s10621_s3 + $0x8] sm:$0xff]  ;;  %v5952_v37 = vld [vmem:[%s10621_s3 + $0x18] sm:$0xff]  ;;  %s10322_s26 = smov 97   ;;  %s10320_s20 = smov 98   ;;  %v888_v57 = vperm.slane %v5962_v55, 0 }
  0x22   : > { %v385_v1 = vld [vmem:[%s10622_s2] sm:$0xff]  ;;  %559 = vperm.xlu2 %6252, %v555_v0   ;;  %v386_v6 = vld [vmem:[%s10622_s2 + $0x8] sm:$0xff]  ;;  %v5951_v39 = vld [vmem:[%s10621_s3 + $0x10] sm:$0xff]  ;;  %v889_v58 = vperm.slane %v5962_v55, 1  ;;  %s10328_s29 = smov 112   ;;  %s10333_s21 = smov 124  }
  0x23   : > { %389 = vperm.xlu0 %6251, %v385_v1   ;;  %v5954_v41 = vld [vmem:[%s10621_s3 + $0x20] sm:$0xff]  ;;  %v5955_v46 = vld [vmem:[%s10621_s3 + $0x28] sm:$0xff]  ;;  %v5957_v50 = vld [vmem:[%s10621_s3 + $0x30] sm:$0xff]  ;;  %vm820_vm10 = vcmask 801792   ;;  %s10626_s28 = smov 110   ;;  %vm672_vm11 = vcmask 785408  }
  0x24   : > { %s6549_s25 = scalar_lea.vmem %s10623_s0, %s6165_s18  ;;  %v5958_v51 = vld [vmem:[%s10621_s3 + $0x38] sm:$0xff]  ;;  %v5961_v52 = vld [vmem:[%s10621_s3 + $0x48] sm:$0xff]  ;;  %v5960_v54 = vld [vmem:[%s10621_s3 + $0x40] sm:$0xff]  ;;  %vm746_vm12 = vcmask 793600   ;;  %vm10482_vm13 = vcmask 916480   ;;  %s10331_s18 = smov 113  }
  0x25   : > { %v371_v7 = vld [vmem:[%s6549_s25 + $0x60] sm:$0xff]  ;;  %v373_v8 = vld [vmem:[%s6549_s25 + $0x70] sm:$0xff]  ;;  %v372_v9 = vld [vmem:[%s6549_s25 + $0x68] sm:$0xff]  ;;  %s10373_s0 = smov 2   ;;  %s10405_s12 = smov 17  }
  0x26   : > { %v381_v11 = vpack.c.bf16 %v373_v8, %v371_v7  ;;  %v374_v12 = vld [vmem:[%s6549_s25 + $0x78] sm:$0xff]  ;;  %v367_v13 = vld [vmem:[%s6549_s25 + $0x40] sm:$0xff]  ;;  %v369_v14 = vld [vmem:[%s6549_s25 + $0x50] sm:$0xff]  ;;  %542 = vrot.lane.b32.xlu1 %v539_v10, %s10314_s11  ;;  %s10368_s11 = smov 1   ;;  %s10827_s6 = sld [smem:[#allocation186_spill]] }
  0x27   : > { %v382_v15 = vpack.c.bf16 %v374_v12, %v372_v9  ;;  %v368_v16 = vld [vmem:[%s6549_s25 + $0x48] sm:$0xff]  ;;  %v370_v17 = vld [vmem:[%s6549_s25 + $0x58] sm:$0xff]  ;;  %v379_v18 = vpack.c.bf16 %v369_v14, %v367_v13  ;;  %v363_v20 = vld [vmem:[%s6549_s25 + $0x20] sm:$0xff]  ;;  %s10828_s5 = sld [smem:[#allocation185_spill]]  ;;  %s10837_s2 = smov 126  }
  0x28   : > { %410 = vmatpush.bf16.msra.mxu0 %v381_v11  ;;  %v380_v19 = vpack.c.bf16 %v370_v17, %v368_v16  ;;  %v365_v21 = vld [vmem:[%s6549_s25 + $0x30] sm:$0xff]  ;;  %v364_v23 = vld [vmem:[%s6549_s25 + $0x28] sm:$0xff]  ;;  %v366_v24 = vld [vmem:[%s6549_s25 + $0x38] sm:$0xff] }
  0x29   : > { %424 = vmatpush.bf16.msra.mxu1 %v382_v15  ;;  %v377_v25 = vpack.c.bf16 %v365_v21, %v363_v20  ;;  %v378_v27 = vpack.c.bf16 %v366_v24, %v364_v23  ;;  %v359_v28 = vld [vmem:[%s6549_s25] sm:$0xff]  ;;  %v361_v29 = vld [vmem:[%s6549_s25 + $0x10] sm:$0xff]  ;;  %v360_v31 = vld [vmem:[%s6549_s25 + $0x8] sm:$0xff] }
  0x2a   : > { %564 = vperm.xlu2 %6252, %v556_v5   ;;  %v534_v30 = vld [vmem:[%s10624_s4] sm:$0xff]  ;;  %v362_v32 = vld [vmem:[%s6549_s25 + $0x18] sm:$0xff]  ;;  %v535_v33 = vld [vmem:[%s10624_s4 + $0x8] sm:$0xff]  ;;  %v375_v34 = vpack.c.bf16 %v361_v29, %v359_v28  ;;  %s10838_s4 = smov 97  }
  0x2b   : > { %394 = vperm.xlu0 %6251, %v386_v6   ;;  %v376_v35 = vpack.c.bf16 %v362_v32, %v360_v31  ;;  %v6166_v36 = vld [vmem:[%s10625_s1] sm:$0xff]  ;;  %v5963_v56 = vld [vmem:[%s10621_s3 + $0x50] sm:$0xff]  ;;  %v5965_v59 = vld [vmem:[%s10312_s9 + $0xc] sm:$0x3]  ;;  %s10392_s1 = smov 92  }
  0x2c   : > { %411 = vmatpush.bf16.msra.mxu0 %v379_v18  ;;  %v963_v60 = vperm.slane %v5965_v59, 1  ;;  %v5964_v61 = vld [vmem:[%s10621_s3 + $0x58] sm:$0xff]  ;;  %v962_v62 = vperm.slane %v5965_v59, 0  ;;  %v5968_v63 = vld [vmem:[%s10312_s9 + $0xe] sm:$0x3]  ;;  %v5966_v1 = vld [vmem:[%s10621_s3 + $0x60] sm:$0xff] }
  0x2d   : > { %425 = vmatpush.bf16.msra.mxu1 %v380_v19  ;;  %v1035_v0 = vperm.slane %v5968_v63, 0  ;;  %v5967_v2 = vld [vmem:[%s10621_s3 + $0x68] sm:$0xff]  ;;  %v5970_v3 = vld [vmem:[%s10621_s3 + $0x78] sm:$0xff]  ;;  %v1036_v4 = vperm.slane %v5968_v63, 1  ;;  %v5969_v5 = vld [vmem:[%s10621_s3 + $0x70] sm:$0xff] }
  0x2e   : > { %580 = vperm.xlu1 %6253, %v535_v33  }
  0x30   : > { %412 = vmatpush.bf16.msra.mxu0 %v377_v25 }
  0x31   : > { %426 = vmatpush.bf16.msra.mxu1 %v378_v27 }
  0x32   : > { %594 = vrot.lane.b32.xlu2 %v592_v26, %s10316_s27 }
  0x33   : > { %575 = vperm.xlu0 %6251, %v534_v30  }
  0x34   : > { %413 = vmatpush.bf16.msra.mxu0 %v375_v34 }
  0x35   : > { %427 = vmatpush.bf16.msra.mxu1 %v376_v35 }
  0x36   : > { %614 = vperm.xlu1 %6253, %v5951_v39  }
  0x37   : > { %5944 = vmatmul.msk.bf16.vlgmr.msra.gmra.mxu0 %vm10479_vm0, %v6166_v36 }
  0x38   : > { %5945 = vmatmul.msk.bf16.vlgmr.msra.gmra.mxu1 %vm10479_vm0, %v6166_v36 }
  0x3a   : > { %619 = vperm.xlu2 %6252, %v5952_v37  }
  0x3b   : > { %596 = vrot.lane.b32.xlu0 %v593_v38, %s10316_s27  ;;  %s10326_s27 = smov 111  }
  0x3e   : > { %670 = vrot.lane.b32.xlu1 %v667_v43, %s10318_s30 }
  0x42   : > { %688 = vperm.xlu2 %6252, %v5954_v41  }
  0x43   : > { %668 = vrot.lane.b32.xlu0 %v666_v42, %s10318_s30  ;;  %s10324_s30 = smov 110  }
  0x46   : > { %742 = vrot.lane.b32.xlu1 %v740_v47, %s10322_s26 }
  0x4a   : > { %744 = vrot.lane.b32.xlu2 %v741_v45, %s10322_s26  ;;  %s10337_s26 = smov 127  }
  0x4b   : > { %693 = vperm.xlu0 %6251, %v5955_v46  }
  0x4e   : > { %767 = vperm.xlu1 %6253, %v5958_v51  }
  0x52   : > { %816 = vrot.lane.b32.xlu2 %v814_v49, %s10320_s20 }
  0x53   : > { %762 = vperm.xlu0 %6251, %v5957_v50  }
  0x56   : > { %836 = vperm.xlu1 %6253, %v5960_v54  }
  0x5a   : > { %841 = vperm.xlu2 %6252, %v5961_v52  }
  0x5b   : > { %818 = vrot.lane.b32.xlu0 %v815_v53, %s10320_s20  ;;  %s10358_s20 = smov 126  }
  0x5e   : > { %892 = vrot.lane.b32.xlu1 %v889_v58, %s10324_s30 }
  0x62   : > { %910 = vperm.xlu2 %6252, %v5963_v56  }
  0x63   : > { %890 = vrot.lane.b32.xlu0 %v888_v57, %s10324_s30  ;;  %s10335_s30 = smov 125  }
  0x66   : > { %964 = vrot.lane.b32.xlu1 %v962_v62, %s10326_s27 }
  0x6a   : > { %966 = vrot.lane.b32.xlu2 %v963_v60, %s10326_s27 }
  0x6b   : > { %915 = vperm.xlu0 %6251, %v5964_v61  }
  0x6e   : > { %989 = vperm.xlu1 %6253, %v5967_v2  }
  0x72   : > { %1037 = vrot.lane.b32.xlu2 %v1035_v0, %s10328_s29 }
  0x73   : > { %984 = vperm.xlu0 %6251, %v5966_v1  }
  0x76   : > { %1056 = vperm.xlu1 %6253, %v5969_v5  }
  0x7a   : > { %1061 = vperm.xlu2 %6252, %v5970_v3  }
  0x7b   : > { %1039 = vrot.lane.b32.xlu0 %v1036_v4, %s10328_s29 }
  0x7c   : > { %v6662_v6 = vpop.permute.xlu2 %559 }
  0x84   : > { %v6664_v7 = vpop.permute.xlu2 %564 }
  0x8c   : > { %v6668_v10 = vpop.permute.xlu2 %594 }
  0x8d   : > { %v603_v16 = vmul.f32 0.0, %v6668_v10 }
  0x90   : > { %v6666_v9 = vpop.permute.xlu1 %540 }
  0x94   : > { %v6676_v14 = vpop.permute.xlu2 %619 }
  0x95   : > { %v390_v8 = vpop.permute.xlu0 %389  ;;  %v625_v27 = vmul.f32 %v6676_v14, %v603_v16 }
  0x98   : > { %v6672_v12 = vpop.permute.xlu1 %542 }
  0x9c   : > { %v6686_v20 = vpop.permute.xlu2 %688 }
  0x9d   : > { %v6670_v11 = vpop.permute.xlu0 %394 }
  0xa0   : > { %v6678_v15 = vpop.permute.xlu1 %580 }
  0xa4   : > { %v6702_v31 = vpop.permute.xlu2 %744 }
  0xa5   : > { %v6674_v13 = vpop.permute.xlu0 %575 }
  0xa8   : > { %v6683_v18 = vpop.permute.xlu1 %614 }
  0xa9   : > { %v622_v19 = vmul.f32 %v6683_v18, %v603_v16 }
  0xab   : > { %634 = vrot.lane.b32.xlu0 %v622_v19, %s10337_s26 }
  0xac   : > { %v6712_v39 = vpop.permute.xlu2 %816 }
  0xad   : > { %v6681_v17 = vpop.permute.xlu0 %596  ;;  %v825_v51 = vmul.f32 0.0, %v6712_v39 }
  0xb0   : > { %v6692_v23 = vpop.permute.xlu1 %670 }
  0xb3   : > { %640 = vrot.lane.b32.xlu0 %v625_v27, %s10337_s26 }
  0xb4   : > { %v415_v24 = vpop.f32.mrf.mxu0  ;;  %v6726_v48 = vpop.permute.xlu2 %841 }
  0xb5   : > { %v6689_v21 = vpop.permute.xlu0 %668  ;;  %v6694_v25 = vadd.f32 %v415_v24, %v390_v8  ;;  %v429_v26 = vpop.f32.mrf.mxu1  ;;  %v847_v3 = vmul.f32 %v6726_v48, %v825_v51 }
  0xb6   : > { %v677_v22 = vmul.f32 0.0, %v6689_v21  ;;  %v6697_v28 = vadd.f32 %v429_v26, %v390_v8 }
  0xb7   : > { %v5946_v30 = vmul.f32 -1.442695, %v6694_v25 }
  0xb8   : > { %v696_v29 = vmul.f32 %v6686_v20, %v677_v22  ;;  %v5947_v32 = vmul.f32 -1.442695, %v6697_v28  ;;  %v6708_v34 = vpop.permute.xlu1 %742 }
  0xb9   : > { %6269 = vpow2.f32 %v5946_v30  ;;  %v751_v40 = vmul.f32 0.0, %v6708_v34 }
  0xba   : > { %708 = vrot.lane.b32.xlu1 %v696_v29, %s10358_s20  ;;  %6271 = vpow2.f32 %v5947_v32 }
  0xbc   : > { %v417_v55 = vpop.f32.mrf.mxu0  ;;  %v6744_v1 = vpop.permute.xlu2 %910 }
  0xbd   : > { %v6706_v33 = vpop.permute.xlu0 %693  ;;  %v6737_v58 = vadd.f32 %v417_v55, %v6670_v11  ;;  %v431_v2 = vpop.f32.mrf.mxu1 }
  0xbe   : > { %v699_v35 = vmul.f32 %v6706_v33, %v677_v22  ;;  %v6750_v22 = vadd.f32 %v431_v2, %v6670_v11 }
  0xbf   : > { %v6270_v36 = vpop.eup %6269  ;;  %v5948_v5 = vmul.f32 -1.442695, %v6737_v58 }
  0xc0   : > { %v446_v37 = vadd.f32 1.0, %v6270_v36  ;;  %v6272_v38 = vpop.eup %6271  ;;  %v6719_v43 = vpop.permute.xlu1 %767  ;;  %v5949_v32 = vmul.f32 -1.442695, %v6750_v22 }
  0xc1   : > { %v6717_v42 = vadd.f32 1.0, %v6272_v38  ;;  %v773_v50 = vmul.f32 %v6719_v43, %v751_v40 }
  0xc2   : > { %714 = vrot.lane.b32.xlu1 %v699_v35, %s10358_s20  ;;  %6273 = vrcp.f32 %v446_v37  ;;  %v461_v0 = vand.u32 2147483648, %v446_v37  ;;  %vm455_vm2 = vweird.f32 %v446_v37  ;;  %v459_v4 = vand.u32 2147483647, %v446_v37 }
  0xc3   : > { %6275 = vrcp.f32 %v6717_v42  ;;  %v476_v11 = vand.u32 2147483648, %v6717_v42  ;;  %vm470_vm7 = vweird.f32 %v6717_v42  ;;  %v474_v36 = vand.u32 2147483647, %v6717_v42 }
  0xc4   : > { %v462_v24 = vor.u32 1.1754944e-38, %v461_v0  ;;  %vm460_vm4 = vcmp.eq.f32.partialorder %v459_v4, 8.507059e+37  ;;  %6277 = vpow2.f32 %v5948_v5  ;;  %v6766_v38 = vpop.permute.xlu2 %966 }
  0xc5   : > { %v6715_v41 = vpop.permute.xlu0 %762  ;;  %6279 = vpow2.f32 %v5949_v32  ;;  %vm475_vm9 = vcmp.eq.f32.partialorder %v474_v36, 8.507059e+37  ;;  %v6827_v36 = vsel %vm672_vm11, %v6689_v21, %v6692_v23 }
  0xc6   : > { %v770_v44 = vmul.f32 %v6715_v41, %v751_v40 }
  0xc8   : > { %782 = vrot.lane.b32.xlu2 %v770_v44, %s10335_s30  ;;  %v6274_v45 = vpop.eup %6273  ;;  %v6728_v49 = vpop.permute.xlu1 %836 }
  0xc9   : > { %v451_v46 = vmul.f32 %v6274_v45, %v446_v37  ;;  %v6276_v53 = vpop.eup %6275  ;;  %v844_v54 = vmul.f32 %v6728_v49, %v825_v51  ;;  %vm456_vm1 = vweird.f32 %v6274_v45 }
  0xca   : > { %v466_v57 = vmul.f32 %v6276_v53, %v6717_v42  ;;  %vm457_vm3 = vmor %vm455_vm2, %vm456_vm1  ;;  %vm471_vm5 = vweird.f32 %v6276_v53  ;;  %v6278_v40 = vpop.eup %6277  ;;  %vm894_vm2 = vcmask 900096  }
  0xcb   : > { %v452_v52 = vsub.f32 1.0, %v451_v46  ;;  %856 = vrot.lane.b32.xlu0 %v844_v54, %s10333_s21  ;;  %vm472_vm8 = vmor %vm470_vm7, %vm471_vm5  ;;  %vm10483_vm5 = vcmask 908288  }
  0xcc   : > { %v467_v63 = vsub.f32 1.0, %v466_v57 }
  0xcd   : > { %v6724_v47 = vpop.permute.xlu0 %818  ;;  %v453_v56 = vmul.f32 %v6274_v45, %v452_v52  ;;  %v6779_v52 = vadd.f32 1.0, %v6278_v40 }
  0xce   : > { %v468_v19 = vmul.f32 %v6276_v53, %v467_v63 }
  0xcf   : > { %v454_v62 = vadd.f32 %v6274_v45, %v453_v56  ;;  %6281 = vrcp.f32 %v6779_v52  ;;  %vm485_vm15 = vweird.f32 %v6779_v52 }
  0xd0   : > { %788 = vrot.lane.b32.xlu2 %v773_v50, %s10335_s30  ;;  %v6742_v61 = vpop.permute.xlu1 %892  ;;  %v469_v30 = vadd.f32 %v6276_v53, %v468_v19  ;;  %v6815_v19 = vsel %vm820_vm10, %v6712_v39, %v6724_v47 }
  0xd1   : > { %v458_v16 = vsel %vm457_vm3, %v6274_v45, %v454_v62  ;;  %v6772_v45 = vsel %vm598_vm6, %v6668_v10, %v6681_v17  ;;  %v6280_v10 = vpop.eup %6279 }
  0xd2   : > { %v463_v27 = vsel %vm460_vm4, %v462_v24, %v458_v16  ;;  %v473_v44 = vsel %vm472_vm8, %v6276_v53, %v469_v30  ;;  %v6791_v57 = vadd.f32 1.0, %v6280_v10  ;;  %v491_v10 = vand.u32 2147483648, %v6779_v52 }
  0xd3   : > { %862 = vrot.lane.b32.xlu0 %v847_v3, %s10333_s21  ;;  %v6761_v35 = vmul.f32 %v463_v27, %v6694_v25  ;;  %v477_v25 = vor.u32 1.1754944e-38, %v476_v11 }
  0xd4   : > { %6283 = vrcp.f32 %v6791_v57  ;;  %vm500_vm7 = vweird.f32 %v6791_v57 }
  0xd5   : > { %v6739_v59 = vpop.permute.xlu0 %890  ;;  %v604_v50 = vmul.f32 %v6772_v45, %v6761_v35  ;;  %v478_v51 = vsel %vm475_vm9, %v477_v25, %v473_v44  ;;  %v6282_v3 = vpop.eup %6281  ;;  %v826_v24 = vmul.f32 %v6815_v19, %v6761_v35  ;;  %v678_v40 = vmul.f32 %v6827_v36, %v6761_v35 }
  0xd6   : > { %v899_v60 = vmul.f32 0.0, %v6739_v59  ;;  %v6786_v55 = vmul.f32 %v478_v51, %v6697_v28  ;;  %vm486_vm14 = vweird.f32 %v6282_v3 }
  0xd7   : > { %v623_v56 = vmul.f32 %v6683_v18, %v604_v50  ;;  %vm487_vm1 = vmor %vm485_vm15, %vm486_vm14  ;;  %vm10474_vm14 = vcmask 924672   ;;  %vm10461_vm15 = vcmask 932864  }
  0xd8   : > { %v918_v8 = vmul.f32 %v6744_v1, %v899_v60  ;;  %v6756_v29 = vpop.permute.xlu1 %964  ;;  %v753_v63 = vmul.f32 %v6702_v31, %v6786_v55  ;;  %v605_v5 = vmul.f32 %v6681_v17, %v6786_v55  ;;  %v679_v16 = vmul.f32 %v6692_v23, %v6786_v55 }
  0xd9   : > { %v973_v46 = vmul.f32 0.0, %v6756_v29  ;;  %v975_v51 = vmul.f32 %v6766_v38, %v6786_v55 }
  0xda   : > { %930 = vrot.lane.b32.xlu1 %v918_v8, %s10328_s29  ;;  %v772_v4 = vmul.f32 %v6715_v41, %v753_v63  ;;  %v481_v8 = vmul.f32 %v6282_v3, %v6779_v52  ;;  %v6819_v27 = vpop.eup %6283  ;;  %v624_v30 = vmul.f32 %v6683_v18, %v605_v5  ;;  %v698_v11 = vmul.f32 %v6686_v20, %v679_v16 }
  0xdb   : > { %v496_v39 = vmul.f32 %v6819_v27, %v6791_v57  ;;  %v6836_v18 = vsel %vm746_vm12, %v6708_v34, %v6702_v31  ;;  %vm501_vm4 = vweird.f32 %v6819_v27 }
  0xdc   : > { %v482_v32 = vsub.f32 1.0, %v481_v8  ;;  %v752_v44 = vmul.f32 %v6836_v18, %v6761_v35  ;;  %vm502_vm8 = vmor %vm500_vm7, %vm501_vm4  ;;  %vm10460_vm4 = vcmask 7168   ;;  %vm10459_vm7 = vcmask 15360  }
  0xdd   : > { %v6754_v26 = vpop.permute.xlu0 %915  ;;  %v497_v25 = vsub.f32 1.0, %v496_v39 }
  0xde   : > { %v921_v37 = vmul.f32 %v6754_v26, %v899_v60  ;;  %v1038_v60 = vpop.permute.xlu2 %1037  ;;  %v483_v21 = vmul.f32 %v6282_v3, %v482_v32 }
  0xdf   : > { %v6793_v62 = vmul.f32 0.0, %v1038_v60  ;;  %v498_v63 = vmul.f32 %v6819_v27, %v497_v25 }
  0xe0   : > { %v6781_v53 = vpop.permute.xlu1 %989  ;;  %v484_v50 = vadd.f32 %v6282_v3, %v483_v21 }
  0xe1   : > { %v995_v2 = vmul.f32 %v6781_v53, %v973_v46  ;;  %v499_v5 = vadd.f32 %v6819_v27, %v498_v63 }
  0xe2   : > { %936 = vrot.lane.b32.xlu1 %v921_v37, %s10328_s29  ;;  %v845_v37 = vmul.f32 %v6728_v49, %v826_v24  ;;  %v504_v24 = vand.u32 2147483647, %v6791_v57 }
  0xe3   : > { %v503_v39 = vsel %vm502_vm8, %v6819_v27, %v499_v5  ;;  %vm10448_vm8 = vcmask 113664  }
  0xe4   : > { %vm505_vm9 = vcmp.eq.f32.partialorder %v504_v24, 8.507059e+37  ;;  %v5973_v24 = vld [vmem:[%s10621_s3 + $0x88] sm:$0xff] }
  0xe5   : > { %v6775_v42 = vpop.permute.xlu0 %984 }
  0xe6   : > { %v992_v54 = vmul.f32 %v6775_v42, %v973_v46  ;;  %v697_v46 = vmul.f32 %v6686_v20, %v678_v40  ;;  %v994_v20 = vmul.f32 %v6775_v42, %v975_v51 }
  0xe8   : > { %1004 = vrot.lane.b32.xlu2 %v992_v54, %s10326_s27  ;;  %v6797_v0 = vpop.permute.xlu1 %1056  ;;  %v771_v54 = vmul.f32 %v6715_v41, %v752_v44 }
  0xe9   : > { %v1064_v28 = vmul.f32 %v6797_v0, %v6793_v62 }
  0xea   : > { %636 = vrot.lane.b32.xlu1 %v623_v56, %s10337_s26  ;;  %v489_v56 = vand.u32 2147483647, %v6779_v52  ;;  %v492_v52 = vor.u32 1.1754944e-38, %v491_v10 }
  0xeb   : > { %1076 = vrot.lane.b32.xlu0 %v1064_v28, %s10626_s28  ;;  %v488_v28 = vsel %vm487_vm1, %v6282_v3, %v484_v50  ;;  %vm10470_vm1 = vcmask 1031168  }
  0xec   : > { %vm490_vm3 = vcmp.eq.f32.partialorder %v489_v56, 8.507059e+37 }
  0xed   : > { %v6846_v34 = vpop.permute.xlu0 %1039  ;;  %v493_v16 = vsel %vm490_vm3, %v492_v52, %v488_v28  ;;  %vm10468_vm3 = vcmask 1039360  }
  0xee   : > { %v6860_v41 = vsel %vm10482_vm13, %v1038_v60, %v6846_v34  ;;  %v506_v60 = vand.u32 2147483648, %v6791_v57  ;;  %v969_v57 = vsel %vm10483_vm5, %v6756_v29, %v6766_v38 }
  0xef   : > { %v1046_v8 = vmul.f32 %v6860_v41, %v6761_v35 }
  0xf0   : > { %1010 = vrot.lane.b32.xlu2 %v995_v2, %s10326_s27  ;;  %v827_v2 = vmul.f32 %v6724_v47, %v6786_v55 }
  0xf2   : > { %786 = vrot.lane.b32.xlu1 %v772_v4, %s10335_s30  ;;  %v901_v4 = vmul.f32 %v6742_v61, %v6786_v55  ;;  %v846_v3 = vmul.f32 %v6728_v49, %v827_v2  ;;  %v1065_v49 = vmul.f32 %v6797_v0, %v1046_v8 }
  0xf3   : > { %712 = vrot.lane.b32.xlu0 %v698_v11, %s10358_s20  ;;  %v6879_v11 = vmul.f32 %v493_v16, %v6737_v58  ;;  %v974_v58 = vmul.f32 %v969_v57, %v6761_v35 }
  0xf4   : > { %v920_v32 = vmul.f32 %v6744_v1, %v901_v4  ;;  %v5971_v4 = vld [vmem:[%s10312_s9 + $0x10] sm:$0x3] }
  0xf5   : > { %v607_v27 = vmul.f32 %v6772_v45, %v6879_v11  ;;  %v993_v25 = vmul.f32 %v6775_v42, %v974_v58  ;;  %v1107_v16 = vperm.slane %v5971_v4, 0 }
  0xf7   : > { %v626_v29 = vmul.f32 %v6676_v14, %v607_v27 }
  0xf8   : > { %638 = vrot.lane.b32.xlu2 %v624_v30, %s10337_s26  ;;  %v895_v30 = vsel %vm894_vm2, %v6739_v59, %v6742_v61 }
  0xf9   : > { %v900_v59 = vmul.f32 %v895_v30, %v6761_v35 }
  0xfa   : > { %858 = vrot.lane.b32.xlu1 %v845_v37, %s10333_s21  ;;  %v507_v37 = vor.u32 1.1754944e-38, %v506_v60 }
  0xfb   : > { %784 = vrot.lane.b32.xlu0 %v771_v54, %s10335_s30  ;;  %v919_v44 = vmul.f32 %v6744_v1, %v900_v59 }
  0xfc   : > { %v508_v40 = vsel %vm505_vm9, %v507_v37, %v503_v39  ;;  %vm10394_vm9 = vcmask 121856  }
  0xfd   : > { %v6894_v21 = vmul.f32 %v508_v40, %v6750_v22 }
  0xff   : > { %v682_v45 = vmul.f32 %v6692_v23, %v6894_v21  ;;  %v756_v1 = vmul.f32 %v6702_v31, %v6894_v21  ;;  %v608_v51 = vmul.f32 %v6681_v17, %v6894_v21  ;;  %v755_v23 = vmul.f32 %v6836_v18, %v6879_v11  ;;  %v1062_v18 = vpop.permute.xlu2 %1061 }
 0x100   : > { %710 = vrot.lane.b32.xlu2 %v697_v46, %s10358_s20  ;;  %v1047_v46 = vmul.f32 %v6846_v34, %v6786_v55  ;;  %v829_v31 = vmul.f32 %v6815_v19, %v6879_v11  ;;  %v681_v17 = vmul.f32 %v6827_v36, %v6879_v11  ;;  %v904_v56 = vmul.f32 %v6742_v61, %v6894_v21 }
 0x101   : > { %v701_v42 = vmul.f32 %v6706_v33, %v682_v45  ;;  %v775_v50 = vmul.f32 %v6719_v43, %v756_v1  ;;  %v774_v54 = vmul.f32 %v6719_v43, %v755_v23  ;;  %v830_v36 = vmul.f32 %v6724_v47, %v6894_v21 }
 0x102   : > { %1008 = vrot.lane.b32.xlu1 %v994_v20, %s10326_s27  ;;  %v1066_v22 = vmul.f32 %v6797_v0, %v1047_v46  ;;  %v627_v0 = vmul.f32 %v6676_v14, %v608_v51  ;;  %v848_v10 = vmul.f32 %v6726_v48, %v829_v31  ;;  %v700_v19 = vmul.f32 %v6706_v33, %v681_v17 }
 0x103   : > { %934 = vrot.lane.b32.xlu0 %v920_v32, %s10328_s29  ;;  %v978_v14 = vmul.f32 %v6766_v38, %v6894_v21  ;;  %v923_v43 = vmul.f32 %v6754_v26, %v904_v56  ;;  %v977_v61 = vmul.f32 %v969_v57, %v6879_v11  ;;  %v1049_v33 = vmul.f32 %v6860_v41, %v6879_v11 }
 0x104   : > { %v849_v38 = vmul.f32 %v6726_v48, %v830_v36  ;;  %v903_v47 = vmul.f32 %v895_v30, %v6879_v11  ;;  %v1067_v48 = vmul.f32 %v1062_v18, %v6793_v62  ;;  %v1050_v52 = vmul.f32 %v6846_v34, %v6894_v21  ;;  %v5972_v34 = vld [vmem:[%s10621_s3 + $0x80] sm:$0xff] }
 0x105   : > { %v997_v63 = vmul.f32 %v6781_v53, %v978_v14  ;;  %v996_v20 = vmul.f32 %v6781_v53, %v977_v61  ;;  %v1068_v28 = vmul.f32 %v1062_v18, %v1049_v33  ;;  %v1108_v53 = vperm.slane %v5971_v4, 1 }
 0x106   : > { %v922_v41 = vmul.f32 %v6754_v26, %v903_v47  ;;  %v1069_v60 = vmul.f32 %v1062_v18, %v1050_v52 }
 0x108   : > { %860 = vrot.lane.b32.xlu2 %v846_v3, %s10333_s21 }
 0x10a   : > { %1078 = vrot.lane.b32.xlu1 %v1065_v49, %s10626_s28 }
 0x10b   : > { %1006 = vrot.lane.b32.xlu0 %v993_v25, %s10326_s27 }
 0x110   : > { %932 = vrot.lane.b32.xlu2 %v919_v44, %s10328_s29 }
 0x112   : > { %642 = vrot.lane.b32.xlu1 %v626_v29, %s10337_s26 }
 0x113   : > { %718 = vrot.lane.b32.xlu0 %v701_v42, %s10358_s20 }
 0x118   : > { %1080 = vrot.lane.b32.xlu2 %v1066_v22, %s10626_s28 }
 0x11a   : > { %792 = vrot.lane.b32.xlu1 %v775_v50, %s10335_s30 }
 0x11b   : > { %790 = vrot.lane.b32.xlu0 %v774_v54, %s10335_s30  ;;  %s10434_s30 = smov 31  }
 0x11d   : > { %v6964_v26 = vpop.permute.xlu0 %634 }
 0x120   : > { %644 = vrot.lane.b32.xlu2 %v627_v0, %s10337_s26  ;;  %s10351_s26 = smov 108  }
 0x122   : > { %864 = vrot.lane.b32.xlu1 %v848_v10, %s10333_s21  ;;  %v6944_v2 = vpop.permute.xlu2 %782 }
 0x123   : > { %940 = vrot.lane.b32.xlu0 %v923_v43, %s10328_s29 }
 0x125   : > { %v6978_v30 = vpop.permute.xlu0 %640 }
 0x128   : > { %716 = vrot.lane.b32.xlu2 %v700_v19, %s10358_s20 }
 0x12a   : > { %1014 = vrot.lane.b32.xlu1 %v997_v63, %s10326_s27  ;;  %v6959_v5 = vpop.permute.xlu2 %788 }
 0x12b   : > { %1012 = vrot.lane.b32.xlu0 %v996_v20, %s10326_s27  ;;  %s10353_s27 = smov 109  }
 0x12c   : > { %v6961_v8 = vpop.permute.xlu1 %708 }
 0x130   : > { %866 = vrot.lane.b32.xlu2 %v849_v38, %s10333_s21  ;;  %s10343_s21 = smov 114  }
 0x132   : > { %1084 = vrot.lane.b32.xlu1 %v1068_v28, %s10626_s28 }
 0x133   : > { %1082 = vrot.lane.b32.xlu0 %v1067_v48, %s10626_s28 }
 0x134   : > { %v6970_v3 = vpop.permute.xlu1 %714 }
 0x138   : > { %938 = vrot.lane.b32.xlu2 %v922_v41, %s10328_s29  ;;  %s10644_s29 = smov 127  }
 0x13a   : > { %1111 = vrot.lane.b32.xlu1 %v1108_v53, %s10331_s18 }
 0x13b   : > { %1109 = vrot.lane.b32.xlu0 %v1107_v16, %s10331_s18  ;;  %s10381_s18 = smov 14  }
 0x13d   : > { %v6984_v49 = vpop.permute.xlu0 %856 }
 0x140   : > { %1086 = vrot.lane.b32.xlu2 %v1069_v60, %s10626_s28 }
 0x142   : > { %v6968_v62 = vpop.permute.xlu2 %1004 }
 0x143   : > { %1134 = vperm.xlu0 %6251, %v5973_v24  }
 0x145   : > { %v6992_v40 = vpop.permute.xlu0 %862 }
 0x148   : > { %1129 = vperm.xlu2 %6252, %v5972_v34  }
 0x14a   : > { %v6980_v32 = vpop.permute.xlu2 %1010 }
 0x14c   : > { %v6982_v39 = vpop.permute.xlu1 %930 }
 0x152   : > { %v6986_v37 = vpop.permute.xlu2 %638 }
 0x154   : > { %v6988_v57 = vpop.permute.xlu1 %936 }
 0x15a   : > { %v6990_v59 = vpop.permute.xlu2 %710 }
 0x15c   : > { %v6994_v58 = vpop.permute.xlu1 %636 }
 0x15d   : > { %v6998_v44 = vpop.permute.xlu0 %1076 }
 0x162   : > { %v6996_v27 = vpop.permute.xlu2 %860 }
 0x164   : > { %v7000_v25 = vpop.permute.xlu1 %786 }
 0x165   : > { %v7004_v46 = vpop.permute.xlu0 %712 }
 0x16a   : > { %v7002_v29 = vpop.permute.xlu2 %932 }
 0x16c   : > { %v7006_v45 = vpop.permute.xlu1 %858 }
 0x16d   : > { %v7010_v22 = vpop.permute.xlu0 %784 }
 0x172   : > { %v7008_v1 = vpop.permute.xlu2 %1080 }
 0x173   : > { %10627 = vst [vmem:[#allocation7_spill] sm:$0xff] %v7008_v1 }
 0x174   : > { %v7012_v42 = vpop.permute.xlu1 %1008 }
 0x175   : > { %v7014_v50 = vpop.permute.xlu0 %934 }
 0x17a   : > { %v7016_v51 = vpop.permute.xlu2 %644 }
 0x17c   : > { %v7018_v23 = vpop.permute.xlu1 %1078 }
 0x17d   : > { %v7020_v31 = vpop.permute.xlu0 %1006 }
 0x182   : > { %v7024_v54 = vpop.permute.xlu2 %716 }
 0x184   : > { %v7022_v0 = vpop.permute.xlu1 %642 }
 0x185   : > { %v7026_v10 = vpop.permute.xlu0 %718 }
 0x18a   : > { %v7030_v56 = vpop.permute.xlu2 %866 }
 0x18c   : > { %v7028_v17 = vpop.permute.xlu1 %792 }
 0x18d   : > { %v7032_v19 = vpop.permute.xlu0 %790 }
 0x192   : > { %v7036_v43 = vpop.permute.xlu2 %938 }
 0x194   : > { %v7034_v14 = vpop.permute.xlu1 %864 }
 0x195   : > { %v7038_v18 = vpop.permute.xlu0 %940 }
 0x19a   : > { %v7044_v61 = vpop.permute.xlu2 %1086 }
 0x19b   : > { %10628 = vst [vmem:[#allocation8_spill] sm:$0xff] %v7044_v61 }
 0x19c   : > { %v7040_v63 = vpop.permute.xlu1 %1014 }
 0x19d   : > { %v7042_v36 = vpop.permute.xlu0 %1012 }
 0x1a2   : > { %v1130_v47 = vpop.permute.xlu2 %1129 }
 0x1a4   : > { %v7046_v33 = vpop.permute.xlu1 %1084 }
 0x1a5   : > { %10629 = vst [vmem:[#allocation9_spill] sm:$0xff] %v7046_v33  ;;  %v7048_v38 = vpop.permute.xlu0 %1082 }
 0x1a6   : > { %10630 = vst [vmem:[#allocation10_spill] sm:$0xff] %v7048_v38 }
 0x1ac   : > { %v1112_v20 = vpop.permute.xlu1 %1111 }
 0x1ad   : > { %v1120_v28 = vmul.f32 %v1112_v20, %v6786_v55  ;;  %v1110_v41 = vpop.permute.xlu0 %1109  ;;  %v1123_v34 = vmul.f32 %v1112_v20, %v6894_v21 }
 0x1ae   : > { %v1114_v48 = vsel %vm10474_vm14, %v1110_v41, %v1112_v20  ;;  %v1118_v53 = vmul.f32 0.0, %v1110_v41  ;;  %v5975_v20 = vld [vmem:[%s10621_s3 + $0x90] sm:$0xff]  ;;  %vm10475_vm14 = vcmask 490496  }
 0x1af   : > { %v1139_v4 = vmul.f32 %v1130_v47, %v1120_v28  ;;  %v1119_v52 = vmul.f32 %v1114_v48, %v6761_v35  ;;  %v1122_v38 = vmul.f32 %v1114_v48, %v6879_v11 }
 0x1b0   : > { %v1137_v16 = vmul.f32 %v1130_v47, %v1118_v53 }
 0x1b1   : > { %1153 = vrot.lane.b32.xlu0 %v1139_v4, %s10353_s27  ;;  %v1138_v60 = vmul.f32 %v1130_v47, %v1119_v52  ;;  %v5974_v47 = vld [vmem:[%s10312_s9 + $0x12] sm:$0x3] }
 0x1b2   : > { %1149 = vrot.lane.b32.xlu1 %v1137_v16, %s10353_s27  ;;  %v1181_v41 = vperm.slane %v5974_v47, 0  ;;  %v1182_v52 = vperm.slane %v5974_v47, 1 }
 0x1b3   : > { %1151 = vrot.lane.b32.xlu2 %v1138_v60, %s10353_s27 }
 0x1b5   : > { %v1135_v24 = vpop.permute.xlu0 %1134 }
 0x1b6   : > { %v1142_v28 = vmul.f32 %v1135_v24, %v1123_v34  ;;  %v1140_v4 = vmul.f32 %v1135_v24, %v1118_v53  ;;  %v1141_v33 = vmul.f32 %v1135_v24, %v1122_v38 }
 0x1b9   : > { %1159 = vrot.lane.b32.xlu0 %v1142_v28, %s10353_s27 }
 0x1ba   : > { %1155 = vrot.lane.b32.xlu1 %v1140_v4, %s10353_s27 }
 0x1bb   : > { %1157 = vrot.lane.b32.xlu2 %v1141_v33, %s10353_s27  ;;  %v5976_v33 = vld [vmem:[%s10621_s3 + $0x98] sm:$0xff]  ;;  %s10650_s27 = smov 95  }
 0x1c1   : > { %1203 = vperm.xlu0 %6251, %v5975_v20  }
 0x1c2   : > { %1183 = vrot.lane.b32.xlu1 %v1181_v41, %s10343_s21 }
 0x1c3   : > { %1185 = vrot.lane.b32.xlu2 %v1182_v52, %s10343_s21  ;;  %s10643_s21 = smov 96  }
 0x1ca   : > { %1208 = vperm.xlu1 %6253, %v5976_v33  }
 0x20d   : > { %v7072_v38 = vpop.permute.xlu2 %1151 }
 0x20e   : > { %10631 = vst [vmem:[#allocation11_spill] sm:$0xff] %v7072_v38 }
 0x215   : > { %v7076_v53 = vpop.permute.xlu2 %1157 }
 0x216   : > { %10633 = vst [vmem:[#allocation13_spill] sm:$0xff] %v7076_v53 }
 0x21d   : > { %v1186_v24 = vpop.permute.xlu2 %1185 }
 0x21e   : > { %v1194_v28 = vmul.f32 %v1186_v24, %v6786_v55 }
 0x223   : > { %v7074_v48 = vpop.permute.xlu0 %1153 }
 0x224   : > { %10632 = vst [vmem:[#allocation12_spill] sm:$0xff] %v7074_v48  ;;  %v7078_v16 = vpop.permute.xlu1 %1149 }
 0x225   : > { %10634 = vst [vmem:[#allocation14_spill] sm:$0xff] %v7078_v16 }
 0x22b   : > { %v7080_v60 = vpop.permute.xlu0 %1159 }
 0x22c   : > { %10635 = vst [vmem:[#allocation15_spill] sm:$0xff] %v7080_v60  ;;  %v7082_v34 = vpop.permute.xlu1 %1155 }
 0x22d   : > { %10636 = vst [vmem:[#allocation16_spill] sm:$0xff] %v7082_v34  ;;  %v1197_v34 = vmul.f32 %v1186_v24, %v6894_v21 }
 0x233   : > { %v1204_v4 = vpop.permute.xlu0 %1203 }
 0x234   : > { %v1213_v47 = vmul.f32 %v1204_v4, %v1194_v28  ;;  %v1184_v20 = vpop.permute.xlu1 %1183 }
 0x235   : > { %v1188_v41 = vsel %vm10461_vm15, %v1184_v20, %v1186_v24  ;;  %v1192_v52 = vmul.f32 0.0, %v1184_v20  ;;  %vm10462_vm15 = vcmask 1014784  }
 0x236   : > { %1227 = vrot.lane.b32.xlu1 %v1213_v47, %s10351_s26  ;;  %v1193_v33 = vmul.f32 %v1188_v41, %v6761_v35  ;;  %v1196_v28 = vmul.f32 %v1188_v41, %v6879_v11 }
 0x237   : > { %v1211_v53 = vmul.f32 %v1204_v4, %v1192_v52 }
 0x238   : > { %v1212_v16 = vmul.f32 %v1204_v4, %v1193_v33 }
 0x239   : > { %1223 = vrot.lane.b32.xlu2 %v1211_v53, %s10351_s26  ;;  %v5977_v53 = vld [vmem:[%s10312_s9 + $0x14] sm:$0x3] }
 0x23a   : > { %1225 = vrot.lane.b32.xlu0 %v1212_v16, %s10351_s26  ;;  %v5978_v16 = vld [vmem:[%s10621_s3 + $0xa0] sm:$0xff]  ;;  %v1255_v24 = vperm.slane %v5977_v53, 0 }
 0x23c   : > { %v1209_v60 = vpop.permute.xlu1 %1208 }
 0x23d   : > { %v1216_v38 = vmul.f32 %v1209_v60, %v1197_v34  ;;  %v1214_v20 = vmul.f32 %v1209_v60, %v1192_v52  ;;  %v1215_v48 = vmul.f32 %v1209_v60, %v1196_v28  ;;  %v1256_v34 = vperm.slane %v5977_v53, 1 }
 0x23f   : > { %1233 = vrot.lane.b32.xlu1 %v1216_v38, %s10351_s26  ;;  %v5979_v38 = vld [vmem:[%s10621_s3 + $0xa8] sm:$0xff] }
 0x241   : > { %1229 = vrot.lane.b32.xlu2 %v1214_v20, %s10351_s26 }
 0x242   : > { %1231 = vrot.lane.b32.xlu0 %v1215_v48, %s10351_s26  ;;  %s10654_s26 = smov 94  }
 0x247   : > { %1276 = vperm.xlu1 %6253, %v5978_v16  }
 0x249   : > { %1257 = vrot.lane.b32.xlu2 %v1255_v24, %s10358_s20 }
 0x24a   : > { %1259 = vrot.lane.b32.xlu0 %v1256_v34, %s10358_s20  ;;  %s10375_s20 = smov 93  }
 0x251   : > { %1281 = vperm.xlu2 %6252, %v5979_v38  }
 0x293   : > { %v7106_v48 = vpop.permute.xlu2 %1223 }
 0x294   : > { %10637 = vst [vmem:[#allocation17_spill] sm:$0xff] %v7106_v48 }
 0x29b   : > { %v7110_v4 = vpop.permute.xlu2 %1229 }
 0x29c   : > { %10639 = vst [vmem:[#allocation19_spill] sm:$0xff] %v7110_v4 }
 0x2a3   : > { %v1258_v33 = vpop.permute.xlu2 %1257 }
 0x2a4   : > { %v1265_v28 = vmul.f32 0.0, %v1258_v33 }
 0x2a8   : > { %v7108_v60 = vpop.permute.xlu1 %1227 }
 0x2a9   : > { %10638 = vst [vmem:[#allocation18_spill] sm:$0xff] %v7108_v60 }
 0x2ab   : > { %v1282_v60 = vpop.permute.xlu2 %1281 }
 0x2ac   : > { %v7112_v47 = vpop.permute.xlu0 %1225 }
 0x2ad   : > { %10640 = vst [vmem:[#allocation20_spill] sm:$0xff] %v7112_v47 }
 0x2b1   : > { %v7114_v41 = vpop.permute.xlu1 %1233 }
 0x2b2   : > { %10641 = vst [vmem:[#allocation21_spill] sm:$0xff] %v7114_v41  ;;  %v1287_v41 = vmul.f32 %v1282_v60, %v1265_v28 }
 0x2b4   : > { %v7116_v52 = vpop.permute.xlu0 %1231 }
 0x2b5   : > { %10642 = vst [vmem:[#allocation22_spill] sm:$0xff] %v7116_v52 }
 0x2b9   : > { %v1277_v20 = vpop.permute.xlu1 %1276 }
 0x2ba   : > { %v1284_v53 = vmul.f32 %v1277_v20, %v1265_v28 }
 0x2bc   : > { %v1260_v16 = vpop.permute.xlu0 %1259  ;;  %1296 = vrot.lane.b32.xlu0 %v1284_v53, %s10643_s21 }
 0x2bd   : > { %v1261_v24 = vsel %vm10470_vm1, %v1258_v33, %v1260_v16  ;;  %v1267_v34 = vmul.f32 %v1260_v16, %v6786_v55  ;;  %v1270_v52 = vmul.f32 %v1260_v16, %v6894_v21  ;;  %v5980_v33 = vld [vmem:[%s10312_s9 + $0x16] sm:$0x3] }
 0x2be   : > { %v1266_v38 = vmul.f32 %v1261_v24, %v6761_v35  ;;  %v1269_v53 = vmul.f32 %v1261_v24, %v6879_v11  ;;  %v1327_v1 = vperm.slane %v5980_v33, 0 }
 0x2bf   : > { %v1286_v4 = vmul.f32 %v1277_v20, %v1267_v34  ;;  %v1289_v47 = vmul.f32 %v1282_v60, %v1270_v52 }
 0x2c0   : > { %v1285_v48 = vmul.f32 %v1277_v20, %v1266_v38  ;;  %v1288_v61 = vmul.f32 %v1282_v60, %v1269_v53 }
 0x2c1   : > { %1300 = vrot.lane.b32.xlu2 %v1286_v4, %s10643_s21  ;;  %v1328_v4 = vperm.slane %v5980_v33, 1 }
 0x2c2   : > { %1298 = vrot.lane.b32.xlu1 %v1285_v48, %s10643_s21  ;;  %v5981_v48 = vld [vmem:[%s10621_s3 + $0xb0] sm:$0xff] }
 0x2c4   : > { %1302 = vrot.lane.b32.xlu0 %v1287_v41, %s10643_s21  ;;  %v5982_v41 = vld [vmem:[%s10621_s3 + $0xb8] sm:$0xff] }
 0x2c9   : > { %1306 = vrot.lane.b32.xlu2 %v1289_v47, %s10643_s21 }
 0x2ca   : > { %1304 = vrot.lane.b32.xlu1 %v1288_v61, %s10643_s21 }
 0x2cc   : > { %1329 = vrot.lane.b32.xlu0 %v1327_v1, %s10644_s29 }
 0x2d1   : > { %1348 = vperm.xlu2 %6252, %v5981_v48  }
 0x2d2   : > { %1331 = vrot.lane.b32.xlu1 %v1328_v4, %s10644_s29 }
 0x2d4   : > { %1353 = vperm.xlu0 %6251, %v5982_v41  }
 0x31b   : > { %v7140_v60 = vpop.permute.xlu2 %1300 }
 0x31c   : > { %10645 = vst [vmem:[#allocation23_spill] sm:$0xff] %v7140_v60 }
 0x323   : > { %v7146_v1 = vpop.permute.xlu2 %1306 }
 0x324   : > { %10648 = vst [vmem:[#allocation26_spill] sm:$0xff] %v7146_v1 }
 0x32b   : > { %v1349_v24 = vpop.permute.xlu2 %1348 }
 0x32e   : > { %v7142_v47 = vpop.permute.xlu0 %1296 }
 0x32f   : > { %10646 = vst [vmem:[#allocation24_spill] sm:$0xff] %v7142_v47 }
 0x334   : > { %v7144_v61 = vpop.permute.xlu1 %1298 }
 0x335   : > { %10647 = vst [vmem:[#allocation25_spill] sm:$0xff] %v7144_v61 }
 0x336   : > { %v7148_v52 = vpop.permute.xlu0 %1302 }
 0x337   : > { %10649 = vst [vmem:[#allocation27_spill] sm:$0xff] %v7148_v52  ;;  %v5984_v52 = vld [vmem:[%s10621_s3 + $0xc0] sm:$0xff] }
 0x33c   : > { %v7150_v28 = vpop.permute.xlu1 %1304 }
 0x33e   : > { %v1330_v20 = vpop.permute.xlu0 %1329 }
 0x33f   : > { %v1337_v16 = vmul.f32 0.0, %v1330_v20 }
 0x341   : > { %v1356_v34 = vmul.f32 %v1349_v24, %v1337_v16 }
 0x343   : > { %1368 = vrot.lane.b32.xlu1 %v1356_v34, %s10650_s27 }
 0x344   : > { %v1332_v38 = vpop.permute.xlu1 %1331 }
 0x345   : > { %v1333_v53 = vsel %vm10468_vm3, %v1330_v20, %v1332_v38  ;;  %v1339_v33 = vmul.f32 %v1332_v38, %v6786_v55  ;;  %v1342_v47 = vmul.f32 %v1332_v38, %v6894_v21 }
 0x346   : > { %v1354_v48 = vpop.permute.xlu0 %1353  ;;  %v1338_v4 = vmul.f32 %v1333_v53, %v6761_v35  ;;  %v1341_v34 = vmul.f32 %v1333_v53, %v6879_v11 }
 0x347   : > { %v1358_v41 = vmul.f32 %v1349_v24, %v1339_v33  ;;  %v1359_v60 = vmul.f32 %v1354_v48, %v1337_v16  ;;  %v1361_v61 = vmul.f32 %v1354_v48, %v1342_v47  ;;  %v5983_v47 = vld [vmem:[%s10312_s9 + $0x18] sm:$0x3] }
 0x348   : > { %v1357_v1 = vmul.f32 %v1349_v24, %v1338_v4  ;;  %v1360_v20 = vmul.f32 %v1354_v48, %v1341_v34  ;;  %v1399_v24 = vperm.slane %v5983_v47, 0 }
 0x349   : > { %1372 = vrot.lane.b32.xlu0 %v1358_v41, %s10650_s27  ;;  %v1400_v41 = vperm.slane %v5983_v47, 1  ;;  %v5988_v47 = vld [vmem:[%s10621_s3 + $0xd8] sm:$0xff] }
 0x34a   : > { %1370 = vrot.lane.b32.xlu2 %v1357_v1, %s10650_s27  ;;  %v5985_v1 = vld [vmem:[%s10621_s3 + $0xc8] sm:$0xff]  ;;  %v1405_v38 = vmul.f32 %v1399_v24, %v6879_v11  ;;  %v1403_v34 = vmul.f32 %v1399_v24, %v6761_v35  ;;  %v5987_v24 = vld [vmem:[%s10621_s3 + $0xd0] sm:$0xff] }
 0x34b   : > { %1374 = vrot.lane.b32.xlu1 %v1359_v60, %s10650_s27 }
 0x351   : > { %1378 = vrot.lane.b32.xlu0 %v1361_v61, %s10650_s27 }
 0x352   : > { %1376 = vrot.lane.b32.xlu2 %v1360_v20, %s10650_s27  ;;  %v1404_v20 = vmul.f32 %v1400_v41, %v6786_v55 }
 0x353   : > { %1412 = vperm.xlu1 %6253, %v5984_v52   ;;  %v5986_v52 = vld [vmem:[%s10312_s9 + $0x1a] sm:$0x3] }
 0x354   : > { %v1454_v48 = vperm.slane %v5986_v52, 1 }
 0x35a   : > { %1417 = vperm.xlu2 %6252, %v5985_v1  }
 0x3a4   : > { %v7169_v16 = vpop.permute.xlu2 %1370 }
 0x3a5   : > { %10651 = vst [vmem:[#allocation28_spill] sm:$0xff] %v7169_v16  ;;  %v1453_v16 = vperm.slane %v5986_v52, 0 }
 0x3ac   : > { %v7171_v60 = vpop.permute.xlu2 %1376 }
 0x3ad   : > { %10652 = vst [vmem:[#allocation29_spill] sm:$0xff] %v7171_v60 }
 0x3b4   : > { %v1418_v61 = vpop.permute.xlu2 %1417 }
 0x3b5   : > { %v1422_v53 = vmul.f32 %v1418_v61, %v1405_v38  ;;  %v7177_v33 = vpop.permute.xlu1 %1368 }
 0x3b6   : > { %10653 = vst [vmem:[#allocation30_spill] sm:$0xff] %v7177_v33 }
 0x3b7   : > { %1432 = vrot.lane.b32.xlu2 %v1422_v53, %s10654_s26  ;;  %v1406_v53 = vmul.f32 %v1400_v41, %v6894_v21 }
 0x3b9   : > { %v1423_v60 = vmul.f32 %v1418_v61, %v1406_v53 }
 0x3bd   : > { %v7183_v4 = vpop.permute.xlu1 %1374 }
 0x3be   : > { %10655 = vst [vmem:[#allocation31_spill] sm:$0xff] %v7183_v4 }
 0x3bf   : > { %1457 = vrot.lane.b32.xlu2 %v1454_v48, %s10368_s11 }
 0x3c5   : > { %v1413_v1 = vpop.permute.xlu1 %1412 }
 0x3c6   : > { %v1420_v38 = vmul.f32 %v1413_v1, %v1403_v34  ;;  %v1421_v33 = vmul.f32 %v1413_v1, %v1404_v20 }
 0x3c8   : > { %1430 = vrot.lane.b32.xlu1 %v1421_v33, %s10654_s26  ;;  %1428 = vrot.lane.b32.xlu0 %v1420_v38, %s10654_s26  ;;  %v7199_v33 = vpop.permute.xlu0 %1372 }
 0x3c9   : > { %10656 = vst [vmem:[#allocation32_spill] sm:$0xff] %v7199_v33 }
 0x3d0   : > { %1455 = vrot.lane.b32.xlu1 %v1453_v16, %s10368_s11  ;;  %1434 = vrot.lane.b32.xlu0 %v1423_v60, %s10654_s26  ;;  %v7201_v48 = vpop.permute.xlu0 %1378  ;;  %s10388_s11 = smov 15  }
 0x3d1   : > { %10657 = vst [vmem:[#allocation33_spill] sm:$0xff] %v7201_v48 }
 0x3d8   : > { %1480 = vperm.xlu1 %6253, %v5988_v47   ;;  %1475 = vperm.xlu0 %6251, %v5987_v24  }
 0x411   : > { %v7207_v16 = vpop.permute.xlu2 %1432 }
 0x412   : > { %10660 = vst [vmem:[#allocation36_spill] sm:$0xff] %v7207_v16 }
 0x419   : > { %v1458_v41 = vpop.permute.xlu2 %1457 }
 0x41a   : > { %v1466_v1 = vmul.f32 0.0, %v1458_v41 }
 0x43a   : > { %v7203_v52 = vpop.permute.xlu1 %1430  ;;  %v7205_v61 = vpop.permute.xlu0 %1428 }
 0x43b   : > { %10658 = vst [vmem:[#allocation34_spill] sm:$0xff] %v7203_v52 }
 0x43c   : > { %10659 = vst [vmem:[#allocation35_spill] sm:$0xff] %v7205_v61 }
 0x442   : > { %v7209_v60 = vpop.permute.xlu0 %1434  ;;  %v1456_v34 = vpop.permute.xlu1 %1455 }
 0x443   : > { %10661 = vst [vmem:[#allocation37_spill] sm:$0xff] %v7209_v60  ;;  %v1460_v20 = vsel %vm10460_vm4, %v1456_v34, %v1458_v41  ;;  %v1464_v38 = vmul.f32 %v1456_v34, %v6761_v35  ;;  %v1467_v41 = vmul.f32 %v1456_v34, %v6879_v11  ;;  %vm10463_vm4 = vcmask 1022976  }
 0x444   : > { %v1465_v53 = vmul.f32 %v1460_v20, %v6786_v55  ;;  %v1468_v60 = vmul.f32 %v1460_v20, %v6894_v21 }
 0x44a   : > { %v1476_v47 = vpop.permute.xlu0 %1475  ;;  %v1481_v16 = vpop.permute.xlu1 %1480 }
 0x44b   : > { %v1485_v24 = vmul.f32 %v1476_v47, %v1466_v1  ;;  %v1484_v48 = vmul.f32 %v1476_v47, %v1465_v53  ;;  %v1483_v52 = vmul.f32 %v1476_v47, %v1464_v38  ;;  %v1488_v61 = vmul.f32 %v1481_v16, %v1466_v1 }
 0x44c   : > { %v1487_v33 = vmul.f32 %v1481_v16, %v1468_v60  ;;  %v1486_v4 = vmul.f32 %v1481_v16, %v1467_v41 }
 0x44d   : > { %1499 = vrot.lane.b32.xlu1 %v1485_v24, %s10375_s20  ;;  %1497 = vrot.lane.b32.xlu0 %v1484_v48, %s10375_s20  ;;  %v5989_v48 = vld [vmem:[%s10312_s9 + $0x1c] sm:$0x3] }
 0x44e   : > { %1495 = vrot.lane.b32.xlu2 %v1483_v52, %s10375_s20  ;;  %v1528_v38 = vperm.slane %v5989_v48, 1  ;;  %v5990_v52 = vld [vmem:[%s10621_s3 + $0xe0] sm:$0xff]  ;;  %v1527_v20 = vperm.slane %v5989_v48, 0 }
 0x455   : > { %1505 = vrot.lane.b32.xlu1 %v1488_v61, %s10375_s20  ;;  %1503 = vrot.lane.b32.xlu0 %v1487_v33, %s10375_s20 }
 0x456   : > { %1501 = vrot.lane.b32.xlu2 %v1486_v4, %s10375_s20  ;;  %v5991_v4 = vld [vmem:[%s10621_s3 + $0xe8] sm:$0xff]  ;;  %s10417_s20 = smov 18  }
 0x45d   : > { %1549 = vperm.xlu1 %6253, %v5990_v52   ;;  %1531 = vrot.lane.b32.xlu0 %v1528_v38, %s10373_s0 }
 0x45e   : > { %1529 = vrot.lane.b32.xlu2 %v1527_v20, %s10373_s0  ;;  %s10390_s0 = smov 80  }
 0x466   : > { %1554 = vperm.xlu2 %6252, %v5991_v4  }
 0x4a8   : > { %v7233_v33 = vpop.permute.xlu2 %1495 }
 0x4a9   : > { %10662 = vst [vmem:[#allocation38_spill] sm:$0xff] %v7233_v33 }
 0x4b0   : > { %v7239_v60 = vpop.permute.xlu2 %1501 }
 0x4b1   : > { %10665 = vst [vmem:[#allocation41_spill] sm:$0xff] %v7239_v60 }
 0x4b8   : > { %v1530_v53 = vpop.permute.xlu2 %1529 }
 0x4b9   : > { %v1538_v47 = vmul.f32 %v1530_v53, %v6761_v35 }
 0x4bf   : > { %v7235_v61 = vpop.permute.xlu1 %1499  ;;  %v7237_v16 = vpop.permute.xlu0 %1497 }
 0x4c0   : > { %10663 = vst [vmem:[#allocation39_spill] sm:$0xff] %v7235_v61 }
 0x4c1   : > { %10664 = vst [vmem:[#allocation40_spill] sm:$0xff] %v7237_v16 }
 0x4c7   : > { %v7241_v34 = vpop.permute.xlu1 %1505  ;;  %v7243_v1 = vpop.permute.xlu0 %1503 }
 0x4c8   : > { %10666 = vst [vmem:[#allocation42_spill] sm:$0xff] %v7241_v34  ;;  %v1555_v34 = vpop.permute.xlu2 %1554 }
 0x4c9   : > { %10667 = vst [vmem:[#allocation43_spill] sm:$0xff] %v7243_v1  ;;  %v1541_v1 = vmul.f32 %v1530_v53, %v6879_v11 }
 0x4cb   : > { %v1560_v33 = vmul.f32 %v1555_v34, %v1541_v1 }
 0x4cf   : > { %v1550_v24 = vpop.permute.xlu1 %1549  ;;  %v1532_v41 = vpop.permute.xlu0 %1531 }
 0x4d0   : > { %v1534_v48 = vsel %vm10459_vm7, %v1530_v53, %v1532_v41  ;;  %v1540_v38 = vmul.f32 0.0, %v1532_v41  ;;  %v1557_v52 = vmul.f32 %v1550_v24, %v1538_v47  ;;  %vm10466_vm7 = vcmask 769024  }
 0x4d1   : > { %v1539_v20 = vmul.f32 %v1534_v48, %v6786_v55  ;;  %v1542_v61 = vmul.f32 %v1534_v48, %v6894_v21 }
 0x4d2   : > { %1569 = vrot.lane.b32.xlu0 %v1557_v52, %s10392_s1  ;;  %v1559_v4 = vmul.f32 %v1550_v24, %v1540_v38  ;;  %v1562_v47 = vmul.f32 %v1555_v34, %v1540_v38  ;;  %v5992_v52 = vld [vmem:[%s10312_s9 + $0x1e] sm:$0x3] }
 0x4d3   : > { %v1558_v60 = vmul.f32 %v1550_v24, %v1539_v20  ;;  %v1561_v41 = vmul.f32 %v1555_v34, %v1542_v61  ;;  %v1601_v24 = vperm.slane %v5992_v52, 0  ;;  %v1602_v53 = vperm.slane %v5992_v52, 1 }
 0x4d4   : > { %1573 = vrot.lane.b32.xlu2 %v1559_v4, %s10392_s1 }
 0x4d5   : > { %1571 = vrot.lane.b32.xlu1 %v1558_v60, %s10392_s1  ;;  %v5993_v60 = vld [vmem:[%s10621_s3 + $0xf0] sm:$0xff] }
 0x4da   : > { %1575 = vrot.lane.b32.xlu0 %v1560_v33, %s10392_s1  ;;  %v5994_v33 = vld [vmem:[%s10621_s3 + $0xf8] sm:$0xff] }
 0x4dc   : > { %1579 = vrot.lane.b32.xlu2 %v1562_v47, %s10392_s1 }
 0x4dd   : > { %1577 = vrot.lane.b32.xlu1 %v1561_v41, %s10392_s1  ;;  %s10407_s1 = smov 78  }
 0x4e2   : > { %1603 = vrot.lane.b32.xlu0 %v1601_v24, %s10381_s18 }
 0x4e4   : > { %1623 = vperm.xlu2 %6252, %v5993_v60  }
 0x4e5   : > { %1605 = vrot.lane.b32.xlu1 %v1602_v53, %s10381_s18  ;;  %s10409_s18 = smov 79  }
 0x4ea   : > { %1628 = vperm.xlu0 %6251, %v5994_v33  }
 0x52e   : > { %v7267_v61 = vpop.permute.xlu2 %1573 }
 0x52f   : > { %10668 = vst [vmem:[#allocation44_spill] sm:$0xff] %v7267_v61 }
 0x536   : > { %v7273_v48 = vpop.permute.xlu2 %1579 }
 0x537   : > { %10671 = vst [vmem:[#allocation47_spill] sm:$0xff] %v7273_v48 }
 0x53e   : > { %v1624_v41 = vpop.permute.xlu2 %1623 }
 0x544   : > { %v7269_v34 = vpop.permute.xlu0 %1569 }
 0x545   : > { %10669 = vst [vmem:[#allocation45_spill] sm:$0xff] %v7269_v34 }
 0x547   : > { %v7271_v1 = vpop.permute.xlu1 %1571 }
 0x548   : > { %10670 = vst [vmem:[#allocation46_spill] sm:$0xff] %v7271_v1  ;;  %v5995_v1 = vld [vmem:[%s10312_s9 + $0x20] sm:$0x3] }
 0x54c   : > { %v7275_v38 = vpop.permute.xlu0 %1575 }
 0x54d   : > { %10672 = vst [vmem:[#allocation48_spill] sm:$0xff] %v7275_v38 }
 0x54f   : > { %v7277_v20 = vpop.permute.xlu1 %1577 }
 0x550   : > { %10673 = vst [vmem:[#allocation49_spill] sm:$0xff] %v7277_v20 }
 0x554   : > { %v1604_v4 = vpop.permute.xlu0 %1603 }
 0x555   : > { %v1612_v47 = vmul.f32 %v1604_v4, %v6761_v35  ;;  %v1615_v20 = vmul.f32 %v1604_v4, %v6879_v11 }
 0x557   : > { %v1606_v52 = vpop.permute.xlu1 %1605  ;;  %v1631_v24 = vmul.f32 %v1624_v41, %v1612_v47 }
 0x558   : > { %v1608_v60 = vsel %vm10448_vm8, %v1604_v4, %v1606_v52  ;;  %v1614_v53 = vmul.f32 0.0, %v1606_v52  ;;  %vm10454_vm8 = vcmask 269312  }
 0x559   : > { %v1613_v33 = vmul.f32 %v1608_v60, %v6786_v55  ;;  %1643 = vrot.lane.b32.xlu1 %v1631_v24, %s10390_s0  ;;  %v1616_v47 = vmul.f32 %v1608_v60, %v6894_v21 }
 0x55a   : > { %v1633_v48 = vmul.f32 %v1624_v41, %v1614_v53 }
 0x55b   : > { %v1632_v61 = vmul.f32 %v1624_v41, %v1613_v33 }
 0x55c   : > { %v1629_v38 = vpop.permute.xlu0 %1628  ;;  %1647 = vrot.lane.b32.xlu0 %v1633_v48, %s10390_s0  ;;  %v1675_v48 = vperm.slane %v5995_v1, 0 }
 0x55d   : > { %1645 = vrot.lane.b32.xlu2 %v1632_v61, %s10390_s0  ;;  %v1634_v34 = vmul.f32 %v1629_v38, %v1615_v20  ;;  %v1636_v52 = vmul.f32 %v1629_v38, %v1614_v53  ;;  %v1635_v24 = vmul.f32 %v1629_v38, %v1616_v47  ;;  %v5996_v61 = vld [vmem:[%s10621_s3 + $0x100] sm:$0xff]  ;;  %v1676_v20 = vperm.slane %v5995_v1, 1 }
 0x561   : > { %1649 = vrot.lane.b32.xlu1 %v1634_v34, %s10390_s0  ;;  %v5997_v34 = vld [vmem:[%s10621_s3 + $0x108] sm:$0xff] }
 0x564   : > { %1653 = vrot.lane.b32.xlu0 %v1636_v52, %s10390_s0 }
 0x565   : > { %1651 = vrot.lane.b32.xlu2 %v1635_v24, %s10390_s0  ;;  %s10426_s0 = smov 30  }
 0x569   : > { %1677 = vrot.lane.b32.xlu1 %v1675_v48, %s10388_s11 }
 0x56c   : > { %1697 = vperm.xlu0 %6251, %v5996_v61  }
 0x56d   : > { %1679 = vrot.lane.b32.xlu2 %v1676_v20, %s10388_s11  ;;  %s10398_s11 = smov 16  }
 0x571   : > { %1702 = vperm.xlu1 %6253, %v5997_v34  }
 0x5b7   : > { %v7301_v38 = vpop.permute.xlu2 %1645 }
 0x5b8   : > { %10674 = vst [vmem:[#allocation50_spill] sm:$0xff] %v7301_v38 }
 0x5bf   : > { %v7307_v60 = vpop.permute.xlu2 %1651 }
 0x5c0   : > { %10677 = vst [vmem:[#allocation53_spill] sm:$0xff] %v7307_v60 }
 0x5c7   : > { %v1680_v1 = vpop.permute.xlu2 %1679 }
 0x5c8   : > { %v1688_v47 = vmul.f32 0.0, %v1680_v1 }
 0x5cb   : > { %v7303_v4 = vpop.permute.xlu1 %1643 }
 0x5cc   : > { %10675 = vst [vmem:[#allocation51_spill] sm:$0xff] %v7303_v4 }
 0x5ce   : > { %v7305_v41 = vpop.permute.xlu0 %1647 }
 0x5cf   : > { %10676 = vst [vmem:[#allocation52_spill] sm:$0xff] %v7305_v41 }
 0x5d3   : > { %v7309_v53 = vpop.permute.xlu1 %1649 }
 0x5d4   : > { %10678 = vst [vmem:[#allocation54_spill] sm:$0xff] %v7309_v53 }
 0x5d6   : > { %v7311_v33 = vpop.permute.xlu0 %1653 }
 0x5d7   : > { %10679 = vst [vmem:[#allocation55_spill] sm:$0xff] %v7311_v33 }
 0x5db   : > { %v1678_v52 = vpop.permute.xlu1 %1677 }
 0x5dc   : > { %v1682_v24 = vsel %vm10394_vm9, %v1678_v52, %v1680_v1  ;;  %v1686_v48 = vmul.f32 %v1678_v52, %v6761_v35  ;;  %v1689_v53 = vmul.f32 %v1678_v52, %v6879_v11  ;;  %vm10400_vm9 = vcmask 130048  }
 0x5dd   : > { %v1687_v61 = vmul.f32 %v1682_v24, %v6786_v55  ;;  %v1690_v1 = vmul.f32 %v1682_v24, %v6894_v21 }
 0x5de   : > { %v1698_v20 = vpop.permute.xlu0 %1697 }
 0x5df   : > { %v1705_v34 = vmul.f32 %v1698_v20, %v1686_v48  ;;  %v1706_v4 = vmul.f32 %v1698_v20, %v1687_v61  ;;  %v1707_v41 = vmul.f32 %v1698_v20, %v1688_v47 }
 0x5e1   : > { %1721 = vrot.lane.b32.xlu1 %v1707_v41, %s10409_s18  ;;  %1717 = vrot.lane.b32.xlu2 %v1705_v34, %s10409_s18  ;;  %v5998_v41 = vld [vmem:[%s10312_s9 + $0x22] sm:$0x3] }
 0x5e2   : > { %1719 = vrot.lane.b32.xlu0 %v1706_v4, %s10409_s18  ;;  %v1749_v48 = vperm.slane %v5998_v41, 0  ;;  %v5999_v4 = vld [vmem:[%s10621_s3 + $0x110] sm:$0xff]  ;;  %v1750_v52 = vperm.slane %v5998_v41, 1 }
 0x5e3   : > { %v1703_v33 = vpop.permute.xlu1 %1702 }
 0x5e4   : > { %v1708_v60 = vmul.f32 %v1703_v33, %v1689_v53  ;;  %v1710_v38 = vmul.f32 %v1703_v33, %v1688_v47  ;;  %v1709_v16 = vmul.f32 %v1703_v33, %v1690_v1 }
 0x5e9   : > { %1727 = vrot.lane.b32.xlu1 %v1710_v38, %s10409_s18  ;;  %1723 = vrot.lane.b32.xlu2 %v1708_v60, %s10409_s18 }
 0x5ea   : > { %1725 = vrot.lane.b32.xlu0 %v1709_v16, %s10409_s18  ;;  %v6000_v16 = vld [vmem:[%s10621_s3 + $0x118] sm:$0xff]  ;;  %s10428_s18 = smov 76  }
 0x5f1   : > { %1771 = vperm.xlu1 %6253, %v5999_v4   ;;  %1751 = vrot.lane.b32.xlu2 %v1749_v48, %s10398_s11 }
 0x5f2   : > { %1753 = vrot.lane.b32.xlu0 %v1750_v52, %s10398_s11  ;;  %s10419_s11 = smov 77  }
 0x5f9   : > { %1776 = vperm.xlu2 %6252, %v6000_v16  }
 0x63b   : > { %v7335_v38 = vpop.permute.xlu2 %1717 }
 0x63c   : > { %10680 = vst [vmem:[#allocation56_spill] sm:$0xff] %v7335_v38  ;;  %v6001_v38 = vld [vmem:[%s10312_s9 + $0x24] sm:$0x3] }
 0x643   : > { %v7341_v33 = vpop.permute.xlu2 %1723 }
 0x644   : > { %10683 = vst [vmem:[#allocation59_spill] sm:$0xff] %v7341_v33 }
 0x64b   : > { %v1752_v61 = vpop.permute.xlu2 %1751 }
 0x64c   : > { %v1760_v20 = vmul.f32 %v1752_v61, %v6761_v35 }
 0x653   : > { %v7337_v60 = vpop.permute.xlu1 %1721 }
 0x654   : > { %10681 = vst [vmem:[#allocation57_spill] sm:$0xff] %v7337_v60  ;;  %v7339_v53 = vpop.permute.xlu0 %1719 }
 0x655   : > { %10682 = vst [vmem:[#allocation58_spill] sm:$0xff] %v7339_v53 }
 0x65b   : > { %v7343_v47 = vpop.permute.xlu1 %1727 }
 0x65c   : > { %10684 = vst [vmem:[#allocation60_spill] sm:$0xff] %v7343_v47  ;;  %v7345_v24 = vpop.permute.xlu0 %1725  ;;  %v1777_v47 = vpop.permute.xlu2 %1776 }
 0x65d   : > { %10685 = vst [vmem:[#allocation61_spill] sm:$0xff] %v7345_v24  ;;  %v1763_v24 = vmul.f32 %v1752_v61, %v6879_v11 }
 0x65f   : > { %v1782_v60 = vmul.f32 %v1777_v47, %v1763_v24  ;;  %v1824_v24 = vperm.slane %v6001_v38, 1 }
 0x663   : > { %v1772_v34 = vpop.permute.xlu1 %1771 }
 0x664   : > { %v1754_v1 = vpop.permute.xlu0 %1753  ;;  %v1779_v41 = vmul.f32 %v1772_v34, %v1760_v20 }
 0x665   : > { %v1756_v48 = vsel %vm10400_vm9, %v1752_v61, %v1754_v1  ;;  %v1762_v4 = vmul.f32 0.0, %v1754_v1  ;;  %vm10411_vm9 = vcmask 138240  }
 0x666   : > { %v1761_v52 = vmul.f32 %v1756_v48, %v6786_v55  ;;  %1791 = vrot.lane.b32.xlu0 %v1779_v41, %s10407_s1  ;;  %v1764_v20 = vmul.f32 %v1756_v48, %v6894_v21 }
 0x667   : > { %v1781_v16 = vmul.f32 %v1772_v34, %v1762_v4  ;;  %v1784_v1 = vmul.f32 %v1777_v47, %v1762_v4 }
 0x668   : > { %v1780_v33 = vmul.f32 %v1772_v34, %v1761_v52  ;;  %v1783_v41 = vmul.f32 %v1777_v47, %v1764_v20  ;;  %v1823_v34 = vperm.slane %v6001_v38, 0 }
 0x669   : > { %1795 = vrot.lane.b32.xlu2 %v1781_v16, %s10407_s1 }
 0x66a   : > { %1793 = vrot.lane.b32.xlu1 %v1780_v33, %s10407_s1  ;;  %v6002_v33 = vld [vmem:[%s10621_s3 + $0x120] sm:$0xff] }
 0x66e   : > { %1797 = vrot.lane.b32.xlu0 %v1782_v60, %s10407_s1  ;;  %v6003_v60 = vld [vmem:[%s10621_s3 + $0x128] sm:$0xff] }
 0x671   : > { %1801 = vrot.lane.b32.xlu2 %v1784_v1, %s10407_s1 }
 0x672   : > { %1799 = vrot.lane.b32.xlu1 %v1783_v41, %s10407_s1  ;;  %s10442_s1 = smov 32  }
 0x676   : > { %1825 = vrot.lane.b32.xlu0 %v1823_v34, %s10405_s12 }
 0x679   : > { %1845 = vperm.xlu2 %6252, %v6002_v33  }
 0x67a   : > { %1827 = vrot.lane.b32.xlu1 %v1824_v24, %s10405_s12  ;;  %s10490_s12 = smov 34  }
 0x67e   : > { %1850 = vperm.xlu0 %6251, %v6003_v60  }
 0x6c3   : > { %v7369_v47 = vpop.permute.xlu2 %1795 }
 0x6c4   : > { %10686 = vst [vmem:[#allocation62_spill] sm:$0xff] %v7369_v47 }
 0x6cb   : > { %v7375_v4 = vpop.permute.xlu2 %1801 }
 0x6cc   : > { %10689 = vst [vmem:[#allocation65_spill] sm:$0xff] %v7375_v4 }
 0x6d3   : > { %v1846_v1 = vpop.permute.xlu2 %1845 }
 0x6d8   : > { %v7371_v61 = vpop.permute.xlu0 %1791 }
 0x6d9   : > { %10687 = vst [vmem:[#allocation63_spill] sm:$0xff] %v7371_v61 }
 0x6dc   : > { %v7373_v48 = vpop.permute.xlu1 %1793 }
 0x6dd   : > { %10688 = vst [vmem:[#allocation64_spill] sm:$0xff] %v7373_v48 }
 0x6e0   : > { %v7377_v52 = vpop.permute.xlu0 %1797 }
 0x6e1   : > { %10690 = vst [vmem:[#allocation66_spill] sm:$0xff] %v7377_v52 }
 0x6e4   : > { %v7379_v16 = vpop.permute.xlu1 %1799 }
 0x6e5   : > { %10691 = vst [vmem:[#allocation67_spill] sm:$0xff] %v7379_v16 }
 0x6e8   : > { %v1826_v38 = vpop.permute.xlu0 %1825 }
 0x6e9   : > { %v1834_v20 = vmul.f32 %v1826_v38, %v6761_v35  ;;  %v1837_v16 = vmul.f32 %v1826_v38, %v6879_v11 }
 0x6eb   : > { %v1853_v41 = vmul.f32 %v1846_v1, %v1834_v20 }
 0x6ec   : > { %v1828_v34 = vpop.permute.xlu1 %1827 }
 0x6ed   : > { %v1830_v33 = vsel %vm10411_vm9, %v1826_v38, %v1828_v34  ;;  %v1836_v24 = vmul.f32 0.0, %v1828_v34  ;;  %1865 = vrot.lane.b32.xlu1 %v1853_v41, %s10419_s11  ;;  %v6004_v41 = vld [vmem:[%s10312_s9 + $0x26] sm:$0x3]  ;;  %vm10421_vm9 = vcmask 146432  }
 0x6ee   : > { %v1835_v60 = vmul.f32 %v1830_v33, %v6786_v55  ;;  %v1838_v20 = vmul.f32 %v1830_v33, %v6894_v21 }
 0x6ef   : > { %v1855_v4 = vmul.f32 %v1846_v1, %v1836_v24 }
 0x6f0   : > { %v1854_v47 = vmul.f32 %v1846_v1, %v1835_v60  ;;  %v1851_v52 = vpop.permute.xlu0 %1850  ;;  %v1897_v1 = vperm.slane %v6004_v41, 0 }
 0x6f1   : > { %1869 = vrot.lane.b32.xlu0 %v1855_v4, %s10419_s11  ;;  %v1856_v61 = vmul.f32 %v1851_v52, %v1837_v16  ;;  %v1858_v34 = vmul.f32 %v1851_v52, %v1836_v24  ;;  %v1857_v48 = vmul.f32 %v1851_v52, %v1838_v20  ;;  %v6006_v4 = vld [vmem:[%s10621_s3 + $0x138] sm:$0xff] }
 0x6f2   : > { %1867 = vrot.lane.b32.xlu2 %v1854_v47, %s10419_s11  ;;  %v6005_v47 = vld [vmem:[%s10621_s3 + $0x130] sm:$0xff] }
 0x6f5   : > { %1871 = vrot.lane.b32.xlu1 %v1856_v61, %s10419_s11  ;;  %v1898_v61 = vperm.slane %v6004_v41, 1 }
 0x6f9   : > { %1875 = vrot.lane.b32.xlu0 %v1858_v34, %s10419_s11 }
 0x6fa   : > { %1873 = vrot.lane.b32.xlu2 %v1857_v48, %s10419_s11  ;;  %s10446_s11 = smov 64  }
 0x6fd   : > { %1899 = vrot.lane.b32.xlu1 %v1897_v1, %s10417_s20 }
 0x701   : > { %1919 = vperm.xlu0 %6251, %v6005_v47  }
 0x702   : > { %1901 = vrot.lane.b32.xlu2 %v1898_v61, %s10417_s20  ;;  %s10990_s20 = smov 80  }
 0x705   : > { %1924 = vperm.xlu1 %6253, %v6006_v4  }
 0x74c   : > { %v7403_v52 = vpop.permute.xlu2 %1867 }
 0x74d   : > { %10692 = vst [vmem:[#allocation68_spill] sm:$0xff] %v7403_v52 }
 0x754   : > { %v7409_v38 = vpop.permute.xlu2 %1873 }
 0x755   : > { %10695 = vst [vmem:[#allocation71_spill] sm:$0xff] %v7409_v38 }
 0x75c   : > { %v1902_v60 = vpop.permute.xlu2 %1901 }
 0x75d   : > { %v1910_v41 = vmul.f32 0.0, %v1902_v60 }
 0x75f   : > { %v7405_v16 = vpop.permute.xlu1 %1865 }
 0x760   : > { %10693 = vst [vmem:[#allocation69_spill] sm:$0xff] %v7405_v16 }
 0x763   : > { %v7407_v48 = vpop.permute.xlu0 %1869 }
 0x764   : > { %10694 = vst [vmem:[#allocation70_spill] sm:$0xff] %v7407_v48 }
 0x767   : > { %v7411_v33 = vpop.permute.xlu1 %1871 }
 0x768   : > { %10696 = vst [vmem:[#allocation72_spill] sm:$0xff] %v7411_v33 }
 0x76b   : > { %v7413_v24 = vpop.permute.xlu0 %1875 }
 0x76c   : > { %10697 = vst [vmem:[#allocation73_spill] sm:$0xff] %v7413_v24 }
 0x76f   : > { %v1900_v20 = vpop.permute.xlu1 %1899 }
 0x770   : > { %v1904_v34 = vsel %vm10421_vm9, %v1900_v20, %v1902_v60  ;;  %v1908_v1 = vmul.f32 %v1900_v20, %v6761_v35  ;;  %v1911_v60 = vmul.f32 %v1900_v20, %v6879_v11  ;;  %vm10430_vm9 = vcmask 244736  }
 0x771   : > { %v1909_v47 = vmul.f32 %v1904_v34, %v6786_v55  ;;  %v1912_v33 = vmul.f32 %v1904_v34, %v6894_v21  ;;  %v6008_v34 = vld [vmem:[%s10621_s3 + $0x140] sm:$0xff] }
 0x773   : > { %v1920_v61 = vpop.permute.xlu0 %1919 }
 0x774   : > { %v1927_v4 = vmul.f32 %v1920_v61, %v1908_v1  ;;  %v1928_v16 = vmul.f32 %v1920_v61, %v1909_v47  ;;  %v1929_v48 = vmul.f32 %v1920_v61, %v1910_v41 }
 0x776   : > { %1943 = vrot.lane.b32.xlu1 %v1929_v48, %s10428_s18  ;;  %1941 = vrot.lane.b32.xlu0 %v1928_v16, %s10428_s18  ;;  %v6007_v16 = vld [vmem:[%s10312_s9 + $0x28] sm:$0x3] }
 0x777   : > { %1939 = vrot.lane.b32.xlu2 %v1927_v4, %s10428_s18  ;;  %v1925_v24 = vpop.permute.xlu1 %1924  ;;  %v1972_v48 = vperm.slane %v6007_v16, 1  ;;  %v1971_v1 = vperm.slane %v6007_v16, 0 }
 0x778   : > { %v1931_v38 = vmul.f32 %v1925_v24, %v1912_v33  ;;  %v1932_v52 = vmul.f32 %v1925_v24, %v1910_v41  ;;  %v1930_v53 = vmul.f32 %v1925_v24, %v1911_v60 }
 0x77e   : > { %1949 = vrot.lane.b32.xlu1 %v1932_v52, %s10428_s18  ;;  %1947 = vrot.lane.b32.xlu0 %v1931_v38, %s10428_s18 }
 0x77f   : > { %1945 = vrot.lane.b32.xlu2 %v1930_v53, %s10428_s18  ;;  %v6009_v53 = vld [vmem:[%s10621_s3 + $0x148] sm:$0xff]  ;;  %s10444_s18 = smov 63  }
 0x786   : > { %1993 = vperm.xlu1 %6253, %v6008_v34   ;;  %1975 = vrot.lane.b32.xlu0 %v1972_v48, %s10426_s0 }
 0x787   : > { %1973 = vrot.lane.b32.xlu2 %v1971_v1, %s10426_s0 }
 0x78f   : > { %1998 = vperm.xlu2 %6252, %v6009_v53  }
 0x7d1   : > { %v7437_v52 = vpop.permute.xlu2 %1939 }
 0x7d2   : > { %10698 = vst [vmem:[#allocation74_spill] sm:$0xff] %v7437_v52 }
 0x7d9   : > { %v7443_v24 = vpop.permute.xlu2 %1945 }
 0x7da   : > { %10701 = vst [vmem:[#allocation77_spill] sm:$0xff] %v7443_v24 }
 0x7e1   : > { %v1974_v47 = vpop.permute.xlu2 %1973 }
 0x7e2   : > { %v1982_v61 = vmul.f32 %v1974_v47, %v6761_v35 }
 0x7e8   : > { %v7439_v38 = vpop.permute.xlu1 %1943  ;;  %v7441_v33 = vpop.permute.xlu0 %1941 }
 0x7e9   : > { %10699 = vst [vmem:[#allocation75_spill] sm:$0xff] %v7439_v38 }
 0x7ea   : > { %10700 = vst [vmem:[#allocation76_spill] sm:$0xff] %v7441_v33  ;;  %v6010_v33 = vld [vmem:[%s10312_s9 + $0x2a] sm:$0x3] }
 0x7f0   : > { %v7445_v20 = vpop.permute.xlu1 %1949  ;;  %v7447_v41 = vpop.permute.xlu0 %1947 }
 0x7f1   : > { %10702 = vst [vmem:[#allocation78_spill] sm:$0xff] %v7445_v20  ;;  %v1999_v20 = vpop.permute.xlu2 %1998 }
 0x7f2   : > { %10703 = vst [vmem:[#allocation79_spill] sm:$0xff] %v7447_v41  ;;  %v1985_v41 = vmul.f32 %v1974_v47, %v6879_v11 }
 0x7f8   : > { %v1994_v4 = vpop.permute.xlu1 %1993  ;;  %v1976_v60 = vpop.permute.xlu0 %1975 }
 0x7f9   : > { %v2001_v16 = vmul.f32 %v1994_v4, %v1982_v61  ;;  %v1978_v48 = vsel %vm10430_vm9, %v1974_v47, %v1976_v60  ;;  %v1984_v34 = vmul.f32 0.0, %v1976_v60  ;;  %v2004_v61 = vmul.f32 %v1999_v20, %v1985_v41 }
 0x7fa   : > { %v1983_v1 = vmul.f32 %v1978_v48, %v6786_v55  ;;  %v1986_v38 = vmul.f32 %v1978_v48, %v6894_v21  ;;  %v2045_v47 = vperm.slane %v6010_v33, 1  ;;  %vm10436_vm9 = vcmask 252928  }
 0x7fb   : > { %v2003_v53 = vmul.f32 %v1994_v4, %v1984_v34  ;;  %2013 = vrot.lane.b32.xlu0 %v2001_v16, %s10446_s11  ;;  %v2006_v52 = vmul.f32 %v1999_v20, %v1984_v34 }
 0x7fc   : > { %v2002_v24 = vmul.f32 %v1994_v4, %v1983_v1  ;;  %v2005_v60 = vmul.f32 %v1999_v20, %v1986_v38  ;;  %v2044_v4 = vperm.slane %v6010_v33, 0  ;;  %v6012_v38 = vld [vmem:[%s10621_s3 + $0x158] sm:$0xff] }
 0x7fd   : > { %2017 = vrot.lane.b32.xlu2 %v2003_v53, %s10446_s11 }
 0x7fe   : > { %2015 = vrot.lane.b32.xlu1 %v2002_v24, %s10446_s11  ;;  %v6011_v24 = vld [vmem:[%s10621_s3 + $0x150] sm:$0xff] }
 0x803   : > { %2019 = vrot.lane.b32.xlu0 %v2004_v61, %s10446_s11 }
 0x805   : > { %2023 = vrot.lane.b32.xlu2 %v2006_v52, %s10446_s11 }
 0x806   : > { %2021 = vrot.lane.b32.xlu1 %v2005_v60, %s10446_s11  ;;  %s10486_s11 = smov 61  }
 0x80b   : > { %2046 = vrot.lane.b32.xlu0 %v2044_v4, %s10434_s30 }
 0x80d   : > { %2066 = vperm.xlu2 %6252, %v6011_v24  }
 0x80e   : > { %2048 = vrot.lane.b32.xlu1 %v2045_v47, %s10434_s30  ;;  %s10488_s30 = smov 62  }
 0x813   : > { %2071 = vperm.xlu0 %6251, %v6012_v38  }
 0x857   : > { %v7471_v52 = vpop.permute.xlu2 %2017 }
 0x858   : > { %10704 = vst [vmem:[#allocation80_spill] sm:$0xff] %v7471_v52 }
 0x85f   : > { %v7477_v16 = vpop.permute.xlu2 %2023 }
 0x860   : > { %10707 = vst [vmem:[#allocation83_spill] sm:$0xff] %v7477_v16 }
 0x867   : > { %v2067_v53 = vpop.permute.xlu2 %2066 }
 0x86d   : > { %v7473_v20 = vpop.permute.xlu0 %2013 }
 0x86e   : > { %10705 = vst [vmem:[#allocation81_spill] sm:$0xff] %v7473_v20  ;;  %v6013_v20 = vld [vmem:[%s10312_s9 + $0x2c] sm:$0x3] }
 0x870   : > { %v7475_v41 = vpop.permute.xlu1 %2015 }
 0x871   : > { %10706 = vst [vmem:[#allocation82_spill] sm:$0xff] %v7475_v41 }
 0x875   : > { %v7479_v33 = vpop.permute.xlu0 %2019 }
 0x876   : > { %10708 = vst [vmem:[#allocation84_spill] sm:$0xff] %v7479_v33 }
 0x878   : > { %v7481_v48 = vpop.permute.xlu1 %2021 }
 0x879   : > { %10709 = vst [vmem:[#allocation85_spill] sm:$0xff] %v7481_v48 }
 0x87d   : > { %v2047_v34 = vpop.permute.xlu0 %2046 }
 0x87e   : > { %v2055_v1 = vmul.f32 %v2047_v34, %v6761_v35  ;;  %v2058_v48 = vmul.f32 %v2047_v34, %v6879_v11 }
 0x880   : > { %v2049_v61 = vpop.permute.xlu1 %2048  ;;  %v2074_v60 = vmul.f32 %v2067_v53, %v2055_v1 }
 0x881   : > { %v2051_v4 = vsel %vm10436_vm9, %v2047_v34, %v2049_v61  ;;  %v2057_v24 = vmul.f32 0.0, %v2049_v61  ;;  %vm2124_vm9 = vcmask 261120  }
 0x882   : > { %v2056_v47 = vmul.f32 %v2051_v4, %v6786_v55  ;;  %2086 = vrot.lane.b32.xlu1 %v2074_v60, %s10444_s18  ;;  %v2059_v1 = vmul.f32 %v2051_v4, %v6894_v21 }
 0x883   : > { %v2076_v38 = vmul.f32 %v2067_v53, %v2057_v24 }
 0x884   : > { %v2075_v16 = vmul.f32 %v2067_v53, %v2056_v47  ;;  %v2118_v53 = vperm.slane %v6013_v20, 0 }
 0x885   : > { %v2072_v33 = vpop.permute.xlu0 %2071  ;;  %2090 = vrot.lane.b32.xlu0 %v2076_v38, %s10444_s18 }
 0x886   : > { %2088 = vrot.lane.b32.xlu2 %v2075_v16, %s10444_s18  ;;  %v2077_v52 = vmul.f32 %v2072_v33, %v2058_v48  ;;  %v2079_v61 = vmul.f32 %v2072_v33, %v2057_v24  ;;  %v2078_v60 = vmul.f32 %v2072_v33, %v2059_v1  ;;  %v6014_v16 = vld [vmem:[%s10621_s3 + $0x160] sm:$0xff]  ;;  %v2119_v48 = vperm.slane %v6013_v20, 1 }
 0x88a   : > { %2092 = vrot.lane.b32.xlu1 %v2077_v52, %s10444_s18  ;;  %v6015_v52 = vld [vmem:[%s10621_s3 + $0x168] sm:$0xff] }
 0x88d   : > { %2096 = vrot.lane.b32.xlu0 %v2079_v61, %s10444_s18 }
 0x88e   : > { %2094 = vrot.lane.b32.xlu2 %v2078_v60, %s10444_s18  ;;  %s10856_s18 = smov 111  }
 0x892   : > { %2120 = vrot.lane.b32.xlu1 %v2118_v53, %s10442_s1 }
 0x895   : > { %2140 = vperm.xlu0 %6251, %v6014_v16  }
 0x896   : > { %2122 = vrot.lane.b32.xlu2 %v2119_v48, %s10442_s1  ;;  %s10452_s1 = smov 33  }
 0x89a   : > { %2145 = vperm.xlu1 %6253, %v6015_v52  }
 0x8e0   : > { %v7505_v33 = vpop.permute.xlu2 %2088 }
 0x8e1   : > { %10710 = vst [vmem:[#allocation86_spill] sm:$0xff] %v7505_v33 }
 0x8e8   : > { %v7511_v24 = vpop.permute.xlu2 %2094 }
 0x8e9   : > { %10713 = vst [vmem:[#allocation89_spill] sm:$0xff] %v7511_v24 }
 0x8f0   : > { %v2123_v20 = vpop.permute.xlu2 %2122 }
 0x8f1   : > { %v2131_v1 = vmul.f32 0.0, %v2123_v20 }
 0x8f4   : > { %v7507_v34 = vpop.permute.xlu1 %2086 }
 0x8f5   : > { %10711 = vst [vmem:[#allocation87_spill] sm:$0xff] %v7507_v34 }
 0x8f7   : > { %v7509_v4 = vpop.permute.xlu0 %2090 }
 0x8f8   : > { %10712 = vst [vmem:[#allocation88_spill] sm:$0xff] %v7509_v4 }
 0x8fc   : > { %v7513_v47 = vpop.permute.xlu1 %2092 }
 0x8fd   : > { %10714 = vst [vmem:[#allocation90_spill] sm:$0xff] %v7513_v47 }
 0x8ff   : > { %v7515_v38 = vpop.permute.xlu0 %2096 }
 0x900   : > { %10715 = vst [vmem:[#allocation91_spill] sm:$0xff] %v7515_v38 }
 0x904   : > { %v2121_v61 = vpop.permute.xlu1 %2120 }
 0x905   : > { %v2125_v60 = vsel %vm2124_vm9, %v2121_v61, %v2123_v20  ;;  %v2129_v53 = vmul.f32 %v2121_v61, %v6761_v35  ;;  %v2132_v47 = vmul.f32 %v2121_v61, %v6879_v11 }
 0x906   : > { %v2130_v16 = vmul.f32 %v2125_v60, %v6786_v55  ;;  %v2133_v20 = vmul.f32 %v2125_v60, %v6894_v21 }
 0x907   : > { %v2141_v48 = vpop.permute.xlu0 %2140 }
 0x908   : > { %v2148_v52 = vmul.f32 %v2141_v48, %v2129_v53  ;;  %v2149_v34 = vmul.f32 %v2141_v48, %v2130_v16  ;;  %v2150_v4 = vmul.f32 %v2141_v48, %v2131_v1 }
 0x90a   : > { %2164 = vrot.lane.b32.xlu1 %v2150_v4, %s10488_s30  ;;  %2160 = vrot.lane.b32.xlu2 %v2148_v52, %s10488_s30  ;;  %v6016_v4 = vld [vmem:[%s10312_s9 + $0x2e] sm:$0x3] }
 0x90b   : > { %2162 = vrot.lane.b32.xlu0 %v2149_v34, %s10488_s30  ;;  %v2192_v53 = vperm.slane %v6016_v4, 0  ;;  %v6017_v34 = vld [vmem:[%s10621_s3 + $0x170] sm:$0xff]  ;;  %v2193_v61 = vperm.slane %v6016_v4, 1 }
 0x90c   : > { %v2146_v38 = vpop.permute.xlu1 %2145 }
 0x90d   : > { %v2151_v24 = vmul.f32 %v2146_v38, %v2132_v47  ;;  %v2153_v33 = vmul.f32 %v2146_v38, %v2131_v1  ;;  %v2152_v41 = vmul.f32 %v2146_v38, %v2133_v20 }
 0x912   : > { %2170 = vrot.lane.b32.xlu1 %v2153_v33, %s10488_s30  ;;  %2166 = vrot.lane.b32.xlu2 %v2151_v24, %s10488_s30 }
 0x913   : > { %2168 = vrot.lane.b32.xlu0 %v2152_v41, %s10488_s30  ;;  %v6018_v41 = vld [vmem:[%s10621_s3 + $0x178] sm:$0xff]  ;;  %s10883_s30 = smov 113  }
 0x91a   : > { %2214 = vperm.xlu1 %6253, %v6017_v34   ;;  %2194 = vrot.lane.b32.xlu2 %v2192_v53, %s10452_s1 }
 0x91b   : > { %2196 = vrot.lane.b32.xlu0 %v2193_v61, %s10452_s1  ;;  %s10484_s1 = smov 60  }
 0x922   : > { %2219 = vperm.xlu2 %6252, %v6018_v41  }
 0x964   : > { %v7539_v33 = vpop.permute.xlu2 %2160 }
 0x965   : > { %10716 = vst [vmem:[#allocation92_spill] sm:$0xff] %v7539_v33  ;;  %v6019_v33 = vld [vmem:[%s10312_s9 + $0x30] sm:$0x3] }
 0x96c   : > { %v7545_v38 = vpop.permute.xlu2 %2166 }
 0x96d   : > { %10718 = vst [vmem:[#allocation94_spill] sm:$0xff] %v7545_v38 }
 0x974   : > { %v2195_v16 = vpop.permute.xlu2 %2194 }
 0x975   : > { %v2203_v48 = vmul.f32 %v2195_v16, %v6761_v35 }
 0x97c   : > { %v7541_v24 = vpop.permute.xlu1 %2164 }
 0x97d   : > { %10717 = vst [vmem:[#allocation93_spill] sm:$0xff] %v7541_v24  ;;  %v7543_v47 = vpop.permute.xlu0 %2162 }
 0x984   : > { %v7547_v1 = vpop.permute.xlu1 %2170 }
 0x985   : > { %10719 = vst [vmem:[#allocation95_spill] sm:$0xff] %v7547_v1  ;;  %v7549_v60 = vpop.permute.xlu0 %2168  ;;  %v2220_v1 = vpop.permute.xlu2 %2219 }
 0x986   : > { %10720 = vst [vmem:[#allocation96_spill] sm:$0xff] %v7549_v60  ;;  %v2206_v60 = vmul.f32 %v2195_v16, %v6879_v11 }
 0x988   : > { %v2225_v24 = vmul.f32 %v2220_v1, %v2206_v60  ;;  %v2267_v60 = vperm.slane %v6019_v33, 1 }
 0x98c   : > { %v2215_v52 = vpop.permute.xlu1 %2214 }
 0x98d   : > { %v2197_v20 = vpop.permute.xlu0 %2196  ;;  %v2222_v4 = vmul.f32 %v2215_v52, %v2203_v48 }
 0x98e   : > { %v2199_v53 = vsel %vm10454_vm8, %v2195_v16, %v2197_v20  ;;  %v2205_v34 = vmul.f32 0.0, %v2197_v20  ;;  %vm2272_vm8 = vcmask 277504  }
 0x98f   : > { %v2204_v61 = vmul.f32 %v2199_v53, %v6786_v55  ;;  %2234 = vrot.lane.b32.xlu0 %v2222_v4, %s10486_s11  ;;  %v2207_v48 = vmul.f32 %v2199_v53, %v6894_v21 }
 0x990   : > { %v2224_v41 = vmul.f32 %v2215_v52, %v2205_v34  ;;  %v2227_v20 = vmul.f32 %v2220_v1, %v2205_v34 }
 0x991   : > { %v2223_v38 = vmul.f32 %v2215_v52, %v2204_v61  ;;  %v2226_v4 = vmul.f32 %v2220_v1, %v2207_v48  ;;  %v2266_v52 = vperm.slane %v6019_v33, 0 }
 0x992   : > { %2238 = vrot.lane.b32.xlu2 %v2224_v41, %s10486_s11 }
 0x993   : > { %2236 = vrot.lane.b32.xlu1 %v2223_v38, %s10486_s11  ;;  %v6020_v38 = vld [vmem:[%s10621_s3 + $0x180] sm:$0xff] }
 0x997   : > { %2240 = vrot.lane.b32.xlu0 %v2225_v24, %s10486_s11  ;;  %v6021_v24 = vld [vmem:[%s10621_s3 + $0x188] sm:$0xff] }
 0x99a   : > { %2244 = vrot.lane.b32.xlu2 %v2227_v20, %s10486_s11 }
 0x99b   : > { %2242 = vrot.lane.b32.xlu1 %v2226_v4, %s10486_s11  ;;  %s10492_s11 = sand.u32 1, %s6379_s14  }
 0x99f   : > { %2268 = vrot.lane.b32.xlu0 %v2266_v52, %s10490_s12 }
 0x9a2   : > { %2288 = vperm.xlu2 %6252, %v6020_v38  }
 0x9a3   : > { %2270 = vrot.lane.b32.xlu1 %v2267_v60, %s10490_s12 }
 0x9a7   : > { %2293 = vperm.xlu0 %6251, %v6021_v24  }
 0x9ec   : > { %v7573_v1 = vpop.permute.xlu2 %2238 }
 0x9ed   : > { %10721 = vst [vmem:[#allocation97_spill] sm:$0xff] %v7573_v1 }
 0x9f4   : > { %v7579_v34 = vpop.permute.xlu2 %2244 }
 0x9f5   : > { %10724 = vst [vmem:[#allocation100_spill] sm:$0xff] %v7579_v34 }
 0x9fc   : > { %v2289_v20 = vpop.permute.xlu2 %2288 }
 0xa01   : > { %v7575_v16 = vpop.permute.xlu0 %2234 }
 0xa02   : > { %10722 = vst [vmem:[#allocation98_spill] sm:$0xff] %v7575_v16 }
 0xa05   : > { %v7577_v53 = vpop.permute.xlu1 %2236 }
 0xa06   : > { %10723 = vst [vmem:[#allocation99_spill] sm:$0xff] %v7577_v53 }
 0xa09   : > { %v7581_v61 = vpop.permute.xlu0 %2240 }
 0xa0a   : > { %10725 = vst [vmem:[#allocation101_spill] sm:$0xff] %v7581_v61 }
 0xa0d   : > { %v7583_v41 = vpop.permute.xlu1 %2242 }
 0xa0e   : > { %10726 = vst [vmem:[#allocation102_spill] sm:$0xff] %v7583_v41 }
 0xa11   : > { %v2269_v33 = vpop.permute.xlu0 %2268 }
 0xa12   : > { %v2277_v48 = vmul.f32 %v2269_v33, %v6761_v35  ;;  %v2280_v41 = vmul.f32 %v2269_v33, %v6879_v11 }
 0xa14   : > { %v2296_v4 = vmul.f32 %v2289_v20, %v2277_v48 }
 0xa15   : > { %v2271_v52 = vpop.permute.xlu1 %2270 }
 0xa16   : > { %v2273_v38 = vsel %vm2272_vm8, %v2269_v33, %v2271_v52  ;;  %v2279_v60 = vmul.f32 0.0, %v2271_v52  ;;  %2308 = vrot.lane.b32.xlu1 %v2296_v4, %s10484_s1 }
 0xa17   : > { %v2278_v24 = vmul.f32 %v2273_v38, %v6786_v55  ;;  %v2281_v48 = vmul.f32 %v2273_v38, %v6894_v21 }
 0xa18   : > { %v2298_v34 = vmul.f32 %v2289_v20, %v2279_v60 }
 0xa19   : > { %v2297_v1 = vmul.f32 %v2289_v20, %v2278_v24  ;;  %v2294_v61 = vpop.permute.xlu0 %2293  ;;  %v551_v20 = vmul.f32 %v6672_v12, %v6786_v55 }
 0xa1a   : > { %2312 = vrot.lane.b32.xlu0 %v2298_v34, %s10484_s1  ;;  %v2299_v16 = vmul.f32 %v2294_v61, %v2280_v41  ;;  %v2301_v52 = vmul.f32 %v2294_v61, %v2279_v60  ;;  %v2300_v53 = vmul.f32 %v2294_v61, %v2281_v48  ;;  %v554_v34 = vmul.f32 %v6672_v12, %v6894_v21 }
 0xa1b   : > { %2310 = vrot.lane.b32.xlu2 %v2297_v1, %s10484_s1  ;;  %v549_v1 = vmul.f32 0.0, %v6666_v9  ;;  %v569_v41 = vmul.f32 %v6662_v6, %v551_v20  ;;  %v647_v60 = vsel %vm10468_vm3, %v6964_v26, %v6994_v58 }
 0xa1c   : > { %v572_v33 = vmul.f32 %v6664_v7, %v554_v34 }
 0xa1d   : > { %v585_v38 = vadd.f32 %v6674_v13, %v569_v41 }
 0xa1e   : > { %2314 = vrot.lane.b32.xlu1 %v2299_v16, %s10484_s1  ;;  %v545_v16 = vsel %vm10466_vm7, %v6666_v9, %v6672_v12  ;;  %v588_v48 = vadd.f32 %v6678_v15, %v572_v33 }
 0xa1f   : > { %v550_v61 = vmul.f32 %v545_v16, %v6761_v35  ;;  %v553_v4 = vmul.f32 %v545_v16, %v6879_v11  ;;  %v659_v12 = vadd.f32 %v6986_v37, %v585_v38  ;;  %v648_v16 = vsel %vm10468_vm3, %v6994_v58, %v6986_v37 }
 0xa20   : > { %v662_v41 = vadd.f32 %v7016_v51, %v588_v48  ;;  %v722_v37 = vsel %vm10470_vm1, %v6990_v59, %v7004_v46  ;;  %v795_v58 = vsel %vm10463_vm4, %v6944_v2, %v7010_v22  ;;  %v724_v2 = vsel %vm10470_vm1, %v7024_v54, %v7026_v10 }
 0xa21   : > { %v568_v9 = vmul.f32 %v6662_v6, %v550_v61  ;;  %v571_v34 = vmul.f32 %v6664_v7, %v553_v4  ;;  %v733_v26 = vadd.f32 %v7004_v46, %v659_v12  ;;  %v869_v12 = vsel %vm10462_vm15, %v6984_v49, %v7006_v45 }
 0xa22   : > { %2318 = vrot.lane.b32.xlu0 %v2301_v52, %s10484_s1  ;;  %v570_v52 = vmul.f32 %v6664_v7, %v549_v1  ;;  %v736_v33 = vadd.f32 %v7026_v10, %v662_v41  ;;  %v872_v49 = vsel %vm10462_vm15, %v7034_v14, %v7030_v56 }
 0xa23   : > { %2316 = vrot.lane.b32.xlu2 %v2300_v53, %s10484_s1  ;;  %v567_v53 = vmul.f32 %v6662_v6, %v549_v1  ;;  %v649_v6 = vsel %vm10468_vm3, %v6978_v30, %v7022_v0  ;;  %v721_v1 = vsel %vm10470_vm1, %v6961_v8, %v6990_v59  ;;  %v584_v7 = vadd.f32 %v6674_v13, %v568_v9  ;;  %s5937_s1 = sshll.u32 %s10492_s11, 7  ;;  %s10898_s11 = smov 114  }
 0xa24   : > { %v586_v61 = vadd.f32 %v6678_v15, %v570_v52  ;;  %v650_v30 = vsel %vm10468_vm3, %v7022_v0, %v7016_v51  ;;  %v587_v8 = vadd.f32 %v6678_v15, %v571_v34  ;;  %v796_v59 = vsel %vm10463_vm4, %v7010_v22, %v7000_v25  ;;  %s8152_s3 = scalar_lea.vmem [#allocation4], %s5937_s1  ;;  %s10951_s1 = smov 1  }
 0xa25   : > { %v583_v24 = vadd.f32 %v6674_v13, %v567_v53  ;;  %v658_v53 = vadd.f32 %v648_v16, %v584_v7  ;;  %v807_v13 = vadd.f32 %v7000_v25, %v733_v26  ;;  %v810_v15 = vadd.f32 %v7028_v17, %v736_v33 }
 0xa26   : > { %v660_v38 = vadd.f32 %v649_v6, %v586_v61  ;;  %v661_v0 = vadd.f32 %v650_v30, %v587_v8  ;;  %v798_v25 = vsel %vm10463_vm4, %v7032_v19, %v7028_v17  ;;  %v1016_v16 = vsel %vm10483_vm5, %v6968_v62, %v7020_v31 }
 0xa27   : > { %v657_v20 = vadd.f32 %v647_v60, %v583_v24  ;;  %v732_v46 = vadd.f32 %v722_v37, %v658_v53  ;;  %v723_v60 = vsel %vm10470_vm1, %v6970_v3, %v7024_v54  ;;  %v797_v24 = vsel %vm10463_vm4, %v6959_v5, %v7032_v19  ;;  %v10727_v37 = vld [vmem:[#allocation7_spill] sm:$0xff]  ;;  %v10728_v53 = vld [vmem:[#allocation8_spill] sm:$0xff] }
 0xa28   : > { %v735_v10 = vadd.f32 %v724_v2, %v661_v0  ;;  %v734_v9 = vadd.f32 %v723_v60, %v660_v38  ;;  %v870_v3 = vsel %vm10462_vm15, %v7006_v45, %v6996_v27  ;;  %v881_v54 = vadd.f32 %v6996_v27, %v807_v13  ;;  %v10732_v38 = vld [vmem:[#allocation11_spill] sm:$0xff]  ;;  %v10735_v0 = vld [vmem:[#allocation13_spill] sm:$0xff] }
 0xa29   : > { %v731_v4 = vadd.f32 %v721_v1, %v657_v20  ;;  %v806_v22 = vadd.f32 %v796_v59, %v732_v46  ;;  %v944_v5 = vsel %vm10482_vm13, %v7002_v29, %v7014_v50  ;;  %v871_v20 = vsel %vm10462_vm15, %v6992_v40, %v7034_v14 }
 0xa2a   : > { %v808_v52 = vadd.f32 %v797_v24, %v734_v9  ;;  %v809_v17 = vadd.f32 %v798_v25, %v735_v10  ;;  %v955_v19 = vadd.f32 %v7014_v50, %v881_v54  ;;  %v884_v45 = vadd.f32 %v7030_v56, %v810_v15  ;;  %v10736_v15 = vld [vmem:[#allocation16_spill] sm:$0xff] }
 0xa2b   : > { %v805_v51 = vadd.f32 %v795_v58, %v731_v4  ;;  %v943_v27 = vsel %vm10482_vm13, %v6982_v39, %v7002_v29  ;;  %v880_v34 = vadd.f32 %v870_v3, %v806_v22  ;;  %v1017_v50 = vsel %vm10483_vm5, %v7020_v31, %v7012_v42  ;;  %v10729_v4 = vld [vmem:[#allocation9_spill] sm:$0xff]  ;;  %v10737_v9 = vld [vmem:[#allocation20_spill] sm:$0xff] }
 0xa2c   : > { %v946_v40 = vsel %vm10482_vm13, %v7036_v43, %v7038_v18  ;;  %v958_v14 = vadd.f32 %v7038_v18, %v884_v45  ;;  %v882_v41 = vadd.f32 %v871_v20, %v808_v52  ;;  %v883_v6 = vadd.f32 %v872_v49, %v809_v17  ;;  %v10739_v52 = vld [vmem:[#allocation22_spill] sm:$0xff]  ;;  %v10740_v17 = vld [vmem:[#allocation19_spill] sm:$0xff] }
 0xa2d   : > { %v879_v48 = vadd.f32 %v869_v12, %v805_v51  ;;  %v954_v56 = vadd.f32 %v944_v5, %v880_v34  ;;  %v1028_v39 = vadd.f32 %v7012_v42, %v955_v19  ;;  %v1019_v62 = vsel %vm10483_vm5, %v7042_v36, %v7040_v63  ;;  %v10734_v51 = vld [vmem:[#allocation15_spill] sm:$0xff]  ;;  %v10738_v12 = vld [vmem:[#allocation17_spill] sm:$0xff]  ;;  %v10741_v45 = vld [vmem:[#allocation18_spill] sm:$0xff] }
 0xa2e   : > { %v957_v1 = vadd.f32 %v946_v40, %v883_v6  ;;  %v945_v31 = vsel %vm10482_vm13, %v6988_v57, %v7036_v43  ;;  %v1031_v7 = vadd.f32 %v7040_v63, %v958_v14  ;;  %v1018_v18 = vsel %vm10483_vm5, %v6980_v32, %v7042_v36  ;;  %v10730_v43 = vld [vmem:[#allocation10_spill] sm:$0xff]  ;;  %v10742_v34 = vld [vmem:[#allocation21_spill] sm:$0xff] }
 0xa2f   : > { %v953_v26 = vadd.f32 %v943_v27, %v879_v48  ;;  %v1027_v61 = vadd.f32 %v1017_v50, %v954_v56  ;;  %vm10465_vm15 = vcmask 891904   ;;  %v1088_v42 = vsel %vm894_vm2, %v6998_v44, %v7018_v23  ;;  %v10731_v44 = vld [vmem:[#allocation12_spill] sm:$0xff]  ;;  %v10743_v56 = vld [vmem:[#allocation27_spill] sm:$0xff]  ;;  %v10744_v6 = vld [vmem:[#allocation25_spill] sm:$0xff] }
 0xa30   : > { %v1089_v58 = vsel %vm894_vm2, %v7018_v23, %v10727_v37  ;;  %v956_v30 = vadd.f32 %v945_v31, %v882_v41  ;;  %v1030_v33 = vadd.f32 %v1019_v62, %v957_v1  ;;  %v1091_v57 = vsel %vm894_vm2, %v10729_v4, %v10728_v53  ;;  %v10733_v23 = vld [vmem:[#allocation14_spill] sm:$0xff] }
 0xa31   : > { %v1026_v29 = vadd.f32 %v1016_v16, %v953_v26  ;;  %v1090_v63 = vsel %vm894_vm2, %v10730_v43, %v10729_v4  ;;  %v1100_v32 = vadd.f32 %v10727_v37, %v1028_v39  ;;  %vm10464_vm4 = vcmask 883712   ;;  %v10745_v39 = vld [vmem:[#allocation24_spill] sm:$0xff]  ;;  %v10747_v1 = vld [vmem:[#allocation26_spill] sm:$0xff]  ;;  %v10748_v37 = vld [vmem:[#allocation29_spill] sm:$0xff] }
 0xa32   : > { %v1029_v36 = vadd.f32 %v1018_v18, %v956_v30  ;;  %v1099_v8 = vadd.f32 %v1089_v58, %v1027_v61  ;;  %v1163_v13 = vsel %vm10465_vm15, %v10732_v38, %v10731_v44  ;;  %v1162_v59 = vsel %vm10465_vm15, %v10733_v23, %v10732_v38  ;;  %v10749_v58 = vld [vmem:[#allocation31_spill] sm:$0xff]  ;;  %v10750_v4 = vld [vmem:[#allocation28_spill] sm:$0xff] }
 0xa33   : > { %v1098_v2 = vadd.f32 %v1088_v42, %v1026_v29  ;;  %v1103_v46 = vadd.f32 %v10728_v53, %v1031_v7  ;;  %v1165_v60 = vsel %vm10465_vm15, %v10735_v0, %v10734_v51  ;;  %v1164_v24 = vsel %vm10465_vm15, %v10736_v15, %v10735_v0  ;;  %v10746_v29 = vld [vmem:[#allocation23_spill] sm:$0xff]  ;;  %v10756_v15 = vld [vmem:[#allocation37_spill] sm:$0xff] }
 0xa34   : > { %v1102_v25 = vadd.f32 %v1091_v57, %v1030_v33  ;;  %v1101_v22 = vadd.f32 %v1090_v63, %v1029_v36  ;;  %v1174_v10 = vadd.f32 %v10731_v44, %v1100_v32  ;;  %v1236_v3 = vsel %vm10464_vm4, %v10738_v12, %v10737_v9  ;;  %v10751_v57 = vld [vmem:[#allocation30_spill] sm:$0xff]  ;;  %v10752_v63 = vld [vmem:[#allocation32_spill] sm:$0xff]  ;;  %v10753_v44 = vld [vmem:[#allocation33_spill] sm:$0xff] }
 0xa35   : > { %v1173_v54 = vadd.f32 %v1163_v13, %v1099_v8  ;;  %v1172_v48 = vadd.f32 %v1162_v59, %v1098_v2  ;;  %v1177_v5 = vadd.f32 %v10734_v51, %v1103_v46  ;;  %v1238_v19 = vsel %vm10464_vm4, %v10740_v17, %v10739_v52  ;;  %v10754_v59 = vld [vmem:[#allocation34_spill] sm:$0xff]  ;;  %v10755_v2 = vld [vmem:[#allocation35_spill] sm:$0xff] }
 0xa36   : > { %v1176_v20 = vadd.f32 %v1165_v60, %v1102_v25  ;;  %v1175_v49 = vadd.f32 %v1164_v24, %v1101_v22  ;;  %v1237_v27 = vsel %vm10464_vm4, %v10737_v9, %v10741_v45  ;;  %v1239_v16 = vsel %vm10464_vm4, %v10739_v52, %v10742_v34  ;;  %v10757_v24 = vld [vmem:[#allocation36_spill] sm:$0xff]  ;;  %v10760_v52 = vld [vmem:[#allocation39_spill] sm:$0xff] }
 0xa37   : > { %v1248_v50 = vadd.f32 %v10741_v45, %v1174_v10  ;;  %v1246_v40 = vadd.f32 %v1236_v3, %v1172_v48  ;;  %v1251_v14 = vadd.f32 %v10742_v34, %v1177_v5  ;;  %v1310_v26 = vsel %vm672_vm11, %v10743_v56, %v7150_v28  ;;  %v10759_v48 = vld [vmem:[#allocation38_spill] sm:$0xff]  ;;  %v10762_v45 = vld [vmem:[#allocation41_spill] sm:$0xff] }
 0xa38   : > { %v1249_v41 = vadd.f32 %v1238_v19, %v1175_v49  ;;  %v1308_v62 = vsel %vm672_vm11, %v10745_v39, %v10744_v6  ;;  %v1309_v61 = vsel %vm672_vm11, %v10744_v6, %v10746_v29  ;;  %v1311_v31 = vsel %vm672_vm11, %v7150_v28, %v10747_v1  ;;  %v10761_v49 = vld [vmem:[#allocation43_spill] sm:$0xff]  ;;  %v10763_v34 = vld [vmem:[#allocation42_spill] sm:$0xff]  ;;  %v10765_v56 = vld [vmem:[#allocation45_spill] sm:$0xff] }
 0xa39   : > { %v1247_v7 = vadd.f32 %v1237_v27, %v1173_v54  ;;  %v1250_v18 = vadd.f32 %v1239_v16, %v1176_v20  ;;  %v1320_v42 = vadd.f32 %v10746_v29, %v1248_v50  ;;  %v1382_v30 = vsel %vm598_vm6, %v10749_v58, %v10748_v37  ;;  %v10758_v54 = vld [vmem:[#allocation40_spill] sm:$0xff]  ;;  %v10767_v29 = vld [vmem:[#allocation49_spill] sm:$0xff] }
 0xa3a   : > { %v1323_v33 = vadd.f32 %v10747_v1, %v1251_v14  ;;  %v1321_v53 = vadd.f32 %v1310_v26, %v1249_v41  ;;  %v1380_v43 = vsel %vm598_vm6, %v10751_v57, %v10750_v4  ;;  %v1381_v32 = vsel %vm598_vm6, %v10750_v4, %v10752_v63  ;;  %v10764_v14 = vld [vmem:[#allocation46_spill] sm:$0xff]  ;;  %v10766_v39 = vld [vmem:[#allocation44_spill] sm:$0xff] }
 0xa3b   : > { %v1318_v28 = vadd.f32 %v1308_v62, %v1246_v40  ;;  %v1319_v36 = vadd.f32 %v1309_v61, %v1247_v7  ;;  %v1322_v8 = vadd.f32 %v1311_v31, %v1250_v18  ;;  %v1383_v38 = vsel %vm598_vm6, %v10748_v37, %v10753_v44  ;;  %v10768_v61 = vld [vmem:[#allocation48_spill] sm:$0xff]  ;;  %v10769_v18 = vld [vmem:[#allocation47_spill] sm:$0xff] }
 0xa3c   : > { %v1392_v13 = vadd.f32 %v10752_v63, %v1320_v42  ;;  %v1393_v23 = vadd.f32 %v1382_v30, %v1321_v53  ;;  %v1436_v46 = vsel %vm10466_vm7, %v10755_v2, %v10754_v59  ;;  %vm10467_vm4 = vcmask 760832   ;;  %v10770_v30 = vld [vmem:[#allocation50_spill] sm:$0xff]  ;;  %v10772_v4 = vld [vmem:[#allocation52_spill] sm:$0xff] }
 0xa3d   : > { %v1390_v51 = vadd.f32 %v1380_v43, %v1318_v28  ;;  %v1391_v0 = vadd.f32 %v1381_v32, %v1319_v36  ;;  %v1395_v60 = vadd.f32 %v10753_v44, %v1323_v33  ;;  %v1437_v25 = vsel %vm10466_vm7, %v10757_v24, %v10756_v15  ;;  %v10771_v33 = vld [vmem:[#allocation51_spill] sm:$0xff]  ;;  %v10774_v44 = vld [vmem:[#allocation54_spill] sm:$0xff] }
 0xa3e   : > { %v1394_v22 = vadd.f32 %v1383_v38, %v1322_v8  ;;  %v1447_v10 = vadd.f32 %v10757_v24, %v1393_v23  ;;  %v1446_v9 = vadd.f32 %v10754_v59, %v1392_v13  ;;  %vm10469_vm15 = vcmask 752640   ;;  %v10773_v8 = vld [vmem:[#allocation53_spill] sm:$0xff]  ;;  %v10775_v13 = vld [vmem:[#allocation58_spill] sm:$0xff]  ;;  %v10776_v23 = vld [vmem:[#allocation56_spill] sm:$0xff] }
 0xa3f   : > { %v1444_v12 = vadd.f32 %v10755_v2, %v1390_v51  ;;  %v1445_v3 = vadd.f32 %v1436_v46, %v1391_v0  ;;  %v1508_v5 = vsel %vm10467_vm4, %v10759_v48, %v10758_v54  ;;  %v1509_v17 = vsel %vm10467_vm4, %v10758_v54, %v10760_v52  ;;  %v10777_v0 = vld [vmem:[#allocation55_spill] sm:$0xff]  ;;  %v10778_v24 = vld [vmem:[#allocation57_spill] sm:$0xff]  ;;  %v10783_v52 = vld [vmem:[#allocation60_spill] sm:$0xff] }
 0xa40   : > { %v1448_v19 = vadd.f32 %v1437_v25, %v1394_v22  ;;  %v1449_v20 = vadd.f32 %v10756_v15, %v1395_v60  ;;  %v1510_v27 = vsel %vm10467_vm4, %v10762_v45, %v10761_v49  ;;  %v1511_v16 = vsel %vm10467_vm4, %v10761_v49, %v10763_v34  ;;  %v10779_v22 = vld [vmem:[#allocation64_spill] sm:$0xff]  ;;  %v10781_v54 = vld [vmem:[#allocation61_spill] sm:$0xff] }
 0xa41   : > { %v1518_v50 = vadd.f32 %v10759_v48, %v1444_v12  ;;  %v1521_v40 = vadd.f32 %v10762_v45, %v1447_v10  ;;  %v1582_v26 = vsel %vm10469_vm15, %v10765_v56, %v10764_v14  ;;  %vm10472_vm7 = vcmask 654336   ;;  %v10780_v10 = vld [vmem:[#allocation63_spill] sm:$0xff]  ;;  %v10785_v45 = vld [vmem:[#allocation68_spill] sm:$0xff] }
 0xa42   : > { %v1519_v41 = vadd.f32 %v1508_v5, %v1445_v3  ;;  %v1520_v6 = vadd.f32 %v1509_v17, %v1446_v9  ;;  %v1583_v62 = vsel %vm10469_vm15, %v10764_v14, %v10766_v39  ;;  %v1584_v1 = vsel %vm10469_vm15, %v10768_v61, %v10767_v29  ;;  %v10782_v48 = vld [vmem:[#allocation59_spill] sm:$0xff] }
 0xa43   : > { %v1522_v31 = vadd.f32 %v1510_v27, %v1448_v19  ;;  %v1523_v7 = vadd.f32 %v1511_v16, %v1449_v20  ;;  %v1585_v42 = vsel %vm10469_vm15, %v10767_v29, %v10769_v18  ;;  %vm10471_vm4 = vcmask 646144   ;;  %v10784_v20 = vld [vmem:[#allocation62_spill] sm:$0xff]  ;;  %v10786_v27 = vld [vmem:[#allocation69_spill] sm:$0xff] }
 0xa44   : > { %v1592_v37 = vadd.f32 %v10765_v56, %v1518_v50  ;;  %v1593_v58 = vadd.f32 %v1582_v26, %v1519_v41  ;;  %v1656_v53 = vsel %vm10472_vm7, %v10771_v33, %v10770_v30  ;;  %v1657_v57 = vsel %vm10472_vm7, %v10770_v30, %v10772_v4  ;;  %v10787_v41 = vld [vmem:[#allocation76_spill] sm:$0xff]  ;;  %v10791_v18 = vld [vmem:[#allocation70_spill] sm:$0xff]  ;;  %v10793_v30 = vld [vmem:[#allocation81_spill] sm:$0xff] }
 0xa45   : > { %v1594_v43 = vadd.f32 %v1583_v62, %v1520_v6  ;;  %v1595_v63 = vadd.f32 %v10768_v61, %v1521_v40  ;;  %v1596_v32 = vadd.f32 %v1584_v1, %v1522_v31  ;;  %vm10473_vm3 = vcmask 637952   ;;  %v10788_v6 = vld [vmem:[#allocation74_spill] sm:$0xff]  ;;  %v10789_v1 = vld [vmem:[#allocation67_spill] sm:$0xff]  ;;  %v10794_v4 = vld [vmem:[#allocation65_spill] sm:$0xff] }
 0xa46   : > { %v1597_v28 = vadd.f32 %v1585_v42, %v1523_v7  ;;  %v1666_v36 = vadd.f32 %v10771_v33, %v1592_v37  ;;  %v1658_v38 = vsel %vm10472_vm7, %v10774_v44, %v10773_v8  ;;  %v1730_v59 = vsel %vm10471_vm4, %v10776_v23, %v10775_v13  ;;  %v10790_v31 = vld [vmem:[#allocation66_spill] sm:$0xff] }
 0xa47   : > { %v1667_v2 = vadd.f32 %v1656_v53, %v1593_v58  ;;  %v1668_v46 = vadd.f32 %v1657_v57, %v1594_v43  ;;  %v1669_v51 = vadd.f32 %v10774_v44, %v1595_v63  ;;  %vm10481_vm15 = vcmask 629760   ;;  %v10792_v58 = vld [vmem:[#allocation82_spill] sm:$0xff]  ;;  %v10795_v63 = vld [vmem:[#allocation71_spill] sm:$0xff] }
 0xa48   : > { %v1659_v60 = vsel %vm10472_vm7, %v10773_v8, %v10777_v0  ;;  %v1740_v15 = vadd.f32 %v10776_v23, %v1666_v36  ;;  %v1731_v25 = vsel %vm10471_vm4, %v10775_v13, %v10778_v24  ;;  %v1804_v9 = vsel %vm10473_vm3, %v10780_v10, %v10779_v22  ;;  %v10797_v36 = vld [vmem:[#allocation75_spill] sm:$0xff]  ;;  %v10800_v0 = vld [vmem:[#allocation80_spill] sm:$0xff] }
 0xa49   : > { %v1670_v12 = vadd.f32 %v1658_v38, %v1596_v32  ;;  %v1741_v3 = vadd.f32 %v1730_v59, %v1667_v2  ;;  %v1732_v5 = vsel %vm10471_vm4, %v10782_v48, %v10781_v54  ;;  %vm10480_vm1 = vcmask 621568   ;;  %v10796_v32 = vld [vmem:[#allocation72_spill] sm:$0xff]  ;;  %v10798_v38 = vld [vmem:[#allocation86_spill] sm:$0xff]  ;;  %v10799_v13 = vld [vmem:[#allocation87_spill] sm:$0xff] }
 0xa4a   : > { %v1733_v17 = vsel %vm10471_vm4, %v10781_v54, %v10783_v52  ;;  %v1814_v19 = vadd.f32 %v10780_v10, %v1740_v15  ;;  %v1805_v49 = vsel %vm10473_vm3, %v10779_v22, %v10784_v20  ;;  %v1878_v34 = vsel %vm10481_vm15, %v10786_v27, %v10785_v45  ;;  %v10801_v24 = vld [vmem:[#allocation92_spill] sm:$0xff]  ;;  %v10803_v54 = vld [vmem:[#allocation77_spill] sm:$0xff]  ;;  %v10806_v20 = vld [vmem:[#allocation98_spill] sm:$0xff] }
 0xa4b   : > { %v1671_v16 = vadd.f32 %v1659_v60, %v1597_v28  ;;  %v1742_v50 = vadd.f32 %v1731_v25, %v1668_v46  ;;  %v1815_v40 = vadd.f32 %v1804_v9, %v1741_v3  ;;  %v1743_v14 = vadd.f32 %v10782_v48, %v1669_v51  ;;  %v10802_v3 = vld [vmem:[#allocation79_spill] sm:$0xff] }
 0xa4c   : > { %v1744_v56 = vadd.f32 %v1732_v5, %v1670_v12  ;;  %v1888_v26 = vadd.f32 %v10786_v27, %v1814_v19  ;;  %v1952_v39 = vsel %vm10480_vm1, %v10788_v6, %v10787_v41  ;;  %vm10478_vm4 = vcmask 515072   ;;  %v10804_v5 = vld [vmem:[#allocation88_spill] sm:$0xff]  ;;  %v10805_v19 = vld [vmem:[#allocation99_spill] sm:$0xff] }
 0xa4d   : > { %v1745_v62 = vadd.f32 %v1733_v17, %v1671_v16  ;;  %v1816_v29 = vadd.f32 %v1805_v49, %v1742_v50  ;;  %v1889_v61 = vadd.f32 %v1878_v34, %v1815_v40  ;;  %v1806_v7 = vsel %vm10473_vm3, %v10790_v31, %v10789_v1  ;;  %v10807_v50 = vld [vmem:[#allocation73_spill] sm:$0xff] }
 0xa4e   : > { %v1879_v42 = vsel %vm10481_vm15, %v10785_v45, %v10791_v18  ;;  %v1962_v37 = vadd.f32 %v10788_v6, %v1888_v26  ;;  %v2025_v33 = vsel %vm10479_vm0, %v10793_v30, %v10792_v58  ;;  %v1817_v53 = vadd.f32 %v10790_v31, %v1743_v14  ;;  %v10808_v14 = vld [vmem:[#allocation85_spill] sm:$0xff]  ;;  %v10812_v18 = vld [vmem:[#allocation90_spill] sm:$0xff] }
 0xa4f   : > { %v1807_v57 = vsel %vm10473_vm3, %v10789_v1, %v10794_v4  ;;  %v1963_v43 = vadd.f32 %v1952_v39, %v1889_v61  ;;  %vm10477_vm7 = vcmask 506880   ;;  %v1880_v28 = vsel %vm10481_vm15, %v10796_v32, %v10795_v63 }
 0xa50   : > { %v1953_v8 = vsel %vm10480_vm1, %v10787_v41, %v10797_v36  ;;  %v2035_v44 = vadd.f32 %v10793_v30, %v1962_v37  ;;  %v2099_v23 = vsel %vm10478_vm4, %v10799_v13, %v10798_v38  ;;  %v1818_v59 = vadd.f32 %v1806_v7, %v1744_v56  ;;  %v10809_v56 = vld [vmem:[#allocation84_spill] sm:$0xff]  ;;  %v10810_v41 = vld [vmem:[#allocation93_spill] sm:$0xff]  ;;  %v10816_v36 = vld [vmem:[#allocation94_spill] sm:$0xff] }
 0xa51   : > { %v1890_v2 = vadd.f32 %v1879_v42, %v1816_v29  ;;  %v2036_v46 = vadd.f32 %v2025_v33, %v1963_v43  ;;  %vm10476_vm3 = vcmask 498688   ;;  %v1819_v51 = vadd.f32 %v1807_v57, %v1745_v62  ;;  %v10811_v7 = vld [vmem:[#allocation89_spill] sm:$0xff]  ;;  %v10814_v43 = vld [vmem:[#allocation78_spill] sm:$0xff] }
 0xa52   : > { %v2026_v60 = vsel %vm10479_vm0, %v10792_v58, %v10800_v0  ;;  %v2109_v15 = vadd.f32 %v10799_v13, %v2035_v44  ;;  %v2173_v25 = vsel %vm10477_vm7, %v10801_v24, %v7543_v47  ;;  %v1891_v22 = vadd.f32 %v10796_v32, %v1817_v53  ;;  %v10813_v37 = vld [vmem:[#allocation97_spill] sm:$0xff]  ;;  %v10818_v0 = vld [vmem:[#allocation102_spill] sm:$0xff] }
 0xa53   : > { %v1892_v10 = vadd.f32 %v1880_v28, %v1818_v59  ;;  %v1964_v9 = vadd.f32 %v1953_v8, %v1890_v2  ;;  %v2110_v12 = vadd.f32 %v2099_v23, %v2036_v46  ;;  %v1954_v48 = vsel %vm10480_vm1, %v10803_v54, %v10802_v3  ;;  %v10815_v28 = vld [vmem:[#allocation96_spill] sm:$0xff] }
 0xa54   : > { %v2100_v52 = vsel %vm10478_vm4, %v10798_v38, %v10804_v5  ;;  %v2183_v17 = vadd.f32 %v10801_v24, %v2109_v15  ;;  %v2247_v49 = vsel %vm10476_vm3, %v10806_v20, %v10805_v19  ;;  %v1965_v45 = vadd.f32 %v10803_v54, %v1891_v22  ;;  %v10817_v38 = vld [vmem:[#allocation83_spill] sm:$0xff] }
 0xa55   : > { %v2037_v27 = vadd.f32 %v2026_v60, %v1964_v9  ;;  %v2184_v34 = vadd.f32 %v2173_v25, %v2110_v12  ;;  %v1881_v40 = vsel %vm10481_vm15, %v10795_v63, %v10807_v50  ;;  %v2027_v26 = vsel %vm10479_vm0, %v10809_v56, %v10808_v14  ;;  %v10819_v60 = vld [vmem:[#allocation101_spill] sm:$0xff]  ;;  %v10820_v9 = vld [vmem:[#allocation91_spill] sm:$0xff]  ;;  %v10822_v50 = vld [vmem:[#allocation100_spill] sm:$0xff] }
 0xa56   : > { %v2174_v6 = vsel %vm10477_vm7, %v7543_v47, %v10810_v41  ;;  %v2257_v39 = vadd.f32 %v10806_v20, %v2183_v17  ;;  %v1966_v62 = vadd.f32 %v1954_v48, %v1892_v10  ;;  %v2038_v29 = vadd.f32 %v10809_v56, %v1965_v45 }
 0xa57   : > { %v2111_v61 = vadd.f32 %v2100_v52, %v2037_v27  ;;  %v2258_v1 = vadd.f32 %v2247_v49, %v2184_v34  ;;  %v2101_v42 = vsel %vm10478_vm4, %v10812_v18, %v10811_v7  ;;  %v2248_v58 = vsel %vm10476_vm3, %v10805_v19, %v10813_v37  ;;  %v10821_v19 = vld [vmem:[#allocation95_spill] sm:$0xff] }
 0xa58   : > { %v1893_v47 = vadd.f32 %v1881_v40, %v1819_v51  ;;  %v2039_v53 = vadd.f32 %v2027_v26, %v1966_v62  ;;  %v1955_v63 = vsel %vm10480_vm1, %v10802_v3, %v10814_v43  ;;  %v2112_v32 = vadd.f32 %v10812_v18, %v2038_v29 }
 0xa59   : > { %v2185_v4 = vadd.f32 %v2174_v6, %v2111_v61  ;;  %v2175_v8 = vsel %vm10477_vm7, %v10816_v36, %v10815_v28  ;;  %v2028_v13 = vsel %vm10479_vm0, %v10808_v14, %v10817_v38  ;;  %v2249_v15 = vsel %vm10476_vm3, %v10819_v60, %v10818_v0 }
 0xa5a   : > { %v2113_v23 = vadd.f32 %v2101_v42, %v2039_v53  ;;  %v2186_v51 = vadd.f32 %v10816_v36, %v2112_v32  ;;  %v1967_v25 = vadd.f32 %v1955_v63, %v1893_v47  ;;  %v2102_v12 = vsel %vm10478_vm4, %v10811_v7, %v10820_v9 }
 0xa5b   : > { %v2259_v59 = vadd.f32 %v2248_v58, %v2185_v4  ;;  %v2176_v20 = vsel %vm10477_vm7, %v10815_v28, %v10821_v19  ;;  %v2250_v40 = vsel %vm10476_vm3, %v10818_v0, %v10822_v50 }
 0xa5c   : > { %v2187_v22 = vadd.f32 %v2175_v8, %v2113_v23  ;;  %v2260_v3 = vadd.f32 %v10819_v60, %v2186_v51  ;;  %v2040_v54 = vadd.f32 %v2028_v13, %v1967_v25  ;;  %v2613_v60 = vld [vmem:[%s10312_s9] sm:$0x3] }
 0xa5e   : > { %v2261_v48 = vadd.f32 %v2249_v15, %v2187_v22  ;;  %v2114_v27 = vadd.f32 %v2102_v12, %v2040_v54 }
 0xa60   : > { %v2188_v26 = vadd.f32 %v2176_v20, %v2114_v27 }
 0xa62   : > { %v2262_v61 = vadd.f32 %v2250_v40, %v2188_v26 }
 0xa75   : > { %v2311_v16 = vpop.permute.xlu2 %2310 }
 0xa7d   : > { %v2317_v5 = vpop.permute.xlu2 %2316 }
 0xa88   : > { %v2309_v31 = vpop.permute.xlu1 %2308 }
 0xa89   : > { %v2321_v30 = vsel %vm10475_vm14, %v2309_v31, %v2311_v16  ;;  %v7913_v33 = vadd.f32 %v2309_v31, %v2257_v39 }
 0xa8a   : > { %v7915_v57 = vadd.f32 %v2321_v30, %v2258_v1 }
 0xa8b   : > { %v6022_v44 = vmul.f32 -1.442695, %v7913_v33 }
 0xa8c   : > { %v6023_v2 = vmul.f32 -1.442695, %v7915_v57  ;;  %v2313_v46 = vpop.permute.xlu0 %2312 }
 0xa8d   : > { %6285 = vpow2.f32 %v6022_v44  ;;  %v2322_v24 = vsel %vm10475_vm14, %v2311_v16, %v2313_v46 }
 0xa8e   : > { %6287 = vpow2.f32 %v6023_v2  ;;  %v7934_v10 = vadd.f32 %v2322_v24, %v2259_v59 }
 0xa90   : > { %v6024_v52 = vmul.f32 -1.442695, %v7934_v10  ;;  %v2315_v17 = vpop.permute.xlu1 %2314 }
 0xa91   : > { %v2323_v49 = vsel %vm10475_vm14, %v2315_v17, %v2317_v5  ;;  %v7945_v45 = vadd.f32 %v2315_v17, %v2260_v3 }
 0xa92   : > { %6289 = vpow2.f32 %v6024_v52  ;;  %v7947_v34 = vadd.f32 %v2323_v49, %v2261_v48 }
 0xa93   : > { %v6286_v16 = vpop.eup %6285  ;;  %v6025_v14 = vmul.f32 -1.442695, %v7945_v45 }
 0xa94   : > { %v6288_v56 = vpop.eup %6287  ;;  %v2355_v41 = vadd.f32 1.0, %v6286_v16  ;;  %v6026_v6 = vmul.f32 -1.442695, %v7947_v34  ;;  %v2319_v39 = vpop.permute.xlu0 %2318 }
 0xa95   : > { %v2356_v62 = vadd.f32 1.0, %v6288_v56  ;;  %6291 = vpow2.f32 %v6025_v14  ;;  %v2324_v29 = vsel %vm10475_vm14, %v2317_v5, %v2319_v39 }
 0xa96   : > { %6293 = vrcp.f32 %v2355_v41  ;;  %v7955_v31 = vadd.f32 %v2324_v29, %v2262_v61  ;;  %v2370_v4 = vand.u32 2147483647, %v2355_v41  ;;  %v2372_v32 = vand.u32 2147483648, %v2355_v41 }
 0xa97   : > { %6295 = vrcp.f32 %v2356_v62  ;;  %v2385_v28 = vand.u32 2147483647, %v2356_v62  ;;  %vm2366_vm14 = vweird.f32 %v2355_v41  ;;  %v2387_v44 = vand.u32 2147483648, %v2356_v62 }
 0xa98   : > { %v6290_v1 = vpop.eup %6289  ;;  %6297 = vpow2.f32 %v6026_v6  ;;  %v6027_v18 = vmul.f32 -1.442695, %v7955_v31  ;;  %vm2381_vm7 = vweird.f32 %v2356_v62  ;;  %vm7967_vm4 = vcmp.eq.f32.partialorder %v2370_v4, 8.507059e+37 }
 0xa99   : > { %v7957_v7 = vadd.f32 1.0, %v6290_v1  ;;  %v2373_v0 = vor.u32 1.1754944e-38, %v2372_v32  ;;  %vm7972_vm1 = vcmp.eq.f32.partialorder %v2385_v28, 8.507059e+37  ;;  %v2388_v22 = vor.u32 1.1754944e-38, %v2387_v44  ;;  %v2491_v32 = vld [vmem:[%s10827_s6] sm:$0xff] }
 0xa9b   : > { %v6292_v42 = vpop.eup %6291  ;;  %6299 = vrcp.f32 %v7957_v7  ;;  %vm2396_vm13 = vweird.f32 %v7957_v7  ;;  %v2400_v3 = vand.u32 2147483647, %v7957_v7  ;;  %v2402_v54 = vand.u32 2147483648, %v7957_v7 }
 0xa9c   : > { %v6294_v37 = vpop.eup %6293  ;;  %v7961_v58 = vadd.f32 1.0, %v6292_v42  ;;  %6301 = vpow2.f32 %v6027_v18 }
 0xa9d   : > { %v6296_v30 = vpop.eup %6295  ;;  %v2362_v47 = vmul.f32 %v6294_v37, %v2355_v41  ;;  %vm2367_vm3 = vweird.f32 %v6294_v37  ;;  %v2403_v6 = vor.u32 1.1754944e-38, %v2402_v54  ;;  %v6040_v54 = vld [vmem:[%s10312_s9 + $0x2] sm:$0x3] }
 0xa9e   : > { %v6298_v53 = vpop.eup %6297  ;;  %v2377_v43 = vmul.f32 %v6296_v30, %v2356_v62  ;;  %6303 = vrcp.f32 %v7961_v58  ;;  %vm2382_vm0 = vweird.f32 %v6296_v30  ;;  %vm2368_vm15 = vmor %vm2366_vm14, %vm2367_vm3  ;;  %v2417_v40 = vand.u32 2147483648, %v7961_v58 }
 0xa9f   : > { %v2363_v63 = vsub.f32 1.0, %v2362_v47  ;;  %v7964_v36 = vadd.f32 1.0, %v6298_v53  ;;  %vm2383_vm5 = vmor %vm2381_vm7, %vm2382_vm0  ;;  %v2415_v26 = vand.u32 2147483647, %v7961_v58 }
 0xaa0   : > { %v2378_v8 = vsub.f32 1.0, %v2377_v43  ;;  %v2418_v29 = vor.u32 1.1754944e-38, %v2417_v40 }
 0xaa1   : > { %v6300_v38 = vpop.eup %6299  ;;  %v2364_v13 = vmul.f32 %v6294_v37, %v2363_v63  ;;  %6305 = vrcp.f32 %v7964_v36  ;;  %v2432_v47 = vand.u32 2147483648, %v7964_v36  ;;  %vm2426_vm7 = vweird.f32 %v7964_v36 }
 0xaa2   : > { %v6302_v23 = vpop.eup %6301  ;;  %v2379_v2 = vmul.f32 %v6296_v30, %v2378_v8  ;;  %v2392_v46 = vmul.f32 %v6300_v38, %v7957_v7  ;;  %vm2397_vm14 = vweird.f32 %v6300_v38  ;;  %v2430_v53 = vand.u32 2147483647, %v7964_v36 }
 0xaa3   : > { %v2365_v51 = vadd.f32 %v6294_v37, %v2364_v13  ;;  %v7976_v15 = vadd.f32 1.0, %v6302_v23  ;;  %vm2398_vm0 = vmor %vm2396_vm13, %vm2397_vm14  ;;  %vm2416_vm13 = vcmp.eq.f32.partialorder %v2415_v26, 8.507059e+37  ;;  %v2433_v44 = vor.u32 1.1754944e-38, %v2432_v47 }
 0xaa4   : > { %v6304_v24 = vpop.eup %6303  ;;  %v2380_v25 = vadd.f32 %v6296_v30, %v2379_v2  ;;  %v2393_v9 = vsub.f32 1.0, %v2392_v46  ;;  %v2492_v46 = vld [vmem:[%s10827_s6 + $0x8] sm:$0xff]  ;;  %v2487_v47 = vpack.c.bf16 %v6879_v11, %v6761_v35 }
 0xaa5   : > { %v2369_v12 = vsel %vm2368_vm15, %v6294_v37, %v2365_v51  ;;  %v2407_v48 = vmul.f32 %v6304_v24, %v7961_v58  ;;  %6307 = vrcp.f32 %v7976_v15  ;;  %vm2401_vm15 = vcmp.eq.f32.partialorder %v2400_v3, 8.507059e+37  ;;  %v2494_v51 = vld [vmem:[%s10827_s6 + $0x18] sm:$0xff]  ;;  %v2611_v3 = vld [vmem:[%s10311_s8 + $0x10] sm:$0xff] }
 0xaa6   : > { %v2374_v5 = vsel %vm7967_vm4, %v2373_v0, %v2369_v12  ;;  %v2384_v52 = vsel %vm2383_vm5, %v6296_v30, %v2380_v25  ;;  %v2394_v17 = vmul.f32 %v6300_v38, %v2393_v9  ;;  %vm2412_vm5 = vweird.f32 %v6304_v24  ;;  %v2638_v25 = vld [vmem:[%s10310_s7 + $0x8] sm:$0xff]  ;;  %v2609_v9 = vld [vmem:[%s10311_s8] sm:$0xff]  ;;  %v2639_v12 = vld [vmem:[%s10310_s7 + $0x10] sm:$0xff] }
 0xaa7   : > { %v6306_v19 = vpop.eup %6305  ;;  %v2389_v20 = vsel %vm7972_vm1, %v2388_v22, %v2384_v52  ;;  %v2451_v49 = vmul.f32 %v2374_v5, %v7913_v33  ;;  %v2408_v27 = vsub.f32 1.0, %v2407_v48  ;;  %vm2411_vm1 = vweird.f32 %v7961_v58  ;;  %v2640_v22 = vld [vmem:[%s10310_s7 + $0x18] sm:$0xff]  ;;  %v2610_v52 = vld [vmem:[%s10311_s8 + $0x8] sm:$0xff] }
 0xaa8   : > { %v2452_v16 = vmul.f32 %v2389_v20, %v7915_v57  ;;  %v2395_v50 = vadd.f32 %v6300_v38, %v2394_v17  ;;  %v2422_v14 = vmul.f32 %v6306_v19, %v7964_v36  ;;  %vm2413_vm3 = vmor %vm2411_vm1, %vm2412_vm5  ;;  %vm2427_vm4 = vweird.f32 %v6306_v19  ;;  %v2612_v48 = vld [vmem:[%s10311_s8 + $0x18] sm:$0xff]  ;;  %v6043_v20 = vld [vmem:[%s10310_s7 + $0x30] sm:$0xff] }
 0xaa9   : > { %v2409_v56 = vmul.f32 %v6304_v24, %v2408_v27  ;;  %vm2428_vm14 = vmor %vm2426_vm7, %vm2427_vm4  ;;  %v2447_v43 = vand.u32 2147483648, %v7976_v15  ;;  %vm2431_vm5 = vcmp.eq.f32.partialorder %v2430_v53, 8.507059e+37  ;;  %v2708_v5 = vperm.slane %v6040_v54, 1  ;;  %v6042_v27 = vld [vmem:[%s10310_s7 + $0x28] sm:$0xff]  ;;  %v6167_v53 = vld [vmem:[%s10828_s5] sm:$0xff] }
 0xaaa   : > { %v2399_v41 = vsel %vm2398_vm0, %v6300_v38, %v2395_v50  ;;  %v2423_v33 = vsub.f32 1.0, %v2422_v14  ;;  %v6254_v39 = vpack.i.bf16 %v2452_v16, %v2451_v49  ;;  %v2707_v17 = vperm.slane %v6040_v54, 0  ;;  %v6044_v49 = vld [vmem:[%s10310_s7 + $0x38] sm:$0xff] }
 0xaab   : > { %v2410_v62 = vadd.f32 %v6304_v24, %v2409_v56  ;;  %v2404_v57 = vsel %vm2401_vm15, %v2403_v6, %v2399_v41  ;;  %v6308_v1 = vpop.eup %6307  ;;  %vm2441_vm15 = vweird.f32 %v7976_v15  ;;  %v2448_v38 = vor.u32 1.1754944e-38, %v2447_v43 }
 0xaac   : > { %v2424_v61 = vmul.f32 %v6306_v19, %v2423_v33  ;;  %6255 = vrot.lane.b32.xlu1 %v6254_v39, %s10490_s12  ;;  %v2437_v37 = vmul.f32 %v6308_v1, %v7976_v15  ;;  %v2453_v30 = vmul.f32 %v2404_v57, %v7934_v10  ;;  %vm2442_vm0 = vweird.f32 %v6308_v1 }
 0xaad   : > { %v2414_v7 = vsel %vm2413_vm3, %v6304_v24, %v2410_v62  ;;  %v2445_v10 = vand.u32 2147483647, %v7976_v15  ;;  %vm2443_vm1 = vmor %vm2441_vm15, %vm2442_vm0  ;;  %v2637_v15 = vld [vmem:[%s10310_s7] sm:$0xff]  ;;  %v2616_v24 = vperm.slane %v2613_v60, 1  ;;  %vm10912_vm4 = vcmask 932864  }
 0xaae   : > { %v2419_v18 = vsel %vm2416_vm13, %v2418_v29, %v2414_v7  ;;  %v2425_v42 = vadd.f32 %v6306_v19, %v2424_v61  ;;  %v2438_v4 = vsub.f32 1.0, %v2437_v37  ;;  %vm10897_vm13 = vcmask 924672  }
 0xaaf   : > { %v2454_v58 = vmul.f32 %v2419_v18, %v7945_v45  ;;  %vm2446_vm3 = vcmp.eq.f32.partialorder %v2445_v10, 8.507059e+37  ;;  %vm10925_vm7 = vcmask 1031168   ;;  %vm10959_vm0 = vcmask 7168  }
 0xab0   : > { %v2429_v28 = vsel %vm2428_vm14, %v6306_v19, %v2425_v42  ;;  %v2439_v8 = vmul.f32 %v6308_v1, %v2438_v4  ;;  %v6041_v19 = vld [vmem:[%s10310_s7 + $0x20] sm:$0xff]  ;;  %vm10938_vm14 = vcmask 1039360   ;;  %vm10989_vm15 = vcmask 113664  }
 0xab1   : > { %v6259_v63 = vpack.i.bf16 %v2454_v58, %v2453_v30  ;;  %v2434_v36 = vsel %vm2431_vm5, %v2433_v44, %v2429_v28  ;;  %v2488_v58 = vpack.c.bf16 %v6894_v21, %v6786_v55  ;;  %v6168_v55 = vld [vmem:[%s10828_s5 + $0x8] sm:$0xff]  ;;  %s10842_s5 = smov 125   ;;  %vm10974_vm5 = vcmask 15360  }
 0xab2   : > { %v2440_v45 = vadd.f32 %v6308_v1, %v2439_v8  ;;  %v2455_v59 = vmul.f32 %v2434_v36, %v7947_v34  ;;  %v2615_v34 = vperm.slane %v2613_v60, 0 }
 0xab3   : > { %6260 = vrot.lane.b32.xlu2 %v6259_v63, %s10490_s12 }
 0xab4   : > { %2497 = vperm.xlu1 %6253, %v2491_v32   ;;  %v2444_v13 = vsel %vm2443_vm1, %v6308_v1, %v2440_v45  ;;  %vm11004_vm1 = vcmask 121856  }
 0xab5   : > { %v2449_v23 = vsel %vm2446_vm3, %v2448_v38, %v2444_v13  ;;  %vm11019_vm3 = vcmask 130048  }
 0xab6   : > { %v2456_v2 = vmul.f32 %v2449_v23, %v7955_v31  ;;  %v2493_v31 = vld [vmem:[%s10827_s6 + $0x10] sm:$0xff]  ;;  %s10847_s6 = smov 124  }
 0xab8   : > { %v6264_v0 = vpack.i.bf16 %v2456_v2, %v2455_v59 }
 0xaba   : > { %6265 = vrot.lane.b32.xlu0 %v6264_v0, %s10490_s12  ;;  %v8127_v0 = vld [vmem:[%s10312_s9 + $0x4] sm:$0x3]  ;;  %s10843_s12 = smov 98  }
 0xabb   : > { %2502 = vperm.xlu2 %6252, %v2492_v46   ;;  %v2836_v60 = vperm.slane %v8127_v0, 0 }
 0xabc   : > { %2512 = vperm.xlu1 %6253, %v2494_v51  }
 0xac2   : > { %2507 = vperm.xlu0 %6251, %v2493_v31  }
 0xac3   : > { %2617 = vrot.lane.b32.xlu2 %v2615_v34, %s10654_s26  ;;  %v6047_v34 = vld [vmem:[%s10310_s7 + $0x48] sm:$0xff] }
 0xac4   : > { %2643 = vperm.xlu1 %6253, %v2637_v15  }
 0xaca   : > { %2619 = vrot.lane.b32.xlu0 %v2616_v24, %s10654_s26 }
 0xacb   : > { %2648 = vperm.xlu2 %6252, %v2638_v25  }
 0xacc   : > { %2658 = vperm.xlu1 %6253, %v2640_v22  }
 0xad2   : > { %2653 = vperm.xlu0 %6251, %v2639_v12  }
 0xad3   : > { %2675 = vperm.xlu2 %6252, %v2609_v9  }
 0xad4   : > { %2685 = vperm.xlu1 %6253, %v2611_v3   ;;  %v6309_v3 = vld [vmem:[%s6549_s25] sm:$0xff] }
 0xada   : > { %2680 = vperm.xlu0 %6251, %v2610_v52  }
 0xadb   : > { %2690 = vperm.xlu2 %6252, %v2612_v48   ;;  %v6310_v48 = vld [vmem:[%s6549_s25 + $0x8] sm:$0xff] }
 0xadc   : > { %2711 = vrot.lane.b32.xlu1 %v2708_v5, %s10650_s27 }
 0xae2   : > { %2709 = vrot.lane.b32.xlu0 %v2707_v17, %s10650_s27 }
 0xae3   : > { %2736 = vperm.xlu2 %6252, %v6041_v19  }
 0xae4   : > { %2746 = vperm.xlu1 %6253, %v6043_v20  }
 0xaea   : > { %2741 = vperm.xlu0 %6251, %v6042_v27  }
 0xaeb   : > { %2751 = vperm.xlu2 %6252, %v6044_v49  }
 0xb0d   : > { %v6261_v16 = vpop.permute.xlu2 %6260 }
 0xb0e   : > { %v6263_v6 = vunpack.i.h.bf16 %v6261_v16  ;;  %v6262_v33 = vunpack.i.l.bf16 %v6261_v16 }
 0xb15   : > { %v8069_v40 = vpop.permute.xlu2 %2502 }
 0xb1d   : > { %v8073_v57 = vpop.permute.xlu2 %2617 }
 0xb1e   : > { %v6256_v50 = vpop.permute.xlu1 %6255 }
 0xb1f   : > { %v6258_v56 = vunpack.i.h.bf16 %v6256_v50  ;;  %v6257_v26 = vunpack.i.l.bf16 %v6256_v50 }
 0xb21   : > { %v2475_v29 = vsel %vm2272_vm8, %v6257_v26, %v6258_v56  ;;  %v2476_v1 = vsel %vm2272_vm8, %v6258_v56, %v6262_v33  ;;  %v6312_v26 = vld [vmem:[%s6549_s25 + $0x18] sm:$0xff] }
 0xb25   : > { %v8090_v4 = vpop.permute.xlu2 %2648 }
 0xb26   : > { %v8071_v14 = vpop.permute.xlu1 %2497 }
 0xb2c   : > { %v6266_v41 = vpop.permute.xlu0 %6265 }
 0xb2d   : > { %v6268_v39 = vunpack.i.h.bf16 %v6266_v41  ;;  %v6267_v62 = vunpack.i.l.bf16 %v6266_v41  ;;  %v8098_v35 = vpop.permute.xlu2 %2675 }
 0xb2e   : > { %v8079_v37 = vpop.permute.xlu1 %2512  ;;  %10831 = vst [vmem:[#allocation9_spill] sm:$0xff] %v8098_v35 }
 0xb2f   : > { %v2477_v61 = vsel %vm2272_vm8, %v6263_v6, %v6267_v62  ;;  %v2478_v7 = vsel %vm2272_vm8, %v6267_v62, %v6268_v39 }
 0xb30   : > { %v2489_v18 = vpack.c.bf16 %v2477_v61, %v2475_v29  ;;  %v2490_v42 = vpack.c.bf16 %v2478_v7, %v2476_v1  ;;  %v6313_v7 = vld [vmem:[%s6549_s25 + $0x20] sm:$0xff] }
 0xb32   : > { %2537 = vmatpush.bf16.msra.mxu2 %v2489_v18  ;;  %2556 = vmatpush.bf16.msra.mxu3 %v2490_v42  ;;  %v6314_v42 = vld [vmem:[%s6549_s25 + $0x28] sm:$0xff] }
 0xb34   : > { %v8081_v30 = vpop.permute.xlu0 %2507 }
 0xb35   : > { %v8109_v32 = vpop.permute.xlu2 %2690 }
 0xb36   : > { %2538 = vmatpush.bf16.msra.mxu2 %v2487_v47  ;;  %2557 = vmatpush.bf16.msra.mxu3 %v2488_v58  ;;  %v8094_v43 = vpop.permute.xlu1 %2643 }
 0xb37   : > { %10829 = vst [vmem:[#allocation7_spill] sm:$0xff] %v8094_v43 }
 0xb39   : > { %6036 = vmatmul.msk.bf16.vlgmr.msra.gmra.mxu2 %vm2124_vm9, %v6167_v53  ;;  %6038 = vmatmul.msk.bf16.vlgmr.msra.gmra.mxu3 %vm2124_vm9, %v6167_v53 }
 0xb3c   : > { %v8096_v63 = vpop.permute.xlu0 %2619 }
 0xb3d   : > { %10830 = vst [vmem:[#allocation8_spill] sm:$0xff] %v8096_v63  ;;  %v2737_v45 = vpop.permute.xlu2 %2736 }
 0xb3e   : > { %v8105_v21 = vpop.permute.xlu1 %2658 }
 0xb44   : > { %v8100_v11 = vpop.permute.xlu0 %2653 }
 0xb45   : > { %v8120_v46 = vpop.permute.xlu2 %2751 }
 0xb46   : > { %v8113_v8 = vpop.permute.xlu1 %2685 }
 0xb49   : > { %6037 = vmatmul.msk.bf16.gmra.mxu2 %vm2124_vm9, %v6168_v55  ;;  %6039 = vmatmul.msk.bf16.gmra.mxu3 %vm2124_vm9, %v6168_v55 }
 0xb4c   : > { %v8111_v28 = vpop.permute.xlu0 %2680 }
 0xb4e   : > { %v8116_v38 = vpop.permute.xlu1 %2711 }
 0xb54   : > { %v2710_v10 = vpop.permute.xlu0 %2709 }
 0xb55   : > { %v2717_v44 = vmul.f32 0.0, %v2710_v10  ;;  %v2713_v31 = vsel %vm598_vm6, %v2710_v10, %v8116_v38 }
 0xb56   : > { %v2747_v59 = vpop.permute.xlu1 %2746 }
 0xb57   : > { %v2754_v36 = vmul.f32 %v2737_v45, %v2717_v44  ;;  %v2760_v2 = vmul.f32 %v2747_v59, %v2717_v44  ;;  %v2763_v51 = vmul.f32 %v8120_v46, %v2717_v44 }
 0xb59   : > { %2778 = vrot.lane.b32.xlu0 %v2754_v36, %s10644_s29 }
 0xb5c   : > { %v2742_v13 = vpop.permute.xlu0 %2741 }
 0xb5d   : > { %v2757_v23 = vmul.f32 %v2742_v13, %v2717_v44 }
 0xb61   : > { %2784 = vrot.lane.b32.xlu0 %v2757_v23, %s10644_s29 }
 0xb69   : > { %2790 = vrot.lane.b32.xlu0 %v2760_v2, %s10644_s29 }
 0xb71   : > { %2796 = vrot.lane.b32.xlu0 %v2763_v51, %s10644_s29 }
 0xb79   : > { %2838 = vrot.lane.b32.xlu0 %v2836_v60, %s10643_s21 }
 0xb81   : > { %2870 = vperm.xlu0 %6251, %v6047_v34   ;;  %v6049_v34 = vld [vmem:[%s10310_s7 + $0x58] sm:$0xff] }
 0xbbc   : > { %v2540_v15 = vpop.f32.mrf.mxu2  ;;  %v2559_v24 = vpop.f32.mrf.mxu3 }
 0xbbd   : > { %v8140_v25 = vadd.f32 %v2540_v15, %v8071_v14  ;;  %v8143_v22 = vadd.f32 %v2559_v24, %v8071_v14  ;;  %v6311_v14 = vld [vmem:[%s6549_s25 + $0x10] sm:$0xff] }
 0xbbf   : > { %10832 = vst [vmem:[#allocation10_spill] sm:$0xff] %v8140_v25  ;;  %v2719_v9 = vmul.f32 %v8116_v38, %v8143_v22  ;;  %v2718_v12 = vmul.f32 %v2713_v31, %v8140_v25  ;;  %v5823_v54 = vadd.f32 %v6309_v3, %v8140_v25  ;;  %v5824_v5 = vadd.f32 %v6310_v48, %v8143_v22 }
 0xbc1   : > { %v2756_v52 = vmul.f32 %v2737_v45, %v2719_v9  ;;  %v2755_v17 = vmul.f32 %v2737_v45, %v2718_v12  ;;  %5839 = vst [vmem:[%s8152_s3] sm:$0xff] %v5823_v54 }
 0xbc2   : > { %5840 = vst [vmem:[%s8152_s3 + $0x8] sm:$0xff] %v5824_v5 }
 0xbc3   : > { %2782 = vrot.lane.b32.xlu2 %v2756_v52, %s10644_s29  ;;  %2780 = vrot.lane.b32.xlu1 %v2755_v17, %s10644_s29 }
 0xbc4   : > { %v2542_v19 = vpop.f32.mrf.mxu2  ;;  %v2561_v20 = vpop.f32.mrf.mxu3 }
 0xbc5   : > { %v8159_v49 = vadd.f32 %v2542_v19, %v8069_v40  ;;  %v8162_v27 = vadd.f32 %v2561_v20, %v8069_v40 }
 0xbc7   : > { %v2722_v16 = vmul.f32 %v8116_v38, %v8162_v27  ;;  %v2721_v50 = vmul.f32 %v2713_v31, %v8159_v49  ;;  %v5825_v56 = vadd.f32 %v6311_v14, %v8159_v49  ;;  %v5826_v41 = vadd.f32 %v6312_v26, %v8162_v27 }
 0xbc9   : > { %v2759_v6 = vmul.f32 %v2742_v13, %v2722_v16  ;;  %v2758_v33 = vmul.f32 %v2742_v13, %v2721_v50  ;;  %5841 = vst [vmem:[%s8152_s3 + $0x10] sm:$0xff] %v5825_v56  ;;  %v6315_v13 = vld [vmem:[%s6549_s25 + $0x30] sm:$0xff] }
 0xbca   : > { %5842 = vst [vmem:[%s8152_s3 + $0x18] sm:$0xff] %v5826_v41 }
 0xbcb   : > { %2788 = vrot.lane.b32.xlu2 %v2759_v6, %s10644_s29  ;;  %2786 = vrot.lane.b32.xlu1 %v2758_v33, %s10644_s29 }
 0xbcc   : > { %v2545_v40 = vpop.f32.mrf.mxu2  ;;  %v2564_v39 = vpop.f32.mrf.mxu3 }
 0xbcd   : > { %v8176_v62 = vadd.f32 %v2545_v40, %v8081_v30  ;;  %v8179_v29 = vadd.f32 %v2564_v39, %v8081_v30 }
 0xbcf   : > { %v2725_v61 = vmul.f32 %v8116_v38, %v8179_v29  ;;  %v2724_v1 = vmul.f32 %v2713_v31, %v8176_v62  ;;  %v5827_v18 = vadd.f32 %v6313_v7, %v8176_v62  ;;  %v5828_v47 = vadd.f32 %v6314_v42, %v8179_v29 }
 0xbd1   : > { %v2762_v58 = vmul.f32 %v2747_v59, %v2725_v61  ;;  %v2761_v53 = vmul.f32 %v2747_v59, %v2724_v1  ;;  %5843 = vst [vmem:[%s8152_s3 + $0x20] sm:$0xff] %v5827_v18  ;;  %v6316_v59 = vld [vmem:[%s6549_s25 + $0x38] sm:$0xff] }
 0xbd2   : > { %5844 = vst [vmem:[%s8152_s3 + $0x28] sm:$0xff] %v5828_v47 }
 0xbd3   : > { %2794 = vrot.lane.b32.xlu2 %v2762_v58, %s10644_s29  ;;  %2792 = vrot.lane.b32.xlu1 %v2761_v53, %s10644_s29 }
 0xbd4   : > { %v2547_v30 = vpop.f32.mrf.mxu2  ;;  %v2566_v55 = vpop.f32.mrf.mxu3 }
 0xbd5   : > { %v8193_v10 = vadd.f32 %v2547_v30, %v8079_v37  ;;  %v8196_v44 = vadd.f32 %v2566_v55, %v8079_v37  ;;  %v2837_v37 = vperm.slane %v8127_v0, 1 }
 0xbd7   : > { %10833 = vst [vmem:[#allocation12_spill] sm:$0xff] %v8196_v44  ;;  %v2728_v45 = vmul.f32 %v8116_v38, %v8196_v44  ;;  %v2727_v36 = vmul.f32 %v2713_v31, %v8193_v10  ;;  %v5829_v23 = vadd.f32 %v6315_v13, %v8193_v10  ;;  %v5830_v2 = vadd.f32 %v6316_v59, %v8196_v44  ;;  %v6046_v38 = vld [vmem:[%s10310_s7 + $0x40] sm:$0xff]  ;;  %v8222_v31 = vpop.permute.xlu0 %2778 }
 0xbd8   : > { %10834 = vst [vmem:[#allocation11_spill] sm:$0xff] %v8222_v31  ;;  %v6050_v13 = vld [vmem:[%s10312_s9 + $0x6] sm:$0x3] }
 0xbd9   : > { %v2765_v51 = vmul.f32 %v8120_v46, %v2728_v45  ;;  %v2764_v60 = vmul.f32 %v8120_v46, %v2727_v36  ;;  %5845 = vst [vmem:[%s8152_s3 + $0x30] sm:$0xff] %v5829_v23  ;;  %v6048_v46 = vld [vmem:[%s10310_s7 + $0x50] sm:$0xff]  ;;  %v2965_v23 = vperm.slane %v6050_v13, 0 }
 0xbda   : > { %5846 = vst [vmem:[%s8152_s3 + $0x38] sm:$0xff] %v5830_v2 }
 0xbdb   : > { %2800 = vrot.lane.b32.xlu2 %v2765_v51, %s10644_s29  ;;  %2798 = vrot.lane.b32.xlu1 %v2764_v60, %s10644_s29 }
 0xbdf   : > { %v8224_v0 = vpop.permute.xlu0 %2784 }
 0xbe3   : > { %2865 = vperm.xlu2 %6252, %v6046_v38   ;;  %2840 = vrot.lane.b32.xlu1 %v2837_v37, %s10643_s21  ;;  %v6052_v37 = vld [vmem:[%s10310_s7 + $0x68] sm:$0xff]  ;;  %v6051_v38 = vld [vmem:[%s10310_s7 + $0x60] sm:$0xff] }
 0xbe7   : > { %v8228_v24 = vpop.permute.xlu0 %2790 }
 0xbeb   : > { %2880 = vperm.xlu2 %6252, %v6049_v34   ;;  %2875 = vperm.xlu1 %6253, %v6048_v46   ;;  %v2966_v34 = vperm.slane %v6050_v13, 1  ;;  %v6054_v46 = vld [vmem:[%s10310_s7 + $0x78] sm:$0xff] }
 0xbef   : > { %v8234_v3 = vpop.permute.xlu0 %2796 }
 0xbf7   : > { %v2839_v5 = vpop.permute.xlu0 %2838 }
 0xbf8   : > { %v2846_v52 = vmul.f32 0.0, %v2839_v5 }
 0xbff   : > { %v2871_v16 = vpop.permute.xlu0 %2870 }
 0xc00   : > { %v2886_v14 = vmul.f32 %v2871_v16, %v2846_v52 }
 0xc1d   : > { %v8226_v15 = vpop.permute.xlu2 %2782 }
 0xc1e   : > { %10835 = vst [vmem:[#allocation14_spill] sm:$0xff] %v8226_v15 }
 0xc25   : > { %v8230_v9 = vpop.permute.xlu2 %2788 }
 0xc2d   : > { %v8232_v12 = vpop.permute.xlu2 %2794 }
 0xc35   : > { %v8236_v54 = vpop.permute.xlu2 %2800  ;;  %v8238_v48 = vpop.permute.xlu1 %2780 }
 0xc36   : > { %10836 = vst [vmem:[#allocation15_spill] sm:$0xff] %v8238_v48 }
 0xc3d   : > { %v2866_v17 = vpop.permute.xlu2 %2865  ;;  %v8240_v19 = vpop.permute.xlu1 %2786 }
 0xc3e   : > { %v2883_v20 = vmul.f32 %v2866_v17, %v2846_v52 }
 0xc40   : > { %2907 = vrot.lane.b32.xlu0 %v2883_v20, %s10837_s2 }
 0xc45   : > { %v8243_v50 = vpop.permute.xlu1 %2792  ;;  %v2881_v58 = vpop.permute.xlu2 %2880 }
 0xc46   : > { %v2892_v53 = vmul.f32 %v2881_v58, %v2846_v52 }
 0xc48   : > { %2913 = vrot.lane.b32.xlu0 %v2886_v14, %s10837_s2 }
 0xc4d   : > { %v8246_v56 = vpop.permute.xlu1 %2798 }
 0xc55   : > { %v2841_v26 = vpop.permute.xlu1 %2840 }
 0xc56   : > { %v2842_v41 = vsel %vm672_vm11, %v2839_v5, %v2841_v26  ;;  %v2848_v6 = vmul.f32 %v2841_v26, %v8143_v22  ;;  %v2851_v61 = vmul.f32 %v2841_v26, %v8162_v27  ;;  %v2854_v30 = vmul.f32 %v2841_v26, %v8179_v29  ;;  %v6053_v5 = vld [vmem:[%s10310_s7 + $0x70] sm:$0xff] }
 0xc57   : > { %v2847_v33 = vmul.f32 %v2842_v41, %v8140_v25  ;;  %v2850_v7 = vmul.f32 %v2842_v41, %v8159_v49  ;;  %v2853_v55 = vmul.f32 %v2842_v41, %v8176_v62  ;;  %v2857_v59 = vmul.f32 %v2841_v26, %v8196_v44 }
 0xc58   : > { %v2885_v40 = vmul.f32 %v2866_v17, %v2848_v6  ;;  %v2888_v42 = vmul.f32 %v2871_v16, %v2851_v61  ;;  %v2856_v2 = vmul.f32 %v2842_v41, %v8193_v10 }
 0xc59   : > { %v2884_v39 = vmul.f32 %v2866_v17, %v2847_v33  ;;  %v2887_v47 = vmul.f32 %v2871_v16, %v2850_v7  ;;  %v2894_v51 = vmul.f32 %v2881_v58, %v2857_v59 }
 0xc5a   : > { %2911 = vrot.lane.b32.xlu2 %v2885_v40, %s10837_s2  ;;  %v2893_v60 = vmul.f32 %v2881_v58, %v2856_v2 }
 0xc5b   : > { %2909 = vrot.lane.b32.xlu1 %v2884_v39, %s10837_s2 }
 0xc5d   : > { %v2876_v1 = vpop.permute.xlu1 %2875 }
 0xc5e   : > { %v2889_v18 = vmul.f32 %v2876_v1, %v2846_v52  ;;  %v2891_v45 = vmul.f32 %v2876_v1, %v2854_v30  ;;  %v2890_v36 = vmul.f32 %v2876_v1, %v2853_v55 }
 0xc60   : > { %2919 = vrot.lane.b32.xlu0 %v2889_v18, %s10837_s2 }
 0xc62   : > { %2917 = vrot.lane.b32.xlu2 %v2888_v42, %s10837_s2 }
 0xc63   : > { %2915 = vrot.lane.b32.xlu1 %v2887_v47, %s10837_s2 }
 0xc68   : > { %2925 = vrot.lane.b32.xlu0 %v2892_v53, %s10837_s2 }
 0xc6a   : > { %2923 = vrot.lane.b32.xlu2 %v2891_v45, %s10837_s2 }
 0xc6b   : > { %2921 = vrot.lane.b32.xlu1 %v2890_v36, %s10837_s2 }
 0xc70   : > { %2967 = vrot.lane.b32.xlu0 %v2965_v23, %s10838_s4 }
 0xc72   : > { %2929 = vrot.lane.b32.xlu2 %v2894_v51, %s10837_s2 }
 0xc73   : > { %2927 = vrot.lane.b32.xlu1 %v2893_v60, %s10837_s2 }
 0xc78   : > { %2999 = vperm.xlu0 %6251, %v6052_v37  }
 0xc7a   : > { %2994 = vperm.xlu2 %6252, %v6051_v38  }
 0xc7b   : > { %2969 = vrot.lane.b32.xlu1 %v2966_v34, %s10838_s4  ;;  %s11005_s4 = smov 79  }
 0xc82   : > { %3009 = vperm.xlu2 %6252, %v6054_v46  }
 0xc83   : > { %3004 = vperm.xlu1 %6253, %v6053_v5  }
 0xcb2   : > { %v8286_v17 = vpop.permute.xlu0 %2907 }
 0xcb3   : > { %10840 = vst [vmem:[#allocation16_spill] sm:$0xff] %v8286_v17 }
 0xcb4   : > { %v8284_v52 = vpop.permute.xlu2 %2911 }
 0xcb5   : > { %10839 = vst [vmem:[#allocation13_spill] sm:$0xff] %v8284_v52 }
 0xcba   : > { %v8290_v16 = vpop.permute.xlu0 %2913 }
 0xcbc   : > { %v8288_v20 = vpop.permute.xlu2 %2917 }
 0xcc4   : > { %v8294_v26 = vpop.permute.xlu2 %2923 }
 0xccc   : > { %v8300_v33 = vpop.permute.xlu2 %2929 }
 0xccd   : > { %v8292_v14 = vpop.permute.xlu1 %2909 }
 0xcce   : > { %10841 = vst [vmem:[#allocation20_spill] sm:$0xff] %v8292_v14 }
 0xcd2   : > { %v8296_v41 = vpop.permute.xlu0 %2919 }
 0xcd4   : > { %v2995_v7 = vpop.permute.xlu2 %2994 }
 0xcd5   : > { %v8298_v6 = vpop.permute.xlu1 %2915 }
 0xcda   : > { %v8302_v40 = vpop.permute.xlu0 %2925 }
 0xcdc   : > { %v3010_v38 = vpop.permute.xlu2 %3009 }
 0xcdd   : > { %v8304_v39 = vpop.permute.xlu1 %2921 }
 0xce2   : > { %v2968_v61 = vpop.permute.xlu0 %2967 }
 0xce3   : > { %v2975_v1 = vmul.f32 0.0, %v2968_v61 }
 0xce5   : > { %v8306_v18 = vpop.permute.xlu1 %2927  ;;  %v3012_v42 = vmul.f32 %v2995_v7, %v2975_v1  ;;  %v3021_v46 = vmul.f32 %v3010_v38, %v2975_v1 }
 0xce7   : > { %3036 = vrot.lane.b32.xlu0 %v3012_v42, %s10842_s5  ;;  %v6055_v42 = vld [vmem:[%s10312_s9 + $0x8] sm:$0x3] }
 0xcea   : > { %v3000_v47 = vpop.permute.xlu0 %2999 }
 0xceb   : > { %v3015_v58 = vmul.f32 %v3000_v47, %v2975_v1 }
 0xced   : > { %v2970_v53 = vpop.permute.xlu1 %2969 }
 0xcee   : > { %v2971_v30 = vsel %vm746_vm12, %v2968_v61, %v2970_v53  ;;  %v2977_v55 = vmul.f32 %v2970_v53, %v8143_v22  ;;  %v2980_v23 = vmul.f32 %v2970_v53, %v8162_v27  ;;  %v2983_v34 = vmul.f32 %v2970_v53, %v8179_v29 }
 0xcef   : > { %3042 = vrot.lane.b32.xlu0 %v3015_v58, %s10842_s5  ;;  %v2976_v45 = vmul.f32 %v2971_v30, %v8140_v25  ;;  %v2979_v2 = vmul.f32 %v2971_v30, %v8159_v49  ;;  %v2982_v5 = vmul.f32 %v2971_v30, %v8176_v62  ;;  %v2986_v58 = vmul.f32 %v2970_v53, %v8196_v44  ;;  %v6059_v53 = vld [vmem:[%s10310_s7 + $0x98] sm:$0xff] }
 0xcf0   : > { %v3014_v36 = vmul.f32 %v2995_v7, %v2977_v55  ;;  %v3017_v60 = vmul.f32 %v3000_v47, %v2980_v23  ;;  %v2985_v55 = vmul.f32 %v2971_v30, %v8193_v10  ;;  %v3095_v23 = vperm.slane %v6055_v42, 1  ;;  %v6058_v30 = vld [vmem:[%s10310_s7 + $0x90] sm:$0xff] }
 0xcf1   : > { %v3013_v13 = vmul.f32 %v2995_v7, %v2976_v45  ;;  %v3016_v37 = vmul.f32 %v3000_v47, %v2979_v2  ;;  %v3094_v47 = vperm.slane %v6055_v42, 0  ;;  %vm10882_vm12 = vcmask 916480  }
 0xcf2   : > { %3040 = vrot.lane.b32.xlu2 %v3014_v36, %s10842_s5  ;;  %v3022_v45 = vmul.f32 %v3010_v38, %v2985_v55  ;;  %v6057_v36 = vld [vmem:[%s10310_s7 + $0x88] sm:$0xff] }
 0xcf3   : > { %3038 = vrot.lane.b32.xlu1 %v3013_v13, %s10842_s5  ;;  %v6056_v13 = vld [vmem:[%s10310_s7 + $0x80] sm:$0xff] }
 0xcf5   : > { %v3005_v59 = vpop.permute.xlu1 %3004 }
 0xcf6   : > { %v3018_v51 = vmul.f32 %v3005_v59, %v2975_v1  ;;  %v3020_v61 = vmul.f32 %v3005_v59, %v2983_v34  ;;  %v3019_v7 = vmul.f32 %v3005_v59, %v2982_v5  ;;  %v3023_v1 = vmul.f32 %v3010_v38, %v2986_v58 }
 0xcf8   : > { %3048 = vrot.lane.b32.xlu0 %v3018_v51, %s10842_s5 }
 0xcfa   : > { %3046 = vrot.lane.b32.xlu2 %v3017_v60, %s10842_s5 }
 0xcfb   : > { %3044 = vrot.lane.b32.xlu1 %v3016_v37, %s10842_s5 }
 0xd00   : > { %3054 = vrot.lane.b32.xlu0 %v3021_v46, %s10842_s5 }
 0xd02   : > { %3052 = vrot.lane.b32.xlu2 %v3020_v61, %s10842_s5 }
 0xd03   : > { %3050 = vrot.lane.b32.xlu1 %v3019_v7, %s10842_s5 }
 0xd08   : > { %3096 = vrot.lane.b32.xlu0 %v3094_v47, %s10843_s12 }
 0xd0a   : > { %3058 = vrot.lane.b32.xlu2 %v3023_v1, %s10842_s5 }
 0xd0b   : > { %3056 = vrot.lane.b32.xlu1 %v3022_v45, %s10842_s5  ;;  %s10961_s5 = smov 2  }
 0xd10   : > { %3128 = vperm.xlu0 %6251, %v6057_v36  }
 0xd12   : > { %3123 = vperm.xlu2 %6252, %v6056_v13  }
 0xd13   : > { %3098 = vrot.lane.b32.xlu1 %v3095_v23, %s10843_s12  ;;  %s11335_s12 = smov 64  }
 0xd1a   : > { %3138 = vperm.xlu2 %6252, %v6059_v53  }
 0xd1b   : > { %3133 = vperm.xlu1 %6253, %v6058_v30  }
 0xd4c   : > { %v8346_v59 = vpop.permute.xlu2 %3040 }
 0xd4d   : > { %10844 = vst [vmem:[#allocation17_spill] sm:$0xff] %v8346_v59 }
 0xd54   : > { %v8350_v51 = vpop.permute.xlu2 %3046 }
 0xd59   : > { %v8348_v2 = vpop.permute.xlu0 %3036 }
 0xd5a   : > { %10845 = vst [vmem:[#allocation22_spill] sm:$0xff] %v8348_v2 }
 0xd5c   : > { %v8356_v38 = vpop.permute.xlu2 %3052 }
 0xd61   : > { %v8352_v60 = vpop.permute.xlu0 %3042 }
 0xd64   : > { %v8362_v5 = vpop.permute.xlu2 %3058 }
 0xd65   : > { %v8354_v37 = vpop.permute.xlu1 %3038 }
 0xd66   : > { %10846 = vst [vmem:[#allocation19_spill] sm:$0xff] %v8354_v37 }
 0xd6a   : > { %v8358_v34 = vpop.permute.xlu0 %3048 }
 0xd6c   : > { %v3124_v58 = vpop.permute.xlu2 %3123 }
 0xd6d   : > { %v8360_v46 = vpop.permute.xlu1 %3044 }
 0xd72   : > { %v8364_v61 = vpop.permute.xlu0 %3054 }
 0xd75   : > { %v8366_v7 = vpop.permute.xlu1 %3050 }
 0xd7a   : > { %v3097_v42 = vpop.permute.xlu0 %3096 }
 0xd7b   : > { %v3104_v47 = vmul.f32 0.0, %v3097_v42 }
 0xd7d   : > { %v8368_v55 = vpop.permute.xlu1 %3056  ;;  %v3141_v1 = vmul.f32 %v3124_v58, %v3104_v47 }
 0xd7f   : > { %3165 = vrot.lane.b32.xlu0 %v3141_v1, %s10847_s6 }
 0xd82   : > { %v3129_v45 = vpop.permute.xlu0 %3128 }
 0xd83   : > { %v3144_v36 = vmul.f32 %v3129_v45, %v3104_v47 }
 0xd85   : > { %v3099_v13 = vpop.permute.xlu1 %3098 }
 0xd86   : > { %v3100_v23 = vsel %vm820_vm10, %v3097_v42, %v3099_v13  ;;  %v3106_v53 = vmul.f32 %v3099_v13, %v8143_v22  ;;  %v3109_v2 = vmul.f32 %v3099_v13, %v8162_v27  ;;  %vm10869_vm10 = vcmask 908288  }
 0xd87   : > { %3171 = vrot.lane.b32.xlu0 %v3144_v36, %s10847_s6  ;;  %v3105_v30 = vmul.f32 %v3100_v23, %v8140_v25  ;;  %v3108_v37 = vmul.f32 %v3100_v23, %v8159_v49  ;;  %v3139_v36 = vpop.permute.xlu2 %3138 }
 0xd88   : > { %v3143_v59 = vmul.f32 %v3124_v58, %v3106_v53  ;;  %v3146_v42 = vmul.f32 %v3129_v45, %v3109_v2 }
 0xd89   : > { %v3142_v52 = vmul.f32 %v3124_v58, %v3105_v30  ;;  %v3145_v17 = vmul.f32 %v3129_v45, %v3108_v37  ;;  %v3112_v58 = vmul.f32 %v3099_v13, %v8179_v29  ;;  %v3114_v37 = vmul.f32 %v3100_v23, %v8193_v10 }
 0xd8a   : > { %3169 = vrot.lane.b32.xlu2 %v3143_v59, %s10847_s6  ;;  %v3150_v59 = vmul.f32 %v3139_v36, %v3104_v47 }
 0xd8b   : > { %3167 = vrot.lane.b32.xlu1 %v3142_v52, %s10847_s6  ;;  %v3111_v52 = vmul.f32 %v3100_v23, %v8176_v62  ;;  %v3151_v45 = vmul.f32 %v3139_v36, %v3114_v37  ;;  %v6063_v23 = vld [vmem:[%s10310_s7 + $0xb0] sm:$0xff] }
 0xd8d   : > { %v3134_v1 = vpop.permute.xlu1 %3133 }
 0xd8e   : > { %v3147_v15 = vmul.f32 %v3134_v1, %v3104_v47  ;;  %v3149_v53 = vmul.f32 %v3134_v1, %v3112_v58  ;;  %v3148_v30 = vmul.f32 %v3134_v1, %v3111_v52  ;;  %v6062_v1 = vld [vmem:[%s10310_s7 + $0xa8] sm:$0xff] }
 0xd90   : > { %3177 = vrot.lane.b32.xlu0 %v3147_v15, %s10847_s6  ;;  %v6060_v15 = vld [vmem:[%s10312_s9 + $0xa] sm:$0x3] }
 0xd91   : > { %v3223_v2 = vperm.slane %v6060_v15, 0  ;;  %v3224_v58 = vperm.slane %v6060_v15, 1 }
 0xd92   : > { %3175 = vrot.lane.b32.xlu2 %v3146_v42, %s10847_s6  ;;  %v6061_v42 = vld [vmem:[%s10310_s7 + $0xa0] sm:$0xff] }
 0xd93   : > { %3173 = vrot.lane.b32.xlu1 %v3145_v17, %s10847_s6  ;;  %v3115_v17 = vmul.f32 %v3099_v13, %v8196_v44  ;;  %v6064_v13 = vld [vmem:[%s10310_s7 + $0xb8] sm:$0xff] }
 0xd95   : > { %v3152_v47 = vmul.f32 %v3139_v36, %v3115_v17 }
 0xd98   : > { %3183 = vrot.lane.b32.xlu0 %v3150_v59, %s10847_s6 }
 0xd9a   : > { %3181 = vrot.lane.b32.xlu2 %v3149_v53, %s10847_s6 }
 0xd9b   : > { %3179 = vrot.lane.b32.xlu1 %v3148_v30, %s10847_s6 }
 0xda0   : > { %3225 = vrot.lane.b32.xlu0 %v3223_v2, %s10626_s28 }
 0xda2   : > { %3187 = vrot.lane.b32.xlu2 %v3152_v47, %s10847_s6 }
 0xda3   : > { %3185 = vrot.lane.b32.xlu1 %v3151_v45, %s10847_s6  ;;  %s10855_s6 = smov 112  }
 0xda8   : > { %3257 = vperm.xlu0 %6251, %v6062_v1  }
 0xdaa   : > { %3252 = vperm.xlu2 %6252, %v6061_v42  }
 0xdab   : > { %3227 = vrot.lane.b32.xlu1 %v3224_v58, %s10626_s28 }
 0xdb2   : > { %3267 = vperm.xlu2 %6252, %v6064_v13  }
 0xdb3   : > { %3262 = vperm.xlu1 %6253, %v6063_v23  }
 0xde4   : > { %v8408_v36 = vpop.permute.xlu2 %3169 }
 0xde5   : > { %10848 = vst [vmem:[#allocation18_spill] sm:$0xff] %v8408_v36 }
 0xdec   : > { %v8412_v52 = vpop.permute.xlu2 %3175 }
 0xdf1   : > { %v8410_v59 = vpop.permute.xlu0 %3165 }
 0xdf2   : > { %10849 = vst [vmem:[#allocation21_spill] sm:$0xff] %v8410_v59 }
 0xdf4   : > { %v8418_v15 = vpop.permute.xlu2 %3181 }
 0xdf5   : > { %10851 = vst [vmem:[#allocation25_spill] sm:$0xff] %v8418_v15 }
 0xdf9   : > { %v8414_v53 = vpop.permute.xlu0 %3171 }
 0xdfc   : > { %v8424_v37 = vpop.permute.xlu2 %3187 }
 0xdfd   : > { %v8416_v30 = vpop.permute.xlu1 %3167  ;;  %10852 = vst [vmem:[#allocation24_spill] sm:$0xff] %v8424_v37 }
 0xdfe   : > { %10850 = vst [vmem:[#allocation27_spill] sm:$0xff] %v8416_v30 }
 0xe02   : > { %v8420_v2 = vpop.permute.xlu0 %3177 }
 0xe04   : > { %v3253_v58 = vpop.permute.xlu2 %3252 }
 0xe05   : > { %v8422_v17 = vpop.permute.xlu1 %3173 }
 0xe0a   : > { %v8426_v47 = vpop.permute.xlu0 %3183 }
 0xe0b   : > { %10853 = vst [vmem:[#allocation23_spill] sm:$0xff] %v8426_v47 }
 0xe0d   : > { %v8428_v45 = vpop.permute.xlu1 %3179 }
 0xe12   : > { %v3226_v1 = vpop.permute.xlu0 %3225 }
 0xe13   : > { %v3233_v42 = vmul.f32 0.0, %v3226_v1 }
 0xe15   : > { %v8430_v13 = vpop.permute.xlu1 %3185  ;;  %v3270_v23 = vmul.f32 %v3253_v58, %v3233_v42 }
 0xe16   : > { %10854 = vst [vmem:[#allocation26_spill] sm:$0xff] %v8430_v13 }
 0xe17   : > { %3294 = vrot.lane.b32.xlu0 %v3270_v23, %s10855_s6 }
 0xe1a   : > { %v3258_v36 = vpop.permute.xlu0 %3257 }
 0xe1b   : > { %v3273_v59 = vmul.f32 %v3258_v36, %v3233_v42 }
 0xe1d   : > { %v3228_v30 = vpop.permute.xlu1 %3227 }
 0xe1e   : > { %v3229_v14 = vsel %vm894_vm2, %v3226_v1, %v3228_v30  ;;  %v3235_v35 = vmul.f32 %v3228_v30, %v8143_v22  ;;  %v3238_v37 = vmul.f32 %v3228_v30, %v8162_v27 }
 0xe1f   : > { %3300 = vrot.lane.b32.xlu0 %v3273_v59, %s10855_s6  ;;  %v3234_v31 = vmul.f32 %v3229_v14, %v8140_v25  ;;  %v3237_v47 = vmul.f32 %v3229_v14, %v8159_v49 }
 0xe20   : > { %v3272_v48 = vmul.f32 %v3253_v58, %v3235_v35  ;;  %v3275_v1 = vmul.f32 %v3258_v36, %v3238_v37  ;;  %v3268_v35 = vpop.permute.xlu2 %3267  ;;  %v3243_v37 = vmul.f32 %v3229_v14, %v8193_v10 }
 0xe21   : > { %v3271_v43 = vmul.f32 %v3253_v58, %v3234_v31  ;;  %v3274_v15 = vmul.f32 %v3258_v36, %v3237_v47  ;;  %v3241_v31 = vmul.f32 %v3228_v30, %v8179_v29 }
 0xe22   : > { %3298 = vrot.lane.b32.xlu2 %v3272_v48, %s10855_s6  ;;  %v3279_v48 = vmul.f32 %v3268_v35, %v3233_v42 }
 0xe23   : > { %3296 = vrot.lane.b32.xlu1 %v3271_v43, %s10855_s6  ;;  %v3240_v43 = vmul.f32 %v3229_v14, %v8176_v62  ;;  %v6069_v14 = vld [vmem:[%s10310_s7 + $0xd8] sm:$0xff] }
 0xe25   : > { %v3263_v23 = vpop.permute.xlu1 %3262 }
 0xe26   : > { %v3276_v13 = vmul.f32 %v3263_v23, %v3233_v42  ;;  %v3278_v59 = vmul.f32 %v3263_v23, %v3241_v31  ;;  %v3277_v58 = vmul.f32 %v3263_v23, %v3240_v43  ;;  %v3280_v42 = vmul.f32 %v3268_v35, %v3243_v37  ;;  %v6067_v23 = vld [vmem:[%s10310_s7 + $0xc8] sm:$0xff] }
 0xe28   : > { %3306 = vrot.lane.b32.xlu0 %v3276_v13, %s10855_s6  ;;  %v6065_v13 = vld [vmem:[%s10312_s9 + $0xc] sm:$0x3] }
 0xe29   : > { %v3352_v36 = vperm.slane %v6065_v13, 0  ;;  %v3353_v31 = vperm.slane %v6065_v13, 1 }
 0xe2a   : > { %3304 = vrot.lane.b32.xlu2 %v3275_v1, %s10855_s6  ;;  %v6066_v1 = vld [vmem:[%s10310_s7 + $0xc0] sm:$0xff] }
 0xe2b   : > { %3302 = vrot.lane.b32.xlu1 %v3274_v15, %s10855_s6  ;;  %v3244_v15 = vmul.f32 %v3228_v30, %v8196_v44  ;;  %v6068_v30 = vld [vmem:[%s10310_s7 + $0xd0] sm:$0xff] }
 0xe2d   : > { %v3281_v47 = vmul.f32 %v3268_v35, %v3244_v15 }
 0xe30   : > { %3312 = vrot.lane.b32.xlu0 %v3279_v48, %s10855_s6 }
 0xe32   : > { %3310 = vrot.lane.b32.xlu2 %v3278_v59, %s10855_s6 }
 0xe33   : > { %3308 = vrot.lane.b32.xlu1 %v3277_v58, %s10855_s6 }
 0xe38   : > { %3354 = vrot.lane.b32.xlu0 %v3352_v36, %s10856_s18 }
 0xe3a   : > { %3316 = vrot.lane.b32.xlu2 %v3281_v47, %s10855_s6 }
 0xe3b   : > { %3314 = vrot.lane.b32.xlu1 %v3280_v42, %s10855_s6 }
 0xe40   : > { %3386 = vperm.xlu0 %6251, %v6067_v23  }
 0xe42   : > { %3381 = vperm.xlu2 %6252, %v6066_v1  }
 0xe43   : > { %3356 = vrot.lane.b32.xlu1 %v3353_v31, %s10856_s18 }
 0xe4a   : > { %3396 = vperm.xlu2 %6252, %v6069_v14  }
 0xe4b   : > { %3391 = vperm.xlu1 %6253, %v6068_v30  }
 0xe7c   : > { %v8470_v35 = vpop.permute.xlu2 %3298 }
 0xe7d   : > { %10857 = vst [vmem:[#allocation29_spill] sm:$0xff] %v8470_v35 }
 0xe84   : > { %v8474_v43 = vpop.permute.xlu2 %3304 }
 0xe85   : > { %10859 = vst [vmem:[#allocation28_spill] sm:$0xff] %v8474_v43 }
 0xe89   : > { %v8472_v48 = vpop.permute.xlu0 %3294 }
 0xe8a   : > { %10858 = vst [vmem:[#allocation31_spill] sm:$0xff] %v8472_v48 }
 0xe8c   : > { %v8480_v13 = vpop.permute.xlu2 %3310 }
 0xe8d   : > { %10862 = vst [vmem:[#allocation33_spill] sm:$0xff] %v8480_v13 }
 0xe91   : > { %v8476_v59 = vpop.permute.xlu0 %3300 }
 0xe92   : > { %10860 = vst [vmem:[#allocation30_spill] sm:$0xff] %v8476_v59 }
 0xe94   : > { %v8486_v37 = vpop.permute.xlu2 %3316 }
 0xe95   : > { %v8478_v58 = vpop.permute.xlu1 %3296  ;;  %10865 = vst [vmem:[#allocation37_spill] sm:$0xff] %v8486_v37 }
 0xe96   : > { %10861 = vst [vmem:[#allocation32_spill] sm:$0xff] %v8478_v58 }
 0xe9a   : > { %v8482_v36 = vpop.permute.xlu0 %3306 }
 0xe9b   : > { %10863 = vst [vmem:[#allocation34_spill] sm:$0xff] %v8482_v36 }
 0xe9c   : > { %v3382_v31 = vpop.permute.xlu2 %3381 }
 0xe9d   : > { %v8484_v15 = vpop.permute.xlu1 %3302 }
 0xe9e   : > { %10864 = vst [vmem:[#allocation35_spill] sm:$0xff] %v8484_v15 }
 0xea2   : > { %v8488_v47 = vpop.permute.xlu0 %3312 }
 0xea3   : > { %10866 = vst [vmem:[#allocation36_spill] sm:$0xff] %v8488_v47 }
 0xea5   : > { %v8490_v42 = vpop.permute.xlu1 %3308 }
 0xea6   : > { %10867 = vst [vmem:[#allocation40_spill] sm:$0xff] %v8490_v42 }
 0xeaa   : > { %v3355_v23 = vpop.permute.xlu0 %3354 }
 0xeab   : > { %v3362_v1 = vmul.f32 0.0, %v3355_v23 }
 0xead   : > { %v8492_v14 = vpop.permute.xlu1 %3314  ;;  %v3399_v30 = vmul.f32 %v3382_v31, %v3362_v1 }
 0xeae   : > { %10868 = vst [vmem:[#allocation38_spill] sm:$0xff] %v8492_v14 }
 0xeaf   : > { %3423 = vrot.lane.b32.xlu0 %v3399_v30, %s10856_s18 }
 0xeb2   : > { %v3387_v35 = vpop.permute.xlu0 %3386 }
 0xeb3   : > { %v3402_v48 = vmul.f32 %v3387_v35, %v3362_v1 }
 0xeb5   : > { %v3357_v58 = vpop.permute.xlu1 %3356 }
 0xeb6   : > { %v3358_v13 = vsel %vm10869_vm10, %v3355_v23, %v3357_v58  ;;  %v3364_v36 = vmul.f32 %v3357_v58, %v8143_v22  ;;  %v3367_v14 = vmul.f32 %v3357_v58, %v8162_v27  ;;  %vm11026_vm10 = vcmask 637952  }
 0xeb7   : > { %3429 = vrot.lane.b32.xlu0 %v3402_v48, %s10856_s18  ;;  %v3363_v37 = vmul.f32 %v3358_v13, %v8140_v25  ;;  %v3366_v43 = vmul.f32 %v3358_v13, %v8159_v49  ;;  %v3397_v48 = vpop.permute.xlu2 %3396 }
 0xeb8   : > { %v3401_v47 = vmul.f32 %v3382_v31, %v3364_v36  ;;  %v3404_v23 = vmul.f32 %v3387_v35, %v3367_v14  ;;  %v3370_v36 = vmul.f32 %v3357_v58, %v8179_v29 }
 0xeb9   : > { %v3400_v42 = vmul.f32 %v3382_v31, %v3363_v37  ;;  %v3403_v15 = vmul.f32 %v3387_v35, %v3366_v43  ;;  %v3408_v37 = vmul.f32 %v3397_v48, %v3362_v1  ;;  %v3373_v43 = vmul.f32 %v3357_v58, %v8196_v44  ;;  %v6074_v58 = vld [vmem:[%s10310_s7 + $0xf8] sm:$0xff] }
 0xeba   : > { %3427 = vrot.lane.b32.xlu2 %v3401_v47, %s10856_s18  ;;  %v3369_v47 = vmul.f32 %v3358_v13, %v8176_v62 }
 0xebb   : > { %3425 = vrot.lane.b32.xlu1 %v3400_v42, %s10856_s18 }
 0xebd   : > { %v3392_v30 = vpop.permute.xlu1 %3391 }
 0xebe   : > { %v3405_v59 = vmul.f32 %v3392_v30, %v3362_v1  ;;  %v3407_v42 = vmul.f32 %v3392_v30, %v3370_v36  ;;  %v3406_v31 = vmul.f32 %v3392_v30, %v3369_v47  ;;  %v3410_v1 = vmul.f32 %v3397_v48, %v3373_v43  ;;  %v6072_v30 = vld [vmem:[%s10310_s7 + $0xe8] sm:$0xff] }
 0xec0   : > { %3435 = vrot.lane.b32.xlu0 %v3405_v59, %s10856_s18  ;;  %v6070_v59 = vld [vmem:[%s10312_s9 + $0xe] sm:$0x3] }
 0xec1   : > { %v3481_v35 = vperm.slane %v6070_v59, 0  ;;  %v3482_v36 = vperm.slane %v6070_v59, 1 }
 0xec2   : > { %3433 = vrot.lane.b32.xlu2 %v3404_v23, %s10856_s18  ;;  %v6071_v23 = vld [vmem:[%s10310_s7 + $0xe0] sm:$0xff] }
 0xec3   : > { %3431 = vrot.lane.b32.xlu1 %v3403_v15, %s10856_s18  ;;  %v3372_v15 = vmul.f32 %v3358_v13, %v8193_v10  ;;  %v6073_v13 = vld [vmem:[%s10310_s7 + $0xf0] sm:$0xff] }
 0xec5   : > { %v3409_v14 = vmul.f32 %v3397_v48, %v3372_v15 }
 0xec8   : > { %3441 = vrot.lane.b32.xlu0 %v3408_v37, %s10856_s18 }
 0xeca   : > { %3439 = vrot.lane.b32.xlu2 %v3407_v42, %s10856_s18 }
 0xecb   : > { %3437 = vrot.lane.b32.xlu1 %v3406_v31, %s10856_s18 }
 0xed0   : > { %3483 = vrot.lane.b32.xlu0 %v3481_v35, %s10855_s6 }
 0xed2   : > { %3445 = vrot.lane.b32.xlu2 %v3410_v1, %s10856_s18 }
 0xed3   : > { %3443 = vrot.lane.b32.xlu1 %v3409_v14, %s10856_s18 }
 0xed8   : > { %3515 = vperm.xlu0 %6251, %v6072_v30  }
 0xeda   : > { %3510 = vperm.xlu2 %6252, %v6071_v23  }
 0xedb   : > { %3485 = vrot.lane.b32.xlu1 %v3482_v36, %s10855_s6  ;;  %s10991_s6 = smov 15  }
 0xee2   : > { %3525 = vperm.xlu2 %6252, %v6074_v58  }
 0xee3   : > { %3520 = vperm.xlu1 %6253, %v6073_v13  }
 0xf14   : > { %v8532_v48 = vpop.permute.xlu2 %3427 }
 0xf15   : > { %10870 = vst [vmem:[#allocation39_spill] sm:$0xff] %v8532_v48 }
 0xf1c   : > { %v8536_v47 = vpop.permute.xlu2 %3433 }
 0xf1d   : > { %10872 = vst [vmem:[#allocation41_spill] sm:$0xff] %v8536_v47 }
 0xf21   : > { %v8534_v37 = vpop.permute.xlu0 %3423 }
 0xf22   : > { %10871 = vst [vmem:[#allocation43_spill] sm:$0xff] %v8534_v37 }
 0xf24   : > { %v8542_v59 = vpop.permute.xlu2 %3439 }
 0xf25   : > { %10875 = vst [vmem:[#allocation45_spill] sm:$0xff] %v8542_v59 }
 0xf29   : > { %v8538_v42 = vpop.permute.xlu0 %3429 }
 0xf2a   : > { %10873 = vst [vmem:[#allocation42_spill] sm:$0xff] %v8538_v42 }
 0xf2c   : > { %v8548_v15 = vpop.permute.xlu2 %3445 }
 0xf2d   : > { %v8540_v31 = vpop.permute.xlu1 %3425  ;;  %10878 = vst [vmem:[#allocation48_spill] sm:$0xff] %v8548_v15 }
 0xf2e   : > { %10874 = vst [vmem:[#allocation46_spill] sm:$0xff] %v8540_v31 }
 0xf32   : > { %v8544_v35 = vpop.permute.xlu0 %3435 }
 0xf33   : > { %10876 = vst [vmem:[#allocation44_spill] sm:$0xff] %v8544_v35 }
 0xf34   : > { %v3511_v36 = vpop.permute.xlu2 %3510 }
 0xf35   : > { %v8546_v43 = vpop.permute.xlu1 %3431 }
 0xf36   : > { %10877 = vst [vmem:[#allocation49_spill] sm:$0xff] %v8546_v43 }
 0xf3a   : > { %v8550_v1 = vpop.permute.xlu0 %3441 }
 0xf3b   : > { %10879 = vst [vmem:[#allocation47_spill] sm:$0xff] %v8550_v1 }
 0xf3d   : > { %v8552_v14 = vpop.permute.xlu1 %3437 }
 0xf3e   : > { %10880 = vst [vmem:[#allocation50_spill] sm:$0xff] %v8552_v14 }
 0xf42   : > { %v3484_v30 = vpop.permute.xlu0 %3483 }
 0xf43   : > { %v3491_v23 = vmul.f32 0.0, %v3484_v30 }
 0xf45   : > { %v8554_v58 = vpop.permute.xlu1 %3443  ;;  %v3528_v13 = vmul.f32 %v3511_v36, %v3491_v23 }
 0xf46   : > { %10881 = vst [vmem:[#allocation51_spill] sm:$0xff] %v8554_v58 }
 0xf47   : > { %3552 = vrot.lane.b32.xlu0 %v3528_v13, %s10626_s28 }
 0xf4a   : > { %v3516_v48 = vpop.permute.xlu0 %3515 }
 0xf4b   : > { %v3531_v37 = vmul.f32 %v3516_v48, %v3491_v23 }
 0xf4d   : > { %v3486_v31 = vpop.permute.xlu1 %3485 }
 0xf4e   : > { %v3487_v59 = vsel %vm10882_vm12, %v3484_v30, %v3486_v31  ;;  %v3493_v35 = vmul.f32 %v3486_v31, %v8143_v22  ;;  %v3496_v58 = vmul.f32 %v3486_v31, %v8162_v27  ;;  %vm11028_vm12 = vmmov %vm11026_vm10 }
 0xf4f   : > { %3558 = vrot.lane.b32.xlu0 %v3531_v37, %s10626_s28  ;;  %v3492_v15 = vmul.f32 %v3487_v59, %v8140_v25  ;;  %v3495_v47 = vmul.f32 %v3487_v59, %v8159_v49  ;;  %v3526_v37 = vpop.permute.xlu2 %3525 }
 0xf50   : > { %v3530_v1 = vmul.f32 %v3511_v36, %v3493_v35  ;;  %v3533_v30 = vmul.f32 %v3516_v48, %v3496_v58  ;;  %v3499_v35 = vmul.f32 %v3486_v31, %v8179_v29 }
 0xf51   : > { %v3529_v14 = vmul.f32 %v3511_v36, %v3492_v15  ;;  %v3532_v43 = vmul.f32 %v3516_v48, %v3495_v47  ;;  %v3537_v15 = vmul.f32 %v3526_v37, %v3491_v23  ;;  %v3502_v47 = vmul.f32 %v3486_v31, %v8196_v44  ;;  %v6079_v31 = vld [vmem:[%s10310_s7 + $0x118] sm:$0xff] }
 0xf52   : > { %3556 = vrot.lane.b32.xlu2 %v3530_v1, %s10626_s28  ;;  %v3498_v1 = vmul.f32 %v3487_v59, %v8176_v62 }
 0xf53   : > { %3554 = vrot.lane.b32.xlu1 %v3529_v14, %s10626_s28 }
 0xf55   : > { %v3521_v13 = vpop.permute.xlu1 %3520 }
 0xf56   : > { %v3534_v42 = vmul.f32 %v3521_v13, %v3491_v23  ;;  %v3536_v14 = vmul.f32 %v3521_v13, %v3499_v35  ;;  %v3535_v36 = vmul.f32 %v3521_v13, %v3498_v1  ;;  %v3539_v23 = vmul.f32 %v3526_v37, %v3502_v47  ;;  %v6077_v13 = vld [vmem:[%s10310_s7 + $0x108] sm:$0xff] }
 0xf58   : > { %3564 = vrot.lane.b32.xlu0 %v3534_v42, %s10626_s28  ;;  %v6075_v42 = vld [vmem:[%s10312_s9 + $0x10] sm:$0x3] }
 0xf59   : > { %v3610_v48 = vperm.slane %v6075_v42, 0  ;;  %v3611_v35 = vperm.slane %v6075_v42, 1 }
 0xf5a   : > { %3562 = vrot.lane.b32.xlu2 %v3533_v30, %s10626_s28  ;;  %v6076_v30 = vld [vmem:[%s10310_s7 + $0x100] sm:$0xff] }
 0xf5b   : > { %3560 = vrot.lane.b32.xlu1 %v3532_v43, %s10626_s28  ;;  %v3501_v43 = vmul.f32 %v3487_v59, %v8193_v10  ;;  %v6078_v59 = vld [vmem:[%s10310_s7 + $0x110] sm:$0xff] }
 0xf5d   : > { %v3538_v58 = vmul.f32 %v3526_v37, %v3501_v43 }
 0xf60   : > { %3570 = vrot.lane.b32.xlu0 %v3537_v15, %s10626_s28 }
 0xf62   : > { %3568 = vrot.lane.b32.xlu2 %v3536_v14, %s10626_s28 }
 0xf63   : > { %3566 = vrot.lane.b32.xlu1 %v3535_v36, %s10626_s28 }
 0xf68   : > { %3612 = vrot.lane.b32.xlu0 %v3610_v48, %s10883_s30 }
 0xf6a   : > { %3574 = vrot.lane.b32.xlu2 %v3539_v23, %s10626_s28 }
 0xf6b   : > { %3572 = vrot.lane.b32.xlu1 %v3538_v58, %s10626_s28  ;;  %s10896_s28 = smov 109  }
 0xf70   : > { %3644 = vperm.xlu0 %6251, %v6077_v13  }
 0xf72   : > { %3639 = vperm.xlu2 %6252, %v6076_v30  }
 0xf73   : > { %3614 = vrot.lane.b32.xlu1 %v3611_v35, %s10883_s30  ;;  %s10976_s30 = smov 14  }
 0xf7a   : > { %3654 = vperm.xlu2 %6252, %v6079_v31  }
 0xf7b   : > { %3649 = vperm.xlu1 %6253, %v6078_v59  }
 0xfac   : > { %v8594_v37 = vpop.permute.xlu2 %3556 }
 0xfad   : > { %10884 = vst [vmem:[#allocation52_spill] sm:$0xff] %v8594_v37 }
 0xfb4   : > { %v8598_v1 = vpop.permute.xlu2 %3562 }
 0xfb5   : > { %10886 = vst [vmem:[#allocation54_spill] sm:$0xff] %v8598_v1 }
 0xfb9   : > { %v8596_v15 = vpop.permute.xlu0 %3552 }
 0xfba   : > { %10885 = vst [vmem:[#allocation53_spill] sm:$0xff] %v8596_v15 }
 0xfbc   : > { %v8604_v42 = vpop.permute.xlu2 %3568 }
 0xfbd   : > { %10889 = vst [vmem:[#allocation55_spill] sm:$0xff] %v8604_v42 }
 0xfc1   : > { %v8600_v14 = vpop.permute.xlu0 %3558 }
 0xfc2   : > { %10887 = vst [vmem:[#allocation58_spill] sm:$0xff] %v8600_v14 }
 0xfc4   : > { %v8610_v43 = vpop.permute.xlu2 %3574 }
 0xfc5   : > { %v8602_v36 = vpop.permute.xlu1 %3554  ;;  %10892 = vst [vmem:[#allocation63_spill] sm:$0xff] %v8610_v43 }
 0xfc6   : > { %10888 = vst [vmem:[#allocation56_spill] sm:$0xff] %v8602_v36 }
 0xfca   : > { %v8606_v48 = vpop.permute.xlu0 %3564 }
 0xfcb   : > { %10890 = vst [vmem:[#allocation57_spill] sm:$0xff] %v8606_v48 }
 0xfcc   : > { %v3640_v35 = vpop.permute.xlu2 %3639 }
 0xfcd   : > { %v8608_v47 = vpop.permute.xlu1 %3560 }
 0xfce   : > { %10891 = vst [vmem:[#allocation64_spill] sm:$0xff] %v8608_v47 }
 0xfd2   : > { %v8612_v23 = vpop.permute.xlu0 %3570 }
 0xfd3   : > { %10893 = vst [vmem:[#allocation61_spill] sm:$0xff] %v8612_v23 }
 0xfd5   : > { %v8614_v58 = vpop.permute.xlu1 %3566 }
 0xfd6   : > { %10894 = vst [vmem:[#allocation59_spill] sm:$0xff] %v8614_v58 }
 0xfda   : > { %v3613_v13 = vpop.permute.xlu0 %3612 }
 0xfdb   : > { %v3620_v30 = vmul.f32 0.0, %v3613_v13 }
 0xfdd   : > { %v8616_v31 = vpop.permute.xlu1 %3572  ;;  %v3657_v59 = vmul.f32 %v3640_v35, %v3620_v30 }
 0xfde   : > { %10895 = vst [vmem:[#allocation60_spill] sm:$0xff] %v8616_v31 }
 0xfdf   : > { %3681 = vrot.lane.b32.xlu0 %v3657_v59, %s10896_s28 }
 0xfe2   : > { %v3645_v37 = vpop.permute.xlu0 %3644 }
 0xfe3   : > { %v3660_v15 = vmul.f32 %v3645_v37, %v3620_v30 }
 0xfe5   : > { %v3615_v36 = vpop.permute.xlu1 %3614 }
 0xfe6   : > { %v3616_v42 = vsel %vm10897_vm13, %v3613_v13, %v3615_v36  ;;  %v3622_v48 = vmul.f32 %v3615_v36, %v8143_v22  ;;  %v3625_v31 = vmul.f32 %v3615_v36, %v8162_v27  ;;  %vm11031_vm13 = vmmov %vm11026_vm10 }
 0xfe7   : > { %3687 = vrot.lane.b32.xlu0 %v3660_v15, %s10896_s28  ;;  %v3621_v43 = vmul.f32 %v3616_v42, %v8140_v25  ;;  %v3624_v1 = vmul.f32 %v3616_v42, %v8159_v49  ;;  %v3655_v15 = vpop.permute.xlu2 %3654 }
 0xfe8   : > { %v3659_v23 = vmul.f32 %v3640_v35, %v3622_v48  ;;  %v3662_v13 = vmul.f32 %v3645_v37, %v3625_v31  ;;  %v3628_v48 = vmul.f32 %v3615_v36, %v8179_v29 }
 0xfe9   : > { %v3658_v58 = vmul.f32 %v3640_v35, %v3621_v43  ;;  %v3661_v47 = vmul.f32 %v3645_v37, %v3624_v1  ;;  %v3666_v43 = vmul.f32 %v3655_v15, %v3620_v30  ;;  %v3631_v1 = vmul.f32 %v3615_v36, %v8196_v44  ;;  %v6084_v36 = vld [vmem:[%s10310_s7 + $0x138] sm:$0xff] }
 0xfea   : > { %3685 = vrot.lane.b32.xlu2 %v3659_v23, %s10896_s28  ;;  %v3627_v23 = vmul.f32 %v3616_v42, %v8176_v62 }
 0xfeb   : > { %3683 = vrot.lane.b32.xlu1 %v3658_v58, %s10896_s28 }
 0xfed   : > { %v3650_v59 = vpop.permute.xlu1 %3649 }
 0xfee   : > { %v3663_v14 = vmul.f32 %v3650_v59, %v3620_v30  ;;  %v3665_v58 = vmul.f32 %v3650_v59, %v3628_v48  ;;  %v3664_v35 = vmul.f32 %v3650_v59, %v3627_v23  ;;  %v3668_v30 = vmul.f32 %v3655_v15, %v3631_v1  ;;  %v6082_v59 = vld [vmem:[%s10310_s7 + $0x128] sm:$0xff] }
 0xff0   : > { %3693 = vrot.lane.b32.xlu0 %v3663_v14, %s10896_s28  ;;  %v6080_v14 = vld [vmem:[%s10312_s9 + $0x12] sm:$0x3] }
 0xff1   : > { %v3739_v37 = vperm.slane %v6080_v14, 0  ;;  %v3740_v48 = vperm.slane %v6080_v14, 1 }
 0xff2   : > { %3691 = vrot.lane.b32.xlu2 %v3662_v13, %s10896_s28  ;;  %v6081_v13 = vld [vmem:[%s10310_s7 + $0x120] sm:$0xff] }
 0xff3   : > { %3689 = vrot.lane.b32.xlu1 %v3661_v47, %s10896_s28  ;;  %v3630_v47 = vmul.f32 %v3616_v42, %v8193_v10  ;;  %v6083_v42 = vld [vmem:[%s10310_s7 + $0x130] sm:$0xff] }
 0xff5   : > { %v3667_v31 = vmul.f32 %v3655_v15, %v3630_v47 }
 0xff8   : > { %3699 = vrot.lane.b32.xlu0 %v3666_v43, %s10896_s28 }
 0xffa   : > { %3697 = vrot.lane.b32.xlu2 %v3665_v58, %s10896_s28 }
 0xffb   : > { %3695 = vrot.lane.b32.xlu1 %v3664_v35, %s10896_s28 }
0x1000   : > { %3741 = vrot.lane.b32.xlu0 %v3739_v37, %s10898_s11 }
0x1002   : > { %3703 = vrot.lane.b32.xlu2 %v3668_v30, %s10896_s28 }
0x1003   : > { %3701 = vrot.lane.b32.xlu1 %v3667_v31, %s10896_s28  ;;  %s10911_s28 = smov 108  }
0x1008   : > { %3773 = vperm.xlu0 %6251, %v6082_v59  }
0x100a   : > { %3768 = vperm.xlu2 %6252, %v6081_v13  }
0x100b   : > { %3743 = vrot.lane.b32.xlu1 %v3740_v48, %s10898_s11  ;;  %s11042_s11 = smov 18  }
0x1012   : > { %3783 = vperm.xlu2 %6252, %v6084_v36  }
0x1013   : > { %3778 = vperm.xlu1 %6253, %v6083_v42  }
0x1044   : > { %v8656_v15 = vpop.permute.xlu2 %3685 }
0x1045   : > { %10899 = vst [vmem:[#allocation62_spill] sm:$0xff] %v8656_v15 }
0x104c   : > { %v8660_v23 = vpop.permute.xlu2 %3691 }
0x104d   : > { %10901 = vst [vmem:[#allocation69_spill] sm:$0xff] %v8660_v23 }
0x1051   : > { %v8658_v43 = vpop.permute.xlu0 %3681 }
0x1052   : > { %10900 = vst [vmem:[#allocation68_spill] sm:$0xff] %v8658_v43 }
0x1054   : > { %v8666_v14 = vpop.permute.xlu2 %3697 }
0x1055   : > { %10904 = vst [vmem:[#allocation67_spill] sm:$0xff] %v8666_v14 }
0x1059   : > { %v8662_v58 = vpop.permute.xlu0 %3687 }
0x105a   : > { %10902 = vst [vmem:[#allocation76_spill] sm:$0xff] %v8662_v58 }
0x105c   : > { %v8672_v47 = vpop.permute.xlu2 %3703 }
0x105d   : > { %v8664_v35 = vpop.permute.xlu1 %3683  ;;  %10907 = vst [vmem:[#allocation82_spill] sm:$0xff] %v8672_v47 }
0x105e   : > { %10903 = vst [vmem:[#allocation74_spill] sm:$0xff] %v8664_v35 }
0x1062   : > { %v8668_v37 = vpop.permute.xlu0 %3693 }
0x1063   : > { %10905 = vst [vmem:[#allocation66_spill] sm:$0xff] %v8668_v37 }
0x1064   : > { %v3769_v48 = vpop.permute.xlu2 %3768 }
0x1065   : > { %v8670_v1 = vpop.permute.xlu1 %3689 }
0x1066   : > { %10906 = vst [vmem:[#allocation70_spill] sm:$0xff] %v8670_v1 }
0x106a   : > { %v8674_v30 = vpop.permute.xlu0 %3699 }
0x106b   : > { %10908 = vst [vmem:[#allocation81_spill] sm:$0xff] %v8674_v30 }
0x106d   : > { %v8676_v31 = vpop.permute.xlu1 %3695 }
0x106e   : > { %10909 = vst [vmem:[#allocation65_spill] sm:$0xff] %v8676_v31 }
0x1072   : > { %v3742_v59 = vpop.permute.xlu0 %3741 }
0x1073   : > { %v3749_v13 = vmul.f32 0.0, %v3742_v59 }
0x1075   : > { %v8678_v36 = vpop.permute.xlu1 %3701  ;;  %v3786_v42 = vmul.f32 %v3769_v48, %v3749_v13 }
0x1076   : > { %10910 = vst [vmem:[#allocation71_spill] sm:$0xff] %v8678_v36 }
0x1077   : > { %3810 = vrot.lane.b32.xlu0 %v3786_v42, %s10911_s28 }
0x107a   : > { %v3774_v15 = vpop.permute.xlu0 %3773 }
0x107b   : > { %v3789_v43 = vmul.f32 %v3774_v15, %v3749_v13 }
0x107d   : > { %v3744_v35 = vpop.permute.xlu1 %3743 }
0x107e   : > { %v3745_v14 = vsel %vm10912_vm4, %v3742_v59, %v3744_v35  ;;  %v3751_v37 = vmul.f32 %v3744_v35, %v8143_v22  ;;  %v3754_v36 = vmul.f32 %v3744_v35, %v8162_v27  ;;  %vm11033_vm4 = vmmov %vm11026_vm10 }
0x107f   : > { %3816 = vrot.lane.b32.xlu0 %v3789_v43, %s10911_s28  ;;  %v3750_v47 = vmul.f32 %v3745_v14, %v8140_v25  ;;  %v3753_v23 = vmul.f32 %v3745_v14, %v8159_v49  ;;  %v3784_v43 = vpop.permute.xlu2 %3783 }
0x1080   : > { %v3788_v30 = vmul.f32 %v3769_v48, %v3751_v37  ;;  %v3791_v59 = vmul.f32 %v3774_v15, %v3754_v36  ;;  %v3757_v37 = vmul.f32 %v3744_v35, %v8179_v29 }
0x1081   : > { %v3787_v31 = vmul.f32 %v3769_v48, %v3750_v47  ;;  %v3790_v1 = vmul.f32 %v3774_v15, %v3753_v23  ;;  %v3795_v47 = vmul.f32 %v3784_v43, %v3749_v13  ;;  %v3760_v23 = vmul.f32 %v3744_v35, %v8196_v44  ;;  %v6089_v35 = vld [vmem:[%s10310_s7 + $0x158] sm:$0xff] }
0x1082   : > { %3814 = vrot.lane.b32.xlu2 %v3788_v30, %s10911_s28  ;;  %v3756_v30 = vmul.f32 %v3745_v14, %v8176_v62 }
0x1083   : > { %3812 = vrot.lane.b32.xlu1 %v3787_v31, %s10911_s28 }
0x1085   : > { %v3779_v42 = vpop.permute.xlu1 %3778 }
0x1086   : > { %v3792_v58 = vmul.f32 %v3779_v42, %v3749_v13  ;;  %v3794_v31 = vmul.f32 %v3779_v42, %v3757_v37  ;;  %v3793_v48 = vmul.f32 %v3779_v42, %v3756_v30  ;;  %v3797_v13 = vmul.f32 %v3784_v43, %v3760_v23  ;;  %v6087_v42 = vld [vmem:[%s10310_s7 + $0x148] sm:$0xff] }
0x1088   : > { %3822 = vrot.lane.b32.xlu0 %v3792_v58, %s10911_s28  ;;  %v6085_v58 = vld [vmem:[%s10312_s9 + $0x14] sm:$0x3] }
0x1089   : > { %v3868_v15 = vperm.slane %v6085_v58, 0  ;;  %v3869_v37 = vperm.slane %v6085_v58, 1 }
0x108a   : > { %3820 = vrot.lane.b32.xlu2 %v3791_v59, %s10911_s28  ;;  %v6086_v59 = vld [vmem:[%s10310_s7 + $0x140] sm:$0xff] }
0x108b   : > { %3818 = vrot.lane.b32.xlu1 %v3790_v1, %s10911_s28  ;;  %v3759_v1 = vmul.f32 %v3745_v14, %v8193_v10  ;;  %v6088_v14 = vld [vmem:[%s10310_s7 + $0x150] sm:$0xff] }
0x108d   : > { %v3796_v36 = vmul.f32 %v3784_v43, %v3759_v1 }
0x1090   : > { %3828 = vrot.lane.b32.xlu0 %v3795_v47, %s10911_s28 }
0x1092   : > { %3826 = vrot.lane.b32.xlu2 %v3794_v31, %s10911_s28 }
0x1093   : > { %3824 = vrot.lane.b32.xlu1 %v3793_v48, %s10911_s28 }
0x1098   : > { %3870 = vrot.lane.b32.xlu0 %v3868_v15, %s10837_s2 }
0x109a   : > { %3832 = vrot.lane.b32.xlu2 %v3797_v13, %s10911_s28 }
0x109b   : > { %3830 = vrot.lane.b32.xlu1 %v3796_v36, %s10911_s28  ;;  %s10960_s28 = smov 93  }
0x10a0   : > { %3902 = vperm.xlu0 %6251, %v6087_v42  }
0x10a2   : > { %3897 = vperm.xlu2 %6252, %v6086_v59  }
0x10a3   : > { %3872 = vrot.lane.b32.xlu1 %v3869_v37, %s10837_s2  ;;  %s11244_s2 = smov 30  }
0x10aa   : > { %3912 = vperm.xlu2 %6252, %v6089_v35  }
0x10ab   : > { %3907 = vperm.xlu1 %6253, %v6088_v14  }
0x10dc   : > { %v8718_v43 = vpop.permute.xlu2 %3814 }
0x10dd   : > { %10913 = vst [vmem:[#allocation72_spill] sm:$0xff] %v8718_v43 }
0x10e4   : > { %v8722_v30 = vpop.permute.xlu2 %3820 }
0x10e5   : > { %10915 = vst [vmem:[#allocation86_spill] sm:$0xff] %v8722_v30 }
0x10e9   : > { %v8720_v47 = vpop.permute.xlu0 %3810 }
0x10ea   : > { %10914 = vst [vmem:[#allocation75_spill] sm:$0xff] %v8720_v47 }
0x10ec   : > { %v8728_v58 = vpop.permute.xlu2 %3826 }
0x10ed   : > { %10918 = vst [vmem:[#allocation92_spill] sm:$0xff] %v8728_v58 }
0x10f1   : > { %v8724_v31 = vpop.permute.xlu0 %3816 }
0x10f2   : > { %10916 = vst [vmem:[#allocation87_spill] sm:$0xff] %v8724_v31 }
0x10f4   : > { %v8734_v1 = vpop.permute.xlu2 %3832 }
0x10f5   : > { %v8726_v48 = vpop.permute.xlu1 %3812  ;;  %10921 = vst [vmem:[#allocation88_spill] sm:$0xff] %v8734_v1 }
0x10f6   : > { %10917 = vst [vmem:[#allocation80_spill] sm:$0xff] %v8726_v48 }
0x10fa   : > { %v8730_v15 = vpop.permute.xlu0 %3822 }
0x10fb   : > { %10919 = vst [vmem:[#allocation79_spill] sm:$0xff] %v8730_v15 }
0x10fc   : > { %v3898_v37 = vpop.permute.xlu2 %3897 }
0x10fd   : > { %v8732_v23 = vpop.permute.xlu1 %3818 }
0x10fe   : > { %10920 = vst [vmem:[#allocation77_spill] sm:$0xff] %v8732_v23 }
0x1102   : > { %v8736_v13 = vpop.permute.xlu0 %3828 }
0x1103   : > { %10922 = vst [vmem:[#allocation99_spill] sm:$0xff] %v8736_v13 }
0x1105   : > { %v8738_v36 = vpop.permute.xlu1 %3824 }
0x1106   : > { %10923 = vst [vmem:[#allocation98_spill] sm:$0xff] %v8738_v36 }
0x110a   : > { %v3871_v42 = vpop.permute.xlu0 %3870 }
0x110b   : > { %v3878_v59 = vmul.f32 0.0, %v3871_v42 }
0x110d   : > { %v8740_v35 = vpop.permute.xlu1 %3830  ;;  %v3915_v14 = vmul.f32 %v3898_v37, %v3878_v59 }
0x110e   : > { %10924 = vst [vmem:[#allocation73_spill] sm:$0xff] %v8740_v35 }
0x110f   : > { %3939 = vrot.lane.b32.xlu0 %v3915_v14, %s10643_s21 }
0x1112   : > { %v3903_v43 = vpop.permute.xlu0 %3902 }
0x1113   : > { %v3918_v47 = vmul.f32 %v3903_v43, %v3878_v59 }
0x1115   : > { %v3873_v48 = vpop.permute.xlu1 %3872 }
0x1116   : > { %v3874_v58 = vsel %vm10925_vm7, %v3871_v42, %v3873_v48  ;;  %v3880_v15 = vmul.f32 %v3873_v48, %v8143_v22  ;;  %v3883_v35 = vmul.f32 %v3873_v48, %v8162_v27  ;;  %vm11036_vm7 = vmmov %vm11033_vm4 }
0x1117   : > { %3945 = vrot.lane.b32.xlu0 %v3918_v47, %s10643_s21  ;;  %v3879_v1 = vmul.f32 %v3874_v58, %v8140_v25  ;;  %v3882_v30 = vmul.f32 %v3874_v58, %v8159_v49  ;;  %v3913_v47 = vpop.permute.xlu2 %3912 }
0x1118   : > { %v3917_v13 = vmul.f32 %v3898_v37, %v3880_v15  ;;  %v3920_v42 = vmul.f32 %v3903_v43, %v3883_v35  ;;  %v3886_v15 = vmul.f32 %v3873_v48, %v8179_v29 }
0x1119   : > { %v3916_v36 = vmul.f32 %v3898_v37, %v3879_v1  ;;  %v3919_v23 = vmul.f32 %v3903_v43, %v3882_v30  ;;  %v3924_v1 = vmul.f32 %v3913_v47, %v3878_v59  ;;  %v3889_v30 = vmul.f32 %v3873_v48, %v8196_v44  ;;  %v6094_v48 = vld [vmem:[%s10310_s7 + $0x178] sm:$0xff] }
0x111a   : > { %3943 = vrot.lane.b32.xlu2 %v3917_v13, %s10643_s21  ;;  %v3885_v13 = vmul.f32 %v3874_v58, %v8176_v62 }
0x111b   : > { %3941 = vrot.lane.b32.xlu1 %v3916_v36, %s10643_s21 }
0x111d   : > { %v3908_v14 = vpop.permute.xlu1 %3907 }
0x111e   : > { %v3921_v31 = vmul.f32 %v3908_v14, %v3878_v59  ;;  %v3923_v36 = vmul.f32 %v3908_v14, %v3886_v15  ;;  %v3922_v37 = vmul.f32 %v3908_v14, %v3885_v13  ;;  %v3926_v59 = vmul.f32 %v3913_v47, %v3889_v30  ;;  %v6092_v14 = vld [vmem:[%s10310_s7 + $0x168] sm:$0xff] }
0x1120   : > { %3951 = vrot.lane.b32.xlu0 %v3921_v31, %s10643_s21  ;;  %v6090_v31 = vld [vmem:[%s10312_s9 + $0x16] sm:$0x3] }
0x1121   : > { %v3997_v43 = vperm.slane %v6090_v31, 0  ;;  %v3998_v15 = vperm.slane %v6090_v31, 1 }
0x1122   : > { %3949 = vrot.lane.b32.xlu2 %v3920_v42, %s10643_s21  ;;  %v6091_v42 = vld [vmem:[%s10310_s7 + $0x160] sm:$0xff] }
0x1123   : > { %3947 = vrot.lane.b32.xlu1 %v3919_v23, %s10643_s21  ;;  %v3888_v23 = vmul.f32 %v3874_v58, %v8193_v10  ;;  %v6093_v58 = vld [vmem:[%s10310_s7 + $0x170] sm:$0xff] }
0x1125   : > { %v3925_v35 = vmul.f32 %v3913_v47, %v3888_v23 }
0x1128   : > { %3957 = vrot.lane.b32.xlu0 %v3924_v1, %s10643_s21 }
0x112a   : > { %3955 = vrot.lane.b32.xlu2 %v3923_v36, %s10643_s21 }
0x112b   : > { %3953 = vrot.lane.b32.xlu1 %v3922_v37, %s10643_s21 }
0x1130   : > { %3999 = vrot.lane.b32.xlu0 %v3997_v43, %s10644_s29 }
0x1132   : > { %3961 = vrot.lane.b32.xlu2 %v3926_v59, %s10643_s21 }
0x1133   : > { %3959 = vrot.lane.b32.xlu1 %v3925_v35, %s10643_s21  ;;  %s11242_s21 = smov 76  }
0x1138   : > { %4031 = vperm.xlu0 %6251, %v6092_v14  }
0x113a   : > { %4026 = vperm.xlu2 %6252, %v6091_v42  }
0x113b   : > { %4001 = vrot.lane.b32.xlu1 %v3998_v15, %s10644_s29  ;;  %s6169_s29 = sshll.u32 %s6507_s17, 7  ;;  %s11386_s17 = sand.u32 1, %s6379_s14  }
0x113c   : > { %s5867_s18 = scalar_lea.hbm %s10313_s10, %s6169_s29 }
0x1142   : > { %4041 = vperm.xlu2 %6252, %v6094_v48  }
0x1143   : > { %4036 = vperm.xlu1 %6253, %v6093_v58  }
0x1174   : > { %v8780_v47 = vpop.permute.xlu2 %3943 }
0x1175   : > { %10926 = vst [vmem:[#allocation85_spill] sm:$0xff] %v8780_v47 }
0x117c   : > { %v8784_v13 = vpop.permute.xlu2 %3949 }
0x117d   : > { %10928 = vst [vmem:[#allocation93_spill] sm:$0xff] %v8784_v13 }
0x1181   : > { %v8782_v1 = vpop.permute.xlu0 %3939 }
0x1182   : > { %10927 = vst [vmem:[#allocation84_spill] sm:$0xff] %v8782_v1 }
0x1184   : > { %v8790_v31 = vpop.permute.xlu2 %3955 }
0x1185   : > { %10931 = vst [vmem:[#allocation97_spill] sm:$0xff] %v8790_v31 }
0x1189   : > { %v8786_v36 = vpop.permute.xlu0 %3945 }
0x118a   : > { %10929 = vst [vmem:[#allocation89_spill] sm:$0xff] %v8786_v36 }
0x118c   : > { %v8796_v23 = vpop.permute.xlu2 %3961 }
0x118d   : > { %v8788_v37 = vpop.permute.xlu1 %3941  ;;  %10934 = vst [vmem:[#allocation94_spill] sm:$0xff] %v8796_v23 }
0x118e   : > { %10930 = vst [vmem:[#allocation90_spill] sm:$0xff] %v8788_v37 }
0x1192   : > { %v8792_v43 = vpop.permute.xlu0 %3951 }
0x1193   : > { %10932 = vst [vmem:[#allocation78_spill] sm:$0xff] %v8792_v43 }
0x1194   : > { %v4027_v15 = vpop.permute.xlu2 %4026 }
0x1195   : > { %v8794_v30 = vpop.permute.xlu1 %3947 }
0x1196   : > { %10933 = vst [vmem:[#allocation96_spill] sm:$0xff] %v8794_v30 }
0x119a   : > { %v8798_v59 = vpop.permute.xlu0 %3957 }
0x119b   : > { %10935 = vst [vmem:[#allocation83_spill] sm:$0xff] %v8798_v59 }
0x119d   : > { %v8800_v35 = vpop.permute.xlu1 %3953 }
0x119e   : > { %10936 = vst [vmem:[#allocation102_spill] sm:$0xff] %v8800_v35 }
0x11a2   : > { %v4000_v14 = vpop.permute.xlu0 %3999 }
0x11a3   : > { %v4007_v42 = vmul.f32 0.0, %v4000_v14 }
0x11a5   : > { %v8802_v48 = vpop.permute.xlu1 %3959  ;;  %v4044_v58 = vmul.f32 %v4027_v15, %v4007_v42 }
0x11a6   : > { %10937 = vst [vmem:[#allocation101_spill] sm:$0xff] %v8802_v48 }
0x11a7   : > { %4068 = vrot.lane.b32.xlu0 %v4044_v58, %s10650_s27 }
0x11aa   : > { %v4032_v47 = vpop.permute.xlu0 %4031 }
0x11ab   : > { %v4047_v1 = vmul.f32 %v4032_v47, %v4007_v42 }
0x11ad   : > { %v4002_v37 = vpop.permute.xlu1 %4001 }
0x11ae   : > { %v4003_v31 = vsel %vm10938_vm14, %v4000_v14, %v4002_v37  ;;  %v4009_v43 = vmul.f32 %v4002_v37, %v8143_v22  ;;  %v4012_v48 = vmul.f32 %v4002_v37, %v8162_v27  ;;  %vm11038_vm14 = vmmov %vm11033_vm4 }
0x11af   : > { %4074 = vrot.lane.b32.xlu0 %v4047_v1, %s10650_s27  ;;  %v4008_v23 = vmul.f32 %v4003_v31, %v8140_v25  ;;  %v4011_v13 = vmul.f32 %v4003_v31, %v8159_v49  ;;  %v4042_v1 = vpop.permute.xlu2 %4041 }
0x11b0   : > { %v4046_v59 = vmul.f32 %v4027_v15, %v4009_v43  ;;  %v4049_v14 = vmul.f32 %v4032_v47, %v4012_v48  ;;  %v4015_v43 = vmul.f32 %v4002_v37, %v8179_v29  ;;  %v6099_v48 = vld [vmem:[%s10310_s7 + $0x198] sm:$0xff] }
0x11b1   : > { %v4045_v35 = vmul.f32 %v4027_v15, %v4008_v23  ;;  %v4048_v30 = vmul.f32 %v4032_v47, %v4011_v13  ;;  %v4053_v23 = vmul.f32 %v4042_v1, %v4007_v42  ;;  %v4018_v47 = vmul.f32 %v4002_v37, %v8196_v44  ;;  %v6096_v13 = vld [vmem:[%s10310_s7 + $0x180] sm:$0xff]  ;;  %v6098_v37 = vld [vmem:[%s10310_s7 + $0x190] sm:$0xff] }
0x11b2   : > { %4072 = vrot.lane.b32.xlu2 %v4046_v59, %s10650_s27  ;;  %v4014_v59 = vmul.f32 %v4003_v31, %v8176_v62 }
0x11b3   : > { %4070 = vrot.lane.b32.xlu1 %v4045_v35, %s10650_s27 }
0x11b5   : > { %v4037_v58 = vpop.permute.xlu1 %4036 }
0x11b6   : > { %v4050_v36 = vmul.f32 %v4037_v58, %v4007_v42  ;;  %v4052_v35 = vmul.f32 %v4037_v58, %v4015_v43  ;;  %v4051_v15 = vmul.f32 %v4037_v58, %v4014_v59 }
0x11b8   : > { %4080 = vrot.lane.b32.xlu0 %v4050_v36, %s10650_s27  ;;  %v4017_v36 = vmul.f32 %v4003_v31, %v8193_v10  ;;  %v6097_v31 = vld [vmem:[%s10310_s7 + $0x188] sm:$0xff] }
0x11ba   : > { %4078 = vrot.lane.b32.xlu2 %v4049_v14, %s10650_s27  ;;  %v4054_v42 = vmul.f32 %v4042_v1, %v4017_v36 }
0x11bb   : > { %4076 = vrot.lane.b32.xlu1 %v4048_v30, %s10650_s27  ;;  %v4055_v30 = vmul.f32 %v4042_v1, %v4018_v47  ;;  %v6095_v47 = vld [vmem:[%s10312_s9 + $0x18] sm:$0x3] }
0x11bc   : > { %v4126_v36 = vperm.slane %v6095_v47, 0 }
0x11c0   : > { %4086 = vrot.lane.b32.xlu0 %v4053_v23, %s10650_s27 }
0x11c2   : > { %4084 = vrot.lane.b32.xlu2 %v4052_v35, %s10650_s27 }
0x11c3   : > { %4082 = vrot.lane.b32.xlu1 %v4051_v15, %s10650_s27 }
0x11c8   : > { %4145 = vperm.xlu0 %6251, %v6096_v13  }
0x11ca   : > { %4090 = vrot.lane.b32.xlu2 %v4055_v30, %s10650_s27  ;;  %v4127_v30 = vperm.slane %v6095_v47, 1  ;;  %v4134_v47 = vmul.f32 %v4126_v36, %v8176_v62 }
0x11cb   : > { %4088 = vrot.lane.b32.xlu1 %v4054_v42, %s10650_s27  ;;  %s11345_s27 = smov 63  }
0x11d0   : > { %4160 = vperm.xlu0 %6251, %v6099_v48  }
0x11d2   : > { %4155 = vperm.xlu2 %6252, %v6098_v37   ;;  %v4130_v37 = vmul.f32 %v4126_v36, %v8140_v25 }
0x11d3   : > { %4150 = vperm.xlu1 %6253, %v6097_v31   ;;  %v4131_v31 = vmul.f32 %v4127_v30, %v8143_v22 }
0x120c   : > { %v8837_v58 = vpop.permute.xlu2 %4072 }
0x120d   : > { %10939 = vst [vmem:[#allocation91_spill] sm:$0xff] %v8837_v58 }
0x1214   : > { %v8843_v43 = vpop.permute.xlu2 %4078 }
0x1215   : > { %10942 = vst [vmem:[#allocation103_spill] sm:$0xff] %v8843_v43 }
0x1219   : > { %v8839_v14 = vpop.permute.xlu0 %4068 }
0x121a   : > { %10940 = vst [vmem:[#allocation95_spill] sm:$0xff] %v8839_v14 }
0x121c   : > { %v8849_v35 = vpop.permute.xlu2 %4084 }
0x121d   : > { %10945 = vst [vmem:[#allocation106_spill] sm:$0xff] %v8849_v35 }
0x1221   : > { %v8841_v1 = vpop.permute.xlu0 %4074 }
0x1222   : > { %10941 = vst [vmem:[#allocation100_spill] sm:$0xff] %v8841_v1 }
0x1224   : > { %v8860_v48 = vpop.permute.xlu2 %4090 }
0x1225   : > { %v8845_v23 = vpop.permute.xlu1 %4070  ;;  %10949 = vst [vmem:[#allocation110_spill] sm:$0xff] %v8860_v48  ;;  %v4133_v48 = vmul.f32 %v4127_v30, %v8162_v27 }
0x1226   : > { %10943 = vst [vmem:[#allocation104_spill] sm:$0xff] %v8845_v23 }
0x122a   : > { %v8847_v59 = vpop.permute.xlu0 %4080 }
0x122b   : > { %10944 = vst [vmem:[#allocation105_spill] sm:$0xff] %v8847_v59 }
0x122d   : > { %v8851_v15 = vpop.permute.xlu1 %4076 }
0x122e   : > { %10946 = vst [vmem:[#allocation107_spill] sm:$0xff] %v8851_v15 }
0x1232   : > { %v8856_v13 = vpop.permute.xlu0 %4086 }
0x1233   : > { %10947 = vst [vmem:[#allocation108_spill] sm:$0xff] %v8856_v13  ;;  %v4156_v13 = vpop.permute.xlu2 %4155 }
0x1234   : > { %v4167_v59 = vmul.f32 %v4156_v13, %v4134_v47  ;;  %v4136_v47 = vmul.f32 %v4126_v36, %v8193_v10 }
0x1235   : > { %v8858_v42 = vpop.permute.xlu1 %4082 }
0x1236   : > { %10948 = vst [vmem:[#allocation109_spill] sm:$0xff] %v8858_v42  ;;  %v4132_v42 = vmul.f32 %v4126_v36, %v8159_v49 }
0x123a   : > { %v4146_v58 = vpop.permute.xlu0 %4145 }
0x123b   : > { %v4163_v14 = vmul.f32 %v4146_v58, %v4130_v37  ;;  %v4164_v23 = vmul.f32 %v4146_v58, %v4131_v31  ;;  %v4135_v31 = vmul.f32 %v4127_v30, %v8179_v29 }
0x123d   : > { %4181 = vrot.lane.b32.xlu2 %v4164_v23, %s10654_s26  ;;  %4179 = vrot.lane.b32.xlu1 %v4163_v14, %s10654_s26  ;;  %v8866_v35 = vpop.permute.xlu1 %4088  ;;  %v4137_v14 = vmul.f32 %v4127_v30, %v8196_v44 }
0x123e   : > { %10950 = vst [vmem:[#allocation111_spill] sm:$0xff] %v8866_v35  ;;  %v4168_v35 = vmul.f32 %v4156_v13, %v4135_v31  ;;  %v6102_v13 = vld [vmem:[%s10310_s7 + $0x1a8] sm:$0xff] }
0x1242   : > { %v4161_v58 = vpop.permute.xlu0 %4160 }
0x1243   : > { %v4170_v23 = vmul.f32 %v4161_v58, %v4137_v14  ;;  %v4169_v15 = vmul.f32 %v4161_v58, %v4136_v47 }
0x1245   : > { %4187 = vrot.lane.b32.xlu2 %v4167_v59, %s10654_s26  ;;  %v4151_v43 = vpop.permute.xlu1 %4150 }
0x1246   : > { %v4165_v1 = vmul.f32 %v4151_v43, %v4132_v42  ;;  %v4166_v37 = vmul.f32 %v4151_v43, %v4133_v48  ;;  %v6100_v43 = vld [vmem:[%s10312_s9 + $0x1a] sm:$0x3] }
0x1247   : > { %v4226_v59 = vperm.slane %v6100_v43, 1  ;;  %v4225_v30 = vperm.slane %v6100_v43, 0 }
0x1248   : > { %4185 = vrot.lane.b32.xlu1 %v4166_v37, %s10654_s26  ;;  %4183 = vrot.lane.b32.xlu0 %v4165_v1, %s10654_s26  ;;  %v6101_v1 = vld [vmem:[%s10310_s7 + $0x1a0] sm:$0xff] }
0x124d   : > { %4193 = vrot.lane.b32.xlu2 %v4170_v23, %s10654_s26 }
0x1250   : > { %4191 = vrot.lane.b32.xlu1 %v4169_v15, %s10654_s26  ;;  %4189 = vrot.lane.b32.xlu0 %v4168_v35, %s10654_s26  ;;  %v6104_v15 = vld [vmem:[%s10310_s7 + $0x1b8] sm:$0xff]  ;;  %v6103_v35 = vld [vmem:[%s10310_s7 + $0x1b0] sm:$0xff]  ;;  %s10975_s26 = smov 92  }
0x1255   : > { %4254 = vperm.xlu2 %6252, %v6101_v1  }
0x1258   : > { %4229 = vrot.lane.b32.xlu1 %v4226_v59, %s10951_s1  ;;  %4227 = vrot.lane.b32.xlu0 %v4225_v30, %s10951_s1  ;;  %s11006_s1 = smov 16  }
0x125d   : > { %4269 = vperm.xlu2 %6252, %v6104_v15  }
0x1260   : > { %4264 = vperm.xlu1 %6253, %v6103_v35   ;;  %4259 = vperm.xlu0 %6251, %v6102_v13  }
0x1297   : > { %v8897_v36 = vpop.permute.xlu2 %4181 }
0x1298   : > { %10952 = vst [vmem:[#allocation112_spill] sm:$0xff] %v8897_v36 }
0x129f   : > { %v8901_v48 = vpop.permute.xlu2 %4187 }
0x12a0   : > { %10954 = vst [vmem:[#allocation114_spill] sm:$0xff] %v8901_v48 }
0x12a7   : > { %v8907_v14 = vpop.permute.xlu2 %4193 }
0x12a8   : > { %10956 = vst [vmem:[#allocation116_spill] sm:$0xff] %v8907_v14 }
0x12af   : > { %v8899_v42 = vpop.permute.xlu1 %4179  ;;  %v4255_v15 = vpop.permute.xlu2 %4254 }
0x12b0   : > { %10953 = vst [vmem:[#allocation113_spill] sm:$0xff] %v8899_v42 }
0x12ba   : > { %v8903_v37 = vpop.permute.xlu0 %4183  ;;  %v8905_v58 = vpop.permute.xlu1 %4185 }
0x12bb   : > { %10955 = vst [vmem:[#allocation115_spill] sm:$0xff] %v8905_v58 }
0x12c2   : > { %v8909_v23 = vpop.permute.xlu0 %4189  ;;  %v8911_v31 = vpop.permute.xlu1 %4191 }
0x12c3   : > { %10957 = vst [vmem:[#allocation117_spill] sm:$0xff] %v8909_v23 }
0x12c4   : > { %10958 = vst [vmem:[#allocation118_spill] sm:$0xff] %v8911_v31 }
0x12ca   : > { %v4228_v47 = vpop.permute.xlu0 %4227  ;;  %v4230_v43 = vpop.permute.xlu1 %4229 }
0x12cb   : > { %v4231_v1 = vsel %vm10959_vm0, %v4228_v47, %v4230_v43  ;;  %v4237_v59 = vmul.f32 0.0, %v4230_v43  ;;  %v4235_v30 = vmul.f32 %v4228_v47, %v8140_v25  ;;  %v4238_v14 = vmul.f32 %v4228_v47, %v8159_v49 }
0x12cc   : > { %v4236_v35 = vmul.f32 %v4231_v1, %v8143_v22  ;;  %v4239_v23 = vmul.f32 %v4231_v1, %v8162_v27  ;;  %vm11040_vm0 = vcmask 138240  }
0x12cd   : > { %v4272_v13 = vmul.f32 %v4255_v15, %v4235_v30  ;;  %v4274_v36 = vmul.f32 %v4255_v15, %v4237_v59 }
0x12ce   : > { %v4273_v42 = vmul.f32 %v4255_v15, %v4236_v35  ;;  %v4241_v15 = vmul.f32 %v4228_v47, %v8176_v62 }
0x12cf   : > { %4296 = vrot.lane.b32.xlu0 %v4272_v13, %s10960_s28  ;;  %4300 = vrot.lane.b32.xlu2 %v4274_v36, %s10960_s28  ;;  %v4242_v36 = vmul.f32 %v4231_v1, %v8179_v29 }
0x12d0   : > { %4298 = vrot.lane.b32.xlu1 %v4273_v42, %s10960_s28 }
0x12d2   : > { %v4260_v31 = vpop.permute.xlu0 %4259  ;;  %v4265_v30 = vpop.permute.xlu1 %4264 }
0x12d3   : > { %v4275_v43 = vmul.f32 %v4260_v31, %v4238_v14  ;;  %v4277_v48 = vmul.f32 %v4260_v31, %v4237_v59  ;;  %v4276_v58 = vmul.f32 %v4260_v31, %v4239_v23  ;;  %v4278_v42 = vmul.f32 %v4265_v30, %v4241_v15  ;;  %v4270_v23 = vpop.permute.xlu2 %4269 }
0x12d4   : > { %v4280_v35 = vmul.f32 %v4265_v30, %v4237_v59  ;;  %v4279_v13 = vmul.f32 %v4265_v30, %v4242_v36  ;;  %v4244_v14 = vmul.f32 %v4228_v47, %v8193_v10  ;;  %v6105_v30 = vld [vmem:[%s10312_s9 + $0x1c] sm:$0x3]  ;;  %v6106_v47 = vld [vmem:[%s10310_s7 + $0x1c0] sm:$0xff]  ;;  %v6107_v36 = vld [vmem:[%s10310_s7 + $0x1c8] sm:$0xff] }
0x12d5   : > { %v4354_v15 = vperm.slane %v6105_v30, 0 }
0x12d6   : > { %v4281_v31 = vmul.f32 %v4270_v23, %v4244_v14 }
0x12d7   : > { %4302 = vrot.lane.b32.xlu0 %v4275_v43, %s10960_s28  ;;  %4306 = vrot.lane.b32.xlu2 %v4277_v48, %s10960_s28  ;;  %v4245_v48 = vmul.f32 %v4231_v1, %v8196_v44  ;;  %v4355_v1 = vperm.slane %v6105_v30, 1 }
0x12d8   : > { %4304 = vrot.lane.b32.xlu1 %v4276_v58, %s10960_s28  ;;  %v4283_v58 = vmul.f32 %v4270_v23, %v4237_v59  ;;  %v6109_v59 = vld [vmem:[%s10310_s7 + $0x1d8] sm:$0xff] }
0x12d9   : > { %v4282_v43 = vmul.f32 %v4270_v23, %v4245_v48 }
0x12df   : > { %4312 = vrot.lane.b32.xlu2 %v4280_v35, %s10960_s28  ;;  %4308 = vrot.lane.b32.xlu0 %v4278_v42, %s10960_s28  ;;  %v6108_v42 = vld [vmem:[%s10310_s7 + $0x1d0] sm:$0xff] }
0x12e0   : > { %4310 = vrot.lane.b32.xlu1 %v4279_v13, %s10960_s28 }
0x12e7   : > { %4318 = vrot.lane.b32.xlu2 %v4283_v58, %s10960_s28  ;;  %4314 = vrot.lane.b32.xlu0 %v4281_v31, %s10960_s28 }
0x12e8   : > { %4316 = vrot.lane.b32.xlu1 %v4282_v43, %s10960_s28  ;;  %s11020_s28 = smov 78  }
0x12ef   : > { %4383 = vperm.xlu2 %6252, %v6106_v47   ;;  %4356 = vrot.lane.b32.xlu0 %v4354_v15, %s10961_s5 }
0x12f0   : > { %4358 = vrot.lane.b32.xlu1 %v4355_v1, %s10961_s5  ;;  %s11021_s5 = smov 17  }
0x12f7   : > { %4398 = vperm.xlu2 %6252, %v6109_v59   ;;  %4388 = vperm.xlu0 %6251, %v6107_v36  }
0x12f8   : > { %4393 = vperm.xlu1 %6253, %v6108_v42  }
0x1329   : > { %v8951_v35 = vpop.permute.xlu2 %4300 }
0x132a   : > { %10962 = vst [vmem:[#allocation119_spill] sm:$0xff] %v8951_v35 }
0x1331   : > { %v8957_v48 = vpop.permute.xlu2 %4306 }
0x1332   : > { %10965 = vst [vmem:[#allocation122_spill] sm:$0xff] %v8957_v48 }
0x1339   : > { %v8963_v31 = vpop.permute.xlu2 %4312 }
0x133a   : > { %10968 = vst [vmem:[#allocation125_spill] sm:$0xff] %v8963_v31 }
0x1341   : > { %v8953_v13 = vpop.permute.xlu0 %4296  ;;  %v8971_v47 = vpop.permute.xlu2 %4318 }
0x1342   : > { %10963 = vst [vmem:[#allocation120_spill] sm:$0xff] %v8953_v13  ;;  %v8955_v14 = vpop.permute.xlu1 %4298 }
0x1343   : > { %10964 = vst [vmem:[#allocation121_spill] sm:$0xff] %v8955_v14 }
0x1344   : > { %10972 = vst [vmem:[#allocation129_spill] sm:$0xff] %v8971_v47 }
0x1349   : > { %v8959_v23 = vpop.permute.xlu0 %4302  ;;  %v4384_v13 = vpop.permute.xlu2 %4383 }
0x134a   : > { %10966 = vst [vmem:[#allocation123_spill] sm:$0xff] %v8959_v23  ;;  %v8961_v58 = vpop.permute.xlu1 %4304 }
0x134b   : > { %10967 = vst [vmem:[#allocation124_spill] sm:$0xff] %v8961_v58 }
0x1351   : > { %v8965_v43 = vpop.permute.xlu0 %4308 }
0x1352   : > { %10969 = vst [vmem:[#allocation126_spill] sm:$0xff] %v8965_v43  ;;  %v8967_v30 = vpop.permute.xlu1 %4310 }
0x1353   : > { %10970 = vst [vmem:[#allocation127_spill] sm:$0xff] %v8967_v30 }
0x1359   : > { %v8969_v15 = vpop.permute.xlu0 %4314 }
0x135a   : > { %10971 = vst [vmem:[#allocation128_spill] sm:$0xff] %v8969_v15  ;;  %v8973_v1 = vpop.permute.xlu1 %4316 }
0x135b   : > { %10973 = vst [vmem:[#allocation130_spill] sm:$0xff] %v8973_v1 }
0x1361   : > { %v4357_v59 = vpop.permute.xlu0 %4356 }
0x1362   : > { %v4359_v36 = vpop.permute.xlu1 %4358  ;;  %v4364_v42 = vmul.f32 %v4357_v59, %v8140_v25  ;;  %v4367_v1 = vmul.f32 %v4357_v59, %v8159_v49 }
0x1363   : > { %v4360_v35 = vsel %vm10974_vm5, %v4357_v59, %v4359_v36  ;;  %v4366_v14 = vmul.f32 0.0, %v4359_v36  ;;  %vm11043_vm5 = vcmask 769024  }
0x1364   : > { %v4365_v31 = vmul.f32 %v4360_v35, %v8143_v22  ;;  %v4401_v48 = vmul.f32 %v4384_v13, %v4364_v42  ;;  %v4368_v15 = vmul.f32 %v4360_v35, %v8162_v27 }
0x1365   : > { %v4403_v43 = vmul.f32 %v4384_v13, %v4366_v14 }
0x1366   : > { %v4402_v58 = vmul.f32 %v4384_v13, %v4365_v31  ;;  %4425 = vrot.lane.b32.xlu0 %v4401_v48, %s10975_s26  ;;  %v4370_v48 = vmul.f32 %v4357_v59, %v8176_v62  ;;  %v4371_v31 = vmul.f32 %v4360_v35, %v8179_v29 }
0x1367   : > { %4429 = vrot.lane.b32.xlu2 %v4403_v43, %s10975_s26 }
0x1368   : > { %4427 = vrot.lane.b32.xlu1 %v4402_v58, %s10975_s26 }
0x1369   : > { %v4389_v47 = vpop.permute.xlu0 %4388 }
0x136a   : > { %v4404_v30 = vmul.f32 %v4389_v47, %v4367_v1  ;;  %v4406_v23 = vmul.f32 %v4389_v47, %v4366_v14  ;;  %v4405_v36 = vmul.f32 %v4389_v47, %v4368_v15  ;;  %v4394_v13 = vpop.permute.xlu1 %4393  ;;  %v4399_v15 = vpop.permute.xlu2 %4398 }
0x136b   : > { %v4407_v58 = vmul.f32 %v4394_v13, %v4370_v48  ;;  %v4409_v43 = vmul.f32 %v4394_v13, %v4366_v14  ;;  %v4408_v42 = vmul.f32 %v4394_v13, %v4371_v31  ;;  %v4412_v1 = vmul.f32 %v4399_v15, %v4366_v14  ;;  %v6110_v13 = vld [vmem:[%s10312_s9 + $0x1e] sm:$0x3]  ;;  %v6112_v14 = vld [vmem:[%s10310_s7 + $0x1e8] sm:$0xff] }
0x136c   : > { %v4483_v48 = vperm.slane %v6110_v13, 0  ;;  %v6114_v31 = vld [vmem:[%s10310_s7 + $0x1f8] sm:$0xff] }
0x136e   : > { %4431 = vrot.lane.b32.xlu0 %v4404_v30, %s10975_s26  ;;  %v4373_v30 = vmul.f32 %v4357_v59, %v8193_v10  ;;  %v6111_v59 = vld [vmem:[%s10310_s7 + $0x1e0] sm:$0xff] }
0x136f   : > { %4435 = vrot.lane.b32.xlu2 %v4406_v23, %s10975_s26  ;;  %v4374_v23 = vmul.f32 %v4360_v35, %v8196_v44  ;;  %v4484_v35 = vperm.slane %v6110_v13, 1 }
0x1370   : > { %4433 = vrot.lane.b32.xlu1 %v4405_v36, %s10975_s26  ;;  %v4410_v47 = vmul.f32 %v4399_v15, %v4373_v30 }
0x1371   : > { %v4411_v36 = vmul.f32 %v4399_v15, %v4374_v23 }
0x1376   : > { %4437 = vrot.lane.b32.xlu0 %v4407_v58, %s10975_s26  ;;  %v6113_v58 = vld [vmem:[%s10310_s7 + $0x1f0] sm:$0xff] }
0x1377   : > { %4441 = vrot.lane.b32.xlu2 %v4409_v43, %s10975_s26 }
0x1378   : > { %4439 = vrot.lane.b32.xlu1 %v4408_v42, %s10975_s26 }
0x137e   : > { %4443 = vrot.lane.b32.xlu0 %v4410_v47, %s10975_s26 }
0x137f   : > { %4447 = vrot.lane.b32.xlu2 %v4412_v1, %s10975_s26 }
0x1380   : > { %4445 = vrot.lane.b32.xlu1 %v4411_v36, %s10975_s26 }
0x1386   : > { %4485 = vrot.lane.b32.xlu0 %v4483_v48, %s10976_s30 }
0x1387   : > { %4512 = vperm.xlu2 %6252, %v6111_v59  }
0x1388   : > { %4487 = vrot.lane.b32.xlu1 %v4484_v35, %s10976_s30  ;;  %s5856_s30 = scalar_lea.sflag [#allocation5], %s11386_s17 }
0x138e   : > { %4517 = vperm.xlu0 %6251, %v6112_v14  }
0x138f   : > { %4527 = vperm.xlu2 %6252, %v6114_v31  }
0x1390   : > { %4522 = vperm.xlu1 %6253, %v6113_v58  }
0x13c1   : > { %v9013_v43 = vpop.permute.xlu2 %4429 }
0x13c2   : > { %10977 = vst [vmem:[#allocation131_spill] sm:$0xff] %v9013_v43 }
0x13c9   : > { %v9019_v23 = vpop.permute.xlu2 %4435 }
0x13ca   : > { %10980 = vst [vmem:[#allocation134_spill] sm:$0xff] %v9019_v23 }
0x13d1   : > { %v9025_v1 = vpop.permute.xlu2 %4441 }
0x13d2   : > { %10983 = vst [vmem:[#allocation137_spill] sm:$0xff] %v9025_v1 }
0x13d8   : > { %v9015_v42 = vpop.permute.xlu0 %4425 }
0x13d9   : > { %10978 = vst [vmem:[#allocation132_spill] sm:$0xff] %v9015_v42  ;;  %v9033_v59 = vpop.permute.xlu2 %4447 }
0x13da   : > { %v9017_v30 = vpop.permute.xlu1 %4427  ;;  %10987 = vst [vmem:[#allocation141_spill] sm:$0xff] %v9033_v59 }
0x13db   : > { %10979 = vst [vmem:[#allocation133_spill] sm:$0xff] %v9017_v30 }
0x13e0   : > { %v9021_v15 = vpop.permute.xlu0 %4431 }
0x13e1   : > { %10981 = vst [vmem:[#allocation135_spill] sm:$0xff] %v9021_v15  ;;  %v4513_v42 = vpop.permute.xlu2 %4512 }
0x13e2   : > { %v9023_v47 = vpop.permute.xlu1 %4433 }
0x13e3   : > { %10982 = vst [vmem:[#allocation136_spill] sm:$0xff] %v9023_v47 }
0x13e8   : > { %v9027_v36 = vpop.permute.xlu0 %4437 }
0x13e9   : > { %10984 = vst [vmem:[#allocation138_spill] sm:$0xff] %v9027_v36 }
0x13ea   : > { %v9029_v13 = vpop.permute.xlu1 %4439 }
0x13eb   : > { %10985 = vst [vmem:[#allocation139_spill] sm:$0xff] %v9029_v13 }
0x13f0   : > { %v9031_v48 = vpop.permute.xlu0 %4443 }
0x13f1   : > { %10986 = vst [vmem:[#allocation140_spill] sm:$0xff] %v9031_v48 }
0x13f2   : > { %v9035_v35 = vpop.permute.xlu1 %4445 }
0x13f3   : > { %10988 = vst [vmem:[#allocation142_spill] sm:$0xff] %v9035_v35 }
0x13f8   : > { %v4486_v14 = vpop.permute.xlu0 %4485 }
0x13f9   : > { %v4493_v58 = vmul.f32 %v4486_v14, %v8140_v25  ;;  %v4496_v35 = vmul.f32 %v4486_v14, %v8159_v49 }
0x13fa   : > { %v4488_v31 = vpop.permute.xlu1 %4487 }
0x13fb   : > { %v4489_v43 = vsel %vm10989_vm15, %v4486_v14, %v4488_v31  ;;  %v4495_v30 = vmul.f32 0.0, %v4488_v31  ;;  %v4530_v23 = vmul.f32 %v4513_v42, %v4493_v58  ;;  %vm11045_vm15 = vcmask 1039360  }
0x13fc   : > { %v4494_v1 = vmul.f32 %v4489_v43, %v8143_v22  ;;  %v4497_v48 = vmul.f32 %v4489_v43, %v8162_v27 }
0x13fd   : > { %v4532_v36 = vmul.f32 %v4513_v42, %v4495_v30  ;;  %4554 = vrot.lane.b32.xlu0 %v4530_v23, %s10990_s20  ;;  %v4499_v23 = vmul.f32 %v4486_v14, %v8176_v62 }
0x13fe   : > { %v4531_v47 = vmul.f32 %v4513_v42, %v4494_v1  ;;  %v4500_v1 = vmul.f32 %v4489_v43, %v8179_v29 }
0x13ff   : > { %4558 = vrot.lane.b32.xlu2 %v4532_v36, %s10990_s20 }
0x1400   : > { %4556 = vrot.lane.b32.xlu1 %v4531_v47, %s10990_s20  ;;  %v4518_v59 = vpop.permute.xlu0 %4517 }
0x1401   : > { %v4533_v13 = vmul.f32 %v4518_v59, %v4496_v35  ;;  %v4535_v15 = vmul.f32 %v4518_v59, %v4495_v30  ;;  %v4534_v31 = vmul.f32 %v4518_v59, %v4497_v48  ;;  %v4528_v48 = vpop.permute.xlu2 %4527 }
0x1402   : > { %v4523_v42 = vpop.permute.xlu1 %4522  ;;  %v4541_v35 = vmul.f32 %v4528_v48, %v4495_v30 }
0x1403   : > { %v4536_v47 = vmul.f32 %v4523_v42, %v4499_v23  ;;  %v4538_v36 = vmul.f32 %v4523_v42, %v4495_v30  ;;  %v4537_v58 = vmul.f32 %v4523_v42, %v4500_v1  ;;  %v6115_v42 = vld [vmem:[%s10312_s9 + $0x20] sm:$0x3]  ;;  %v6117_v30 = vld [vmem:[%s10310_s7 + $0x208] sm:$0xff]  ;;  %v6119_v1 = vld [vmem:[%s10310_s7 + $0x218] sm:$0xff] }
0x1404   : > { %v4612_v23 = vperm.slane %v6115_v42, 0 }
0x1405   : > { %4560 = vrot.lane.b32.xlu0 %v4533_v13, %s10990_s20  ;;  %v4502_v13 = vmul.f32 %v4486_v14, %v8193_v10  ;;  %v6116_v14 = vld [vmem:[%s10310_s7 + $0x200] sm:$0xff] }
0x1407   : > { %4564 = vrot.lane.b32.xlu2 %v4535_v15, %s10990_s20  ;;  %v4503_v15 = vmul.f32 %v4489_v43, %v8196_v44  ;;  %v4539_v59 = vmul.f32 %v4528_v48, %v4502_v13  ;;  %v4613_v43 = vperm.slane %v6115_v42, 1 }
0x1408   : > { %4562 = vrot.lane.b32.xlu1 %v4534_v31, %s10990_s20 }
0x1409   : > { %v4540_v31 = vmul.f32 %v4528_v48, %v4503_v15 }
0x140d   : > { %4566 = vrot.lane.b32.xlu0 %v4536_v47, %s10990_s20  ;;  %v6118_v47 = vld [vmem:[%s10310_s7 + $0x210] sm:$0xff] }
0x140f   : > { %4570 = vrot.lane.b32.xlu2 %v4538_v36, %s10990_s20 }
0x1410   : > { %4568 = vrot.lane.b32.xlu1 %v4537_v58, %s10990_s20 }
0x1415   : > { %4572 = vrot.lane.b32.xlu0 %v4539_v59, %s10990_s20 }
0x1417   : > { %4576 = vrot.lane.b32.xlu2 %v4541_v35, %s10990_s20 }
0x1418   : > { %4574 = vrot.lane.b32.xlu1 %v4540_v31, %s10990_s20 }
0x141d   : > { %4614 = vrot.lane.b32.xlu0 %v4612_v23, %s10991_s6 }
0x141f   : > { %4641 = vperm.xlu2 %6252, %v6116_v14  }
0x1420   : > { %4616 = vrot.lane.b32.xlu1 %v4613_v43, %s10991_s6  ;;  %s11041_s6 = smov 77  }
0x1425   : > { %4646 = vperm.xlu0 %6251, %v6117_v30  }
0x1427   : > { %4656 = vperm.xlu2 %6252, %v6119_v1  }
0x1428   : > { %4651 = vperm.xlu1 %6253, %v6118_v47  }
0x1459   : > { %v9075_v36 = vpop.permute.xlu2 %4558 }
0x145a   : > { %10992 = vst [vmem:[#allocation143_spill] sm:$0xff] %v9075_v36 }
0x1461   : > { %v9081_v15 = vpop.permute.xlu2 %4564 }
0x1462   : > { %10995 = vst [vmem:[#allocation146_spill] sm:$0xff] %v9081_v15 }
0x1469   : > { %v9087_v35 = vpop.permute.xlu2 %4570 }
0x146a   : > { %10998 = vst [vmem:[#allocation149_spill] sm:$0xff] %v9087_v35 }
0x146f   : > { %v9077_v58 = vpop.permute.xlu0 %4554 }
0x1470   : > { %10993 = vst [vmem:[#allocation144_spill] sm:$0xff] %v9077_v58 }
0x1471   : > { %v9095_v14 = vpop.permute.xlu2 %4576 }
0x1472   : > { %v9079_v13 = vpop.permute.xlu1 %4556  ;;  %11002 = vst [vmem:[#allocation153_spill] sm:$0xff] %v9095_v14 }
0x1473   : > { %10994 = vst [vmem:[#allocation145_spill] sm:$0xff] %v9079_v13 }
0x1477   : > { %v9083_v48 = vpop.permute.xlu0 %4560 }
0x1478   : > { %10996 = vst [vmem:[#allocation147_spill] sm:$0xff] %v9083_v48 }
0x1479   : > { %v4642_v58 = vpop.permute.xlu2 %4641 }
0x147a   : > { %v9085_v59 = vpop.permute.xlu1 %4562 }
0x147b   : > { %10997 = vst [vmem:[#allocation148_spill] sm:$0xff] %v9085_v59 }
0x147f   : > { %v9089_v31 = vpop.permute.xlu0 %4566 }
0x1480   : > { %10999 = vst [vmem:[#allocation150_spill] sm:$0xff] %v9089_v31 }
0x1482   : > { %v9091_v42 = vpop.permute.xlu1 %4568 }
0x1483   : > { %11000 = vst [vmem:[#allocation151_spill] sm:$0xff] %v9091_v42 }
0x1487   : > { %v9093_v23 = vpop.permute.xlu0 %4572 }
0x1488   : > { %11001 = vst [vmem:[#allocation152_spill] sm:$0xff] %v9093_v23 }
0x148a   : > { %v9097_v43 = vpop.permute.xlu1 %4574 }
0x148b   : > { %11003 = vst [vmem:[#allocation154_spill] sm:$0xff] %v9097_v43 }
0x148f   : > { %v4615_v30 = vpop.permute.xlu0 %4614 }
0x1490   : > { %v4622_v47 = vmul.f32 %v4615_v30, %v8140_v25  ;;  %v4625_v43 = vmul.f32 %v4615_v30, %v8159_v49 }
0x1492   : > { %v4617_v1 = vpop.permute.xlu1 %4616  ;;  %v4659_v15 = vmul.f32 %v4642_v58, %v4622_v47 }
0x1493   : > { %v4618_v36 = vsel %vm11004_vm1, %v4615_v30, %v4617_v1  ;;  %v4624_v13 = vmul.f32 0.0, %v4617_v1  ;;  %vm11046_vm1 = vmmov %vm11045_vm15 }
0x1494   : > { %v4623_v35 = vmul.f32 %v4618_v36, %v8143_v22  ;;  %4683 = vrot.lane.b32.xlu0 %v4659_v15, %s11005_s4  ;;  %v4626_v23 = vmul.f32 %v4618_v36, %v8162_v27  ;;  %v4628_v15 = vmul.f32 %v4615_v30, %v8176_v62 }
0x1495   : > { %v4661_v31 = vmul.f32 %v4642_v58, %v4624_v13 }
0x1496   : > { %v4660_v59 = vmul.f32 %v4642_v58, %v4623_v35  ;;  %v4629_v35 = vmul.f32 %v4618_v36, %v8179_v29 }
0x1497   : > { %4687 = vrot.lane.b32.xlu2 %v4661_v31, %s11005_s4  ;;  %v4647_v14 = vpop.permute.xlu0 %4646 }
0x1498   : > { %4685 = vrot.lane.b32.xlu1 %v4660_v59, %s11005_s4  ;;  %v4662_v42 = vmul.f32 %v4647_v14, %v4625_v43  ;;  %v4664_v48 = vmul.f32 %v4647_v14, %v4624_v13  ;;  %v4663_v1 = vmul.f32 %v4647_v14, %v4626_v23  ;;  %v4657_v23 = vpop.permute.xlu2 %4656 }
0x1499   : > { %v4670_v43 = vmul.f32 %v4657_v23, %v4624_v13 }
0x149a   : > { %v4652_v58 = vpop.permute.xlu1 %4651 }
0x149b   : > { %v4665_v59 = vmul.f32 %v4652_v58, %v4628_v15  ;;  %v4667_v31 = vmul.f32 %v4652_v58, %v4624_v13  ;;  %v4666_v47 = vmul.f32 %v4652_v58, %v4629_v35  ;;  %v6120_v58 = vld [vmem:[%s10312_s9 + $0x22] sm:$0x3]  ;;  %v6122_v13 = vld [vmem:[%s10310_s7 + $0x228] sm:$0xff]  ;;  %v6124_v35 = vld [vmem:[%s10310_s7 + $0x238] sm:$0xff] }
0x149c   : > { %4689 = vrot.lane.b32.xlu0 %v4662_v42, %s11005_s4  ;;  %v4631_v42 = vmul.f32 %v4615_v30, %v8193_v10  ;;  %v4741_v15 = vperm.slane %v6120_v58, 0  ;;  %v6121_v30 = vld [vmem:[%s10310_s7 + $0x220] sm:$0xff] }
0x149e   : > { %v4668_v14 = vmul.f32 %v4657_v23, %v4631_v42 }
0x149f   : > { %4693 = vrot.lane.b32.xlu2 %v4664_v48, %s11005_s4  ;;  %v4632_v48 = vmul.f32 %v4618_v36, %v8196_v44  ;;  %v4742_v36 = vperm.slane %v6120_v58, 1 }
0x14a0   : > { %4691 = vrot.lane.b32.xlu1 %v4663_v1, %s11005_s4 }
0x14a1   : > { %v4669_v1 = vmul.f32 %v4657_v23, %v4632_v48 }
0x14a4   : > { %4695 = vrot.lane.b32.xlu0 %v4665_v59, %s11005_s4  ;;  %v6123_v59 = vld [vmem:[%s10310_s7 + $0x230] sm:$0xff] }
0x14a7   : > { %4699 = vrot.lane.b32.xlu2 %v4667_v31, %s11005_s4 }
0x14a8   : > { %4697 = vrot.lane.b32.xlu1 %v4666_v47, %s11005_s4 }
0x14ac   : > { %4701 = vrot.lane.b32.xlu0 %v4668_v14, %s11005_s4 }
0x14af   : > { %4705 = vrot.lane.b32.xlu2 %v4670_v43, %s11005_s4 }
0x14b0   : > { %4703 = vrot.lane.b32.xlu1 %v4669_v1, %s11005_s4 }
0x14b4   : > { %4743 = vrot.lane.b32.xlu0 %v4741_v15, %s11006_s1 }
0x14b7   : > { %4770 = vperm.xlu2 %6252, %v6121_v30  }
0x14b8   : > { %4745 = vrot.lane.b32.xlu1 %v4742_v36, %s11006_s1 }
0x14bc   : > { %4775 = vperm.xlu0 %6251, %v6122_v13  }
0x14bf   : > { %4785 = vperm.xlu2 %6252, %v6124_v35  }
0x14c0   : > { %4780 = vperm.xlu1 %6253, %v6123_v59  }
0x14f1   : > { %v9137_v31 = vpop.permute.xlu2 %4687 }
0x14f2   : > { %11007 = vst [vmem:[#allocation155_spill] sm:$0xff] %v9137_v31 }
0x14f9   : > { %v9143_v48 = vpop.permute.xlu2 %4693 }
0x14fa   : > { %11010 = vst [vmem:[#allocation158_spill] sm:$0xff] %v9143_v48 }
0x1501   : > { %v9149_v43 = vpop.permute.xlu2 %4699 }
0x1502   : > { %11013 = vst [vmem:[#allocation161_spill] sm:$0xff] %v9149_v43 }
0x1506   : > { %v9139_v47 = vpop.permute.xlu0 %4683 }
0x1507   : > { %11008 = vst [vmem:[#allocation156_spill] sm:$0xff] %v9139_v47 }
0x1509   : > { %v9157_v30 = vpop.permute.xlu2 %4705 }
0x150a   : > { %v9141_v42 = vpop.permute.xlu1 %4685  ;;  %11017 = vst [vmem:[#allocation165_spill] sm:$0xff] %v9157_v30 }
0x150b   : > { %11009 = vst [vmem:[#allocation157_spill] sm:$0xff] %v9141_v42 }
0x150e   : > { %v9145_v23 = vpop.permute.xlu0 %4689 }
0x150f   : > { %11011 = vst [vmem:[#allocation159_spill] sm:$0xff] %v9145_v23 }
0x1511   : > { %v4771_v47 = vpop.permute.xlu2 %4770 }
0x1512   : > { %v9147_v14 = vpop.permute.xlu1 %4691 }
0x1513   : > { %11012 = vst [vmem:[#allocation160_spill] sm:$0xff] %v9147_v14 }
0x1516   : > { %v9151_v1 = vpop.permute.xlu0 %4695 }
0x1517   : > { %11014 = vst [vmem:[#allocation162_spill] sm:$0xff] %v9151_v1 }
0x151a   : > { %v9153_v58 = vpop.permute.xlu1 %4697 }
0x151b   : > { %11015 = vst [vmem:[#allocation163_spill] sm:$0xff] %v9153_v58 }
0x151e   : > { %v9155_v15 = vpop.permute.xlu0 %4701 }
0x151f   : > { %11016 = vst [vmem:[#allocation164_spill] sm:$0xff] %v9155_v15 }
0x1522   : > { %v9159_v36 = vpop.permute.xlu1 %4703 }
0x1523   : > { %11018 = vst [vmem:[#allocation166_spill] sm:$0xff] %v9159_v36 }
0x1526   : > { %v4744_v13 = vpop.permute.xlu0 %4743 }
0x1527   : > { %v4751_v59 = vmul.f32 %v4744_v13, %v8140_v25  ;;  %v4754_v15 = vmul.f32 %v4744_v13, %v8159_v49 }
0x1529   : > { %v4788_v48 = vmul.f32 %v4771_v47, %v4751_v59 }
0x152a   : > { %v4746_v35 = vpop.permute.xlu1 %4745 }
0x152b   : > { %v4747_v31 = vsel %vm11019_vm3, %v4744_v13, %v4746_v35  ;;  %v4753_v42 = vmul.f32 0.0, %v4746_v35  ;;  %4812 = vrot.lane.b32.xlu0 %v4788_v48, %s11020_s28  ;;  %v4757_v48 = vmul.f32 %v4744_v13, %v8176_v62  ;;  %vm11047_vm3 = vmmov %vm11046_vm1 }
0x152c   : > { %v4752_v43 = vmul.f32 %v4747_v31, %v8143_v22  ;;  %v4755_v30 = vmul.f32 %v4747_v31, %v8162_v27 }
0x152d   : > { %v4790_v1 = vmul.f32 %v4771_v47, %v4753_v42 }
0x152e   : > { %v4789_v14 = vmul.f32 %v4771_v47, %v4752_v43  ;;  %v4776_v36 = vpop.permute.xlu0 %4775  ;;  %v4758_v43 = vmul.f32 %v4747_v31, %v8179_v29 }
0x152f   : > { %4816 = vrot.lane.b32.xlu2 %v4790_v1, %s11020_s28  ;;  %v4791_v58 = vmul.f32 %v4776_v36, %v4754_v15  ;;  %v4793_v23 = vmul.f32 %v4776_v36, %v4753_v42  ;;  %v4792_v35 = vmul.f32 %v4776_v36, %v4755_v30  ;;  %v4786_v15 = vpop.permute.xlu2 %4785 }
0x1530   : > { %4814 = vrot.lane.b32.xlu1 %v4789_v14, %s11020_s28  ;;  %v4799_v36 = vmul.f32 %v4786_v15, %v4753_v42 }
0x1532   : > { %v4781_v47 = vpop.permute.xlu1 %4780 }
0x1533   : > { %4818 = vrot.lane.b32.xlu0 %v4791_v58, %s11020_s28  ;;  %v4794_v14 = vmul.f32 %v4781_v47, %v4757_v48  ;;  %v4796_v1 = vmul.f32 %v4781_v47, %v4753_v42  ;;  %v4795_v59 = vmul.f32 %v4781_v47, %v4758_v43  ;;  %v4760_v58 = vmul.f32 %v4744_v13, %v8193_v10  ;;  %v6125_v47 = vld [vmem:[%s10312_s9 + $0x24] sm:$0x3]  ;;  %v6127_v42 = vld [vmem:[%s10310_s7 + $0x248] sm:$0xff]  ;;  %v6129_v43 = vld [vmem:[%s10310_s7 + $0x258] sm:$0xff] }
0x1534   : > { %v4870_v48 = vperm.slane %v6125_v47, 0  ;;  %v6126_v13 = vld [vmem:[%s10310_s7 + $0x240] sm:$0xff] }
0x1535   : > { %v4797_v30 = vmul.f32 %v4786_v15, %v4760_v58 }
0x1537   : > { %4822 = vrot.lane.b32.xlu2 %v4793_v23, %s11020_s28  ;;  %v4761_v23 = vmul.f32 %v4747_v31, %v8196_v44  ;;  %v4871_v31 = vperm.slane %v6125_v47, 1 }
0x1538   : > { %4820 = vrot.lane.b32.xlu1 %v4792_v35, %s11020_s28 }
0x1539   : > { %v4798_v35 = vmul.f32 %v4786_v15, %v4761_v23 }
0x153b   : > { %4824 = vrot.lane.b32.xlu0 %v4794_v14, %s11020_s28  ;;  %v6128_v14 = vld [vmem:[%s10310_s7 + $0x250] sm:$0xff] }
0x153f   : > { %4828 = vrot.lane.b32.xlu2 %v4796_v1, %s11020_s28 }
0x1540   : > { %4826 = vrot.lane.b32.xlu1 %v4795_v59, %s11020_s28 }
0x1543   : > { %4830 = vrot.lane.b32.xlu0 %v4797_v30, %s11020_s28 }
0x1547   : > { %4834 = vrot.lane.b32.xlu2 %v4799_v36, %s11020_s28 }
0x1548   : > { %4832 = vrot.lane.b32.xlu1 %v4798_v35, %s11020_s28  ;;  %s11356_s28 = smov 62  }
0x154b   : > { %4872 = vrot.lane.b32.xlu0 %v4870_v48, %s11021_s5 }
0x154f   : > { %4899 = vperm.xlu2 %6252, %v6126_v13  }
0x1550   : > { %4874 = vrot.lane.b32.xlu1 %v4871_v31, %s11021_s5 }
0x1553   : > { %4904 = vperm.xlu0 %6251, %v6127_v42  }
0x1557   : > { %4914 = vperm.xlu2 %6252, %v6129_v43  }
0x1558   : > { %4909 = vperm.xlu1 %6253, %v6128_v14  }
0x1589   : > { %v9199_v1 = vpop.permute.xlu2 %4816 }
0x158a   : > { %11022 = vst [vmem:[#allocation167_spill] sm:$0xff] %v9199_v1 }
0x1591   : > { %v4823_v23 = vpop.permute.xlu2 %4822 }
0x1599   : > { %v4829_v47 = vpop.permute.xlu2 %4828 }
0x159d   : > { %v9201_v59 = vpop.permute.xlu0 %4812 }
0x159e   : > { %11023 = vst [vmem:[#allocation168_spill] sm:$0xff] %v9201_v59 }
0x15a1   : > { %v4835_v43 = vpop.permute.xlu2 %4834 }
0x15a2   : > { %v9203_v58 = vpop.permute.xlu1 %4814 }
0x15a3   : > { %11024 = vst [vmem:[#allocation169_spill] sm:$0xff] %v9203_v58 }
0x15a5   : > { %v9205_v15 = vpop.permute.xlu0 %4818 }
0x15a6   : > { %11025 = vst [vmem:[#allocation170_spill] sm:$0xff] %v9205_v15 }
0x15aa   : > { %v4821_v30 = vpop.permute.xlu1 %4820 }
0x15ab   : > { %v9209_v36 = vsel %vm11026_vm10, %v9205_v15, %v4821_v30  ;;  %v9212_v35 = vsel %vm11028_vm12, %v4821_v30, %v4823_v23  ;;  %vm11048_vm10 = vmmov %vm11046_vm1 }
0x15ac   : > { %11027 = vst [vmem:[#allocation171_spill] sm:$0xff] %v9209_v36  ;;  %vm11049_vm12 = vmmov %vm11046_vm1 }
0x15ad   : > { %11029 = vst [vmem:[#allocation172_spill] sm:$0xff] %v9212_v35  ;;  %v9214_v48 = vpop.permute.xlu0 %4824 }
0x15ae   : > { %11030 = vst [vmem:[#allocation173_spill] sm:$0xff] %v9214_v48 }
0x15b2   : > { %v4827_v13 = vpop.permute.xlu1 %4826 }
0x15b3   : > { %v9218_v31 = vsel %vm11031_vm13, %v9214_v48, %v4827_v13  ;;  %v9221_v42 = vsel %vm11033_vm4, %v4827_v13, %v4829_v47  ;;  %v4900_v48 = vpop.permute.xlu2 %4899  ;;  %vm11050_vm13 = vmmov %vm11046_vm1  ;;  %vm11051_vm4 = vcmask 1031168  }
0x15b4   : > { %11032 = vst [vmem:[#allocation174_spill] sm:$0xff] %v9218_v31 }
0x15b5   : > { %11034 = vst [vmem:[#allocation175_spill] sm:$0xff] %v9221_v42  ;;  %v9223_v14 = vpop.permute.xlu0 %4830 }
0x15b6   : > { %11035 = vst [vmem:[#allocation176_spill] sm:$0xff] %v9223_v14 }
0x15ba   : > { %v4833_v1 = vpop.permute.xlu1 %4832 }
0x15bb   : > { %v9227_v58 = vsel %vm11036_vm7, %v9223_v14, %v4833_v1  ;;  %v9230_v23 = vsel %vm11038_vm14, %v4833_v1, %v4835_v43  ;;  %vm11052_vm7 = vmmov %vm11051_vm4 }
0x15bc   : > { %11037 = vst [vmem:[#allocation177_spill] sm:$0xff] %v9227_v58  ;;  %vm11053_vm14 = vmmov %vm11051_vm4 }
0x15bd   : > { %11039 = vst [vmem:[#allocation178_spill] sm:$0xff] %v9230_v23  ;;  %v4873_v30 = vpop.permute.xlu0 %4872 }
0x15be   : > { %v4880_v59 = vmul.f32 %v4873_v30, %v8140_v25  ;;  %v4883_v43 = vmul.f32 %v4873_v30, %v8159_v49 }
0x15c0   : > { %v4917_v13 = vmul.f32 %v4900_v48, %v4880_v59 }
0x15c2   : > { %v4875_v35 = vpop.permute.xlu1 %4874  ;;  %4941 = vrot.lane.b32.xlu0 %v4917_v13, %s11041_s6 }
0x15c3   : > { %v4876_v31 = vsel %vm11040_vm0, %v4873_v30, %v4875_v35  ;;  %v4882_v47 = vmul.f32 0.0, %v4875_v35  ;;  %v4886_v35 = vmul.f32 %v4873_v30, %v8176_v62  ;;  %vm11054_vm0 = vmmov %vm11051_vm4 }
0x15c4   : > { %v4881_v42 = vmul.f32 %v4876_v31, %v8143_v22  ;;  %v4884_v25 = vmul.f32 %v4876_v31, %v8162_v27 }
0x15c5   : > { %v4919_v36 = vmul.f32 %v4900_v48, %v4882_v47  ;;  %v4905_v1 = vpop.permute.xlu0 %4904 }
0x15c6   : > { %v4918_v15 = vmul.f32 %v4900_v48, %v4881_v42  ;;  %v4920_v23 = vmul.f32 %v4905_v1, %v4883_v43  ;;  %v4922_v58 = vmul.f32 %v4905_v1, %v4882_v47  ;;  %v4921_v14 = vmul.f32 %v4905_v1, %v4884_v25  ;;  %v6130_v43 = vld [vmem:[%s10312_s9 + $0x26] sm:$0x3] }
0x15c7   : > { %4945 = vrot.lane.b32.xlu2 %v4919_v36, %s11041_s6  ;;  %v4887_v36 = vmul.f32 %v4876_v31, %v8179_v29  ;;  %v4889_v25 = vmul.f32 %v4873_v30, %v8193_v10  ;;  %v6131_v30 = vld [vmem:[%s10310_s7 + $0x260] sm:$0xff] }
0x15c8   : > { %4943 = vrot.lane.b32.xlu1 %v4918_v15, %s11041_s6 }
0x15ca   : > { %4947 = vrot.lane.b32.xlu0 %v4920_v23, %s11041_s6  ;;  %v4910_v59 = vpop.permute.xlu1 %4909  ;;  %v4915_v23 = vpop.permute.xlu2 %4914 }
0x15cb   : > { %v4923_v15 = vmul.f32 %v4910_v59, %v4886_v35  ;;  %v4925_v48 = vmul.f32 %v4910_v59, %v4882_v47  ;;  %v4924_v42 = vmul.f32 %v4910_v59, %v4887_v36  ;;  %v4928_v13 = vmul.f32 %v4915_v23, %v4882_v47  ;;  %v6132_v47 = vld [vmem:[%s10310_s7 + $0x268] sm:$0xff]  ;;  %v6134_v35 = vld [vmem:[%s10310_s7 + $0x278] sm:$0xff]  ;;  %v6133_v36 = vld [vmem:[%s10310_s7 + $0x270] sm:$0xff] }
0x15cc   : > { %v4999_v59 = vperm.slane %v6130_v43, 0 }
0x15cf   : > { %4951 = vrot.lane.b32.xlu2 %v4922_v58, %s11041_s6  ;;  %v4890_v58 = vmul.f32 %v4876_v31, %v8196_v44  ;;  %v5000_v31 = vperm.slane %v6130_v43, 1 }
0x15d0   : > { %4949 = vrot.lane.b32.xlu1 %v4921_v14, %s11041_s6  ;;  %v4926_v14 = vmul.f32 %v4915_v23, %v4889_v25 }
0x15d1   : > { %v4927_v1 = vmul.f32 %v4915_v23, %v4890_v58  ;;  %v9282_v58 = vmul.f32 0.0, %v8073_v57  ;;  %v2636_v23 = vmul.f32 %v8096_v63, %v8196_v44 }
0x15d2   : > { %4953 = vrot.lane.b32.xlu0 %v4923_v15, %s11041_s6  ;;  %v9273_v15 = vsel %vm11043_vm5, %v8073_v57, %v8096_v63  ;;  %vm11055_vm5 = vmmov %vm11054_vm0 }
0x15d3   : > { %11044 = vst [vmem:[#allocation179_spill] sm:$0xff] %v9273_v15  ;;  %v2629_v25 = vmul.f32 %v9273_v15, %v8159_v49  ;;  %v2667_v57 = vmul.f32 %v8100_v11, %v9282_v58 }
0x15d7   : > { %4957 = vrot.lane.b32.xlu2 %v4925_v48, %s11041_s6  ;;  %v2630_v48 = vmul.f32 %v8096_v63, %v8162_v27 }
0x15d8   : > { %4955 = vrot.lane.b32.xlu1 %v4924_v42, %s11041_s6  ;;  %v2633_v42 = vmul.f32 %v8096_v63, %v8179_v29 }
0x15d9   : > { %v2666_v43 = vmul.f32 %v8090_v4, %v2630_v48 }
0x15da   : > { %4959 = vrot.lane.b32.xlu0 %v4926_v14, %s11041_s6  ;;  %v2632_v14 = vmul.f32 %v9273_v15, %v8176_v62 }
0x15df   : > { %4963 = vrot.lane.b32.xlu2 %v4928_v13, %s11041_s6  ;;  %v2635_v13 = vmul.f32 %v9273_v15, %v8193_v10  ;;  %v2699_v15 = vadd.f32 %v8113_v8, %v2667_v57 }
0x15e0   : > { %4961 = vrot.lane.b32.xlu1 %v4927_v1, %s11041_s6  ;;  %v2670_v1 = vmul.f32 %v8105_v21, %v9282_v58  ;;  %s11366_s6 = smov 61  }
0x15e2   : > { %5001 = vrot.lane.b32.xlu0 %v4999_v59, %s11042_s11  ;;  %v2669_v59 = vmul.f32 %v8100_v11, %v2633_v42  ;;  %v2702_v48 = vadd.f32 %v8109_v32, %v2670_v1 }
0x15e4   : > { %v2701_v63 = vadd.f32 %v8113_v8, %v2669_v59 }
0x15e7   : > { %5028 = vperm.xlu2 %6252, %v6131_v30   ;;  %v2665_v30 = vmul.f32 %v8090_v4, %v2629_v25  ;;  %v2698_v25 = vadd.f32 %v8111_v28, %v2666_v43 }
0x15e8   : > { %5003 = vrot.lane.b32.xlu1 %v5000_v31, %s11042_s11  ;;  %v2672_v31 = vmul.f32 %v8105_v21, %v2636_v23 }
0x15e9   : > { %v2697_v44 = vadd.f32 %v8111_v28, %v2665_v30  ;;  %v2827_v1 = vadd.f32 %v8230_v9, %v2698_v25 }
0x15ea   : > { %5033 = vperm.xlu0 %6251, %v6132_v47   ;;  %v2664_v47 = vmul.f32 %v8090_v4, %v9282_v58  ;;  %v2704_v23 = vadd.f32 %v8109_v32, %v2672_v31  ;;  %v2804_v4 = vsel %vm11045_vm15, %v8224_v0, %v8240_v19  ;;  %v2808_v0 = vsel %vm11049_vm12, %v8234_v3, %v8246_v56  ;;  %vm11056_vm15 = vmmov %vm11054_vm0 }
0x15eb   : > { %v2831_v57 = vadd.f32 %v2808_v0, %v2702_v48  ;;  %v2937_v3 = vsel %vm11055_vm5, %v8302_v40, %v8306_v18 }
0x15ec   : > { %v2696_v42 = vadd.f32 %v8111_v28, %v2664_v47  ;;  %v2807_v28 = vsel %vm11048_vm10, %v8243_v50, %v8232_v12  ;;  %v2833_v43 = vadd.f32 %v8236_v54, %v2704_v23 }
0x15ef   : > { %5043 = vperm.xlu2 %6252, %v6134_v35   ;;  %v2668_v35 = vmul.f32 %v8100_v11, %v2632_v14  ;;  %v2805_v11 = vsel %vm11046_vm1, %v8240_v19, %v8230_v9  ;;  %v2830_v19 = vadd.f32 %v8232_v12, %v2701_v63  ;;  %v2934_v9 = vsel %vm11052_vm7, %v8298_v6, %v8288_v20 }
0x15f0   : > { %5038 = vperm.xlu1 %6253, %v6133_v36   ;;  %v2671_v36 = vmul.f32 %v8105_v21, %v2635_v13  ;;  %v2806_v21 = vsel %vm11047_vm3, %v8228_v24, %v8243_v50  ;;  %v2825_v24 = vadd.f32 %v2804_v4, %v2696_v42  ;;  %v2826_v59 = vadd.f32 %v2805_v11, %v2697_v44  ;;  %v11066_v4 = vld [vmem:[#allocation25_spill] sm:$0xff] }
0x15f1   : > { %v2700_v14 = vadd.f32 %v8113_v8, %v2668_v35  ;;  %v2809_v8 = vsel %vm11050_vm13, %v8246_v56, %v8236_v54  ;;  %v2828_v30 = vadd.f32 %v2806_v21, %v2699_v15  ;;  %v2935_v63 = vsel %vm11053_vm14, %v8296_v41, %v8304_v39 }
0x15f2   : > { %v2703_v13 = vadd.f32 %v8109_v32, %v2671_v36  ;;  %v2933_v32 = vsel %vm11051_vm4, %v8290_v16, %v8298_v6  ;;  %v2936_v44 = vsel %vm11054_vm0, %v8304_v39, %v8294_v26  ;;  %v2938_v54 = vsel %vm11056_vm15, %v8306_v18, %v8300_v33 }
0x15f3   : > { %v2829_v50 = vadd.f32 %v2807_v28, %v2700_v14  ;;  %v2956_v56 = vadd.f32 %v8288_v20, %v2827_v1  ;;  %v2959_v16 = vadd.f32 %v8294_v26, %v2830_v19  ;;  %v2962_v6 = vadd.f32 %v8300_v33, %v2833_v43  ;;  %v11069_v14 = vld [vmem:[#allocation23_spill] sm:$0xff] }
0x15f4   : > { %v2832_v12 = vadd.f32 %v2809_v8, %v2703_v13  ;;  %v2954_v41 = vadd.f32 %v2933_v32, %v2825_v24  ;;  %v2955_v15 = vadd.f32 %v2934_v9, %v2826_v59  ;;  %v2957_v31 = vadd.f32 %v2935_v63, %v2828_v30  ;;  %v11073_v8 = vld [vmem:[#allocation35_spill] sm:$0xff]  ;;  %v11076_v24 = vld [vmem:[#allocation28_spill] sm:$0xff]  ;;  %v11079_v32 = vld [vmem:[#allocation34_spill] sm:$0xff] }
0x15f5   : > { %vm11057_vm1 = vcmask 1022976   ;;  %v2958_v47 = vadd.f32 %v2936_v44, %v2829_v50  ;;  %v2960_v35 = vadd.f32 %v2937_v3, %v2831_v57  ;;  %v3085_v26 = vadd.f32 %v8350_v51, %v2956_v56  ;;  %v11078_v30 = vld [vmem:[#allocation40_spill] sm:$0xff]  ;;  %v11081_v63 = vld [vmem:[#allocation33_spill] sm:$0xff]  ;;  %v11083_v44 = vld [vmem:[#allocation38_spill] sm:$0xff] }
0x15f6   : > { %v3062_v39 = vsel %vm11057_vm1, %v8352_v60, %v8360_v46  ;;  %vm11058_vm3 = vmmov %vm11057_vm1  ;;  %v2961_v18 = vadd.f32 %v2938_v54, %v2832_v12  ;;  %v3088_v36 = vadd.f32 %v8356_v38, %v2959_v16  ;;  %v3091_v48 = vadd.f32 %v8362_v5, %v2962_v6  ;;  %v11084_v3 = vld [vmem:[#allocation36_spill] sm:$0xff]  ;;  %v11086_v6 = vld [vmem:[#allocation37_spill] sm:$0xff] }
0x15f7   : > { %v3063_v40 = vsel %vm11058_vm3, %v8360_v46, %v8350_v51  ;;  %vm11059_vm10 = vmmov %vm11057_vm1  ;;  %v3083_v42 = vadd.f32 %v3062_v39, %v2954_v41  ;;  %vm11063_vm7 = vcmask 1014784   ;;  %v3214_v11 = vadd.f32 %v8412_v52, %v3085_v26 }
0x15f8   : > { %v3064_v20 = vsel %vm11059_vm10, %v8358_v34, %v8366_v7  ;;  %vm11060_vm12 = vmmov %vm11057_vm1  ;;  %v3084_v34 = vadd.f32 %v3063_v40, %v2955_v15  ;;  %v3191_v51 = vsel %vm11063_vm7, %v8414_v53, %v8422_v17  ;;  %v3217_v21 = vadd.f32 %v11066_v4, %v3088_v36  ;;  %v11068_v53 = vld [vmem:[#allocation26_spill] sm:$0xff]  ;;  %v11094_v36 = vld [vmem:[#allocation44_spill] sm:$0xff] }
0x15f9   : > { %v3065_v33 = vsel %vm11060_vm12, %v8366_v7, %v8356_v38  ;;  %vm11061_vm13 = vmmov %vm11057_vm1  ;;  %v3086_v25 = vadd.f32 %v3064_v20, %v2957_v31  ;;  %v3212_v0 = vadd.f32 %v3191_v51, %v3083_v42  ;;  %vm11075_vm3 = vcmask 916480  }
0x15fa   : > { %v3066_v60 = vsel %vm11061_vm13, %v8364_v61, %v8368_v55  ;;  %vm11062_vm4 = vmmov %vm11057_vm1  ;;  %v3343_v56 = vadd.f32 %v11076_v24, %v3214_v11  ;;  %v3346_v16 = vadd.f32 %v11081_v63, %v3217_v21 }
0x15fb   : > { %v3067_v46 = vsel %vm11062_vm4, %v8368_v55, %v8362_v5  ;;  %vm11064_vm14 = vmmov %vm11063_vm7  ;;  %v3087_v55 = vadd.f32 %v3065_v33, %v2958_v47  ;;  %v3089_v23 = vadd.f32 %v3066_v60, %v2960_v35  ;;  %v11088_v47 = vld [vmem:[#allocation49_spill] sm:$0xff]  ;;  %v11089_v35 = vld [vmem:[#allocation42_spill] sm:$0xff] }
0x15fc   : > { %v3192_v7 = vsel %vm11064_vm14, %v8422_v17, %v8412_v52  ;;  %vm11065_vm0 = vmmov %vm11063_vm7  ;;  %v3090_v38 = vadd.f32 %v3067_v46, %v2961_v18  ;;  %v11071_v17 = vld [vmem:[#allocation24_spill] sm:$0xff]  ;;  %vm11090_vm14 = vcmask 908288   ;;  %v11091_v33 = vld [vmem:[#allocation41_spill] sm:$0xff] }
0x15fd   : > { %v3193_v61 = vsel %vm11065_vm0, %v8420_v2, %v8428_v45  ;;  %vm11067_vm5 = vmmov %vm11065_vm0  ;;  %v3220_v2 = vadd.f32 %v11071_v17, %v3091_v48  ;;  %v3213_v1 = vadd.f32 %v3192_v7, %v3084_v34  ;;  %v3449_v18 = vsel %vm11090_vm14, %v11089_v35, %v11088_v47  ;;  %v11093_v46 = vld [vmem:[#allocation50_spill] sm:$0xff]  ;;  %v11098_v7 = vld [vmem:[#allocation51_spill] sm:$0xff] }
0x15fe   : > { %v3194_v5 = vsel %vm11067_vm5, %v8428_v45, %v11066_v4  ;;  %vm11070_vm15 = vmmov %vm11065_vm0  ;;  %v3215_v19 = vadd.f32 %v3193_v61, %v3086_v25  ;;  %v11074_v45 = vld [vmem:[#allocation30_spill] sm:$0xff]  ;;  %v3472_v34 = vadd.f32 %v11091_v33, %v3343_v56  ;;  %v11096_v25 = vld [vmem:[#allocation45_spill] sm:$0xff] }
0x15ff   : > { %v3195_v28 = vsel %vm11070_vm15, %v11069_v14, %v11068_v53  ;;  %vm11072_vm1 = vmmov %vm11065_vm0  ;;  %v3216_v43 = vadd.f32 %v3194_v5, %v3087_v55  ;;  %v3320_v52 = vsel %vm11075_vm3, %v11074_v45, %v11073_v8  ;;  %v3349_v41 = vadd.f32 %v11086_v6, %v3220_v2  ;;  %v11099_v61 = vld [vmem:[#allocation47_spill] sm:$0xff]  ;;  %v11103_v14 = vld [vmem:[#allocation64_spill] sm:$0xff] }
0x1600   : > { %v3196_v13 = vsel %vm11072_vm1, %v11068_v53, %v11071_v17  ;;  %vm11077_vm10 = vmmov %vm11075_vm3  ;;  %v3218_v57 = vadd.f32 %v3195_v28, %v3089_v23  ;;  %v3341_v31 = vadd.f32 %v3320_v52, %v3212_v0  ;;  %v3475_v23 = vadd.f32 %v11096_v25, %v3346_v16  ;;  %v11104_v28 = vld [vmem:[#allocation58_spill] sm:$0xff]  ;;  %v11108_v45 = vld [vmem:[#allocation55_spill] sm:$0xff] }
0x1601   : > { %v3321_v59 = vsel %vm11077_vm10, %v11073_v8, %v11076_v24  ;;  %vm11080_vm12 = vmmov %vm11075_vm3  ;;  %v3219_v9 = vadd.f32 %v3196_v13, %v3090_v38  ;;  %v11101_v38 = vld [vmem:[#allocation48_spill] sm:$0xff]  ;;  %v3578_v17 = vsel %vm894_vm2, %v11104_v28, %v11103_v14  ;;  %v11105_v13 = vld [vmem:[#allocation54_spill] sm:$0xff]  ;;  %vm11114_vm10 = vcmask 891904  }
0x1602   : > { %v3322_v50 = vsel %vm11080_vm12, %v11079_v32, %v11078_v30  ;;  %vm11082_vm13 = vmmov %vm11075_vm3  ;;  %v3342_v39 = vadd.f32 %v3321_v59, %v3213_v1  ;;  %v3478_v4 = vadd.f32 %v11101_v38, %v3349_v41  ;;  %v3470_v5 = vadd.f32 %v3449_v18, %v3341_v31  ;;  %v11109_v32 = vld [vmem:[#allocation60_spill] sm:$0xff]  ;;  %v11112_v16 = vld [vmem:[#allocation70_spill] sm:$0xff] }
0x1603   : > { %v3323_v12 = vsel %vm11082_vm13, %v11078_v30, %v11081_v63  ;;  %vm11085_vm4 = vmmov %vm11075_vm3  ;;  %v3344_v40 = vadd.f32 %v3322_v50, %v3215_v19  ;;  %v3579_v2 = vsel %vm894_vm2, %v11103_v14, %v11105_v13  ;;  %v11106_v19 = vld [vmem:[#allocation59_spill] sm:$0xff]  ;;  %v3601_v59 = vadd.f32 %v11105_v13, %v3472_v34  ;;  %v11110_v50 = vld [vmem:[#allocation61_spill] sm:$0xff] }
0x1604   : > { %v3324_v54 = vsel %vm11085_vm4, %v11084_v3, %v11083_v44  ;;  %vm11087_vm7 = vmmov %vm11075_vm3  ;;  %v3345_v20 = vadd.f32 %v3323_v12, %v3216_v43  ;;  %v11107_v43 = vld [vmem:[#allocation57_spill] sm:$0xff]  ;;  %v3581_v52 = vsel %vm894_vm2, %v11106_v19, %v11108_v45  ;;  %v3604_v30 = vadd.f32 %v11108_v45, %v3475_v23  ;;  %v11120_v18 = vld [vmem:[#allocation67_spill] sm:$0xff] }
0x1605   : > { %v3325_v15 = vsel %vm11087_vm7, %v11083_v44, %v11086_v6  ;;  %v3347_v26 = vadd.f32 %v3324_v54, %v3218_v57  ;;  %vm11092_vm0 = vmmov %vm11090_vm14  ;;  %v3580_v8 = vsel %vm894_vm2, %v11107_v43, %v11106_v19  ;;  %v3582_v57 = vsel %vm894_vm2, %v11110_v50, %v11109_v32  ;;  %v11113_v6 = vld [vmem:[#allocation76_spill] sm:$0xff]  ;;  %v11132_v14 = vld [vmem:[#allocation98_spill] sm:$0xff] }
0x1606   : > { %v3450_v60 = vsel %vm11092_vm0, %v11088_v47, %v11091_v33  ;;  %vm11095_vm5 = vmmov %vm11092_vm0  ;;  %v3348_v42 = vadd.f32 %v3325_v15, %v3219_v9  ;;  %v11111_v9 = vld [vmem:[#allocation63_spill] sm:$0xff]  ;;  %v3599_v12 = vadd.f32 %v3578_v17, %v3470_v5  ;;  %v3707_v41 = vsel %vm11114_vm10, %v11113_v6, %v11112_v16  ;;  %v11115_v15 = vld [vmem:[#allocation69_spill] sm:$0xff] }
0x1607   : > { %v3451_v48 = vsel %vm11095_vm5, %v11094_v36, %v11093_v46  ;;  %vm11097_vm15 = vmmov %vm11092_vm0  ;;  %v3471_v21 = vadd.f32 %v3450_v60, %v3342_v39  ;;  %v3607_v63 = vadd.f32 %v11111_v9, %v3478_v4  ;;  %v3583_v3 = vsel %vm894_vm2, %v11109_v32, %v11111_v9  ;;  %v11118_v47 = vld [vmem:[#allocation66_spill] sm:$0xff]  ;;  %v11123_v33 = vld [vmem:[#allocation81_spill] sm:$0xff] }
0x1608   : > { %v3452_v51 = vsel %vm11097_vm15, %v11093_v46, %v11096_v25  ;;  %vm11100_vm1 = vmmov %vm11092_vm0  ;;  %v3473_v53 = vadd.f32 %v3451_v48, %v3344_v40  ;;  %v11117_v40 = vld [vmem:[#allocation65_spill] sm:$0xff]  ;;  %v3730_v36 = vadd.f32 %v11115_v15, %v3601_v59  ;;  %v3733_v48 = vadd.f32 %v11120_v18, %v3604_v30  ;;  %v11133_v28 = vld [vmem:[#allocation79_spill] sm:$0xff] }
0x1609   : > { %v3453_v55 = vsel %vm11100_vm1, %v11099_v61, %v11098_v7  ;;  %vm11102_vm3 = vmmov %vm11092_vm0  ;;  %v3474_v0 = vadd.f32 %v3452_v51, %v3345_v20  ;;  %v3600_v44 = vadd.f32 %v3579_v2, %v3471_v21  ;;  %v3728_v51 = vadd.f32 %v3707_v41, %v3599_v12  ;;  %v11127_v61 = vld [vmem:[#allocation77_spill] sm:$0xff]  ;;  %v11135_v13 = vld [vmem:[#allocation92_spill] sm:$0xff] }
0x160a   : > { %v3454_v11 = vsel %vm11102_vm3, %v11098_v7, %v11101_v38  ;;  %v3476_v1 = vadd.f32 %v3453_v55, %v3347_v26  ;;  %v3602_v54 = vadd.f32 %v3580_v8, %v3473_v53  ;;  %vm11116_vm12 = vmmov %vm11114_vm10  ;;  %v11122_v26 = vld [vmem:[#allocation71_spill] sm:$0xff]  ;;  %vm11129_vm0 = vcmask 883712   ;;  %v11142_v30 = vld [vmem:[#allocation88_spill] sm:$0xff] }
0x160b   : > { %v3477_v24 = vadd.f32 %v3454_v11, %v3348_v42  ;;  %v3603_v56 = vadd.f32 %v3581_v52, %v3474_v0  ;;  %v3708_v31 = vsel %vm11116_vm12, %v11112_v16, %v11115_v15  ;;  %vm11119_vm13 = vmmov %vm11114_vm10  ;;  %v11125_v42 = vld [vmem:[#allocation82_spill] sm:$0xff]  ;;  %v11128_v55 = vld [vmem:[#allocation87_spill] sm:$0xff]  ;;  %v3862_v8 = vadd.f32 %v11135_v13, %v3733_v48 }
0x160c   : > { %v3605_v39 = vadd.f32 %v3582_v57, %v3476_v1  ;;  %v3709_v35 = vsel %vm11119_vm13, %v11118_v47, %v11117_v40  ;;  %vm11121_vm4 = vmmov %vm11114_vm10  ;;  %v3736_v25 = vadd.f32 %v11125_v42, %v3607_v63  ;;  %v3729_v7 = vadd.f32 %v3708_v31, %v3600_v44  ;;  %v11130_v11 = vld [vmem:[#allocation86_spill] sm:$0xff]  ;;  %v11137_v0 = vld [vmem:[#allocation96_spill] sm:$0xff] }
0x160d   : > { %v3710_v20 = vsel %vm11121_vm4, %v11117_v40, %v11120_v18  ;;  %vm11124_vm7 = vmmov %vm11121_vm4  ;;  %v3606_v46 = vadd.f32 %v3583_v3, %v3477_v24  ;;  %v3836_v23 = vsel %vm11129_vm0, %v11128_v55, %v11127_v61  ;;  %v3731_v38 = vadd.f32 %v3709_v35, %v3602_v54  ;;  %v11138_v1 = vld [vmem:[#allocation89_spill] sm:$0xff]  ;;  %v11140_v24 = vld [vmem:[#allocation99_spill] sm:$0xff] }
0x160e   : > { %v3711_v60 = vsel %vm11124_vm7, %v11123_v33, %v11122_v26  ;;  %vm11126_vm14 = vmmov %vm11121_vm4  ;;  %v3732_v4 = vadd.f32 %v3710_v20, %v3603_v56  ;;  %v3965_v19 = vsel %vm672_vm11, %v11138_v1, %v11137_v0  ;;  %v3859_v43 = vadd.f32 %v11130_v11, %v3730_v36  ;;  %v11139_v52 = vld [vmem:[#allocation73_spill] sm:$0xff]  ;;  %v11144_v9 = vld [vmem:[#allocation107_spill] sm:$0xff] }
0x160f   : > { %v3712_v34 = vsel %vm11126_vm14, %v11122_v26, %v11125_v42  ;;  %v3734_v5 = vadd.f32 %v3711_v60, %v3605_v39  ;;  %vm11131_vm5 = vmmov %vm11129_vm0  ;;  %v3857_v45 = vadd.f32 %v3836_v23, %v3728_v51  ;;  %v3865_v32 = vadd.f32 %v11142_v30, %v3736_v25  ;;  %v11145_v63 = vld [vmem:[#allocation100_spill] sm:$0xff]  ;;  %v11146_v54 = vld [vmem:[#allocation93_spill] sm:$0xff] }
0x1610   : > { %v3837_v21 = vsel %vm11131_vm5, %v11127_v61, %v11130_v11  ;;  %v3735_v53 = vadd.f32 %v3712_v34, %v3606_v46  ;;  %vm11134_vm15 = vmmov %vm11129_vm0  ;;  %v4094_v12 = vsel %vm598_vm6, %v11145_v63, %v11144_v9  ;;  %v3966_v56 = vsel %vm672_vm11, %v11137_v0, %v11146_v54  ;;  %v11147_v41 = vld [vmem:[#allocation102_spill] sm:$0xff]  ;;  %v11149_v39 = vld [vmem:[#allocation97_spill] sm:$0xff] }
0x1611   : > { %v3838_v17 = vsel %vm11134_vm15, %v11133_v28, %v11132_v14  ;;  %vm11136_vm1 = vmmov %vm11129_vm0  ;;  %v3858_v50 = vadd.f32 %v3837_v21, %v3729_v7  ;;  %v3986_v16 = vadd.f32 %v3965_v19, %v3857_v45  ;;  %v11148_v15 = vld [vmem:[#allocation78_spill] sm:$0xff]  ;;  %v3968_v40 = vsel %vm672_vm11, %v11147_v41, %v11149_v39  ;;  %v11150_v47 = vld [vmem:[#allocation101_spill] sm:$0xff] }
0x1612   : > { %v3839_v2 = vsel %vm11136_vm1, %v11132_v14, %v11135_v13  ;;  %vm11141_vm3 = vmmov %vm11129_vm0  ;;  %v3860_v44 = vadd.f32 %v3838_v17, %v3731_v38  ;;  %v3967_v31 = vsel %vm672_vm11, %v11148_v15, %v11147_v41  ;;  %v11151_v35 = vld [vmem:[#allocation83_spill] sm:$0xff]  ;;  %v3988_v26 = vadd.f32 %v11146_v54, %v3859_v43  ;;  %v11152_v33 = vld [vmem:[#allocation94_spill] sm:$0xff] }
0x1613   : > { %v3840_v59 = vsel %vm11141_vm3, %v11140_v24, %v11139_v52  ;;  %vm11143_vm10 = vmmov %vm11129_vm0  ;;  %v3861_v3 = vadd.f32 %v3839_v2, %v3732_v4  ;;  %v3969_v18 = vsel %vm672_vm11, %v11151_v35, %v11150_v47  ;;  %v3970_v60 = vsel %vm672_vm11, %v11150_v47, %v11152_v33  ;;  %v11153_v25 = vld [vmem:[#allocation103_spill] sm:$0xff]  ;;  %v11155_v11 = vld [vmem:[#allocation105_spill] sm:$0xff] }
0x1614   : > { %v3841_v57 = vsel %vm11143_vm10, %v11139_v52, %v11142_v30  ;;  %v3863_v6 = vadd.f32 %v3840_v59, %v3734_v5  ;;  %v4115_v46 = vadd.f32 %v4094_v12, %v3986_v16  ;;  %v3991_v48 = vadd.f32 %v11149_v39, %v3862_v8  ;;  %v11154_v5 = vld [vmem:[#allocation109_spill] sm:$0xff]  ;;  %v11158_v28 = vld [vmem:[#allocation106_spill] sm:$0xff]  ;;  %v11159_v0 = vld [vmem:[#allocation123_spill] sm:$0xff] }
0x1615   : > { %v3864_v20 = vadd.f32 %v3841_v57, %v3735_v53  ;;  %v3994_v42 = vadd.f32 %v11152_v33, %v3865_v32  ;;  %v3987_v34 = vadd.f32 %v3966_v56, %v3858_v50  ;;  %v4095_v51 = vsel %vm598_vm6, %v11144_v9, %v11153_v25  ;;  %v11156_v53 = vld [vmem:[#allocation115_spill] sm:$0xff]  ;;  %v11160_v19 = vld [vmem:[#allocation110_spill] sm:$0xff]  ;;  %v11162_v45 = vld [vmem:[#allocation108_spill] sm:$0xff] }
0x1616   : > { %v3989_v7 = vadd.f32 %v3967_v31, %v3860_v44  ;;  %v3990_v61 = vadd.f32 %v3968_v40, %v3861_v3  ;;  %v3992_v55 = vadd.f32 %v3969_v18, %v3863_v6  ;;  %v4214_v23 = vadd.f32 %v8903_v37, %v4115_v46  ;;  %v11161_v8 = vld [vmem:[#allocation111_spill] sm:$0xff]  ;;  %v11163_v24 = vld [vmem:[#allocation124_spill] sm:$0xff]  ;;  %v11165_v59 = vld [vmem:[#allocation122_spill] sm:$0xff] }
0x1617   : > { %v9528_v38 = vadd.f32 %v3970_v60, %v3864_v20  ;;  %v4117_v4 = vadd.f32 %v11153_v25, %v3988_v26  ;;  %v4096_v21 = vsel %vm598_vm6, %v11155_v11, %v11154_v5  ;;  %vm11157_vm12 = vcmask 769024   ;;  %v11167_v9 = vld [vmem:[#allocation135_spill] sm:$0xff]  ;;  %v11168_v54 = vld [vmem:[#allocation136_spill] sm:$0xff]  ;;  %v11170_v16 = vld [vmem:[#allocation134_spill] sm:$0xff] }
0x1618   : > { %v4196_v14 = vsel %vm11157_vm12, %v8903_v37, %v11156_v53  ;;  %v4120_v17 = vadd.f32 %v11158_v28, %v3991_v48  ;;  %v4116_v13 = vadd.f32 %v4095_v51, %v3987_v34  ;;  %v4097_v2 = vsel %vm598_vm6, %v11154_v5, %v11158_v28  ;;  %v11172_v39 = vld [vmem:[#allocation147_spill] sm:$0xff]  ;;  %v11173_v35 = vld [vmem:[#allocation148_spill] sm:$0xff]  ;;  %v11175_v20 = vld [vmem:[#allocation146_spill] sm:$0xff] }
0x1619   : > { %v4343_v1 = vadd.f32 %v11159_v0, %v4214_v23  ;;  %v9543_v43 = vadd.f32 %v11160_v19, %v3994_v42  ;;  %v4098_v52 = vsel %vm598_vm6, %v11162_v45, %v11161_v8  ;;  %vm11164_vm13 = vcmask 760832   ;;  %v11179_v46 = vld [vmem:[#allocation114_spill] sm:$0xff]  ;;  %v11180_v42 = vld [vmem:[#allocation117_spill] sm:$0xff]  ;;  %vm11181_vm3 = vmmov %vm11157_vm12 }
0x161a   : > { %v4322_v37 = vsel %vm11164_vm13, %v11159_v0, %v11163_v24  ;;  %vm11166_vm4 = vmmov %vm11164_vm13  ;;  %v4118_v32 = vadd.f32 %v4096_v21, %v3989_v7  ;;  %v4215_v50 = vadd.f32 %v4196_v14, %v4116_v13  ;;  %v4216_v57 = vadd.f32 %v11156_v53, %v4117_v4  ;;  %v11183_v4 = vld [vmem:[#allocation160_spill] sm:$0xff]  ;;  %v11185_v11 = vld [vmem:[#allocation158_spill] sm:$0xff] }
0x161b   : > { %v4323_v30 = vsel %vm11166_vm4, %v11163_v24, %v11165_v59  ;;  %v4472_v63 = vadd.f32 %v11167_v9, %v4343_v1  ;;  %v4119_v44 = vadd.f32 %v4097_v2, %v3990_v61  ;;  %v4099_v3 = vsel %vm598_vm6, %v11161_v8, %v11160_v19  ;;  %v11187_v21 = vld [vmem:[#allocation126_spill] sm:$0xff]  ;;  %v11188_v14 = vld [vmem:[#allocation127_spill] sm:$0xff]  ;;  %vm11189_vm13 = vmmov %vm11166_vm4 }
0x161c   : > { %vm11169_vm7 = vcmask 752640   ;;  %v4121_v41 = vadd.f32 %v4098_v52, %v3992_v55  ;;  %v4344_v15 = vadd.f32 %v4322_v37, %v4215_v50  ;;  %v4345_v31 = vadd.f32 %v4323_v30, %v4216_v57  ;;  %v11182_v55 = vld [vmem:[#allocation159_spill] sm:$0xff]  ;;  %v11191_v1 = vld [vmem:[#allocation118_spill] sm:$0xff]  ;;  %vm11192_vm4 = vmmov %vm11181_vm3 }
0x161d   : > { %v4451_v56 = vsel %vm11169_vm7, %v11167_v9, %v11168_v54  ;;  %vm11171_vm14 = vmmov %vm11169_vm7  ;;  %v4601_v40 = vadd.f32 %v11172_v39, %v4472_v63  ;;  %vm11174_vm0 = vcmask 654336   ;;  %vm11177_vm15 = vcmask 629760   ;;  %v11193_v8 = vld [vmem:[#allocation125_spill] sm:$0xff]  ;;  %v11195_v52 = vld [vmem:[#allocation170_spill] sm:$0xff] }
0x161e   : > { %v4452_v6 = vsel %vm11171_vm14, %v11168_v54, %v11170_v16  ;;  %v4580_v18 = vsel %vm11174_vm0, %v11172_v39, %v11173_v35  ;;  %vm11176_vm5 = vmmov %vm11174_vm0  ;;  %v4217_v48 = vadd.f32 %v11179_v46, %v4118_v32  ;;  %v4197_v34 = vsel %vm11181_vm3, %v11179_v46, %v11180_v42  ;;  %v11196_v59 = vld [vmem:[#allocation138_spill] sm:$0xff]  ;;  %v11197_v63 = vld [vmem:[#allocation139_spill] sm:$0xff] }
0x161f   : > { %v4581_v26 = vsel %vm11176_vm5, %v11173_v35, %v11175_v20  ;;  %vm11178_vm1 = vmmov %vm11177_vm15  ;;  %v4473_v25 = vadd.f32 %v4451_v56, %v4344_v15  ;;  %v4474_v51 = vadd.f32 %v4452_v6, %v4345_v31  ;;  %v4219_v61 = vadd.f32 %v11180_v42, %v4120_v17  ;;  %v11190_v17 = vld [vmem:[#allocation116_spill] sm:$0xff]  ;;  %v11198_v54 = vld [vmem:[#allocation137_spill] sm:$0xff] }
0x1620   : > { %v4730_v23 = vadd.f32 %v11182_v55, %v4601_v40  ;;  %vm11184_vm10 = vcmask 646144   ;;  %v4346_v53 = vadd.f32 %v11187_v21, %v4217_v48  ;;  %v4324_v28 = vsel %vm11189_vm13, %v11187_v21, %v11188_v14  ;;  %vm11194_vm7 = vmmov %vm11189_vm13  ;;  %v11200_v15 = vld [vmem:[#allocation150_spill] sm:$0xff]  ;;  %v11202_v40 = vld [vmem:[#allocation172_spill] sm:$0xff] }
0x1621   : > { %v4946_v36 = vpop.permute.xlu2 %4945  ;;  %v4709_v5 = vsel %vm11184_vm10, %v11182_v55, %v11183_v4  ;;  %vm11186_vm12 = vmmov %vm11184_vm10  ;;  %v4602_v13 = vadd.f32 %v4580_v18, %v4473_v25  ;;  %v4603_v2 = vadd.f32 %v4581_v26, %v4474_v51  ;;  %v4218_v0 = vadd.f32 %v4197_v34, %v4119_v44  ;;  %v11203_v18 = vld [vmem:[#allocation151_spill] sm:$0xff]  ;;  %v11204_v26 = vld [vmem:[#allocation149_spill] sm:$0xff] }
0x1622   : > { %v4198_v19 = vsel %vm11192_vm4, %v11191_v1, %v11190_v17  ;;  %v4325_v45 = vsel %vm11194_vm7, %v11188_v14, %v11193_v8  ;;  %v4859_v24 = vadd.f32 %v11195_v52, %v4730_v23  ;;  %v4220_v37 = vadd.f32 %v11191_v1, %v4121_v41  ;;  %vm11199_vm0 = vmmov %vm11171_vm14  ;;  %v11201_v41 = vld [vmem:[#allocation171_spill] sm:$0xff]  ;;  %v11207_v23 = vld [vmem:[#allocation162_spill] sm:$0xff] }
0x1623   : > { %v4475_v30 = vadd.f32 %v11196_v59, %v4346_v53  ;;  %v4731_v32 = vadd.f32 %v4709_v5, %v4602_v13  ;;  %v4347_v9 = vadd.f32 %v4324_v28, %v4218_v0  ;;  %v4453_v44 = vsel %vm11171_vm14, %v11196_v59, %v11197_v63  ;;  %vm11206_vm3 = vmmov %vm11178_vm1  ;;  %v11208_v5 = vld [vmem:[#allocation163_spill] sm:$0xff]  ;;  %v11211_v53 = vld [vmem:[#allocation128_spill] sm:$0xff] }
0x1624   : > { %v4454_v56 = vsel %vm11199_vm0, %v11197_v63, %v11198_v54  ;;  %v4348_v6 = vadd.f32 %v4325_v45, %v4219_v61  ;;  %v4582_v20 = vsel %vm11176_vm5, %v11200_v15, %v11203_v18  ;;  %v4122_v55 = vadd.f32 %v4099_v3, %v9528_v38  ;;  %v11212_v14 = vld [vmem:[#allocation130_spill] sm:$0xff]  ;;  %vm11213_vm13 = vmmov %vm11194_vm7  ;;  %v11214_v3 = vld [vmem:[#allocation129_spill] sm:$0xff] }
0x1625   : > { %v4604_v31 = vadd.f32 %v11200_v15, %v4475_v30  ;;  %v4860_v39 = vadd.f32 %v11201_v41, %v4731_v32  ;;  %v4476_v34 = vadd.f32 %v4453_v44, %v4347_v9  ;;  %v4326_v28 = vsel %vm11213_vm13, %v11211_v53, %v11212_v14  ;;  %vm11215_vm4 = vmmov %vm11194_vm7  ;;  %v11216_v8 = vld [vmem:[#allocation173_spill] sm:$0xff]  ;;  %v11224_v15 = vld [vmem:[#allocation175_spill] sm:$0xff] }
0x1626   : > { %v4477_v25 = vadd.f32 %v4454_v56, %v4348_v6  ;;  %v4221_v38 = vadd.f32 %v4198_v19, %v4122_v55  ;;  %v4327_v1 = vsel %vm11215_vm4, %v11212_v14, %v11214_v3  ;;  %v4222_v52 = vadd.f32 %v11190_v17, %v9543_v43  ;;  %vm11219_vm7 = vmmov %vm11199_vm0  ;;  %v11220_v19 = vld [vmem:[#allocation141_spill] sm:$0xff]  ;;  %v11222_v56 = vld [vmem:[#allocation152_spill] sm:$0xff] }
0x1627   : > { %v4605_v13 = vadd.f32 %v4582_v20, %v4476_v34  ;;  %vm11221_vm14 = vmmov %vm11199_vm0  ;;  %v11223_v43 = vld [vmem:[#allocation174_spill] sm:$0xff]  ;;  %v11230_v34 = vld [vmem:[#allocation164_spill] sm:$0xff]  ;;  %vm11241_vm4 = vcmask 146432  }
0x1628   : > { %v4351_v54 = vadd.f32 %v4327_v1, %v4222_v52  ;;  %vm11226_vm0 = vmmov %vm11176_vm5  ;;  %v11231_v55 = vld [vmem:[#allocation166_spill] sm:$0xff] }
0x1629   : > { %v4952_v7 = vpop.permute.xlu2 %4951  ;;  %v11237_v3 = vld [vmem:[#allocation178_spill] sm:$0xff]  ;;  %vm11239_vm13 = vmmov %vm11178_vm1 }
0x1631   : > { %v4958_v0 = vpop.permute.xlu2 %4957 }
0x1634   : > { %v9556_v12 = vpop.permute.xlu0 %4941 }
0x163a   : > { %v4944_v47 = vpop.permute.xlu1 %4943 }
0x163b   : > { %v9576_v33 = vsel %vm11177_vm15, %v9556_v12, %v4944_v47  ;;  %v9579_v60 = vsel %vm11178_vm1, %v4944_v47, %v4946_v36  ;;  %v4710_v36 = vsel %vm11186_vm12, %v11183_v4, %v11185_v11  ;;  %vm11205_vm15 = vmmov %vm11176_vm5  ;;  %v4733_v4 = vadd.f32 %v11207_v23, %v4604_v31 }
0x163c   : > { %v4732_v50 = vadd.f32 %v4710_v36, %v4603_v2  ;;  %v4948_v57 = vpop.permute.xlu0 %4947  ;;  %v4583_v46 = vsel %vm11205_vm15, %v11203_v18, %v11204_v26  ;;  %v4711_v11 = vsel %vm11184_vm10, %v11207_v23, %v11208_v5  ;;  %v11209_v36 = vld [vmem:[#allocation161_spill] sm:$0xff]  ;;  %vm11210_vm12 = vmmov %vm11184_vm10 }
0x163d   : > { %v9612_v16 = vadd.f32 %v4948_v57, %v4859_v24  ;;  %v4712_v21 = vsel %vm11210_vm12, %v11208_v5, %v11209_v36  ;;  %v4606_v2 = vadd.f32 %v4583_v46, %v4477_v25  ;;  %v4862_v45 = vadd.f32 %v11216_v8, %v4733_v4  ;;  %v11217_v24 = vld [vmem:[#allocation140_spill] sm:$0xff]  ;;  %vm11228_vm5 = vmmov %vm11226_vm0  ;;  %v11233_v4 = vld [vmem:[#allocation165_spill] sm:$0xff] }
0x163e   : > { %v4861_v47 = vadd.f32 %v11202_v40, %v4732_v50  ;;  %v4350_v50 = vadd.f32 %v4326_v28, %v4221_v38  ;;  %vm11229_vm15 = vmmov %vm11178_vm1  ;;  %v4964_v28 = vpop.permute.xlu2 %4963 }
0x163f   : > { %v4735_v30 = vadd.f32 %v4712_v21, %v4606_v2  ;;  %v11235_v21 = vld [vmem:[#allocation176_spill] sm:$0xff]  ;;  %vm11238_vm12 = vmmov %vm11178_vm1 }
0x1641   : > { %v4864_v31 = vadd.f32 %v11224_v15, %v4735_v30  ;;  %v11240_v30 = vld [vmem:[#allocation10_spill] sm:$0xff] }
0x1642   : > { %v4950_v35 = vpop.permute.xlu1 %4949 }
0x1643   : > { %v4967_v48 = vsel %vm11178_vm1, %v4948_v57, %v4950_v35  ;;  %v4968_v42 = vsel %vm11206_vm3, %v4950_v35, %v4952_v7  ;;  %v4349_v7 = vadd.f32 %v11211_v53, %v4220_v37  ;;  %v4734_v37 = vadd.f32 %v4711_v11, %v4605_v13  ;;  %v11218_v57 = vld [vmem:[#allocation142_spill] sm:$0xff]  ;;  %vm11232_vm3 = vmmov %vm11184_vm10 }
0x1644   : > { %v9625_v51 = vadd.f32 %v4967_v48, %v4860_v39  ;;  %v9627_v61 = vadd.f32 %v4968_v42, %v4861_v47  ;;  %v4954_v32 = vpop.permute.xlu0 %4953  ;;  %v4455_v9 = vsel %vm11219_vm7, %v11217_v24, %v11218_v57  ;;  %v4456_v63 = vsel %vm11221_vm14, %v11218_v57, %v11220_v19  ;;  %v11225_v39 = vld [vmem:[#allocation154_spill] sm:$0xff]  ;;  %v11227_v47 = vld [vmem:[#allocation153_spill] sm:$0xff]  ;;  %vm11234_vm10 = vmmov %vm11232_vm3 }
0x1645   : > { %v4478_v59 = vadd.f32 %v11217_v24, %v4349_v7  ;;  %v9654_v44 = vadd.f32 %v4954_v32, %v4862_v45  ;;  %v4863_v17 = vadd.f32 %v11223_v43, %v4734_v37  ;;  %v4584_v40 = vsel %vm11226_vm0, %v11222_v56, %v11225_v39 }
0x1646   : > { %v4585_v35 = vsel %vm11228_vm5, %v11225_v39, %v11227_v47  ;;  %v4479_v26 = vadd.f32 %v4455_v9, %v4350_v50  ;;  %v4480_v46 = vadd.f32 %v4456_v63, %v4351_v54  ;;  %v4713_v23 = vsel %vm11232_vm3, %v11230_v34, %v11231_v55  ;;  %v5029_v50 = vpop.permute.xlu2 %5028 }
0x1647   : > { %v4607_v6 = vadd.f32 %v11222_v56, %v4478_v59  ;;  %v4714_v5 = vsel %vm11234_vm10, %v11231_v55, %v11233_v4  ;;  %vm11250_vm7 = vcmask 1039360   ;;  %vm11254_vm14 = vcmask 1031168  }
0x1648   : > { %v4608_v11 = vadd.f32 %v4584_v40, %v4479_v26  ;;  %v4609_v36 = vadd.f32 %v4585_v35, %v4480_v46  ;;  %vm11256_vm0 = vmmov %vm11250_vm7  ;;  %vm11259_vm5 = vcmask 1022976   ;;  %vm11269_vm10 = vcmask 916480  }
0x1649   : > { %v4736_v25 = vadd.f32 %v11230_v34, %v4607_v6  ;;  %vm11266_vm3 = vmmov %vm11259_vm5 }
0x164a   : > { %v4956_v41 = vpop.permute.xlu1 %4955  ;;  %v4737_v7 = vadd.f32 %v4713_v23, %v4608_v11  ;;  %v4738_v14 = vadd.f32 %v4714_v5, %v4609_v36  ;;  %v6135_v11 = vld [vmem:[%s10312_s9 + $0x28] sm:$0x3] }
0x164b   : > { %v4969_v18 = vsel %vm11229_vm15, %v4954_v32, %v4956_v41  ;;  %v4970_v20 = vsel %vm11178_vm1, %v4956_v41, %v4958_v0  ;;  %v4865_v53 = vadd.f32 %v11235_v21, %v4736_v25  ;;  %v11236_v0 = vld [vmem:[#allocation177_spill] sm:$0xff]  ;;  %v11243_v25 = vld [vmem:[#allocation12_spill] sm:$0xff]  ;;  %v5128_v36 = vperm.slane %v6135_v11, 0  ;;  %v6136_v21 = vld [vmem:[%s10310_s7 + $0x280] sm:$0xff] }
0x164c   : > { %v9667_v48 = vadd.f32 %v4969_v18, %v4863_v17  ;;  %v9669_v42 = vadd.f32 %v4970_v20, %v4864_v31  ;;  %v4960_v13 = vpop.permute.xlu0 %4959  ;;  %v4866_v38 = vadd.f32 %v11236_v0, %v4737_v7  ;;  %v4867_v1 = vadd.f32 %v11237_v3, %v4738_v14  ;;  %v6137_v7 = vld [vmem:[%s10310_s7 + $0x288] sm:$0xff]  ;;  %v6139_v14 = vld [vmem:[%s10310_s7 + $0x298] sm:$0xff]  ;;  %vm11261_vm15 = vmmov %vm11254_vm14 }
0x164d   : > { %v9679_v2 = vadd.f32 %v4960_v13, %v4865_v53  ;;  %v5129_v53 = vperm.slane %v6135_v11, 1  ;;  %vm11264_vm1 = vcmask 1014784  }
0x164e   : > { %v5044_v34 = vpop.permute.xlu2 %5043 }
0x1652   : > { %v4962_v8 = vpop.permute.xlu1 %4961 }
0x1653   : > { %v4971_v45 = vsel %vm11238_vm12, %v4960_v13, %v4962_v8  ;;  %v4972_v52 = vsel %vm11239_vm13, %v4962_v8, %v4964_v28  ;;  %v6138_v28 = vld [vmem:[%s10310_s7 + $0x290] sm:$0xff]  ;;  %v11245_v13 = vld [vmem:[#allocation7_spill] sm:$0xff]  ;;  %vm11271_vm12 = vmmov %vm11264_vm1  ;;  %vm11274_vm13 = vcmask 908288  }
0x1654   : > { %v9685_v24 = vadd.f32 %v4971_v45, %v4866_v38  ;;  %v9687_v59 = vadd.f32 %v4972_v52, %v4867_v1  ;;  %v5002_v37 = vpop.permute.xlu0 %5001  ;;  %v2661_v0 = vmul.f32 %v11245_v13, %v9282_v58  ;;  %v11246_v38 = vld [vmem:[#allocation8_spill] sm:$0xff]  ;;  %v11247_v1 = vld [vmem:[#allocation179_spill] sm:$0xff] }
0x1655   : > { %v5009_v32 = vmul.f32 %v5002_v37, %v11240_v30  ;;  %v5012_v17 = vmul.f32 %v5002_v37, %v8159_v49  ;;  %v5015_v47 = vmul.f32 %v5002_v37, %v8176_v62  ;;  %v5018_v46 = vmul.f32 %v5002_v37, %v8193_v10  ;;  %v11248_v45 = vld [vmem:[#allocation15_spill] sm:$0xff] }
0x1656   : > { %v2627_v3 = vmul.f32 %v11246_v38, %v8143_v22  ;;  %v2626_v8 = vmul.f32 %v11247_v1, %v11240_v30  ;;  %v11249_v52 = vld [vmem:[#allocation11_spill] sm:$0xff] }
0x1657   : > { %v5046_v9 = vmul.f32 %v5029_v50, %v5009_v32  ;;  %v5055_v23 = vmul.f32 %v5044_v34, %v5018_v46 }
0x1658   : > { %v2663_v32 = vmul.f32 %v11245_v13, %v2627_v3 }
0x1659   : > { %5070 = vrot.lane.b32.xlu0 %v5046_v9, %s11242_s21  ;;  %v2662_v9 = vmul.f32 %v11245_v13, %v2626_v8  ;;  %v11273_v13 = vld [vmem:[#allocation43_spill] sm:$0xff]  ;;  %v11275_v8 = vld [vmem:[#allocation29_spill] sm:$0xff] }
0x165a   : > { %v5004_v57 = vpop.permute.xlu1 %5003 }
0x165b   : > { %v5005_v19 = vsel %vm11241_vm4, %v5002_v37, %v5004_v57  ;;  %v5011_v63 = vmul.f32 0.0, %v5004_v57  ;;  %v2802_v37 = vsel %vm11250_vm7, %v11249_v52, %v11248_v45  ;;  %vm11276_vm4 = vmmov %vm11269_vm10  ;;  %v11277_v52 = vld [vmem:[#allocation56_spill] sm:$0xff] }
0x165c   : > { %v5010_v54 = vmul.f32 %v5005_v19, %v8143_v22  ;;  %v5034_v43 = vpop.permute.xlu0 %5033  ;;  %v5013_v15 = vmul.f32 %v5005_v19, %v8162_v27  ;;  %v5016_v18 = vmul.f32 %v5005_v19, %v8179_v29  ;;  %v5019_v55 = vmul.f32 %v5005_v19, %v11243_v25  ;;  %v11252_v19 = vld [vmem:[#allocation20_spill] sm:$0xff]  ;;  %vm11280_vm7 = vmmov %vm11274_vm13 }
0x165d   : > { %v5048_v56 = vmul.f32 %v5029_v50, %v5011_v63  ;;  %v5049_v31 = vmul.f32 %v5034_v43, %v5012_v17  ;;  %v5051_v41 = vmul.f32 %v5034_v43, %v5011_v63  ;;  %v5057_v4 = vmul.f32 %v5044_v34, %v5011_v63  ;;  %v11258_v17 = vld [vmem:[#allocation22_spill] sm:$0xff] }
0x165e   : > { %v5047_v6 = vmul.f32 %v5029_v50, %v5010_v54  ;;  %v5050_v39 = vmul.f32 %v5034_v43, %v5013_v15  ;;  %v5056_v5 = vmul.f32 %v5044_v34, %v5019_v55  ;;  %v11251_v50 = vld [vmem:[#allocation9_spill] sm:$0xff]  ;;  %v11257_v43 = vld [vmem:[#allocation19_spill] sm:$0xff] }
0x165f   : > { %5074 = vrot.lane.b32.xlu2 %v5048_v56, %s11242_s21  ;;  %v2693_v57 = vadd.f32 %v11251_v50, %v2661_v0  ;;  %v11255_v56 = vld [vmem:[#allocation14_spill] sm:$0xff]  ;;  %v3060_v15 = vsel %vm11259_vm5, %v11258_v17, %v11257_v43  ;;  %v11265_v55 = vld [vmem:[#allocation17_spill] sm:$0xff] }
0x1660   : > { %5072 = vrot.lane.b32.xlu1 %v5047_v6, %s11242_s21  ;;  %v2803_v6 = vsel %vm11256_vm0, %v11248_v45, %v11255_v56  ;;  %vm11287_vm0 = vcmask 883712  }
0x1661   : > { %5076 = vrot.lane.b32.xlu0 %v5049_v31, %s11242_s21  ;;  %v2822_v54 = vadd.f32 %v2802_v37, %v2693_v57  ;;  %v2695_v31 = vadd.f32 %v11251_v50, %v2663_v32  ;;  %v11278_v37 = vld [vmem:[#allocation53_spill] sm:$0xff] }
0x1662   : > { %v5039_v40 = vpop.permute.xlu1 %5038  ;;  %v3576_v32 = vsel %vm894_vm2, %v11278_v37, %v11277_v52 }
0x1663   : > { %v5052_v35 = vmul.f32 %v5039_v40, %v5015_v47  ;;  %v5054_v20 = vmul.f32 %v5039_v40, %v5011_v63  ;;  %v5053_v26 = vmul.f32 %v5039_v40, %v5016_v18  ;;  %v11253_v63 = vld [vmem:[#allocation16_spill] sm:$0xff]  ;;  %v11260_v40 = vld [vmem:[#allocation13_spill] sm:$0xff] }
0x1664   : > { %v2931_v58 = vsel %vm11254_vm14, %v11253_v63, %v11252_v19  ;;  %v2932_v47 = vsel %vm11261_vm15, %v11252_v19, %v11260_v40  ;;  %v11263_v18 = vld [vmem:[#allocation21_spill] sm:$0xff]  ;;  %v11279_v19 = vld [vmem:[#allocation39_spill] sm:$0xff]  ;;  %vm11283_vm14 = vcmask 891904   ;;  %vm11300_vm15 = vcmask 769024  }
0x1665   : > { %vm11289_vm5 = vmmov %vm11283_vm14 }
0x1667   : > { %5080 = vrot.lane.b32.xlu2 %v5051_v41, %s11242_s21  ;;  %v2694_v41 = vadd.f32 %v11251_v50, %v2662_v9 }
0x1668   : > { %5078 = vrot.lane.b32.xlu1 %v5050_v39, %s11242_s21  ;;  %v2951_v39 = vadd.f32 %v2931_v58, %v2822_v54  ;;  %v11281_v58 = vld [vmem:[#allocation74_spill] sm:$0xff]  ;;  %v11282_v54 = vld [vmem:[#allocation68_spill] sm:$0xff] }
0x1669   : > { %5082 = vrot.lane.b32.xlu0 %v5052_v35, %s11242_s21  ;;  %v11262_v35 = vld [vmem:[#allocation27_spill] sm:$0xff]  ;;  %v2823_v46 = vadd.f32 %v2803_v6, %v2694_v41  ;;  %v11285_v41 = vld [vmem:[#allocation80_spill] sm:$0xff] }
0x166a   : > { %v3080_v34 = vadd.f32 %v3060_v15, %v2951_v39  ;;  %v11284_v15 = vld [vmem:[#allocation52_spill] sm:$0xff]  ;;  %v11286_v39 = vld [vmem:[#allocation75_spill] sm:$0xff] }
0x166f   : > { %5086 = vrot.lane.b32.xlu2 %v5054_v20, %s11242_s21  ;;  %v3189_v20 = vsel %vm11264_vm1, %v11263_v18, %v11262_v35  ;;  %vm11308_vm1 = vcmask 752640  }
0x1670   : > { %5084 = vrot.lane.b32.xlu1 %v5053_v26, %s11242_s21  ;;  %v2824_v26 = vadd.f32 %v11255_v56, %v2695_v31  ;;  %v3705_v56 = vsel %vm11283_vm14, %v11282_v54, %v11281_v58  ;;  %v3577_v31 = vsel %vm894_vm2, %v11277_v52, %v11284_v15  ;;  %vm11293_vm2 = vmmov %vm11287_vm0  ;;  %v11301_v54 = vld [vmem:[#allocation120_spill] sm:$0xff] }
0x1671   : > { %5088 = vrot.lane.b32.xlu0 %v5055_v23, %s11242_s21  ;;  %v3061_v23 = vsel %vm11266_vm3, %v11257_v43, %v11265_v55  ;;  %vm11310_vm3 = vmmov %vm11308_vm1 }
0x1677   : > { %5092 = vrot.lane.b32.xlu2 %v5057_v4, %s11242_s21  ;;  %v11267_v4 = vld [vmem:[#allocation32_spill] sm:$0xff] }
0x1678   : > { %5090 = vrot.lane.b32.xlu1 %v5056_v5, %s11242_s21  ;;  %v11268_v5 = vld [vmem:[#allocation31_spill] sm:$0xff]  ;;  %v3319_v45 = vsel %vm11276_vm4, %v11267_v4, %v11275_v8  ;;  %s11336_s21 = smov 31  }
0x1679   : > { %5130 = vrot.lane.b32.xlu0 %v5128_v36, %s11244_s2  ;;  %v3318_v11 = vsel %vm11269_vm10, %v11268_v5, %v11267_v4  ;;  %v2953_v36 = vadd.f32 %v11260_v40, %v2824_v26  ;;  %v3834_v40 = vsel %vm11287_vm0, %v11286_v39, %v11285_v41  ;;  %v11306_v39 = vld [vmem:[#allocation132_spill] sm:$0xff]  ;;  %vm11313_vm10 = vcmask 654336  }
0x167a   : > { %vm11326_vm0 = vcmask 621568  }
0x167b   : > { %v3082_v38 = vadd.f32 %v11265_v55, %v2953_v36 }
0x167f   : > { %5157 = vperm.xlu2 %6252, %v6136_v21   ;;  %v2952_v21 = vadd.f32 %v2932_v47, %v2823_v46  ;;  %v11290_v46 = vld [vmem:[#allocation90_spill] sm:$0xff] }
0x1680   : > { %5132 = vrot.lane.b32.xlu1 %v5129_v53, %s11244_s2  ;;  %v3209_v53 = vadd.f32 %v3189_v20, %v3080_v34  ;;  %v11288_v20 = vld [vmem:[#allocation62_spill] sm:$0xff]  ;;  %v11291_v34 = vld [vmem:[#allocation84_spill] sm:$0xff]  ;;  %s5868_s2 = sshll.u32 %s8152_s3, 4  ;;  %s5869_s2 = int_to_ptr.vmem [resolvable:$true] %s5868_s2 }
0x1681   : > { %5162 = vperm.xlu0 %6251, %v6137_v7   ;;  %v11270_v7 = vld [vmem:[#allocation18_spill] sm:$0xff]  ;;  %v3081_v3 = vadd.f32 %v3061_v23, %v2952_v21  ;;  %v3706_v26 = vsel %vm11289_vm5, %v11281_v58, %v11288_v20  ;;  %v3963_v55 = vsel %vm672_vm11, %v11291_v34, %v11290_v46  ;;  %v11294_v21 = vld [vmem:[#allocation104_spill] sm:$0xff]  ;;  %vm11327_vm5 = vmmov %vm11326_vm0 }
0x1682   : > { %v3338_v1 = vadd.f32 %v3318_v11, %v3209_v53  ;;  %v3211_v50 = vadd.f32 %v11270_v7, %v3082_v38  ;;  %v11292_v11 = vld [vmem:[#allocation72_spill] sm:$0xff]  ;;  %v11295_v53 = vld [vmem:[#allocation95_spill] sm:$0xff] }
0x1683   : > { %v3835_v36 = vsel %vm11293_vm2, %v11285_v41, %v11292_v11  ;;  %v11311_v34 = vld [vmem:[#allocation144_spill] sm:$0xff]  ;;  %vm11328_vm2 = vmmov %vm11326_vm0 }
0x1684   : > { %v3340_v6 = vadd.f32 %v11275_v8, %v3211_v50  ;;  %v11298_v50 = vld [vmem:[#allocation113_spill] sm:$0xff] }
0x1686   : > { %v3469_v47 = vadd.f32 %v11279_v19, %v3340_v6  ;;  %v11302_v6 = vld [vmem:[#allocation121_spill] sm:$0xff] }
0x1687   : > { %5172 = vperm.xlu2 %6252, %v6139_v14   ;;  %v3190_v14 = vsel %vm11271_vm12, %v11262_v35, %v11270_v7  ;;  %v4092_v7 = vsel %vm598_vm6, %v11295_v53, %v11294_v21  ;;  %vm11315_vm12 = vmmov %vm11313_vm10 }
0x1688   : > { %5167 = vperm.xlu1 %6253, %v6138_v28   ;;  %v11272_v28 = vld [vmem:[#allocation46_spill] sm:$0xff]  ;;  %v3210_v57 = vadd.f32 %v3190_v14, %v3081_v3  ;;  %v3598_v23 = vadd.f32 %v11284_v15, %v3469_v47  ;;  %v11307_v47 = vld [vmem:[#allocation133_spill] sm:$0xff] }
0x1689   : > { %v3447_v0 = vsel %vm11274_vm13, %v11273_v13, %v11272_v28  ;;  %v3448_v63 = vsel %vm11280_vm7, %v11272_v28, %v11279_v19  ;;  %vm11318_vm13 = vcmask 646144   ;;  %vm11323_vm7 = vcmask 637952  }
0x168a   : > { %v3467_v9 = vadd.f32 %v3447_v0, %v3338_v1  ;;  %v3339_v43 = vadd.f32 %v3319_v45, %v3210_v57  ;;  %v3727_v14 = vadd.f32 %v11288_v20, %v3598_v23  ;;  %v11296_v0 = vld [vmem:[#allocation85_spill] sm:$0xff]  ;;  %v11297_v45 = vld [vmem:[#allocation91_spill] sm:$0xff]  ;;  %vm11320_vm4 = vmmov %vm11318_vm13 }
0x168b   : > { %v3964_v38 = vsel %vm672_vm11, %v11290_v46, %v11296_v0  ;;  %v4093_v52 = vsel %vm598_vm6, %v11294_v21, %v11297_v45  ;;  %vm11303_vm11 = vcmask 760832   ;;  %v11312_v23 = vld [vmem:[#allocation145_spill] sm:$0xff]  ;;  %vm11325_vm14 = vmmov %vm11323_vm7 }
0x168c   : > { %v3596_v17 = vadd.f32 %v3576_v32, %v3467_v9  ;;  %v3468_v35 = vadd.f32 %v3448_v63, %v3339_v43  ;;  %v3856_v3 = vadd.f32 %v11292_v11, %v3727_v14  ;;  %v11299_v9 = vld [vmem:[#allocation112_spill] sm:$0xff]  ;;  %v4320_v43 = vsel %vm11303_vm11, %v11301_v54, %v11302_v6  ;;  %vm11305_vm6 = vmmov %vm11303_vm11 }
0x168d   : > { %v4195_v19 = vsel %vm11300_vm15, %v11298_v50, %v11299_v9  ;;  %vm11329_vm15 = vmmov %vm11326_vm0 }
0x168e   : > { %v3725_v18 = vadd.f32 %v3705_v56, %v3596_v17  ;;  %v3597_v4 = vadd.f32 %v3577_v31, %v3468_v35  ;;  %v3985_v37 = vadd.f32 %v11296_v0, %v3856_v3  ;;  %v11304_v17 = vld [vmem:[#allocation119_spill] sm:$0xff]  ;;  %v4449_v35 = vsel %vm11308_vm1, %v11306_v39, %v11307_v47  ;;  %vm11330_vm11 = vmmov %vm11326_vm0 }
0x168f   : > { %v4321_v15 = vsel %vm11305_vm6, %v11302_v6, %v11304_v17  ;;  %v11319_v0 = vld [vmem:[#allocation155_spill] sm:$0xff]  ;;  %vm11331_vm6 = vmmov %vm11326_vm0 }
0x1690   : > { %v3854_v5 = vadd.f32 %v3834_v40, %v3725_v18  ;;  %v3726_v28 = vadd.f32 %v3706_v26, %v3597_v4  ;;  %v4114_v63 = vadd.f32 %v11297_v45, %v3985_v37  ;;  %v11309_v18 = vld [vmem:[#allocation131_spill] sm:$0xff]  ;;  %v4578_v4 = vsel %vm11313_vm10, %v11311_v34, %v11312_v23  ;;  %vm11332_vm1 = vmmov %vm11326_vm0 }
0x1691   : > { %v4450_v20 = vsel %vm11310_vm3, %v11307_v47, %v11309_v18  ;;  %vm11333_vm3 = vmmov %vm11326_vm0  ;;  %vm11334_vm10 = vcmask 244736  }
0x1692   : > { %v3983_v13 = vadd.f32 %v3963_v55, %v3854_v5  ;;  %v3855_v1 = vadd.f32 %v3835_v36, %v3726_v28  ;;  %v4213_v31 = vadd.f32 %v11299_v9, %v4114_v63  ;;  %v11314_v5 = vld [vmem:[#allocation143_spill] sm:$0xff]  ;;  %v11317_v28 = vld [vmem:[#allocation157_spill] sm:$0xff] }
0x1693   : > { %v4579_v11 = vsel %vm11315_vm12, %v11312_v23, %v11314_v5  ;;  %vm11337_vm12 = vcmask 523264  }
0x1694   : > { %v4112_v8 = vadd.f32 %v4092_v7, %v3983_v13  ;;  %v3984_v32 = vadd.f32 %v3964_v38, %v3855_v1  ;;  %v4342_v46 = vadd.f32 %v4321_v15, %v4213_v31  ;;  %v11316_v7 = vld [vmem:[#allocation156_spill] sm:$0xff]  ;;  %v4708_v38 = vsel %vm11320_vm4, %v11317_v28, %v11319_v0  ;;  %vm11339_vm4 = vmmov %vm11337_vm12 }
0x1695   : > { %v4707_v13 = vsel %vm11318_vm13, %v11316_v7, %v11317_v28  ;;  %vm11338_vm13 = vmmov %vm11337_vm12 }
0x1696   : > { %v4211_v57 = vadd.f32 %v11298_v50, %v4112_v8  ;;  %v4113_v58 = vadd.f32 %v4093_v52, %v3984_v32  ;;  %v4471_v53 = vadd.f32 %v4450_v20, %v4342_v46  ;;  %v11321_v8 = vld [vmem:[#allocation168_spill] sm:$0xff]  ;;  %v11322_v52 = vld [vmem:[#allocation169_spill] sm:$0xff]  ;;  %v11324_v32 = vld [vmem:[#allocation167_spill] sm:$0xff] }
0x1697   : > { %v4836_v37 = vsel %vm11323_vm7, %v11321_v8, %v11322_v52  ;;  %v4837_v50 = vsel %vm11325_vm14, %v11322_v52, %v11324_v32  ;;  %vm11340_vm7 = vmmov %vm11339_vm4 }
0x1698   : > { %v4340_v56 = vadd.f32 %v11301_v54, %v4211_v57  ;;  %v4212_v41 = vadd.f32 %v4195_v19, %v4113_v58  ;;  %v4600_v1 = vadd.f32 %v4579_v11, %v4471_v53  ;;  %vm11341_vm14 = vmmov %vm11339_vm4 }
0x169a   : > { %v4469_v40 = vadd.f32 %v11306_v39, %v4340_v56  ;;  %v4341_v26 = vadd.f32 %v4320_v43, %v4212_v41  ;;  %v4729_v9 = vadd.f32 %v4708_v38, %v4600_v1 }
0x169c   : > { %v4598_v55 = vadd.f32 %v11311_v34, %v4469_v40  ;;  %v4470_v21 = vadd.f32 %v4449_v35, %v4341_v26  ;;  %v4858_v54 = vadd.f32 %v4837_v50, %v4729_v9 }
0x169e   : > { %v4727_v14 = vadd.f32 %v11316_v7, %v4598_v55  ;;  %v4599_v3 = vadd.f32 %v4578_v4, %v4470_v21  ;;  %v4987_v43 = vadd.f32 %v9579_v60, %v4858_v54 }
0x16a0   : > { %v4856_v45 = vadd.f32 %v11321_v8, %v4727_v14  ;;  %v4728_v57 = vadd.f32 %v4707_v13, %v4599_v3 }
0x16a2   : > { %v4985_v19 = vadd.f32 %v9556_v12, %v4856_v45  ;;  %v4857_v58 = vadd.f32 %v4836_v37, %v4728_v57 }
0x16a4   : > { %v4986_v6 = vadd.f32 %v9576_v33, %v4857_v58 }
0x16b9   : > { %v5075_v36 = vpop.permute.xlu2 %5074 }
0x16c1   : > { %v5081_v15 = vpop.permute.xlu2 %5080 }
0x16c9   : > { %v5087_v26 = vpop.permute.xlu2 %5086 }
0x16cb   : > { %v5071_v63 = vpop.permute.xlu0 %5070 }
0x16cc   : > { %v9856_v56 = vadd.f32 %v5071_v63, %v4985_v19 }
0x16d2   : > { %v5073_v17 = vpop.permute.xlu1 %5072 }
0x16d3   : > { %v5094_v31 = vsel %vm11326_vm0, %v5071_v63, %v5073_v17  ;;  %v5095_v41 = vsel %vm11327_vm5, %v5073_v17, %v5075_v36  ;;  %v5077_v12 = vpop.permute.xlu0 %5076  ;;  %vm11342_vm0 = vmmov %vm11339_vm4 }
0x16d4   : > { %v9862_v39 = vadd.f32 %v5094_v31, %v4986_v6  ;;  %v9864_v40 = vadd.f32 %v5095_v41, %v4987_v43  ;;  %v9867_v47 = vadd.f32 %v5077_v12, %v9612_v16  ;;  %vm11343_vm5 = vmmov %vm11342_vm0 }
0x16da   : > { %v5079_v35 = vpop.permute.xlu1 %5078 }
0x16db   : > { %v5096_v18 = vsel %vm11328_vm2, %v5077_v12, %v5079_v35  ;;  %v5097_v33 = vsel %vm11329_vm15, %v5079_v35, %v5081_v15  ;;  %v5083_v46 = vpop.permute.xlu0 %5082  ;;  %v6140_v15 = vld [vmem:[%s10312_s9 + $0x2a] sm:$0x3]  ;;  %v6141_v12 = vld [vmem:[%s10310_s7 + $0x2a0] sm:$0xff]  ;;  %vm11344_vm2 = vmmov %vm11342_vm0  ;;  %vm11346_vm15 = vcmask 252928  }
0x16dc   : > { %v9872_v60 = vadd.f32 %v5096_v18, %v9625_v51  ;;  %v9875_v20 = vadd.f32 %v5097_v33, %v9627_v61  ;;  %v9878_v34 = vadd.f32 %v5083_v46, %v9654_v44  ;;  %v5093_v51 = vpop.permute.xlu2 %5092  ;;  %v5257_v41 = vperm.slane %v6140_v15, 0  ;;  %v6142_v18 = vld [vmem:[%s10310_s7 + $0x2a8] sm:$0xff]  ;;  %v6144_v33 = vld [vmem:[%s10310_s7 + $0x2b8] sm:$0xff] }
0x16dd   : > { %v5258_v35 = vperm.slane %v6140_v15, 1 }
0x16e2   : > { %v5085_v55 = vpop.permute.xlu1 %5084 }
0x16e3   : > { %v5098_v16 = vsel %vm11330_vm11, %v5083_v46, %v5085_v55  ;;  %v5099_v23 = vsel %vm11331_vm6, %v5085_v55, %v5087_v26  ;;  %v5089_v11 = vpop.permute.xlu0 %5088  ;;  %v6143_v26 = vld [vmem:[%s10310_s7 + $0x2b0] sm:$0xff]  ;;  %vm11348_vm11 = vcmask 515072  }
0x16e4   : > { %v9883_v4 = vadd.f32 %v5098_v16, %v9667_v48  ;;  %v9886_v5 = vadd.f32 %v5099_v23, %v9669_v42  ;;  %v9889_v61 = vadd.f32 %v5089_v11, %v9679_v2  ;;  %v5158_v14 = vpop.permute.xlu2 %5157  ;;  %vm11349_vm6 = vmmov %vm11348_vm11 }
0x16ea   : > { %v5091_v36 = vpop.permute.xlu1 %5090 }
0x16eb   : > { %v5100_v44 = vsel %vm11332_vm1, %v5089_v11, %v5091_v36  ;;  %v5101_v21 = vsel %vm11333_vm3, %v5091_v36, %v5093_v51  ;;  %v5131_v48 = vpop.permute.xlu0 %5130  ;;  %vm11350_vm1 = vmmov %vm11349_vm6 }
0x16ec   : > { %v9894_v53 = vadd.f32 %v5100_v44, %v9685_v24  ;;  %v9897_v7 = vadd.f32 %v5101_v21, %v9687_v59  ;;  %v5138_v42 = vmul.f32 %v5131_v48, %v11240_v30  ;;  %v5141_v59 = vmul.f32 %v5131_v48, %v8159_v49  ;;  %v5173_v54 = vpop.permute.xlu2 %5172  ;;  %vm11351_vm3 = vmmov %vm11350_vm1 }
0x16ed   : > { %v5144_v50 = vmul.f32 %v5131_v48, %v8176_v62  ;;  %v5147_v63 = vmul.f32 %v5131_v48, %v8193_v10 }
0x16ee   : > { %v5175_v28 = vmul.f32 %v5158_v14, %v5138_v42 }
0x16ef   : > { %v5184_v43 = vmul.f32 %v5173_v54, %v5147_v63 }
0x16f0   : > { %5199 = vrot.lane.b32.xlu0 %v5175_v28, %s11335_s12 }
0x16f2   : > { %v5133_v13 = vpop.permute.xlu1 %5132 }
0x16f3   : > { %v5134_v2 = vsel %vm11334_vm10, %v5131_v48, %v5133_v13  ;;  %v5140_v0 = vmul.f32 0.0, %v5133_v13  ;;  %v5163_v24 = vpop.permute.xlu0 %5162  ;;  %vm11352_vm10 = vmmov %vm11350_vm1 }
0x16f4   : > { %v5139_v38 = vmul.f32 %v5134_v2, %v8143_v22  ;;  %v5142_v8 = vmul.f32 %v5134_v2, %v8162_v27  ;;  %v5178_v45 = vmul.f32 %v5163_v24, %v5141_v59  ;;  %v5145_v9 = vmul.f32 %v5134_v2, %v8179_v29 }
0x16f5   : > { %v5177_v3 = vmul.f32 %v5158_v14, %v5140_v0  ;;  %v5180_v52 = vmul.f32 %v5163_v24, %v5140_v0  ;;  %v5148_v6 = vmul.f32 %v5134_v2, %v11243_v25  ;;  %v5186_v17 = vmul.f32 %v5173_v54, %v5140_v0 }
0x16f6   : > { %v5176_v1 = vmul.f32 %v5158_v14, %v5139_v38  ;;  %v5179_v37 = vmul.f32 %v5163_v24, %v5142_v8 }
0x16f7   : > { %5203 = vrot.lane.b32.xlu2 %v5177_v3, %s11335_s12  ;;  %v5185_v31 = vmul.f32 %v5173_v54, %v5148_v6 }
0x16f8   : > { %5201 = vrot.lane.b32.xlu1 %v5176_v1, %s11335_s12  ;;  %5205 = vrot.lane.b32.xlu0 %v5178_v45, %s11335_s12 }
0x16fa   : > { %v5168_v32 = vpop.permute.xlu1 %5167 }
0x16fb   : > { %v5181_v57 = vmul.f32 %v5168_v32, %v5144_v50  ;;  %v5183_v19 = vmul.f32 %v5168_v32, %v5140_v0  ;;  %v5182_v58 = vmul.f32 %v5168_v32, %v5145_v9 }
0x16ff   : > { %5209 = vrot.lane.b32.xlu2 %v5180_v52, %s11335_s12 }
0x1700   : > { %5207 = vrot.lane.b32.xlu1 %v5179_v37, %s11335_s12  ;;  %5211 = vrot.lane.b32.xlu0 %v5181_v57, %s11335_s12 }
0x1707   : > { %5215 = vrot.lane.b32.xlu2 %v5183_v19, %s11335_s12 }
0x1708   : > { %5213 = vrot.lane.b32.xlu1 %v5182_v58, %s11335_s12  ;;  %5217 = vrot.lane.b32.xlu0 %v5184_v43, %s11335_s12 }
0x170f   : > { %5221 = vrot.lane.b32.xlu2 %v5186_v17, %s11335_s12 }
0x1710   : > { %5219 = vrot.lane.b32.xlu1 %v5185_v31, %s11335_s12  ;;  %5259 = vrot.lane.b32.xlu0 %v5257_v41, %s11336_s21  ;;  %s11347_s12 = smov 32  }
0x1717   : > { %5286 = vperm.xlu2 %6252, %v6141_v12  }
0x1718   : > { %5261 = vrot.lane.b32.xlu1 %v5258_v35, %s11336_s21  ;;  %5291 = vperm.xlu0 %6251, %v6142_v18   ;;  %s11371_s21 = smov 60  }
0x171f   : > { %5301 = vperm.xlu2 %6252, %v6144_v33  }
0x1720   : > { %5296 = vperm.xlu1 %6253, %v6143_v26  }
0x1751   : > { %v5204_v46 = vpop.permute.xlu2 %5203 }
0x1759   : > { %v5210_v23 = vpop.permute.xlu2 %5209 }
0x1761   : > { %v5216_v13 = vpop.permute.xlu2 %5215 }
0x1762   : > { %v5200_v55 = vpop.permute.xlu0 %5199 }
0x1763   : > { %v9938_v16 = vadd.f32 %v5200_v55, %v9856_v56 }
0x176a   : > { %v5202_v51 = vpop.permute.xlu1 %5201  ;;  %v5206_v48 = vpop.permute.xlu0 %5205 }
0x176b   : > { %v5223_v11 = vsel %vm11337_vm12, %v5200_v55, %v5202_v51  ;;  %v5224_v36 = vsel %vm11338_vm13, %v5202_v51, %v5204_v46  ;;  %v9949_v42 = vadd.f32 %v5206_v48, %v9867_v47  ;;  %vm11353_vm12 = vmmov %vm11350_vm1 }
0x176c   : > { %v9943_v44 = vadd.f32 %v5223_v11, %v9862_v39  ;;  %v9946_v21 = vadd.f32 %v5224_v36, %v9864_v40  ;;  %vm11354_vm13 = vmmov %vm11350_vm1 }
0x1772   : > { %v5208_v14 = vpop.permute.xlu1 %5207  ;;  %v5212_v39 = vpop.permute.xlu0 %5211 }
0x1773   : > { %v5225_v56 = vsel %vm11339_vm4, %v5206_v48, %v5208_v14  ;;  %v5226_v28 = vsel %vm11340_vm7, %v5208_v14, %v5210_v23  ;;  %v9960_v40 = vadd.f32 %v5212_v39, %v9878_v34  ;;  %v6145_v23 = vld [vmem:[%s10312_s9 + $0x2c] sm:$0x3]  ;;  %v6146_v48 = vld [vmem:[%s10310_s7 + $0x2c0] sm:$0xff]  ;;  %vm11355_vm4 = vmmov %vm11350_vm1 }
0x1774   : > { %v9954_v2 = vadd.f32 %v5225_v56, %v9872_v60  ;;  %v9957_v0 = vadd.f32 %v5226_v28, %v9875_v20  ;;  %v5222_v60 = vpop.permute.xlu2 %5221  ;;  %v5386_v36 = vperm.slane %v6145_v23, 0  ;;  %v5387_v14 = vperm.slane %v6145_v23, 1  ;;  %v6147_v56 = vld [vmem:[%s10310_s7 + $0x2c8] sm:$0xff]  ;;  %v6149_v28 = vld [vmem:[%s10310_s7 + $0x2d8] sm:$0xff] }
0x177a   : > { %v5214_v38 = vpop.permute.xlu1 %5213  ;;  %v5218_v59 = vpop.permute.xlu0 %5217 }
0x177b   : > { %v5227_v47 = vsel %vm11341_vm14, %v5212_v39, %v5214_v38  ;;  %v5228_v3 = vsel %vm11342_vm0, %v5214_v38, %v5216_v13  ;;  %v9971_v20 = vadd.f32 %v5218_v59, %v9889_v61  ;;  %v6148_v13 = vld [vmem:[%s10310_s7 + $0x2d0] sm:$0xff] }
0x177c   : > { %v9965_v1 = vadd.f32 %v5227_v47, %v9883_v4  ;;  %v9968_v24 = vadd.f32 %v5228_v3, %v9886_v5  ;;  %v5287_v32 = vpop.permute.xlu2 %5286 }
0x1782   : > { %v5220_v8 = vpop.permute.xlu1 %5219  ;;  %v5260_v4 = vpop.permute.xlu0 %5259 }
0x1783   : > { %v5229_v34 = vsel %vm11343_vm5, %v5218_v59, %v5220_v8  ;;  %v5230_v45 = vsel %vm11344_vm2, %v5220_v8, %v5222_v60  ;;  %v5267_v5 = vmul.f32 %v5260_v4, %v11240_v30  ;;  %v5270_v54 = vmul.f32 %v5260_v4, %v8159_v49 }
0x1784   : > { %v9976_v52 = vadd.f32 %v5229_v34, %v9894_v53  ;;  %v9979_v37 = vadd.f32 %v5230_v45, %v9897_v7  ;;  %v5273_v31 = vmul.f32 %v5260_v4, %v8176_v62  ;;  %v5276_v35 = vmul.f32 %v5260_v4, %v8193_v10  ;;  %v5302_v26 = vpop.permute.xlu2 %5301 }
0x1785   : > { %v5304_v50 = vmul.f32 %v5287_v32, %v5267_v5 }
0x1786   : > { %v5313_v46 = vmul.f32 %v5302_v26, %v5276_v35 }
0x1787   : > { %5328 = vrot.lane.b32.xlu0 %v5304_v50, %s11345_s27 }
0x178a   : > { %v5262_v57 = vpop.permute.xlu1 %5261  ;;  %v5292_v58 = vpop.permute.xlu0 %5291 }
0x178b   : > { %v5263_v61 = vsel %vm11346_vm15, %v5260_v4, %v5262_v57  ;;  %v5269_v9 = vmul.f32 0.0, %v5262_v57  ;;  %v5307_v7 = vmul.f32 %v5292_v58, %v5270_v54 }
0x178c   : > { %v5268_v19 = vmul.f32 %v5263_v61, %v8143_v22  ;;  %v5271_v6 = vmul.f32 %v5263_v61, %v8162_v27  ;;  %v5274_v12 = vmul.f32 %v5263_v61, %v8179_v29  ;;  %v5277_v55 = vmul.f32 %v5263_v61, %v11243_v25 }
0x178d   : > { %v5306_v63 = vmul.f32 %v5287_v32, %v5269_v9  ;;  %v5309_v43 = vmul.f32 %v5292_v58, %v5269_v9  ;;  %v5315_v51 = vmul.f32 %v5302_v26, %v5269_v9 }
0x178e   : > { %v5305_v53 = vmul.f32 %v5287_v32, %v5268_v19  ;;  %v5308_v15 = vmul.f32 %v5292_v58, %v5271_v6  ;;  %v5314_v11 = vmul.f32 %v5302_v26, %v5277_v55 }
0x178f   : > { %5332 = vrot.lane.b32.xlu2 %v5306_v63, %s11345_s27  ;;  %5334 = vrot.lane.b32.xlu0 %v5307_v7, %s11345_s27 }
0x1790   : > { %5330 = vrot.lane.b32.xlu1 %v5305_v53, %s11345_s27 }
0x1792   : > { %v5297_v17 = vpop.permute.xlu1 %5296 }
0x1793   : > { %v5310_v41 = vmul.f32 %v5297_v17, %v5273_v31  ;;  %v5312_v18 = vmul.f32 %v5297_v17, %v5269_v9  ;;  %v5311_v33 = vmul.f32 %v5297_v17, %v5274_v12 }
0x1797   : > { %5338 = vrot.lane.b32.xlu2 %v5309_v43, %s11345_s27  ;;  %5340 = vrot.lane.b32.xlu0 %v5310_v41, %s11345_s27 }
0x1798   : > { %5336 = vrot.lane.b32.xlu1 %v5308_v15, %s11345_s27 }
0x179f   : > { %5344 = vrot.lane.b32.xlu2 %v5312_v18, %s11345_s27  ;;  %5346 = vrot.lane.b32.xlu0 %v5313_v46, %s11345_s27 }
0x17a0   : > { %5342 = vrot.lane.b32.xlu1 %v5311_v33, %s11345_s27 }
0x17a7   : > { %5350 = vrot.lane.b32.xlu2 %v5315_v51, %s11345_s27  ;;  %5388 = vrot.lane.b32.xlu0 %v5386_v36, %s11347_s12 }
0x17a8   : > { %5348 = vrot.lane.b32.xlu1 %v5314_v11, %s11345_s27  ;;  %s11357_s27 = smov 33  }
0x17af   : > { %5415 = vperm.xlu2 %6252, %v6146_v48   ;;  %5420 = vperm.xlu0 %6251, %v6147_v56  }
0x17b0   : > { %5390 = vrot.lane.b32.xlu1 %v5387_v14, %s11347_s12  ;;  %s6345_s12 = scalar_lea.hbm %s10313_s10, 256 }
0x17b7   : > { %5430 = vperm.xlu2 %6252, %v6149_v28  }
0x17b8   : > { %5425 = vperm.xlu1 %6253, %v6148_v13  }
0x17e9   : > { %v5333_v39 = vpop.permute.xlu2 %5332 }
0x17f1   : > { %v5339_v3 = vpop.permute.xlu2 %5338 }
0x17f9   : > { %v5329_v38 = vpop.permute.xlu0 %5328  ;;  %v5345_v50 = vpop.permute.xlu2 %5344 }
0x17fa   : > { %v10020_v47 = vadd.f32 %v5329_v38, %v9938_v16 }
0x1801   : > { %v5335_v4 = vpop.permute.xlu0 %5334 }
0x1802   : > { %v5331_v60 = vpop.permute.xlu1 %5330  ;;  %v10031_v5 = vadd.f32 %v5335_v4, %v9949_v42 }
0x1803   : > { %v5352_v59 = vsel %vm11348_vm11, %v5329_v38, %v5331_v60  ;;  %v5353_v8 = vsel %vm11349_vm6, %v5331_v60, %v5333_v39  ;;  %vm11367_vm6 = vcmask 269312  }
0x1804   : > { %v10025_v34 = vadd.f32 %v5352_v59, %v9943_v44  ;;  %v10028_v45 = vadd.f32 %v5353_v8, %v9946_v21 }
0x1809   : > { %v5341_v44 = vpop.permute.xlu0 %5340 }
0x180a   : > { %v5337_v32 = vpop.permute.xlu1 %5336  ;;  %v10042_v21 = vadd.f32 %v5341_v44, %v9960_v40 }
0x180b   : > { %v5354_v16 = vsel %vm11350_vm1, %v5335_v4, %v5337_v32  ;;  %v5355_v57 = vsel %vm11351_vm3, %v5337_v32, %v5339_v3  ;;  %v6150_v3 = vld [vmem:[%s10312_s9 + $0x2e] sm:$0x3]  ;;  %v6151_v4 = vld [vmem:[%s10310_s7 + $0x2e0] sm:$0xff]  ;;  %vm11369_vm1 = vcmask 498688  }
0x180c   : > { %v10036_v61 = vadd.f32 %v5354_v16, %v9954_v2  ;;  %v10039_v9 = vadd.f32 %v5355_v57, %v9957_v0  ;;  %v5351_v2 = vpop.permute.xlu2 %5350  ;;  %v5515_v59 = vperm.slane %v6150_v3, 0  ;;  %v5516_v32 = vperm.slane %v6150_v3, 1  ;;  %v6154_v16 = vld [vmem:[%s10310_s7 + $0x2f8] sm:$0xff]  ;;  %v6153_v57 = vld [vmem:[%s10310_s7 + $0x2f0] sm:$0xff]  ;;  %vm11370_vm3 = vmmov %vm11369_vm1 }
0x1811   : > { %v5347_v54 = vpop.permute.xlu0 %5346 }
0x1812   : > { %v5343_v19 = vpop.permute.xlu1 %5342  ;;  %v10053_v0 = vadd.f32 %v5347_v54, %v9971_v20 }
0x1813   : > { %v5356_v42 = vsel %vm11352_vm10, %v5341_v44, %v5343_v19  ;;  %v5357_v63 = vsel %vm11353_vm12, %v5343_v19, %v5345_v50  ;;  %v6152_v50 = vld [vmem:[%s10310_s7 + $0x2e8] sm:$0xff]  ;;  %vm11372_vm10 = vcmask 490496  }
0x1814   : > { %v10047_v58 = vadd.f32 %v5356_v42, %v9965_v1  ;;  %v10050_v53 = vadd.f32 %v5357_v63, %v9968_v24  ;;  %v5416_v15 = vpop.permute.xlu2 %5415  ;;  %vm11373_vm12 = vmmov %vm11372_vm10 }
0x1819   : > { %v5389_v1 = vpop.permute.xlu0 %5388 }
0x181a   : > { %v5349_v7 = vpop.permute.xlu1 %5348  ;;  %v5396_v24 = vmul.f32 %v5389_v1, %v11240_v30  ;;  %v5402_v23 = vmul.f32 %v5389_v1, %v8176_v62  ;;  %v5405_v48 = vmul.f32 %v5389_v1, %v8193_v10 }
0x181b   : > { %v5358_v40 = vsel %vm11354_vm13, %v5347_v54, %v5349_v7  ;;  %v5359_v6 = vsel %vm11355_vm4, %v5349_v7, %v5351_v2  ;;  %vm11374_vm13 = vmmov %vm11369_vm1 }
0x181c   : > { %v10058_v43 = vadd.f32 %v5358_v40, %v9976_v52  ;;  %v10061_v17 = vadd.f32 %v5359_v6, %v9979_v37  ;;  %v5433_v31 = vmul.f32 %v5416_v15, %v5396_v24  ;;  %v5399_v52 = vmul.f32 %v5389_v1, %v8159_v49  ;;  %v5431_v13 = vpop.permute.xlu2 %5430  ;;  %vm11375_vm4 = vmmov %vm11369_vm1 }
0x181d   : > { %v5442_v39 = vmul.f32 %v5431_v13, %v5405_v48 }
0x181e   : > { %5457 = vrot.lane.b32.xlu0 %v5433_v31, %s11356_s28 }
0x1821   : > { %v5421_v18 = vpop.permute.xlu0 %5420 }
0x1822   : > { %v5391_v20 = vpop.permute.xlu1 %5390  ;;  %v5436_v37 = vmul.f32 %v5421_v18, %v5399_v52 }
0x1823   : > { %v5392_v41 = vsel %vm2124_vm9, %v5389_v1, %v5391_v20  ;;  %v5398_v12 = vmul.f32 0.0, %v5391_v20  ;;  %vm11358_vm9 = vcmask 506880  }
0x1824   : > { %v5397_v35 = vmul.f32 %v5392_v41, %v8143_v22  ;;  %v5400_v46 = vmul.f32 %v5392_v41, %v8162_v27  ;;  %v5403_v14 = vmul.f32 %v5392_v41, %v8179_v29  ;;  %v5406_v38 = vmul.f32 %v5392_v41, %v11243_v25  ;;  %vm11359_vm7 = vmmov %vm11358_vm9 }
0x1825   : > { %v5435_v33 = vmul.f32 %v5416_v15, %v5398_v12  ;;  %v5438_v51 = vmul.f32 %v5421_v18, %v5398_v12  ;;  %v5444_v60 = vmul.f32 %v5431_v13, %v5398_v12  ;;  %vm11360_vm14 = vmmov %vm11359_vm7 }
0x1826   : > { %v5434_v26 = vmul.f32 %v5416_v15, %v5397_v35  ;;  %5463 = vrot.lane.b32.xlu0 %v5436_v37, %s11356_s28  ;;  %v5437_v36 = vmul.f32 %v5421_v18, %v5400_v46  ;;  %v5443_v8 = vmul.f32 %v5431_v13, %v5406_v38  ;;  %vm11361_vm0 = vmmov %vm11359_vm7  ;;  %v6156_v13 = vld [vmem:[%s10310_s7 + $0x300] sm:$0xff]  ;;  %v6157_v38 = vld [vmem:[%s10310_s7 + $0x308] sm:$0xff] }
0x1827   : > { %5461 = vrot.lane.b32.xlu2 %v5435_v33, %s11356_s28  ;;  %vm11362_vm5 = vmmov %vm11361_vm0 }
0x1828   : > { %5459 = vrot.lane.b32.xlu1 %v5434_v26, %s11356_s28  ;;  %vm11363_vm2 = vmmov %vm11361_vm0 }
0x1829   : > { %vm11364_vm15 = vmmov %vm11361_vm0 }
0x182a   : > { %v5426_v55 = vpop.permute.xlu1 %5425  ;;  %vm11365_vm11 = vmmov %vm11361_vm0 }
0x182b   : > { %v5439_v11 = vmul.f32 %v5426_v55, %v5402_v23  ;;  %v5441_v56 = vmul.f32 %v5426_v55, %v5398_v12  ;;  %v5440_v28 = vmul.f32 %v5426_v55, %v5403_v14 }
0x182e   : > { %5469 = vrot.lane.b32.xlu0 %v5439_v11, %s11356_s28 }
0x182f   : > { %5467 = vrot.lane.b32.xlu2 %v5438_v51, %s11356_s28 }
0x1830   : > { %5465 = vrot.lane.b32.xlu1 %v5437_v36, %s11356_s28  ;;  %v6155_v36 = vld [vmem:[%s10312_s9 + $0x30] sm:$0x3] }
0x1836   : > { %5475 = vrot.lane.b32.xlu0 %v5442_v39, %s11356_s28  ;;  %v5645_v39 = vperm.slane %v6155_v36, 1 }
0x1837   : > { %5473 = vrot.lane.b32.xlu2 %v5441_v56, %s11356_s28  ;;  %v5644_v56 = vperm.slane %v6155_v36, 0 }
0x1838   : > { %5471 = vrot.lane.b32.xlu1 %v5440_v28, %s11356_s28 }
0x183e   : > { %5517 = vrot.lane.b32.xlu0 %v5515_v59, %s11357_s27 }
0x183f   : > { %5479 = vrot.lane.b32.xlu2 %v5444_v60, %s11356_s28  ;;  %v6159_v60 = vld [vmem:[%s10310_s7 + $0x318] sm:$0xff] }
0x1840   : > { %5477 = vrot.lane.b32.xlu1 %v5443_v8, %s11356_s28  ;;  %s11368_s28 = smov 34   ;;  %v6158_v8 = vld [vmem:[%s10310_s7 + $0x310] sm:$0xff] }
0x1846   : > { %5549 = vperm.xlu0 %6251, %v6152_v50  }
0x1847   : > { %5544 = vperm.xlu2 %6252, %v6151_v4  }
0x1848   : > { %5519 = vrot.lane.b32.xlu1 %v5516_v32, %s11357_s27 }
0x184f   : > { %5559 = vperm.xlu2 %6252, %v6154_v16  }
0x1850   : > { %5554 = vperm.xlu1 %6253, %v6153_v57  }
0x1881   : > { %v5462_v44 = vpop.permute.xlu2 %5461 }
0x1889   : > { %v5468_v63 = vpop.permute.xlu2 %5467 }
0x1890   : > { %v5458_v19 = vpop.permute.xlu0 %5457 }
0x1891   : > { %v10102_v42 = vadd.f32 %v5458_v19, %v10020_v47  ;;  %v5474_v15 = vpop.permute.xlu2 %5473 }
0x1898   : > { %v5464_v40 = vpop.permute.xlu0 %5463 }
0x1899   : > { %v10113_v24 = vadd.f32 %v5464_v40, %v10031_v5  ;;  %v5480_v33 = vpop.permute.xlu2 %5479 }
0x189a   : > { %v5460_v2 = vpop.permute.xlu1 %5459 }
0x189b   : > { %v5481_v54 = vsel %vm11358_vm9, %v5458_v19, %v5460_v2  ;;  %v5482_v7 = vsel %vm11359_vm7, %v5460_v2, %v5462_v44  ;;  %vm11376_vm9 = vmmov %vm11372_vm10 }
0x189c   : > { %v10107_v6 = vadd.f32 %v5481_v54, %v10025_v34  ;;  %v10110_v1 = vadd.f32 %v5482_v7, %v10028_v45  ;;  %vm11377_vm7 = vmmov %vm11376_vm9 }
0x18a0   : > { %v5470_v41 = vpop.permute.xlu0 %5469 }
0x18a1   : > { %v10124_v34 = vadd.f32 %v5470_v41, %v10042_v21  ;;  %v5545_v11 = vpop.permute.xlu2 %5544 }
0x18a2   : > { %v5466_v31 = vpop.permute.xlu1 %5465 }
0x18a3   : > { %v5483_v47 = vsel %vm11360_vm14, %v5464_v40, %v5466_v31  ;;  %v5484_v20 = vsel %vm11361_vm0, %v5466_v31, %v5468_v63  ;;  %vm11378_vm14 = vmmov %vm11369_vm1 }
0x18a4   : > { %v10118_v12 = vadd.f32 %v5483_v47, %v10036_v61  ;;  %v10121_v35 = vadd.f32 %v5484_v20, %v10039_v9  ;;  %vm11379_vm0 = vmmov %vm11369_vm1 }
0x18a8   : > { %v5476_v52 = vpop.permute.xlu0 %5475 }
0x18a9   : > { %v10135_v61 = vadd.f32 %v5476_v52, %v10053_v0  ;;  %v5560_v7 = vpop.permute.xlu2 %5559 }
0x18aa   : > { %v5472_v45 = vpop.permute.xlu1 %5471 }
0x18ab   : > { %v5485_v5 = vsel %vm11362_vm5, %v5470_v41, %v5472_v45  ;;  %v5486_v18 = vsel %vm11363_vm2, %v5472_v45, %v5474_v15  ;;  %vm11380_vm5 = vmmov %vm11377_vm7 }
0x18ac   : > { %v10129_v26 = vadd.f32 %v5485_v5, %v10047_v58  ;;  %v10132_v37 = vadd.f32 %v5486_v18, %v10050_v53  ;;  %vm11381_vm2 = vmmov %vm11380_vm5 }
0x18b0   : > { %v5518_v55 = vpop.permute.xlu0 %5517 }
0x18b1   : > { %v5525_v58 = vmul.f32 %v5518_v55, %v11240_v30  ;;  %v5528_v59 = vmul.f32 %v5518_v55, %v8159_v49  ;;  %v5531_v16 = vmul.f32 %v5518_v55, %v8176_v62  ;;  %v5534_v63 = vmul.f32 %v5518_v55, %v8193_v10 }
0x18b2   : > { %v5478_v9 = vpop.permute.xlu1 %5477 }
0x18b3   : > { %v5487_v21 = vsel %vm11364_vm15, %v5476_v52, %v5478_v9  ;;  %v5488_v46 = vsel %vm11365_vm11, %v5478_v9, %v5480_v33  ;;  %v5562_v53 = vmul.f32 %v5545_v11, %v5525_v58  ;;  %v5571_v15 = vmul.f32 %v5560_v7, %v5534_v63  ;;  %vm11382_vm15 = vmmov %vm11379_vm0 }
0x18b4   : > { %v10140_v23 = vadd.f32 %v5487_v21, %v10058_v43  ;;  %v10143_v51 = vadd.f32 %v5488_v46, %v10061_v17  ;;  %vm11383_vm11 = vmmov %vm11379_vm0 }
0x18b5   : > { %5586 = vrot.lane.b32.xlu0 %v5562_v53, %s11366_s6 }
0x18b8   : > { %v5550_v3 = vpop.permute.xlu0 %5549 }
0x18b9   : > { %v5565_v4 = vmul.f32 %v5550_v3, %v5528_v59 }
0x18ba   : > { %v5520_v0 = vpop.permute.xlu1 %5519 }
0x18bb   : > { %v5521_v48 = vsel %vm11367_vm6, %v5518_v55, %v5520_v0  ;;  %v5527_v14 = vmul.f32 0.0, %v5520_v0  ;;  %vm11384_vm6 = vmmov %vm11381_vm2 }
0x18bc   : > { %v5526_v43 = vmul.f32 %v5521_v48, %v8143_v22  ;;  %v5529_v32 = vmul.f32 %v5521_v48, %v8162_v27  ;;  %v5532_v2 = vmul.f32 %v5521_v48, %v8179_v29  ;;  %v5535_v31 = vmul.f32 %v5521_v48, %v11243_v25 }
0x18bd   : > { %v5564_v28 = vmul.f32 %v5545_v11, %v5527_v14  ;;  %5646 = vrot.lane.b32.xlu0 %v5644_v56, %s11368_s28  ;;  %v5567_v57 = vmul.f32 %v5550_v3, %v5527_v14  ;;  %v5573_v47 = vmul.f32 %v5560_v7, %v5527_v14 }
0x18be   : > { %v5563_v17 = vmul.f32 %v5545_v11, %v5526_v43  ;;  %v5566_v44 = vmul.f32 %v5550_v3, %v5529_v32  ;;  %v5572_v20 = vmul.f32 %v5560_v7, %v5535_v31 }
0x18bf   : > { %5590 = vrot.lane.b32.xlu2 %v5564_v28, %s11366_s6 }
0x18c0   : > { %5588 = vrot.lane.b32.xlu1 %v5563_v17, %s11366_s6 }
0x18c2   : > { %v5555_v50 = vpop.permute.xlu1 %5554 }
0x18c3   : > { %v5568_v19 = vmul.f32 %v5555_v50, %v5531_v16  ;;  %v5570_v54 = vmul.f32 %v5555_v50, %v5527_v14  ;;  %v5569_v40 = vmul.f32 %v5555_v50, %v5532_v2 }
0x18c5   : > { %5678 = vperm.xlu0 %6251, %v6157_v38  }
0x18c7   : > { %5673 = vperm.xlu2 %6252, %v6156_v13  }
0x18c8   : > { %5648 = vrot.lane.b32.xlu1 %v5645_v39, %s11368_s28 }
0x18cd   : > { %5592 = vrot.lane.b32.xlu0 %v5565_v4, %s11366_s6 }
0x18cf   : > { %5688 = vperm.xlu2 %6252, %v6159_v60  }
0x18d0   : > { %5683 = vperm.xlu1 %6253, %v6158_v8  }
0x18d5   : > { %5598 = vrot.lane.b32.xlu0 %v5568_v19, %s11366_s6 }
0x18d7   : > { %5596 = vrot.lane.b32.xlu2 %v5567_v57, %s11366_s6 }
0x18d8   : > { %5594 = vrot.lane.b32.xlu1 %v5566_v44, %s11366_s6 }
0x18dd   : > { %5604 = vrot.lane.b32.xlu0 %v5571_v15, %s11366_s6 }
0x18df   : > { %5602 = vrot.lane.b32.xlu2 %v5570_v54, %s11366_s6 }
0x18e0   : > { %5600 = vrot.lane.b32.xlu1 %v5569_v40, %s11366_s6 }
0x18e7   : > { %5608 = vrot.lane.b32.xlu2 %v5573_v47, %s11366_s6 }
0x18e8   : > { %5606 = vrot.lane.b32.xlu1 %v5572_v20, %s11366_s6 }
0x1919   : > { %v5591_v41 = vpop.permute.xlu2 %5590 }
0x1921   : > { %v5674_v58 = vpop.permute.xlu2 %5673 }
0x1927   : > { %v5587_v45 = vpop.permute.xlu0 %5586 }
0x1928   : > { %v5630_v5 = vadd.f32 %v5587_v45, %v10102_v42 }
0x1929   : > { %v5689_v38 = vpop.permute.xlu2 %5688 }
0x192f   : > { %v5647_v33 = vpop.permute.xlu0 %5646 }
0x1930   : > { %v5654_v21 = vmul.f32 %v5647_v33, %v11240_v30  ;;  %v5657_v48 = vmul.f32 %v5647_v33, %v8159_v49 }
0x1932   : > { %v5589_v18 = vpop.permute.xlu1 %5588  ;;  %v5691_v11 = vmul.f32 %v5674_v58, %v5654_v21 }
0x1933   : > { %v5610_v52 = vsel %vm11369_vm1, %v5587_v45, %v5589_v18  ;;  %v5611_v9 = vsel %vm11370_vm3, %v5589_v18, %v5591_v41  ;;  %vm11385_vm1 = vmmov %vm11381_vm2 }
0x1934   : > { %v5631_v46 = vadd.f32 %v5610_v52, %v10107_v6  ;;  %v5632_v55 = vadd.f32 %v5611_v9, %v10110_v1  ;;  %5715 = vrot.lane.b32.xlu0 %v5691_v11, %s11371_s21  ;;  %v5660_v1 = vmul.f32 %v5647_v33, %v8176_v62 }
0x1937   : > { %v5679_v0 = vpop.permute.xlu0 %5678 }
0x1938   : > { %v5694_v56 = vmul.f32 %v5679_v0, %v5657_v48 }
0x193a   : > { %v5649_v53 = vpop.permute.xlu1 %5648 }
0x193b   : > { %v5650_v42 = vsel %vm2272_vm8, %v5647_v33, %v5649_v53  ;;  %v5656_v36 = vmul.f32 0.0, %v5649_v53 }
0x193c   : > { %v5655_v14 = vmul.f32 %v5650_v42, %v8143_v22  ;;  %5721 = vrot.lane.b32.xlu0 %v5694_v56, %s11371_s21  ;;  %v5658_v6 = vmul.f32 %v5650_v42, %v8162_v27  ;;  %v5663_v22 = vmul.f32 %v5647_v33, %v8193_v10  ;;  %v5661_v49 = vmul.f32 %v5650_v42, %v8179_v29  ;;  %v5597_v29 = vpop.permute.xlu2 %5596 }
0x193d   : > { %v5693_v43 = vmul.f32 %v5674_v58, %v5656_v36  ;;  %v5696_v13 = vmul.f32 %v5679_v0, %v5656_v36  ;;  %v5664_v62 = vmul.f32 %v5650_v42, %v11243_v25  ;;  %v5702_v59 = vmul.f32 %v5689_v38, %v5656_v36 }
0x193e   : > { %v5692_v30 = vmul.f32 %v5674_v58, %v5655_v14  ;;  %v5695_v39 = vmul.f32 %v5679_v0, %v5658_v6  ;;  %v5700_v27 = vmul.f32 %v5689_v38, %v5663_v22 }
0x193f   : > { %5719 = vrot.lane.b32.xlu2 %v5693_v43, %s11371_s21  ;;  %v5701_v8 = vmul.f32 %v5689_v38, %v5664_v62  ;;  %v5593_v10 = vpop.permute.xlu0 %5592  ;;  %v6317_v62 = vld [vmem:[%s6549_s25 + $0x40] sm:$0xff] }
0x1940   : > { %5717 = vrot.lane.b32.xlu1 %v5692_v30, %s11371_s21  ;;  %v5633_v25 = vadd.f32 %v5593_v10, %v10113_v24 }
0x1942   : > { %v5684_v28 = vpop.permute.xlu1 %5683 }
0x1943   : > { %v5697_v17 = vmul.f32 %v5684_v28, %v5660_v1  ;;  %v5699_v3 = vmul.f32 %v5684_v28, %v5656_v36  ;;  %v5698_v60 = vmul.f32 %v5684_v28, %v5661_v49 }
0x1944   : > { %v5603_v50 = vpop.permute.xlu2 %5602 }
0x1945   : > { %5727 = vrot.lane.b32.xlu0 %v5697_v17, %s11371_s21 }
0x1947   : > { %5725 = vrot.lane.b32.xlu2 %v5696_v13, %s11371_s21  ;;  %v5599_v32 = vpop.permute.xlu0 %5598 }
0x1948   : > { %5723 = vrot.lane.b32.xlu1 %v5695_v39, %s11371_s21  ;;  %v5636_v18 = vadd.f32 %v5599_v32, %v10124_v34 }
0x194a   : > { %v5595_v4 = vpop.permute.xlu1 %5594 }
0x194b   : > { %v5613_v24 = vsel %vm11375_vm4, %v5595_v4, %v5597_v29 }
0x194c   : > { %v5609_v44 = vpop.permute.xlu2 %5608  ;;  %v5635_v52 = vadd.f32 %v5613_v24, %v10121_v35 }
0x194d   : > { %5733 = vrot.lane.b32.xlu0 %v5700_v27, %s11371_s21 }
0x194f   : > { %5731 = vrot.lane.b32.xlu2 %v5699_v3, %s11371_s21  ;;  %v5605_v57 = vpop.permute.xlu0 %5604 }
0x1950   : > { %5729 = vrot.lane.b32.xlu1 %v5698_v60, %s11371_s21  ;;  %v5639_v0 = vadd.f32 %v5605_v57, %v10135_v61 }
0x1952   : > { %v5601_v16 = vpop.permute.xlu1 %5600 }
0x1953   : > { %v5614_v34 = vsel %vm11378_vm14, %v5599_v32, %v5601_v16 }
0x1954   : > { %v5637_v42 = vadd.f32 %v5614_v34, %v10129_v26 }
0x1957   : > { %5737 = vrot.lane.b32.xlu2 %v5702_v59, %s11371_s21 }
0x1958   : > { %5735 = vrot.lane.b32.xlu1 %v5701_v8, %s11371_s21  ;;  %v6318_v8 = vld [vmem:[%s6549_s25 + $0x48] sm:$0xff] }
0x195a   : > { %v5607_v19 = vpop.permute.xlu1 %5606 }
0x195b   : > { %v5616_v61 = vsel %vm11382_vm15, %v5605_v57, %v5607_v19  ;;  %v5617_v26 = vsel %vm11383_vm11, %v5607_v19, %v5609_v44  ;;  %v6319_v57 = vld [vmem:[%s6549_s25 + $0x50] sm:$0xff]  ;;  %v6320_v19 = vld [vmem:[%s6549_s25 + $0x58] sm:$0xff] }
0x195c   : > { %v5641_v28 = vadd.f32 %v5617_v26, %v10143_v51 }
0x1999   : > { %v5720_v54 = vpop.permute.xlu2 %5719 }
0x19a1   : > { %v5726_v45 = vpop.permute.xlu2 %5725 }
0x19a6   : > { %v5716_v63 = vpop.permute.xlu0 %5715 }
0x19a7   : > { %v5759_v2 = vadd.f32 %v5716_v63, %v5630_v5  ;;  %v5612_v5 = vsel %vm11374_vm13, %v5593_v10, %v5595_v4 }
0x19a8   : > { %v5634_v33 = vadd.f32 %v5612_v5, %v10118_v12  ;;  %v5615_v12 = vsel %vm11379_vm0, %v5601_v16, %v5603_v50 }
0x19a9   : > { %5783 = vrot.lane.b32.xlu0 %v5759_v2, %s11368_s28  ;;  %v5732_v35 = vpop.permute.xlu2 %5731  ;;  %v5638_v36 = vadd.f32 %v5615_v12, %v10132_v37  ;;  %v5640_v37 = vadd.f32 %v5616_v61, %v10140_v23 }
0x19ae   : > { %v5722_v7 = vpop.permute.xlu0 %5721 }
0x19af   : > { %v5762_v15 = vadd.f32 %v5722_v7, %v5633_v25 }
0x19b1   : > { %5789 = vrot.lane.b32.xlu0 %v5762_v15, %s11368_s28  ;;  %v5738_v17 = vpop.permute.xlu2 %5737  ;;  %v6321_v15 = vld [vmem:[%s6549_s25 + $0x60] sm:$0xff] }
0x19b2   : > { %v5718_v40 = vpop.permute.xlu1 %5717 }
0x19b3   : > { %v5739_v31 = vsel %vm11372_vm10, %v5716_v63, %v5718_v40  ;;  %v5740_v47 = vsel %vm11373_vm12, %v5718_v40, %v5720_v54 }
0x19b4   : > { %v5760_v20 = vadd.f32 %v5739_v31, %v5631_v46  ;;  %v5761_v41 = vadd.f32 %v5740_v47, %v5632_v55  ;;  %v6322_v47 = vld [vmem:[%s6549_s25 + $0x68] sm:$0xff] }
0x19b6   : > { %5787 = vrot.lane.b32.xlu2 %v5761_v41, %s11368_s28  ;;  %5785 = vrot.lane.b32.xlu1 %v5760_v20, %s11368_s28 }
0x19b7   : > { %v5728_v9 = vpop.permute.xlu0 %5727 }
0x19b8   : > { %v5765_v46 = vadd.f32 %v5728_v9, %v5636_v18 }
0x19ba   : > { %v5724_v21 = vpop.permute.xlu1 %5723  ;;  %5795 = vrot.lane.b32.xlu0 %v5765_v46, %s11368_s28 }
0x19bb   : > { %v5741_v55 = vsel %vm11376_vm9, %v5722_v7, %v5724_v21  ;;  %v5742_v58 = vsel %vm11377_vm7, %v5724_v21, %v5726_v45 }
0x19bc   : > { %v5763_v11 = vadd.f32 %v5741_v55, %v5634_v33  ;;  %v5764_v53 = vadd.f32 %v5742_v58, %v5635_v52  ;;  %v6323_v33 = vld [vmem:[%s6549_s25 + $0x70] sm:$0xff] }
0x19be   : > { %5793 = vrot.lane.b32.xlu2 %v5764_v53, %s11368_s28  ;;  %5791 = vrot.lane.b32.xlu1 %v5763_v11, %s11368_s28 }
0x19bf   : > { %v5734_v48 = vpop.permute.xlu0 %5733 }
0x19c0   : > { %v5768_v43 = vadd.f32 %v5734_v48, %v5639_v0 }
0x19c2   : > { %v5730_v14 = vpop.permute.xlu1 %5729  ;;  %5801 = vrot.lane.b32.xlu0 %v5768_v43, %s11368_s28 }
0x19c3   : > { %v5743_v56 = vsel %vm11380_vm5, %v5728_v9, %v5730_v14  ;;  %v5744_v30 = vsel %vm11381_vm2, %v5730_v14, %v5732_v35  ;;  %v6324_v9 = vld [vmem:[%s6549_s25 + $0x78] sm:$0xff] }
0x19c4   : > { %v5766_v6 = vadd.f32 %v5743_v56, %v5637_v42  ;;  %v5767_v1 = vadd.f32 %v5744_v30, %v5638_v36 }
0x19c6   : > { %5799 = vrot.lane.b32.xlu2 %v5767_v1, %s11368_s28  ;;  %5797 = vrot.lane.b32.xlu1 %v5766_v6, %s11368_s28 }
0x19ca   : > { %v5736_v13 = vpop.permute.xlu1 %5735 }
0x19cb   : > { %v5745_v39 = vsel %vm11384_vm6, %v5734_v48, %v5736_v13  ;;  %v5746_v22 = vsel %vm11385_vm1, %v5736_v13, %v5738_v17 }
0x19cc   : > { %v5769_v49 = vadd.f32 %v5745_v39, %v5640_v37  ;;  %v5770_v38 = vadd.f32 %v5746_v22, %v5641_v28 }
0x19ce   : > { %5805 = vrot.lane.b32.xlu2 %v5770_v38, %s11368_s28  ;;  %5803 = vrot.lane.b32.xlu1 %v5769_v49, %s11368_s28  ;;  %s5870_s28 = sshll.u32 %s5867_s18, 4  ;;  %s5871_s28 = int_to_ptr.hbm [resolvable:$true] %s5870_s28 }
0x19cf   : > { %s6339_s11 = sshra.s32 %s5871_s28, 4  ;;  %s6340_s11 = int_to_ptr.hbm [resolvable:$true] %s6339_s11 }
0x19d0   : > { %s6341_s27 = scalar_lea.hbm %s6340_s11, 128  ;;  %p6346_p0 = scmp.lt.s32.totalorder %s6340_s11, %s10313_s10 }
0x19d1   : > { %p6342_p11 = scmp.ne.s32.totalorder %s6340_s11, %s6341_s27  ;;  %p6347_p1 = scmp.lt.s32.totalorder %s6345_s12, %s6341_s27 }
0x19d3   : > { %p6343_p12 = pnand %p6342_p11, %p6524_p5  ;;  %p6348_p2 = por %p6347_p1, %p6346_p0 }
0x19d5   : > { %p6344_p13 = pneg %p6343_p12 }
0x19d7   : > { %p6349_p3 = pnand %p6348_p2, %p6344_p13 }
0x1a10   : > { %v5788_v3 = vpop.permute.xlu2 %5787 }
0x1a18   : > { %v5794_v29 = vpop.permute.xlu2 %5793 }
0x1a1b   : > { %v5784_v23 = vpop.permute.xlu0 %5783 }
0x1a20   : > { %v5800_v2 = vpop.permute.xlu2 %5799 }
0x1a23   : > { %v5790_v4 = vpop.permute.xlu0 %5789 }
0x1a28   : > { %v5786_v60 = vpop.permute.xlu1 %5785  ;;  %v5806_v41 = vpop.permute.xlu2 %5805 }
0x1a29   : > { %v5807_v51 = vsel %vm2272_vm8, %v5784_v23, %v5786_v60  ;;  %v5808_v27 = vsel %vm2272_vm8, %v5786_v60, %v5788_v3 }
0x1a2a   : > { %v5831_v59 = vadd.f32 %v6317_v62, %v5807_v51  ;;  %v5832_v10 = vadd.f32 %v6318_v8, %v5808_v27 }
0x1a2c   : > { %5847 = vst [vmem:[%s8152_s3 + $0x40] sm:$0xff] %v5831_v59  ;;  %v5796_v54 = vpop.permute.xlu0 %5795 }
0x1a2d   : > { %5848 = vst [vmem:[%s8152_s3 + $0x48] sm:$0xff] %v5832_v10 }
0x1a30   : > { %v5792_v32 = vpop.permute.xlu1 %5791 }
0x1a31   : > { %v5809_v50 = vsel %vm2272_vm8, %v5790_v4, %v5792_v32  ;;  %v5810_v16 = vsel %vm2272_vm8, %v5792_v32, %v5794_v29 }
0x1a32   : > { %v5833_v44 = vadd.f32 %v6319_v57, %v5809_v50  ;;  %v5834_v63 = vadd.f32 %v6320_v19, %v5810_v16 }
0x1a34   : > { %5849 = vst [vmem:[%s8152_s3 + $0x50] sm:$0xff] %v5833_v44  ;;  %v5802_v45 = vpop.permute.xlu0 %5801 }
0x1a35   : > { %5850 = vst [vmem:[%s8152_s3 + $0x58] sm:$0xff] %v5834_v63 }
0x1a38   : > { %v5798_v25 = vpop.permute.xlu1 %5797 }
0x1a39   : > { %v5811_v7 = vsel %vm2272_vm8, %v5796_v54, %v5798_v25  ;;  %v5812_v40 = vsel %vm2272_vm8, %v5798_v25, %v5800_v2 }
0x1a3a   : > { %v5835_v31 = vadd.f32 %v6321_v15, %v5811_v7  ;;  %v5836_v20 = vadd.f32 %v6322_v47, %v5812_v40 }
0x1a3c   : > { %5851 = vst [vmem:[%s8152_s3 + $0x60] sm:$0xff] %v5835_v31 }
0x1a3d   : > { %5852 = vst [vmem:[%s8152_s3 + $0x68] sm:$0xff] %v5836_v20 }
0x1a40   : > { %v5804_v5 = vpop.permute.xlu1 %5803 }
0x1a41   : > { %v5813_v24 = vsel %vm2272_vm8, %v5802_v45, %v5804_v5  ;;  %v5814_v18 = vsel %vm2272_vm8, %v5804_v5, %v5806_v41 }
0x1a42   : > { %v5837_v52 = vadd.f32 %v6323_v33, %v5813_v24  ;;  %v5838_v21 = vadd.f32 %v6324_v9, %v5814_v18 }
0x1a44   : > { %5853 = vst [vmem:[%s8152_s3 + $0x70] sm:$0xff] %v5837_v52 }
0x1a45   : > { %5854 = vst [vmem:[%s8152_s3 + $0x78] sm:$0xff] %v5838_v21 }
0x1a46   : > { %6352 = shalt.err (!%p6349_p3)
}
0x1a47   : > { %s6430_s3 = smov 256  }
0x1a48   : > { %6170 = dma.vmem_to_hbm [thread:$0]  (%p6524_p5), %s5869_s2, 2048, %s5871_s28, %s5856_s30, %s6430_s3, %s6430_s3, %s11006_s1  }
0x1a49 PF: > { %p6176_p4 = scmp.ge.s32.totalorder %s6387_s16, 2  ;;  %s5885_s20 = sand.u32 1, %s6375_s13  }
0x1a4a   : > { %s5886_s21 = scalar_lea.sflag [#allocation5], %s5885_s20 }
0x1a4b   : > { %p6173_p7 = pnand %p6176_p4, %p6528_p6 }
0x1a4d   : > { %p6174_p8 = pneg %p6173_p7 }
0x1a4f   : > { %6370 = dma.done.wait (%p6174_p8), %s5886_s21, 2048  }
0x1a50   : > { %6372 = vsyncadd (%p6174_p8), %s5886_s21, 4294965248  ;;  %p20_p9 = scmp.ge.s32.totalorder %s6511_s19, 4   ;;  %s11387_s13 = smov %s6379_s14 }
0x1a51   : > { %s11388_s14 = smov %s6383_s15  ;;  %s11389_s15 = smov %s6522_s22 }
0x1a52   : > { %s11390_s16 = smov %s6511_s19  ;;  %22 = sbr.rel (!%p20_p9) target bundleno = 11 (0xb), region = 167 }
0x1a57   :  { %5892 = vsyncpa [#allocation5], 1 }
0x1a58   :  { %5894 = vsyncpa [#allocation5 + $0x1], 1 }

</bundles_post_ra>
